<compile_context>
chip_gen: v5e
topology: v5e:2x2
jax: 0.10.0
libtpu: 0.0.40
codegen_flags: <defaults>
</compile_context>

<pallas_src>
import math

import jax
import jax.numpy as jnp
from jax.experimental import pallas as pl
from jax.experimental.pallas import tpu as pltpu


_INV_SQRT2 = 1.0 / math.sqrt(2.0)


def _erf_f32(x):
    # Abramowitz & Stegun 7.1.26 rational approximation, |abs err| <= 1.5e-7.
    # Uses only exp / mul / add / div / where, guaranteed to lower on Mosaic.
    a1, a2, a3, a4, a5 = (0.254829592, -0.284496736, 1.421413741,
                          -1.453152027, 1.061405429)
    p = 0.3275911
    sign = jnp.where(x >= 0.0, 1.0, -1.0)
    ax = jnp.abs(x)
    t = 1.0 / (1.0 + p * ax)
    poly = ((((a5 * t + a4) * t + a3) * t + a2) * t + a1) * t
    return sign * (1.0 - poly * jnp.exp(-ax * ax))


def _geglu_kernel(x_ref, wa_ref, wg_ref, ba_ref, bg_ref, o_ref):
    # x_ref: (tm, K); wa/wg: (K, tn); ba/bg: (1, tn); o_ref: (tm, tn)
    x = x_ref[...]
    a = (jnp.dot(x, wa_ref[...], preferred_element_type=jnp.float32)
         + ba_ref[...].astype(jnp.float32))
    g = (jnp.dot(x, wg_ref[...], preferred_element_type=jnp.float32)
         + bg_ref[...].astype(jnp.float32))
    # exact-erf GELU (matches F.gelu default), evaluated in f32
    gelu_g = 0.5 * g * (1.0 + _erf_f32(g * _INV_SQRT2))
    o_ref[...] = (a * gelu_g).astype(o_ref.dtype)


def geglu(x, weight, bias, *, block_tokens=512, block_out=512, out_dtype=None):
    """GEGLU forward.

    x:      (..., dim_in)
    weight: (2*dim_out, dim_in)   -- PyTorch nn.Linear layout
    bias:   (2*dim_out,)
    returns (..., dim_out)
    """
    *lead, dim_in = x.shape
    two_dout, k = weight.shape
    assert k == dim_in and two_dout % 2 == 0
    dim_out = two_dout // 2
    out_dtype = out_dtype or x.dtype

    # Parameter prep (plain-JAX glue): split the projection into the value and
    # gate halves and transpose to (dim_in, dim_out) so the kernel is x @ W.
    # PyTorch's .chunk(2, dim=-1) maps the first dim_out rows to "x" and the
    # last dim_out rows to "gate".
    wa = weight[:dim_out].T
    wg = weight[dim_out:].T
    ba = bias[:dim_out].reshape(1, dim_out)
    bg = bias[dim_out:].reshape(1, dim_out)

    x2d = x.reshape(-1, dim_in)
    tokens = x2d.shape[0]

    # Tile sizes: full array dim when small (legal), else (8,128)-aligned tiles.
    tm = tokens if tokens <= block_tokens else block_tokens
    tn = dim_out if dim_out <= block_out else block_out
    grid = (pl.cdiv(tokens, tm), pl.cdiv(dim_out, tn))

    out = pl.pallas_call(
        _geglu_kernel,
        grid=grid,
        in_specs=[
            pl.BlockSpec((tm, dim_in), lambda i, j: (i, 0)),   # x rows
            pl.BlockSpec((dim_in, tn), lambda i, j: (0, j)),   # Wa cols
            pl.BlockSpec((dim_in, tn), lambda i, j: (0, j)),   # Wg cols
            pl.BlockSpec((1, tn), lambda i, j: (0, j)),        # ba
            pl.BlockSpec((1, tn), lambda i, j: (0, j)),        # bg
        ],
        out_specs=pl.BlockSpec((tm, tn), lambda i, j: (i, j)),
        out_shape=jax.ShapeDtypeStruct((tokens, dim_out), out_dtype),
        compiler_params=pltpu.CompilerParams(
            dimension_semantics=("parallel", "parallel"),
            vmem_limit_bytes=32 * 1024 * 1024,
        ),
    )(x2d, wa, wg, ba, bg)
    return out.reshape(*lead, dim_out)


if __name__ == "__main__":
    key = jax.random.PRNGKey(0)

    # Small shapes consistent with GEGLU inside FeedForward of a transformer
    # block: tokens = batch * seq, dim_in = model dim, dim_out = 4 * dim_in.
    batch, seq = 2, 512          # 1024 tokens -> exercises the row-tile grid
    dim_in = 64
    dim_out = 4 * dim_in         # 256 (lane-dense output tiles)

    kx, kw, kb = jax.random.split(key, 3)
    x = jax.random.normal(kx, (batch, seq, dim_in), jnp.float32)
    weight = 0.02 * jax.random.normal(kw, (2 * dim_out, dim_in), jnp.float32)
    bias = 0.02 * jax.random.normal(kb, (2 * dim_out,), jnp.float32)

    out = geglu(x, weight, bias)
    out = jax.block_until_ready(out)
    assert out.shape == (batch, seq, dim_out), out.shape

    # Pure-JAX reference (exact-erf GELU, matching F.gelu's default).
    h = x @ weight.T + bias
    a_ref, g_ref = h[..., :dim_out], h[..., dim_out:]
    ref = a_ref * jax.nn.gelu(g_ref, approximate=False)
    max_err = float(jnp.max(jnp.abs(out - ref)))
    assert math.isfinite(max_err) and max_err < 1e-2, max_err

    # bf16 storage path (perf recommendation: halves HBM traffic; the kernel
    # still accumulates the matmuls and evaluates the gate in f32).
    out_bf16 = geglu(x.astype(jnp.bfloat16),
                     weight.astype(jnp.bfloat16),
                     bias.astype(jnp.bfloat16))
    out_bf16 = jax.block_until_ready(out_bf16)
    assert out_bf16.shape == (batch, seq, dim_out)
    assert bool(jnp.all(jnp.isfinite(out_bf16.astype(jnp.float32))))

    print("KERNEL_OK")
</pallas_src>

<mosaic_0001>
module attributes {stable_mosaic.version = 11 : i64} {
  func.func @_geglu_kernel(%arg0: i32, %arg1: i32, %arg2: memref<512x64xf32, #tpu.memory_space<vmem>>, %arg3: memref<64x256xf32, #tpu.memory_space<vmem>>, %arg4: memref<64x256xf32, #tpu.memory_space<vmem>>, %arg5: memref<1x256xf32, #tpu.memory_space<vmem>>, %arg6: memref<1x256xf32, #tpu.memory_space<vmem>>, %arg7: memref<512x256xf32, #tpu.memory_space<vmem>>) attributes {dimension_semantics = [#tpu.dimension_semantics<parallel>, #tpu.dimension_semantics<parallel>], iteration_bounds = array<i64: 2, 1>, scalar_prefetch = 0 : i64, scratch_operands = 0 : i64, tpu.core_type = #tpu.core_type<tc>, window_params = [{transform_indices = @transform_0, window_bounds = array<i64: 512, 64>}, {transform_indices = @transform_1, window_bounds = array<i64: 64, 256>}, {transform_indices = @transform_2, window_bounds = array<i64: 64, 256>}, {transform_indices = @transform_3, window_bounds = array<i64: 1, 256>}, {transform_indices = @transform_4, window_bounds = array<i64: 1, 256>}, {transform_indices = @transform_5, window_bounds = array<i64: 512, 256>}]} {
    %c0 = arith.constant 0 : index
    %c0_0 = arith.constant 0 : index
    %0 = vector.load %arg2[%c0, %c0_0] : memref<512x64xf32, #tpu.memory_space<vmem>>, vector<512x64xf32>
    %c0_1 = arith.constant 0 : index
    %c0_2 = arith.constant 0 : index
    %1 = vector.load %arg3[%c0_1, %c0_2] : memref<64x256xf32, #tpu.memory_space<vmem>>, vector<64x256xf32>
    %cst = arith.constant dense<0.000000e+00> : vector<512x256xf32>
    %2 = tpu.matmul %0, %1, %cst {dimension_numbers = #tpu.dot_dimension_numbers<[1], [0], [0], [1], [0, 0, 1, 1], [], []>} : vector<512x64xf32>, vector<64x256xf32>, vector<512x256xf32> -> vector<512x256xf32>
    %c0_3 = arith.constant 0 : index
    %c0_4 = arith.constant 0 : index
    %3 = vector.load %arg5[%c0_3, %c0_4] : memref<1x256xf32, #tpu.memory_space<vmem>>, vector<1x256xf32>
    %4 = vector.broadcast %3 : vector<1x256xf32> to vector<512x256xf32>
    %5 = arith.addf %2, %4 : vector<512x256xf32>
    %c0_5 = arith.constant 0 : index
    %c0_6 = arith.constant 0 : index
    %6 = vector.load %arg4[%c0_5, %c0_6] : memref<64x256xf32, #tpu.memory_space<vmem>>, vector<64x256xf32>
    %cst_7 = arith.constant dense<0.000000e+00> : vector<512x256xf32>
    %7 = tpu.matmul %0, %6, %cst_7 {dimension_numbers = #tpu.dot_dimension_numbers<[1], [0], [0], [1], [0, 0, 1, 1], [], []>} : vector<512x64xf32>, vector<64x256xf32>, vector<512x256xf32> -> vector<512x256xf32>
    %c0_8 = arith.constant 0 : index
    %c0_9 = arith.constant 0 : index
    %8 = vector.load %arg6[%c0_8, %c0_9] : memref<1x256xf32, #tpu.memory_space<vmem>>, vector<1x256xf32>
    %9 = vector.broadcast %8 : vector<1x256xf32> to vector<512x256xf32>
    %10 = arith.addf %7, %9 : vector<512x256xf32>
    %cst_10 = arith.constant 5.000000e-01 : f32
    %11 = vector.broadcast %cst_10 : f32 to vector<512x256xf32>
    %12 = arith.mulf %11, %10 : vector<512x256xf32>
    %cst_11 = arith.constant 0.707106769 : f32
    %13 = vector.broadcast %cst_11 : f32 to vector<512x256xf32>
    %14 = arith.mulf %10, %13 : vector<512x256xf32>
    %cst_12 = arith.constant 0.000000e+00 : f32
    %15 = vector.broadcast %cst_12 : f32 to vector<512x256xf32>
    %16 = arith.cmpf oge, %14, %15 : vector<512x256xf32>
    %cst_13 = arith.constant 1.000000e+00 : f32
    %cst_14 = arith.constant -1.000000e+00 : f32
    %17 = vector.broadcast %cst_13 : f32 to vector<512x256xf32>
    %18 = vector.broadcast %cst_14 : f32 to vector<512x256xf32>
    %19 = arith.select %16, %17, %18 : vector<512x256xi1>, vector<512x256xf32>
    %20 = math.absf %14 : vector<512x256xf32>
    %cst_15 = arith.constant 0.327591091 : f32
    %21 = vector.broadcast %cst_15 : f32 to vector<512x256xf32>
    %22 = arith.mulf %21, %20 : vector<512x256xf32>
    %cst_16 = arith.constant 1.000000e+00 : f32
    %23 = vector.broadcast %cst_16 : f32 to vector<512x256xf32>
    %24 = arith.addf %23, %22 : vector<512x256xf32>
    %cst_17 = arith.constant 1.000000e+00 : f32
    %25 = vector.broadcast %cst_17 : f32 to vector<512x256xf32>
    %26 = arith.divf %25, %24 : vector<512x256xf32>
    %cst_18 = arith.constant 1.06140542 : f32
    %27 = vector.broadcast %cst_18 : f32 to vector<512x256xf32>
    %28 = arith.mulf %27, %26 : vector<512x256xf32>
    %cst_19 = arith.constant -1.45315206 : f32
    %29 = vector.broadcast %cst_19 : f32 to vector<512x256xf32>
    %30 = arith.addf %28, %29 : vector<512x256xf32>
    %31 = arith.mulf %30, %26 : vector<512x256xf32>
    %cst_20 = arith.constant 1.42141378 : f32
    %32 = vector.broadcast %cst_20 : f32 to vector<512x256xf32>
    %33 = arith.addf %31, %32 : vector<512x256xf32>
    %34 = arith.mulf %33, %26 : vector<512x256xf32>
    %cst_21 = arith.constant -0.284496725 : f32
    %35 = vector.broadcast %cst_21 : f32 to vector<512x256xf32>
    %36 = arith.addf %34, %35 : vector<512x256xf32>
    %37 = arith.mulf %36, %26 : vector<512x256xf32>
    %cst_22 = arith.constant 0.254829586 : f32
    %38 = vector.broadcast %cst_22 : f32 to vector<512x256xf32>
    %39 = arith.addf %37, %38 : vector<512x256xf32>
    %40 = arith.mulf %39, %26 : vector<512x256xf32>
    %cst_23 = arith.constant 0.000000e+00 : f32
    %41 = vector.broadcast %cst_23 : f32 to vector<512x256xf32>
    %42 = arith.subf %41, %20 : vector<512x256xf32>
    %43 = arith.mulf %42, %20 : vector<512x256xf32>
    %44 = math.exp %43 : vector<512x256xf32>
    %45 = arith.mulf %40, %44 : vector<512x256xf32>
    %cst_24 = arith.constant 1.000000e+00 : f32
    %46 = vector.broadcast %cst_24 : f32 to vector<512x256xf32>
    %47 = arith.subf %46, %45 : vector<512x256xf32>
    %48 = arith.mulf %19, %47 : vector<512x256xf32>
    %cst_25 = arith.constant 1.000000e+00 : f32
    %49 = vector.broadcast %cst_25 : f32 to vector<512x256xf32>
    %50 = arith.addf %49, %48 : vector<512x256xf32>
    %51 = arith.mulf %12, %50 : vector<512x256xf32>
    %52 = arith.mulf %5, %51 : vector<512x256xf32>
    %c0_26 = arith.constant 0 : index
    %c0_27 = arith.constant 0 : index
    %53 = vector.load %arg7[%c0_26, %c0_27] : memref<512x256xf32, #tpu.memory_space<vmem>>, vector<512x256xf32>
    tpu.vector_store %arg7[%c0_26, %c0_27], %52 {strides = array<i32>} : memref<512x256xf32, #tpu.memory_space<vmem>>, vector<512x256xf32>,
    return
  }
  func.func @transform_0(%arg0: i32, %arg1: i32) -> (i32, i32) {
    %c0_i32 = arith.constant 0 : i32
    %c0_i32_0 = arith.constant 0 : i32
    return %arg0, %c0_i32 : i32, i32
  }
  func.func @transform_1(%arg0: i32, %arg1: i32) -> (i32, i32) {
    %c0_i32 = arith.constant 0 : i32
    %c0_i32_0 = arith.constant 0 : i32
    return %c0_i32, %arg1 : i32, i32
  }
  func.func @transform_2(%arg0: i32, %arg1: i32) -> (i32, i32) {
    %c0_i32 = arith.constant 0 : i32
    %c0_i32_0 = arith.constant 0 : i32
    return %c0_i32, %arg1 : i32, i32
  }
  func.func @transform_3(%arg0: i32, %arg1: i32) -> (i32, i32) {
    %c0_i32 = arith.constant 0 : i32
    %c0_i32_0 = arith.constant 0 : i32
    return %c0_i32, %arg1 : i32, i32
  }
  func.func @transform_4(%arg0: i32, %arg1: i32) -> (i32, i32) {
    %c0_i32 = arith.constant 0 : i32
    %c0_i32_0 = arith.constant 0 : i32
    return %c0_i32, %arg1 : i32, i32
  }
  func.func @transform_5(%arg0: i32, %arg1: i32) -> (i32, i32) {
    %c0_i32 = arith.constant 0 : i32
    return %arg0, %arg1 : i32, i32
  }
}

</mosaic_0001>

<bundles_post_ra>
// kernel: tpu_custom_call.1
= control target key start
LH: loop header
LB: loop body
LE: loop exit
PB: predicated region body
PF: predicated region fallthrough
CT: control target
= control target key end

     0   :  { %10 = vsyncpa [#allocation3], 0  ;;  %s13984_s0 = inlined_call_operand.vmem [shape: f32[1024,64], index: 0, kind: input, shape index: {}]   ;;  %s13985_s1 = inlined_call_operand.vmem [shape: f32[64,256], index: 1, kind: input, shape index: {}]   ;;  %s13986_s2 = inlined_call_operand.vmem [shape: f32[64,256], index: 2, kind: input, shape index: {}]   ;;  %s13987_s3 = inlined_call_operand.vmem [shape: f32[1,256], index: 3, kind: input, shape index: {}]   ;;  %s13988_s4 = inlined_call_operand.vmem [shape: f32[1,256], index: 4, kind: input, shape index: {}]   ;;  %s13989_s5 = inlined_call_operand.hbm [shape: f32[1024,256], index: 5, kind: output, shape index: {}]  }
   0x1   :  { %12 = vsyncpa [#allocation3 + $0x1], 0  ;;  %s7941_s18 = smov 0   ;;  %s7943_s19 = smov 0  }
   0x2   :  { %s7945_s20 = smov 0   ;;  %s7947_s21 = smov 0  }
   0x3   :  { %s7949_s22 = smov 0   ;;  %s7951_s23 = smov 0  }
   0x4 LB: > { %s6982_s24 = sadd.s32 4294967295, %s7906_s23   ;;  %s6983_s25 = sadd.s32 4294967294, %s7906_s23   ;;  %s7906_s23 = sphi %s7951_s23, %s18_s23   ;;  %s7902_s22 = sphi %s7949_s22, %s14122_s22   ;;  %s7898_s21 = sphi %s7947_s21, %s14121_s21   ;;  %s7894_s20 = sphi %s7945_s20, %s14120_s20   ;;  %s7890_s19 = sphi %s7943_s19, %s14119_s19   ;;  %s7886_s18 = sphi %s7941_s18, %s14118_s18  }
   0x5   : > { %s30_s26 = sadd.s32 1, %s7902_s22  ;;  %s169_s27 = sadd.s32 1, %s7894_s20 }
   0x6   : > { %p32_p0 = scmp.ge.s32.totalorder %s30_s26, 2  ;;  %p179_p1 = scmp.ne.s32.totalorder %s7894_s20, %s7890_s19 }
   0x7   : > { %p180_p2 = scmp.eq.s32.totalorder %s6982_s24, 1  ;;  %p185_p3 = scmp.ne.s32.totalorder %s7890_s19, %s7886_s18 }
   0x8   : > { %s14124_s26 = smov (%p32_p0, %s30_s26), 0  ;;  %p186_p5 = scmp.eq.s32.totalorder %s6983_s25, 1 }
   0x9   : > { %p7981_p4 = por %p180_p2, %p179_p1  ;;  %s164_s29 = ssub.s32 %s7902_s22, %s14124_s26 }
   0xa   : > { %p6990_p6 = scmp.ge.s32.totalorder %s7906_s23, 1  ;;  %p167_p7 = scmp.eq.s32.totalorder %s164_s29, 0 }
   0xb   : > { %p7988_p8 = por %p186_p5, %p185_p3  ;;  %p247_p9 = scmp.lt.s32.totalorder %s7906_s23, 3 }
   0xc   : > { %s7994_s6 = scalar_select %p167_p7, %s7894_s20, %s169_s27  }
   0xd   : > { %p248_p10 = pnand %p6990_p6, %p247_p9 }
   0xf   : > { %251 = sbr.rel (%p248_p10) target bundleno = 1508 (0x5e4), region = 40 }
  0x14   : > { %v1034_v0 = vld [vmem:[%s13986_s2 + $0x70] sm:$0xff]  ;;  %v1035_v1 = vld [vmem:[%s13986_s2 + $0x78] sm:$0xff]  ;;  %v1032_v2 = vld [vmem:[%s13986_s2 + $0x60] sm:$0xff]  ;;  %s6992_s13 = sshll.u32 %s7898_s21, 6  ;;  %vm409_vm0 = vcmask 523264   ;;  %s290_s8 = sand.u32 1, %s7890_s19  }
  0x15   : > { %1050 = vmatpush.msra.mxu2 %v1034_v0  ;;  %1259 = vmatpush.msra.mxu3 %v1035_v1  ;;  %v1033_v3 = vld [vmem:[%s13986_s2 + $0x68] sm:$0xff]  ;;  %p294_p11 = scmp.lt.s32.totalorder %s6992_s13, 127  ;;  %v1030_v4 = vld [vmem:[%s13986_s2 + $0x50] sm:$0xff]  ;;  %v1031_v5 = vld [vmem:[%s13986_s2 + $0x58] sm:$0xff]  ;;  %s6837_s16 = scalar_lea.sflag [#allocation3], %s290_s8 }
  0x16   : > { %v1028_v6 = vld [vmem:[%s13986_s2 + $0x40] sm:$0xff]  ;;  %v1029_v7 = vld [vmem:[%s13986_s2 + $0x48] sm:$0xff]  ;;  %v1026_v8 = vld [vmem:[%s13986_s2 + $0x30] sm:$0xff]  ;;  %s7848_s29 = scalar_lea.hbm %s13989_s5, 2048 }
  0x17   : > { %1051 = vmatpush.msra.mxu2 %v1032_v2  ;;  %1260 = vmatpush.msra.mxu3 %v1033_v3  ;;  %s14126_s13 = smov (!%p294_p11, %s6992_s13), 127  ;;  %v1027_v9 = vld [vmem:[%s13986_s2 + $0x38] sm:$0xff]  ;;  %v1024_v10 = vld [vmem:[%s13986_s2 + $0x20] sm:$0xff]  ;;  %v1025_v11 = vld [vmem:[%s13986_s2 + $0x28] sm:$0xff] }
  0x18   : > { %s6993_s14 = sshll.u32 %s14126_s13, 3  ;;  %v1022_v12 = vld [vmem:[%s13986_s2 + $0x10] sm:$0xff]  ;;  %v1023_v13 = vld [vmem:[%s13986_s2 + $0x18] sm:$0xff]  ;;  %v1020_v14 = vld [vmem:[%s13986_s2] sm:$0xff]  ;;  %s6991_s13 = sshll.u32 %s290_s8, 10 }
  0x19   : > { %1052 = vmatpush.msra.mxu2 %v1030_v4  ;;  %1261 = vmatpush.msra.mxu3 %v1031_v5  ;;  %s8042_s9 = scalar_lea.vmem %s13984_s0, %s6993_s14  ;;  %v1021_v15 = vld [vmem:[%s13986_s2 + $0x8] sm:$0xff]  ;;  %v401_v18 = vld [vmem:[%s13985_s1 + $0x70] sm:$0xff]  ;;  %v402_v19 = vld [vmem:[%s13985_s1 + $0x78] sm:$0xff]  ;;  %s8785_s10 = scalar_lea.vmem [#allocation2], %s6991_s13 }
  0x1a   : > { %v323_v16 = vld [vmem:[%s8042_s9] sm:$0xff]  ;;  %v324_v17 = vld [vmem:[%s8042_s9 + $0x8] sm:$0xff]  ;;  %610 = vmatpush.msra.mxu0 %v401_v18  ;;  %819 = vmatpush.msra.mxu1 %v402_v19  ;;  %v397_v22 = vld [vmem:[%s13985_s1 + $0x50] sm:$0xff] }
  0x1b   : > { %1053 = vmatpush.msra.mxu2 %v1028_v6  ;;  %1262 = vmatpush.msra.mxu3 %v1029_v7  ;;  %v399_v20 = vld [vmem:[%s13985_s1 + $0x60] sm:$0xff]  ;;  %v400_v21 = vld [vmem:[%s13985_s1 + $0x68] sm:$0xff]  ;;  %v398_v23 = vld [vmem:[%s13985_s1 + $0x58] sm:$0xff] }
  0x1c   : > { %611 = vmatpush.msra.mxu0 %v399_v20  ;;  %820 = vmatpush.msra.mxu1 %v400_v21  ;;  %v325_v24 = vld [vmem:[%s8042_s9 + $0x10] sm:$0xff]  ;;  %v395_v25 = vld [vmem:[%s13985_s1 + $0x40] sm:$0xff]  ;;  %v396_v26 = vld [vmem:[%s13985_s1 + $0x48] sm:$0xff] }
  0x1d   : > { %1054 = vmatpush.msra.mxu2 %v1026_v8  ;;  %1263 = vmatpush.msra.mxu3 %v1027_v9  ;;  %v393_v27 = vld [vmem:[%s13985_s1 + $0x30] sm:$0xff]  ;;  %v394_v28 = vld [vmem:[%s13985_s1 + $0x38] sm:$0xff]  ;;  %v391_v29 = vld [vmem:[%s13985_s1 + $0x20] sm:$0xff] }
  0x1e   : > { %612 = vmatpush.msra.mxu0 %v397_v22  ;;  %821 = vmatpush.msra.mxu1 %v398_v23  ;;  %v392_v30 = vld [vmem:[%s13985_s1 + $0x28] sm:$0xff]  ;;  %v389_v31 = vld [vmem:[%s13985_s1 + $0x10] sm:$0xff]  ;;  %v390_v32 = vld [vmem:[%s13985_s1 + $0x18] sm:$0xff] }
  0x1f   : > { %1055 = vmatpush.msra.mxu2 %v1024_v10  ;;  %1264 = vmatpush.msra.mxu3 %v1025_v11  ;;  %v326_v33 = vld [vmem:[%s8042_s9 + $0x18] sm:$0xff]  ;;  %v387_v34 = vld [vmem:[%s13985_s1] sm:$0xff]  ;;  %v388_v35 = vld [vmem:[%s13985_s1 + $0x8] sm:$0xff] }
  0x20   : > { %613 = vmatpush.msra.mxu0 %v395_v25  ;;  %822 = vmatpush.msra.mxu1 %v396_v26  ;;  %v327_v36 = vld [vmem:[%s8042_s9 + $0x20] sm:$0xff]  ;;  %v328_v37 = vld [vmem:[%s8042_s9 + $0x28] sm:$0xff]  ;;  %v329_v38 = vld [vmem:[%s8042_s9 + $0x30] sm:$0xff] }
  0x21   : > { %1056 = vmatpush.msra.mxu2 %v1022_v12  ;;  %1265 = vmatpush.msra.mxu3 %v1023_v13  ;;  %v330_v39 = vld [vmem:[%s8042_s9 + $0x38] sm:$0xff]  ;;  %v331_v40 = vld [vmem:[%s8042_s9 + $0x40] sm:$0xff]  ;;  %v332_v41 = vld [vmem:[%s8042_s9 + $0x48] sm:$0xff] }
  0x22   : > { %614 = vmatpush.msra.mxu0 %v393_v27  ;;  %823 = vmatpush.msra.mxu1 %v394_v28  ;;  %v333_v42 = vld [vmem:[%s8042_s9 + $0x50] sm:$0xff]  ;;  %v334_v43 = vld [vmem:[%s8042_s9 + $0x58] sm:$0xff]  ;;  %v335_v44 = vld [vmem:[%s8042_s9 + $0x60] sm:$0xff] }
  0x23   : > { %1057 = vmatpush.msra.mxu2 %v1020_v14  ;;  %1266 = vmatpush.msra.mxu3 %v1021_v15  ;;  %v336_v45 = vld [vmem:[%s8042_s9 + $0x68] sm:$0xff]  ;;  %v337_v46 = vld [vmem:[%s8042_s9 + $0x70] sm:$0xff]  ;;  %v338_v47 = vld [vmem:[%s8042_s9 + $0x78] sm:$0xff] }
  0x24   : > { %7122 = vmatmul.msk.f32.vlgmr.msra.gmra.mxu2 %vm409_vm0, %v323_v16  ;;  %7186 = vmatmul.msk.f32.vlgmr.msra.gmra.mxu3 %vm409_vm0, %v323_v16  ;;  %v8173_v48 = vld [vmem:[%s8042_s9 + $0x80] sm:$0xff]  ;;  %v8191_v56 = vld [vmem:[%s8042_s9 + $0x88] sm:$0xff]  ;;  %v8214_v4 = vld [vmem:[%s8042_s9 + $0x90] sm:$0xff] }
  0x25   : > { %615 = vmatpush.msra.mxu0 %v391_v29  ;;  %824 = vmatpush.msra.mxu1 %v392_v30  ;;  %v1036_v49 = vld [vmem:[%s13988_s4] sm:$0x3] }
  0x26   : > { %v8182_v50 = vperm.slane %v1036_v49, 0  ;;  %v8184_v51 = vperm.slane %v1036_v49, 1 }
  0x27   : > { %616 = vmatpush.msra.mxu0 %v389_v31  ;;  %825 = vmatpush.msra.mxu1 %v390_v32 }
  0x29   : > { %617 = vmatpush.msra.mxu0 %v387_v34  ;;  %826 = vmatpush.msra.mxu1 %v388_v35 }
  0x2a   : > { %6994 = vmatmul.msk.f32.vlgmr.msra.gmra.mxu0 %vm409_vm0, %v323_v16  ;;  %7058 = vmatmul.msk.f32.vlgmr.msra.gmra.mxu1 %vm409_vm0, %v323_v16 }
  0x2c   : > { %7123 = vmatmul.msk.f32.gmra.mxu2 %vm409_vm0, %v324_v17  ;;  %7187 = vmatmul.msk.f32.gmra.mxu3 %vm409_vm0, %v324_v17 }
  0x32   : > { %6995 = vmatmul.msk.f32.gmra.mxu0 %vm409_vm0, %v324_v17  ;;  %7059 = vmatmul.msk.f32.gmra.mxu1 %vm409_vm0, %v324_v17  ;;  %v8245_v17 = vld [vmem:[%s8042_s9 + $0x98] sm:$0xff] }
  0x34   : > { %7124 = vmatmul.msk.f32.gmra.mxu2 %vm409_vm0, %v325_v24  ;;  %7188 = vmatmul.msk.f32.gmra.mxu3 %vm409_vm0, %v325_v24 }
  0x3a   : > { %6996 = vmatmul.msk.f32.gmra.mxu0 %vm409_vm0, %v325_v24  ;;  %7060 = vmatmul.msk.f32.gmra.mxu1 %vm409_vm0, %v325_v24 }
  0x3c   : > { %7125 = vmatmul.msk.f32.gmra.mxu2 %vm409_vm0, %v326_v33  ;;  %7189 = vmatmul.msk.f32.gmra.mxu3 %vm409_vm0, %v326_v33 }
  0x42   : > { %6997 = vmatmul.msk.f32.gmra.mxu0 %vm409_vm0, %v326_v33  ;;  %7061 = vmatmul.msk.f32.gmra.mxu1 %vm409_vm0, %v326_v33 }
  0x44   : > { %7126 = vmatmul.msk.f32.gmra.mxu2 %vm409_vm0, %v327_v36  ;;  %7190 = vmatmul.msk.f32.gmra.mxu3 %vm409_vm0, %v327_v36 }
  0x4a   : > { %6998 = vmatmul.msk.f32.gmra.mxu0 %vm409_vm0, %v327_v36  ;;  %7062 = vmatmul.msk.f32.gmra.mxu1 %vm409_vm0, %v327_v36 }
  0x4c   : > { %7127 = vmatmul.msk.f32.gmra.mxu2 %vm409_vm0, %v328_v37  ;;  %7191 = vmatmul.msk.f32.gmra.mxu3 %vm409_vm0, %v328_v37 }
  0x52   : > { %6999 = vmatmul.msk.f32.gmra.mxu0 %vm409_vm0, %v328_v37  ;;  %7063 = vmatmul.msk.f32.gmra.mxu1 %vm409_vm0, %v328_v37 }
  0x54   : > { %7128 = vmatmul.msk.f32.gmra.mxu2 %vm409_vm0, %v329_v38  ;;  %7192 = vmatmul.msk.f32.gmra.mxu3 %vm409_vm0, %v329_v38 }
  0x5a   : > { %7000 = vmatmul.msk.f32.gmra.mxu0 %vm409_vm0, %v329_v38  ;;  %7064 = vmatmul.msk.f32.gmra.mxu1 %vm409_vm0, %v329_v38 }
  0x5c   : > { %7129 = vmatmul.msk.f32.gmra.mxu2 %vm409_vm0, %v330_v39  ;;  %7193 = vmatmul.msk.f32.gmra.mxu3 %vm409_vm0, %v330_v39 }
  0x62   : > { %7001 = vmatmul.msk.f32.gmra.mxu0 %vm409_vm0, %v330_v39  ;;  %7065 = vmatmul.msk.f32.gmra.mxu1 %vm409_vm0, %v330_v39  ;;  %v13990_v39 = vmov -1.0  }
  0x64   : > { %7130 = vmatmul.msk.f32.gmra.mxu2 %vm409_vm0, %v331_v40  ;;  %7194 = vmatmul.msk.f32.gmra.mxu3 %vm409_vm0, %v331_v40 }
  0x6a   : > { %7002 = vmatmul.msk.f32.gmra.mxu0 %vm409_vm0, %v331_v40  ;;  %7066 = vmatmul.msk.f32.gmra.mxu1 %vm409_vm0, %v331_v40 }
  0x6c   : > { %7131 = vmatmul.msk.f32.gmra.mxu2 %vm409_vm0, %v332_v41  ;;  %7195 = vmatmul.msk.f32.gmra.mxu3 %vm409_vm0, %v332_v41 }
  0x72   : > { %7003 = vmatmul.msk.f32.gmra.mxu0 %vm409_vm0, %v332_v41  ;;  %7067 = vmatmul.msk.f32.gmra.mxu1 %vm409_vm0, %v332_v41 }
  0x74   : > { %7132 = vmatmul.msk.f32.gmra.mxu2 %vm409_vm0, %v333_v42  ;;  %7196 = vmatmul.msk.f32.gmra.mxu3 %vm409_vm0, %v333_v42 }
  0x7a   : > { %7004 = vmatmul.msk.f32.gmra.mxu0 %vm409_vm0, %v333_v42  ;;  %7068 = vmatmul.msk.f32.gmra.mxu1 %vm409_vm0, %v333_v42 }
  0x7c   : > { %7133 = vmatmul.msk.f32.gmra.mxu2 %vm409_vm0, %v334_v43  ;;  %7197 = vmatmul.msk.f32.gmra.mxu3 %vm409_vm0, %v334_v43 }
  0x82   : > { %7005 = vmatmul.msk.f32.gmra.mxu0 %vm409_vm0, %v334_v43  ;;  %7069 = vmatmul.msk.f32.gmra.mxu1 %vm409_vm0, %v334_v43 }
  0x84   : > { %7134 = vmatmul.msk.f32.gmra.mxu2 %vm409_vm0, %v335_v44  ;;  %7198 = vmatmul.msk.f32.gmra.mxu3 %vm409_vm0, %v335_v44 }
  0x8a   : > { %7006 = vmatmul.msk.f32.gmra.mxu0 %vm409_vm0, %v335_v44  ;;  %7070 = vmatmul.msk.f32.gmra.mxu1 %vm409_vm0, %v335_v44 }
  0x8c   : > { %7135 = vmatmul.msk.f32.gmra.mxu2 %vm409_vm0, %v336_v45  ;;  %7199 = vmatmul.msk.f32.gmra.mxu3 %vm409_vm0, %v336_v45 }
  0x92   : > { %7007 = vmatmul.msk.f32.gmra.mxu0 %vm409_vm0, %v336_v45  ;;  %7071 = vmatmul.msk.f32.gmra.mxu1 %vm409_vm0, %v336_v45 }
  0x94   : > { %7136 = vmatmul.msk.f32.gmra.mxu2 %vm409_vm0, %v337_v46  ;;  %7200 = vmatmul.msk.f32.gmra.mxu3 %vm409_vm0, %v337_v46 }
  0x9a   : > { %7008 = vmatmul.msk.f32.gmra.mxu0 %vm409_vm0, %v337_v46  ;;  %7072 = vmatmul.msk.f32.gmra.mxu1 %vm409_vm0, %v337_v46 }
  0x9c   : > { %7137 = vmatmul.msk.f32.gmra.mxu2 %vm409_vm0, %v338_v47  ;;  %7201 = vmatmul.msk.f32.gmra.mxu3 %vm409_vm0, %v338_v47 }
  0xa2   : > { %7009 = vmatmul.msk.f32.gmra.mxu0 %vm409_vm0, %v338_v47  ;;  %7073 = vmatmul.msk.f32.gmra.mxu1 %vm409_vm0, %v338_v47 }
  0xa4   : > { %7138 = vmatmul.msk.f32.gmra.mxu2 %vm409_vm0, %v8173_v48  ;;  %7202 = vmatmul.msk.f32.gmra.mxu3 %vm409_vm0, %v8173_v48 }
  0xa7   : > { %v1059_v52 = vpop.f32.mrf.mxu2  ;;  %v1268_v53 = vpop.f32.mrf.mxu3 }
  0xa8   : > { %v1060_v54 = vadd.f32 %v1059_v52, %v8182_v50  ;;  %v1269_v55 = vadd.f32 %v1268_v53, %v8184_v51 }
  0xaa   : > { %v8193_v57 = vmul.f32 0.70710677, %v1060_v54  ;;  %v8195_v58 = vmul.f32 0.70710677, %v1269_v55  ;;  %v8235_v10 = vmul.f32 0.5, %v1060_v54  ;;  %v8241_v15 = vmul.f32 0.5, %v1269_v55  ;;  %7010 = vmatmul.msk.f32.gmra.mxu0 %vm409_vm0, %v8173_v48  ;;  %7074 = vmatmul.msk.f32.gmra.mxu1 %vm409_vm0, %v8173_v48 }
  0xac   : > { %v1972_v59 = vand.u32 2147483647, %v8193_v57  ;;  %v8199_v60 = vand.u32 2147483647, %v8195_v58  ;;  %7139 = vmatmul.msk.f32.gmra.mxu2 %vm409_vm0, %v8191_v56  ;;  %7203 = vmatmul.msk.f32.gmra.mxu3 %vm409_vm0, %v8191_v56  ;;  %vm1716_vm1 = vcmp.ge.f32.partialorder %v8193_v57, 0.0  ;;  %vm1717_vm2 = vcmp.ge.f32.partialorder %v8195_v58, 0.0 }
  0xad   : > { %v8278_v40 = vsel %vm1716_vm1, 1.0, %v13990_v39  ;;  %v8286_v45 = vsel %vm1717_vm2, 1.0, %v13990_v39 }
  0xae   : > { %v2100_v61 = vmul.f32 0.3275911, %v1972_v59  ;;  %v2101_v62 = vmul.f32 0.3275911, %v8199_v60  ;;  %v5428_v18 = vsub.f32 0.0, %v1972_v59  ;;  %v5429_v22 = vsub.f32 0.0, %v8199_v60 }
  0xaf   : > { %v1062_v63 = vpop.f32.mrf.mxu2  ;;  %v1271_v0 = vpop.f32.mrf.mxu3 }
  0xb0   : > { %v2228_v1 = vadd.f32 1.0, %v2100_v61  ;;  %v8208_v2 = vadd.f32 1.0, %v2101_v62  ;;  %v8211_v3 = vadd.f32 %v1062_v63, %v8182_v50  ;;  %v8217_v5 = vadd.f32 %v1271_v0, %v8184_v51 }
  0xb1   : > { %v5556_v34 = vmul.f32 %v5428_v18, %v1972_v59  ;;  %v5557_v38 = vmul.f32 %v5429_v22, %v8199_v60 }
  0xb2   : > { %7316 = vrcp.f32 %v2228_v1  ;;  %v8225_v6 = vmul.f32 0.70710677, %v8211_v3  ;;  %v8228_v7 = vmul.f32 0.70710677, %v8217_v5  ;;  %v2365_v25 = vand.u32 2147483647, %v2228_v1  ;;  %7011 = vmatmul.msk.f32.gmra.mxu0 %vm409_vm0, %v8191_v56  ;;  %7075 = vmatmul.msk.f32.gmra.mxu1 %vm409_vm0, %v8191_v56 }
  0xb3   : > { %7318 = vrcp.f32 %v8208_v2  ;;  %v2367_v26 = vand.u32 2147483648, %v2228_v1  ;;  %v2382_v30 = vand.u32 2147483648, %v8208_v2  ;;  %v2380_v32 = vand.u32 2147483647, %v8208_v2 }
  0xb4   : > { %7140 = vmatmul.msk.f32.gmra.mxu2 %vm409_vm0, %v8214_v4  ;;  %7204 = vmatmul.msk.f32.gmra.mxu3 %vm409_vm0, %v8214_v4  ;;  %v8233_v8 = vand.u32 2147483647, %v8225_v6  ;;  %v8238_v11 = vand.u32 2147483647, %v8228_v7  ;;  %vm2361_vm5 = vweird.f32 %v2228_v1  ;;  %vm2376_vm7 = vweird.f32 %v8208_v2 }
  0xb5   : > { %v2368_v36 = vor.u32 1.1754944e-38, %v2367_v26  ;;  %vm2366_vm8 = vcmp.eq.f32.partialorder %v2365_v25, 8.507059e+37  ;;  %v2383_v42 = vor.u32 1.1754944e-38, %v2382_v30  ;;  %vm2381_vm10 = vcmp.eq.f32.partialorder %v2380_v32, 8.507059e+37 }
  0xb6   : > { %v2102_v16 = vmul.f32 0.3275911, %v8233_v8  ;;  %v2103_v20 = vmul.f32 0.3275911, %v8238_v11  ;;  %v5684_v49 = vmul.f32 1.442695, %v5556_v34 }
  0xb7   : > { %v1065_v12 = vpop.f32.mrf.mxu2  ;;  %v1274_v43 = vpop.f32.mrf.mxu3  ;;  %v5686_v57 = vmul.f32 1.442695, %v5557_v38 }
  0xb8   : > { %v7317_v9 = vpop.eup %7316  ;;  %v8251_v23 = vadd.f32 1.0, %v2102_v16  ;;  %v8254_v24 = vadd.f32 %v1065_v12, %v8182_v50  ;;  %v8256_v28 = vadd.f32 1.0, %v2103_v20  ;;  %v8297_v58 = vadd.f32 %v1274_v43, %v8184_v51  ;;  %v8314_v16 = vld [vmem:[%s8042_s9 + $0xa0] sm:$0xff] }
  0xb9   : > { %v7319_v13 = vpop.eup %7318  ;;  %v2357_v14 = vmul.f32 %v7317_v9, %v2228_v1  ;;  %vm2362_vm3 = vweird.f32 %v7317_v9 }
  0xba   : > { %v2372_v19 = vmul.f32 %v7319_v13, %v8208_v2  ;;  %7320 = vrcp.f32 %v8251_v23  ;;  %vm2377_vm4 = vweird.f32 %v7319_v13  ;;  %v8271_v35 = vmul.f32 0.70710677, %v8254_v24  ;;  %vm2363_vm6 = vmor %vm2361_vm5, %vm2362_vm3  ;;  %7012 = vmatmul.msk.f32.gmra.mxu0 %vm409_vm0, %v8214_v4  ;;  %7076 = vmatmul.msk.f32.gmra.mxu1 %vm409_vm0, %v8214_v4 }
  0xbb   : > { %v2358_v21 = vsub.f32 1.0, %v2357_v14  ;;  %7322 = vrcp.f32 %v8256_v28  ;;  %vm2378_vm9 = vmor %vm2376_vm7, %vm2377_vm4  ;;  %vm2391_vm11 = vweird.f32 %v8251_v23  ;;  %v2395_v61 = vand.u32 2147483647, %v8251_v23 }
  0xbc   : > { %v2373_v27 = vsub.f32 1.0, %v2372_v19  ;;  %7141 = vmatmul.msk.f32.gmra.mxu2 %vm409_vm0, %v8245_v17  ;;  %7205 = vmatmul.msk.f32.gmra.mxu3 %vm409_vm0, %v8245_v17  ;;  %v8292_v53 = vand.u32 2147483647, %v8271_v35  ;;  %v2397_v1 = vand.u32 2147483648, %v8251_v23  ;;  %v8311_v14 = vmul.f32 0.70710677, %v8297_v58 }
  0xbd   : > { %v2359_v29 = vmul.f32 %v7317_v9, %v2358_v21  ;;  %v2410_v22 = vand.u32 2147483647, %v8256_v28  ;;  %vm2396_vm14 = vcmp.eq.f32.partialorder %v2395_v61, 8.507059e+37  ;;  %vm2406_vm1 = vweird.f32 %v8256_v28 }
  0xbe   : > { %v2374_v31 = vmul.f32 %v7319_v13, %v2373_v27  ;;  %v2104_v2 = vmul.f32 0.3275911, %v8292_v53  ;;  %v2398_v27 = vor.u32 1.1754944e-38, %v2397_v1  ;;  %v8329_v30 = vand.u32 2147483647, %v8311_v14 }
  0xbf   : > { %v2360_v33 = vadd.f32 %v7317_v9, %v2359_v29  ;;  %vm2411_vm3 = vcmp.eq.f32.partialorder %v2410_v22, 8.507059e+37  ;;  %vm1718_vm4 = vcmp.ge.f32.partialorder %v8225_v6, 0.0  ;;  %vm1719_vm5 = vcmp.ge.f32.partialorder %v8228_v7, 0.0  ;;  %v1068_v61 = vpop.f32.mrf.mxu2 }
  0xc0   : > { %v2375_v37 = vadd.f32 %v7319_v13, %v2374_v31  ;;  %v7321_v47 = vpop.eup %7320  ;;  %v8317_v20 = vadd.f32 1.0, %v2104_v2  ;;  %v2105_v43 = vmul.f32 0.3275911, %v8329_v30  ;;  %v8379_v22 = vsel %vm1719_vm5, 1.0, %v13990_v39 }
  0xc1   : > { %v2364_v41 = vsel %vm2363_vm6, %v7317_v9, %v2360_v33  ;;  %v7323_v54 = vpop.eup %7322  ;;  %v2387_v59 = vmul.f32 %v7321_v47, %v8251_v23  ;;  %vm2392_vm12 = vweird.f32 %v7321_v47  ;;  %vm1720_vm7 = vcmp.ge.f32.partialorder %v8271_v35, 0.0 }
  0xc2   : > { %v8281_v44 = vsel %vm2366_vm8, %v2368_v36, %v2364_v41  ;;  %v2379_v46 = vsel %vm2378_vm9, %v7319_v13, %v2375_v37  ;;  %v2402_v62 = vmul.f32 %v7323_v54, %v8256_v28  ;;  %v2412_v13 = vand.u32 2147483648, %v8256_v28  ;;  %vm2393_vm15 = vmor %vm2391_vm11, %vm2392_vm12  ;;  %7013 = vmatmul.msk.f32.gmra.mxu0 %vm409_vm0, %v8245_v17  ;;  %7077 = vmatmul.msk.f32.gmra.mxu1 %vm409_vm0, %v8245_v17 }
  0xc3   : > { %v4276_v48 = vmul.f32 1.0614054, %v8281_v44  ;;  %v8289_v52 = vsel %vm2381_vm10, %v2383_v42, %v2379_v46  ;;  %v2388_v0 = vsub.f32 1.0, %v2387_v59  ;;  %vm2407_vm13 = vweird.f32 %v7323_v54 }
  0xc4   : > { %v4277_v55 = vmul.f32 1.0614054, %v8289_v52  ;;  %v2403_v12 = vsub.f32 1.0, %v2402_v62  ;;  %7142 = vmatmul.msk.f32.gmra.mxu2 %vm409_vm0, %v8314_v16  ;;  %7206 = vmatmul.msk.f32.gmra.mxu3 %vm409_vm0, %v8314_v16  ;;  %7324 = vrcp.f32 %v8317_v20  ;;  %vm2408_vm2 = vmor %vm2406_vm1, %vm2407_vm13  ;;  %v2413_v34 = vor.u32 1.1754944e-38, %v2412_v13 }
  0xc5   : > { %v4404_v60 = vadd.f32 -1.4531521, %v4276_v48  ;;  %v2389_v19 = vmul.f32 %v7321_v47, %v2388_v0  ;;  %7326 = vpow2.f32 %v5684_v49  ;;  %v5430_v28 = vsub.f32 0.0, %v8233_v8 }
  0xc6   : > { %v4405_v63 = vadd.f32 -1.4531521, %v4277_v55  ;;  %v2404_v21 = vmul.f32 %v7323_v54, %v2403_v12  ;;  %v8345_v41 = vmul.f32 0.5, %v8211_v3  ;;  %v8348_v42 = vmul.f32 0.5, %v8217_v5 }
  0xc7   : > { %v4532_v9 = vmul.f32 %v4404_v60, %v8281_v44  ;;  %v2390_v26 = vadd.f32 %v7321_v47, %v2389_v19  ;;  %7328 = vpow2.f32 %v5686_v57  ;;  %v5558_v55 = vmul.f32 %v5430_v28, %v8233_v8 }
  0xc8   : > { %v4533_v18 = vmul.f32 %v4405_v63, %v8289_v52  ;;  %v2405_v29 = vadd.f32 %v7323_v54, %v2404_v21  ;;  %v5431_v59 = vsub.f32 0.0, %v8238_v11  ;;  %v8360_v60 = vadd.f32 1.0, %v2105_v43 }
  0xc9   : > { %v4660_v56 = vadd.f32 1.4214138, %v4532_v9  ;;  %v2394_v33 = vsel %vm2393_vm15, %v7321_v47, %v2390_v26  ;;  %v2425_v0 = vand.u32 2147483647, %v8317_v20  ;;  %v2427_v1 = vand.u32 2147483648, %v8317_v20 }
  0xca   : > { %v4661_v25 = vadd.f32 1.4214138, %v4533_v18  ;;  %v8333_v36 = vsel %vm2396_vm14, %v2398_v27, %v2394_v33  ;;  %v2409_v37 = vsel %vm2408_vm2, %v7323_v54, %v2405_v29  ;;  %v7325_v46 = vpop.eup %7324  ;;  %v8353_v54 = vsel %vm1718_vm4, 1.0, %v13990_v39  ;;  %v8390_v29 = vld [vmem:[%s8042_s9 + $0xa8] sm:$0xff]  ;;  %7014 = vmatmul.msk.f32.gmra.mxu0 %vm409_vm0, %v8314_v16  ;;  %7078 = vmatmul.msk.f32.gmra.mxu1 %vm409_vm0, %v8314_v16 }
  0xcb   : > { %v4788_v31 = vmul.f32 %v4660_v56, %v8281_v44  ;;  %v4278_v23 = vmul.f32 1.0614054, %v8333_v36  ;;  %v8338_v38 = vsel %vm2411_vm3, %v2413_v34, %v2409_v37  ;;  %v2417_v3 = vmul.f32 %v7325_v46, %v8317_v20  ;;  %v8362_v62 = vpop.eup %7326 }
  0xcc   : > { %v4789_v32 = vmul.f32 %v4661_v25, %v8289_v52  ;;  %v4279_v6 = vmul.f32 1.0614054, %v8338_v38  ;;  %7330 = vrcp.f32 %v8360_v60  ;;  %vm2422_vm6 = vweird.f32 %v7325_v46  ;;  %7143 = vmatmul.msk.f32.gmra.mxu2 %vm409_vm0, %v8390_v29  ;;  %7207 = vmatmul.msk.f32.gmra.mxu3 %vm409_vm0, %v8390_v29 }
  0xcd   : > { %v4916_v47 = vadd.f32 -0.28449672, %v4788_v31  ;;  %v4406_v49 = vadd.f32 -1.4531521, %v4278_v23  ;;  %v2418_v63 = vsub.f32 1.0, %v2417_v3  ;;  %v8371_v18 = vadd.f32 %v1068_v61, %v8182_v50  ;;  %v8373_v19 = vpop.eup %7328 }
  0xce   : > { %v4917_v48 = vadd.f32 -0.28449672, %v4789_v32  ;;  %v4407_v4 = vadd.f32 -1.4531521, %v4279_v6  ;;  %v5688_v21 = vmul.f32 1.442695, %v5558_v55  ;;  %v5559_v25 = vmul.f32 %v5431_v59, %v8238_v11 }
  0xcf   : > { %v4534_v5 = vmul.f32 %v4406_v49, %v8333_v36  ;;  %v5044_v2 = vmul.f32 %v4916_v47, %v8281_v44  ;;  %v2419_v13 = vmul.f32 %v7325_v46, %v2418_v63  ;;  %vm2421_vm8 = vweird.f32 %v8317_v20  ;;  %v1277_v47 = vpop.f32.mrf.mxu3 }
  0xd0   : > { %v4535_v57 = vmul.f32 %v4407_v4, %v8338_v38  ;;  %v5045_v9 = vmul.f32 %v4917_v48, %v8289_v52  ;;  %v8393_v31 = vmul.f32 0.5, %v8254_v24  ;;  %vm2423_vm9 = vmor %vm2421_vm8, %vm2422_vm6  ;;  %v2428_v11 = vor.u32 1.1754944e-38, %v2427_v1  ;;  %v1071_v1 = vpop.f32.mrf.mxu2 }
  0xd1   : > { %v4662_v12 = vadd.f32 1.4214138, %v4534_v5  ;;  %v2420_v27 = vadd.f32 %v7325_v46, %v2419_v13  ;;  %v5172_v7 = vadd.f32 0.2548296, %v5044_v2  ;;  %v5432_v32 = vsub.f32 0.0, %v8292_v53 }
  0xd2   : > { %v4663_v8 = vadd.f32 1.4214138, %v4535_v57  ;;  %v5173_v17 = vadd.f32 0.2548296, %v5045_v9  ;;  %vm2426_vm10 = vcmp.eq.f32.partialorder %v2425_v0, 8.507059e+37  ;;  %v7331_v34 = vpop.eup %7330  ;;  %7332 = vpow2.f32 %v5688_v21  ;;  %7015 = vmatmul.msk.f32.gmra.mxu0 %vm409_vm0, %v8390_v29  ;;  %7079 = vmatmul.msk.f32.gmra.mxu1 %vm409_vm0, %v8390_v29 }
  0xd3   : > { %v4790_v56 = vmul.f32 %v4662_v12, %v8333_v36  ;;  %v2424_v33 = vsel %vm2423_vm9, %v7325_v46, %v2420_v27  ;;  %v8402_v20 = vmul.f32 0.70710677, %v8371_v18  ;;  %v8407_v37 = vsel %vm1720_vm7, 1.0, %v13990_v39 }
  0xd4   : > { %v4791_v26 = vmul.f32 %v4663_v8, %v8338_v38  ;;  %v8409_v23 = vsel %vm2426_vm10, %v2428_v11, %v2424_v33  ;;  %v5690_v6 = vmul.f32 1.442695, %v5559_v25  ;;  %v2432_v46 = vmul.f32 %v7331_v34, %v8360_v60 }
  0xd5   : > { %v4918_v24 = vadd.f32 -0.28449672, %v4790_v56  ;;  %v4280_v43 = vmul.f32 1.0614054, %v8409_v23  ;;  %v5300_v48 = vmul.f32 %v5172_v7, %v8281_v44  ;;  %v5560_v49 = vmul.f32 %v5432_v32, %v8292_v53 }
  0xd6   : > { %v4919_v28 = vadd.f32 -0.28449672, %v4791_v26  ;;  %v5433_v4 = vsub.f32 0.0, %v8329_v30  ;;  %v8417_v3 = vand.u32 2147483647, %v8402_v20  ;;  %v5301_v35 = vmul.f32 %v5173_v17, %v8289_v52 }
  0xd7   : > { %v4408_v5 = vadd.f32 -1.4531521, %v4280_v43  ;;  %v2433_v55 = vsub.f32 1.0, %v2432_v46  ;;  %v2442_v59 = vand.u32 2147483648, %v8360_v60  ;;  %v5046_v61 = vmul.f32 %v4918_v24, %v8333_v36 }
  0xd8   : > { %v2440_v57 = vand.u32 2147483647, %v8360_v60  ;;  %v2106_v63 = vmul.f32 0.3275911, %v8417_v3  ;;  %v8425_v44 = vadd.f32 %v1277_v47, %v8184_v51  ;;  %v5047_v52 = vmul.f32 %v4919_v28, %v8338_v38  ;;  %v7333_v2 = vpop.eup %7332 }
  0xd9   : > { %v4536_v53 = vmul.f32 %v4408_v5, %v8409_v23  ;;  %v2434_v0 = vmul.f32 %v7331_v34, %v2433_v55  ;;  %vm2437_vm11 = vweird.f32 %v7331_v34  ;;  %vm1721_vm12 = vcmp.ge.f32.partialorder %v8311_v14, 0.0 }
  0xda   : > { %vm2436_vm13 = vweird.f32 %v8360_v60  ;;  %v5561_v9 = vmul.f32 %v5433_v4, %v8329_v30  ;;  %v8436_v12 = vadd.f32 1.0, %v2106_v63  ;;  %v5940_v8 = vmul.f32 %v8362_v62, %v5300_v48 }
  0xdb   : > { %v4664_v13 = vadd.f32 1.4214138, %v4536_v53  ;;  %v2435_v16 = vadd.f32 %v7331_v34, %v2434_v0  ;;  %v2443_v56 = vor.u32 1.1754944e-38, %v2442_v59  ;;  %v5174_v21 = vadd.f32 0.2548296, %v5046_v61  ;;  %vm2438_vm14 = vmor %vm2436_vm13, %vm2437_vm11 }
  0xdc   : > { %7334 = vrcp.f32 %v8436_v12  ;;  %v8441_v25 = vmul.f32 0.70710677, %v8425_v44  ;;  %v8444_v26 = vadd.f32 %v1071_v1, %v8182_v50  ;;  %v5941_v60 = vmul.f32 %v8373_v19, %v5301_v35  ;;  %v345_v35 = vld [vmem:[%s8042_s9 + $0xb0] sm:$0xff] }
  0xdd   : > { %v5175_v30 = vadd.f32 0.2548296, %v5047_v52  ;;  %v2439_v27 = vsel %vm2438_vm14, %v7331_v34, %v2435_v16  ;;  %vm2441_vm15 = vcmp.eq.f32.partialorder %v2440_v57, 8.507059e+37  ;;  %7336 = vpow2.f32 %v5690_v6  ;;  %7144 = vmatmul.msk.f32.gmra.mxu2 %vm409_vm0, %v345_v35  ;;  %7208 = vmatmul.msk.f32.gmra.mxu3 %vm409_vm0, %v345_v35 }
  0xde   : > { %v4792_v62 = vmul.f32 %v4664_v13, %v8409_v23  ;;  %v5692_v7 = vmul.f32 1.442695, %v5560_v49  ;;  %v8448_v11 = vsel %vm2441_vm15, %v2443_v56, %v2439_v27  ;;  %v6068_v32 = vsub.f32 1.0, %v5940_v8  ;;  %v1074_v8 = vpop.f32.mrf.mxu2  ;;  %7016 = vmatmul.msk.f32.gmra.mxu0 %vm409_vm0, %v345_v35  ;;  %7080 = vmatmul.msk.f32.gmra.mxu1 %vm409_vm0, %v345_v35 }
  0xdf   : > { %v8451_v17 = vmul.f32 0.5, %v8297_v58  ;;  %v4281_v33 = vmul.f32 1.0614054, %v8448_v11  ;;  %v5694_v24 = vmul.f32 1.442695, %v5561_v9  ;;  %v5302_v28 = vmul.f32 %v5174_v21, %v8333_v36  ;;  %v1280_v9 = vpop.f32.mrf.mxu3 }
  0xe0   : > { %v8458_v19 = vsel %vm1721_vm12, 1.0, %v13990_v39  ;;  %v8461_v34 = vand.u32 2147483647, %v8441_v25  ;;  %v8464_v6 = vmul.f32 0.70710677, %v8444_v26  ;;  %v6069_v58 = vsub.f32 1.0, %v5941_v60 }
  0xe1   : > { %v5303_v36 = vmul.f32 %v5175_v30, %v8338_v38  ;;  %v4409_v43 = vadd.f32 -1.4531521, %v4281_v33  ;;  %v5434_v14 = vsub.f32 0.0, %v8417_v3  ;;  %v4920_v47 = vadd.f32 -0.28449672, %v4792_v62 }
  0xe2   : > { %v7335_v46 = vpop.eup %7334  ;;  %7338 = vpow2.f32 %v5692_v7  ;;  %v2107_v48 = vmul.f32 0.3275911, %v8461_v34  ;;  %v8474_v49 = vand.u32 2147483647, %v8464_v6  ;;  %v8477_v4 = vmul.f32 %v6068_v32, %v8278_v40 }
  0xe3   : > { %7340 = vpow2.f32 %v5694_v24  ;;  %v8480_v29 = vmul.f32 0.5, %v8371_v18  ;;  %v2447_v38 = vmul.f32 %v7335_v46, %v8436_v12  ;;  %v7337_v5 = vpop.eup %7336  ;;  %v5942_v55 = vmul.f32 %v7333_v2, %v5302_v28 }
  0xe4   : > { %v4537_v59 = vmul.f32 %v4409_v43, %v8448_v11  ;;  %v8485_v61 = vadd.f32 1.0, %v2107_v48  ;;  %v2108_v57 = vmul.f32 0.3275911, %v8474_v49  ;;  %v5943_v40 = vmul.f32 %v7337_v5, %v5303_v36 }
  0xe5   : > { %v2448_v63 = vsub.f32 1.0, %v2447_v38  ;;  %v2457_v18 = vand.u32 2147483648, %v8436_v12  ;;  %v5562_v52 = vmul.f32 %v5434_v14, %v8417_v3  ;;  %v8493_v53 = vmul.f32 %v6069_v58, %v8286_v45 }
  0xe6   : > { %v5048_v0 = vmul.f32 %v4920_v47, %v8409_v23  ;;  %vm1722_vm1 = vcmp.ge.f32.partialorder %v8402_v20, 0.0  ;;  %7342 = vrcp.f32 %v8485_v61  ;;  %vm2452_vm2 = vweird.f32 %v7335_v46 }
  0xe7   : > { %v2449_v1 = vmul.f32 %v7335_v46, %v2448_v63  ;;  %v2455_v2 = vand.u32 2147483647, %v8436_v12  ;;  %vm1723_vm3 = vcmp.ge.f32.partialorder %v8441_v25, 0.0  ;;  %v6070_v16 = vsub.f32 1.0, %v5942_v55 }
  0xe8   : > { %v7339_v13 = vpop.eup %7338  ;;  %v4665_v3 = vadd.f32 1.4214138, %v4537_v59  ;;  %vm2451_vm4 = vweird.f32 %v8436_v12  ;;  %v8501_v45 = vadd.f32 1.0, %v2108_v57  ;;  %v6071_v21 = vsub.f32 1.0, %v5943_v40 }
  0xe9   : > { %v8505_v56 = vpop.eup %7340  ;;  %v2450_v60 = vadd.f32 %v7335_v46, %v2449_v1  ;;  %v2458_v30 = vor.u32 1.1754944e-38, %v2457_v18  ;;  %v5696_v27 = vmul.f32 1.442695, %v5562_v52  ;;  %v5176_v62 = vadd.f32 0.2548296, %v5048_v0  ;;  %vm2453_vm5 = vmor %vm2451_vm4, %vm2452_vm2 }
  0xea   : > { %7344 = vrcp.f32 %v8501_v45  ;;  %v8510_v7 = vadd.f32 %v1280_v9, %v8184_v51  ;;  %v8513_v12 = vadd.f32 %v1074_v8, %v8182_v50  ;;  %v8518_v32 = vsel %vm1722_vm1, 1.0, %v13990_v39 }
  0xeb   : > { %v2454_v33 = vsel %vm2453_vm5, %v7335_v46, %v2450_v60  ;;  %vm2456_vm6 = vcmp.eq.f32.partialorder %v2455_v2, 8.507059e+37  ;;  %v8521_v24 = vmul.f32 0.5, %v8425_v44  ;;  %v4793_v58 = vmul.f32 %v4665_v3, %v8448_v11 }
  0xec   : > { %v7343_v28 = vpop.eup %7342  ;;  %v8524_v36 = vsel %vm2456_vm6, %v2458_v30, %v2454_v33  ;;  %v8529_v43 = vsel %vm1723_vm3, 1.0, %v13990_v39  ;;  %v5435_v14 = vsub.f32 0.0, %v8461_v34  ;;  %v8533_v20 = vmul.f32 %v6070_v16, %v8353_v54 }
  0xed   : > { %v8536_v46 = vmul.f32 %v6071_v21, %v8379_v22  ;;  %v4282_v44 = vmul.f32 1.0614054, %v8524_v36  ;;  %v2462_v47 = vmul.f32 %v7343_v28, %v8485_v61  ;;  %v5304_v48 = vmul.f32 %v5176_v62, %v8409_v23 }
  0xee   : > { %7346 = vpow2.f32 %v5696_v27  ;;  %v8542_v38 = vmul.f32 0.70710677, %v8510_v7  ;;  %v8545_v25 = vmul.f32 0.70710677, %v8513_v12  ;;  %v2470_v54 = vand.u32 2147483647, %v8485_v61 }
  0xef   : > { %v4410_v35 = vadd.f32 -1.4531521, %v4282_v44  ;;  %v2463_v5 = vsub.f32 1.0, %v2462_v47  ;;  %v2472_v22 = vand.u32 2147483648, %v8485_v61  ;;  %v4921_v59 = vadd.f32 -0.28449672, %v4793_v58 }
  0xf0   : > { %v7345_v55 = vpop.eup %7344  ;;  %v5563_v57 = vmul.f32 %v5435_v14, %v8461_v34  ;;  %vm1724_vm7 = vcmp.ge.f32.partialorder %v8464_v6, 0.0  ;;  %v8552_v23 = vand.u32 2147483647, %v8542_v38  ;;  %v8555_v40 = vand.u32 2147483647, %v8545_v25 }
  0xf1   : > { %v2464_v63 = vmul.f32 %v7343_v28, %v2463_v5  ;;  %vm2467_vm8 = vweird.f32 %v7343_v28  ;;  %v2477_v18 = vmul.f32 %v7345_v55, %v8501_v45  ;;  %v5436_v52 = vsub.f32 0.0, %v8474_v49 }
  0xf2   : > { %v5944_v0 = vmul.f32 %v7339_v13, %v5304_v48  ;;  %v4538_v1 = vmul.f32 %v4410_v35, %v8524_v36  ;;  %vm2466_vm9 = vweird.f32 %v8485_v61  ;;  %v2109_v34 = vmul.f32 0.3275911, %v8552_v23  ;;  %v1283_v48 = vpop.f32.mrf.mxu3 }
  0xf3   : > { %v2465_v2 = vadd.f32 %v7343_v28, %v2464_v63  ;;  %vm2471_vm10 = vcmp.eq.f32.partialorder %v2470_v54, 8.507059e+37  ;;  %v2473_v9 = vor.u32 1.1754944e-38, %v2472_v22  ;;  %v2478_v8 = vsub.f32 1.0, %v2477_v18  ;;  %vm2468_vm11 = vmor %vm2466_vm9, %vm2467_vm8 }
  0xf4   : > { %v8562_v16 = vpop.eup %7346  ;;  %v5049_v3 = vmul.f32 %v4921_v59, %v8448_v11  ;;  %v2487_v21 = vand.u32 2147483648, %v8501_v45  ;;  %v8566_v60 = vadd.f32 1.0, %v2109_v34  ;;  %v2110_v13 = vmul.f32 0.3275911, %v8555_v40 }
  0xf5   : > { %v2469_v30 = vsel %vm2468_vm11, %v7343_v28, %v2465_v2  ;;  %v2479_v27 = vmul.f32 %v7345_v55, %v2478_v8  ;;  %vm2482_vm12 = vweird.f32 %v7345_v55  ;;  %v2485_v61 = vand.u32 2147483647, %v8501_v45 }
  0xf6   : > { %v4666_v62 = vadd.f32 1.4214138, %v4538_v1  ;;  %v8570_v33 = vsel %vm2471_vm10, %v2473_v9, %v2469_v30  ;;  %v5564_v58 = vmul.f32 %v5436_v52, %v8474_v49  ;;  %7348 = vrcp.f32 %v8566_v60 }
  0xf7   : > { %v4283_v14 = vmul.f32 1.0614054, %v8570_v33  ;;  %v5698_v44 = vmul.f32 1.442695, %v5563_v57  ;;  %v2480_v47 = vadd.f32 %v7345_v55, %v2479_v27  ;;  %vm2481_vm13 = vweird.f32 %v8501_v45 }
  0xf8   : > { %v6072_v35 = vsub.f32 1.0, %v5944_v0  ;;  %v5177_v28 = vadd.f32 0.2548296, %v5049_v3  ;;  %vm2483_vm14 = vmor %vm2481_vm13, %vm2482_vm12  ;;  %v2488_v5 = vor.u32 1.1754944e-38, %v2487_v21  ;;  %v8576_v54 = vadd.f32 1.0, %v2110_v13 }
  0xf9   : > { %v4411_v22 = vadd.f32 -1.4531521, %v4283_v14  ;;  %v8579_v59 = vmul.f32 0.5, %v8444_v26  ;;  %v2484_v49 = vsel %vm2483_vm14, %v7345_v55, %v2480_v47  ;;  %vm2486_vm15 = vcmp.eq.f32.partialorder %v2485_v61, 8.507059e+37 }
  0xfa   : > { %v4794_v63 = vmul.f32 %v4666_v62, %v8524_v36  ;;  %v8582_v18 = vsel %vm2486_vm15, %v2488_v5, %v2484_v49  ;;  %v5700_v57 = vmul.f32 1.442695, %v5564_v58  ;;  %v8585_v45 = vadd.f32 %v1283_v48, %v8184_v51  ;;  %v346_v58 = vld [vmem:[%s8042_s9 + $0xb8] sm:$0xff] }
  0xfb   : > { %v4539_v52 = vmul.f32 %v4411_v22, %v8570_v33  ;;  %v8591_v0 = vsel %vm1724_vm7, 1.0, %v13990_v39  ;;  %v4284_v26 = vmul.f32 1.0614054, %v8582_v18  ;;  %7350 = vrcp.f32 %v8576_v54  ;;  %7145 = vmatmul.msk.f32.gmra.mxu2 %vm409_vm0, %v346_v58  ;;  %7209 = vmatmul.msk.f32.gmra.mxu3 %vm409_vm0, %v346_v58 }
  0xfc   : > { %v7349_v55 = vpop.eup %7348  ;;  %v8596_v1 = vmul.f32 %v6072_v35, %v8407_v37  ;;  %v5305_v34 = vmul.f32 %v5177_v28, %v8448_v11  ;;  %7352 = vpow2.f32 %v5698_v44  ;;  %v5437_v2 = vsub.f32 0.0, %v8552_v23  ;;  %v1077_v35 = vpop.f32.mrf.mxu2  ;;  %7017 = vmatmul.msk.f32.gmra.mxu0 %vm409_vm0, %v346_v58  ;;  %7081 = vmatmul.msk.f32.gmra.mxu1 %vm409_vm0, %v346_v58 }
  0xfd   : > { %v4412_v9 = vadd.f32 -1.4531521, %v4284_v26  ;;  %v8601_v8 = vmul.f32 0.5, %v8510_v7  ;;  %v2492_v6 = vmul.f32 %v7349_v55, %v8566_v60  ;;  %v8605_v3 = vmul.f32 0.5, %v8513_v12 }
  0xfe   : > { %v4922_v21 = vadd.f32 -0.28449672, %v4794_v63  ;;  %7354 = vpow2.f32 %v5700_v57  ;;  %v2500_v37 = vand.u32 2147483647, %v8566_v60  ;;  %v8609_v13 = vmul.f32 0.70710677, %v8585_v45 }
  0xff   : > { %v4667_v11 = vadd.f32 1.4214138, %v4539_v52  ;;  %v4540_v30 = vmul.f32 %v4412_v9, %v8582_v18  ;;  %v2493_v27 = vsub.f32 1.0, %v2492_v6  ;;  %v2502_v61 = vand.u32 2147483648, %v8566_v60 }
 0x100   : > { %v5945_v7 = vmul.f32 %v8505_v56, %v5305_v34  ;;  %vm1725_vm1 = vcmp.ge.f32.partialorder %v8542_v38, 0.0  ;;  %v5565_v12 = vmul.f32 %v5437_v2, %v8552_v23  ;;  %v8617_v62 = vand.u32 2147483647, %v8609_v13  ;;  %v1286_v23 = vpop.f32.mrf.mxu3 }
 0x101   : > { %v7351_v14 = vpop.eup %7350  ;;  %v4668_v44 = vadd.f32 1.4214138, %v4540_v30  ;;  %v2494_v47 = vmul.f32 %v7349_v55, %v2493_v27  ;;  %vm2497_vm2 = vweird.f32 %v7349_v55  ;;  %v5438_v48 = vsub.f32 0.0, %v8555_v40 }
 0x102   : > { %v8623_v56 = vpop.eup %7352  ;;  %vm2496_vm3 = vweird.f32 %v8566_v60  ;;  %vm8626_vm4 = vcmp.eq.f32.partialorder %v2500_v37, 8.507059e+37  ;;  %v2507_v28 = vmul.f32 %v7351_v14, %v8576_v54  ;;  %v2111_v5 = vmul.f32 0.3275911, %v8617_v62 }
 0x103   : > { %v5050_v22 = vmul.f32 %v4922_v21, %v8524_v36  ;;  %v4795_v49 = vmul.f32 %v4667_v11, %v8570_v33  ;;  %v2495_v63 = vadd.f32 %v7349_v55, %v2494_v47  ;;  %v2503_v57 = vor.u32 1.1754944e-38, %v2502_v61  ;;  %vm2498_vm5 = vmor %vm2496_vm3, %vm2497_vm2 }
 0x104   : > { %v8636_v52 = vpop.eup %7354  ;;  %v2508_v60 = vsub.f32 1.0, %v2507_v28  ;;  %v2515_v26 = vand.u32 2147483647, %v8576_v54  ;;  %v8640_v34 = vadd.f32 1.0, %v2111_v5  ;;  %v8643_v2 = vadd.f32 %v1077_v35, %v8182_v50 }
 0x105   : > { %v4796_v9 = vmul.f32 %v4668_v44, %v8582_v18  ;;  %v2499_v6 = vsel %vm2498_vm5, %v7349_v55, %v2495_v63  ;;  %v2517_v21 = vand.u32 2147483648, %v8576_v54  ;;  %v5566_v37 = vmul.f32 %v5438_v48, %v8555_v40 }
 0x106   : > { %v8650_v11 = vsel %vm8626_vm4, %v2503_v57, %v2499_v6  ;;  %v2509_v30 = vmul.f32 %v7351_v14, %v2508_v60  ;;  %vm2512_vm6 = vweird.f32 %v7351_v14  ;;  %7356 = vrcp.f32 %v8640_v34 }
 0x107   : > { %v6073_v27 = vsub.f32 1.0, %v5945_v7  ;;  %v4923_v61 = vadd.f32 -0.28449672, %v4795_v49  ;;  %v4285_v58 = vmul.f32 1.0614054, %v8650_v11  ;;  %vm1726_vm7 = vcmp.ge.f32.partialorder %v8545_v25, 0.0 }
 0x108   : > { %v5702_v44 = vmul.f32 1.442695, %v5565_v12  ;;  %v2510_v55 = vadd.f32 %v7351_v14, %v2509_v30  ;;  %vm2511_vm8 = vweird.f32 %v8576_v54  ;;  %v8657_v40 = vmul.f32 0.70710677, %v8643_v2 }
 0x109   : > { %v4924_v47 = vadd.f32 -0.28449672, %v4796_v9  ;;  %v8662_v48 = vsel %vm1725_vm1, 1.0, %v13990_v39  ;;  %v4413_v35 = vadd.f32 -1.4531521, %v4285_v58  ;;  %vm2513_vm9 = vmor %vm2511_vm8, %vm2512_vm6  ;;  %v2518_v7 = vor.u32 1.1754944e-38, %v2517_v21 }
 0x10a   : > { %v5178_v28 = vadd.f32 0.2548296, %v5050_v22  ;;  %v2514_v5 = vsel %vm2513_vm9, %v7351_v14, %v2510_v55  ;;  %vm2516_vm10 = vcmp.eq.f32.partialorder %v2515_v26, 8.507059e+37  ;;  %v5704_v12 = vmul.f32 1.442695, %v5566_v37 }
 0x10b   : > { %v5051_v49 = vmul.f32 %v4923_v61, %v8570_v33  ;;  %v4541_v54 = vmul.f32 %v4413_v35, %v8650_v11  ;;  %v8669_v63 = vsel %vm1726_vm7, 1.0, %v13990_v39  ;;  %v8671_v38 = vsel %vm2516_vm10, %v2518_v7, %v2514_v5 }
 0x10c   : > { %v7357_v57 = vpop.eup %7356  ;;  %v8674_v60 = vmul.f32 %v6073_v27, %v8458_v19  ;;  %v4286_v22 = vmul.f32 1.0614054, %v8671_v38  ;;  %v8678_v14 = vand.u32 2147483647, %v8657_v40  ;;  %v8681_v26 = vadd.f32 %v1286_v23, %v8184_v51 }
 0x10d   : > { %v5052_v9 = vmul.f32 %v4924_v47, %v8582_v18  ;;  %v4669_v25 = vadd.f32 1.4214138, %v4541_v54  ;;  %7358 = vpow2.f32 %v5702_v44  ;;  %v2522_v6 = vmul.f32 %v7357_v57, %v8640_v34  ;;  %v619_v54 = vpop.f32.mrf.mxu0 }
 0x10e   : > { %v5306_v21 = vmul.f32 %v5178_v28, %v8524_v36  ;;  %v4414_v37 = vadd.f32 -1.4531521, %v4286_v22  ;;  %7360 = vpow2.f32 %v5704_v12  ;;  %v2112_v19 = vmul.f32 0.3275911, %v8678_v14  ;;  %v347_v36 = vld [vmem:[%s8042_s9 + $0xc0] sm:$0xff]  ;;  %v8707_v22 = vpop.f32.mrf.mxu1 }
 0x10f   : > { %v5179_v30 = vadd.f32 0.2548296, %v5051_v49  ;;  %v2523_v27 = vsub.f32 1.0, %v2522_v6  ;;  %v2532_v61 = vand.u32 2147483648, %v8640_v34  ;;  %v5439_v58 = vsub.f32 0.0, %v8617_v62  ;;  %7146 = vmatmul.msk.f32.gmra.mxu2 %vm409_vm0, %v347_v36  ;;  %7210 = vmatmul.msk.f32.gmra.mxu3 %vm409_vm0, %v347_v36 }
 0x110   : > { %v4797_v55 = vmul.f32 %v4669_v25, %v8650_v11  ;;  %v4542_v47 = vmul.f32 %v4414_v37, %v8671_v38  ;;  %v8691_v35 = vadd.f32 1.0, %v2112_v19  ;;  %v8694_v44 = vmul.f32 0.70710677, %v8681_v26  ;;  %7018 = vmatmul.msk.f32.gmra.mxu0 %vm409_vm0, %v347_v36  ;;  %7082 = vmatmul.msk.f32.gmra.mxu1 %vm409_vm0, %v347_v36 }
 0x111   : > { %v5180_v7 = vadd.f32 0.2548296, %v5052_v9  ;;  %v2524_v23 = vmul.f32 %v7357_v57, %v2523_v27  ;;  %vm2527_vm11 = vweird.f32 %v7357_v57  ;;  %v2530_v28 = vand.u32 2147483647, %v8640_v34 }
 0x112   : > { %v8701_v5 = vmul.f32 %v8562_v16, %v5306_v21  ;;  %v4670_v12 = vadd.f32 1.4214138, %v4542_v47  ;;  %v8704_v49 = vmul.f32 0.5, %v8585_v45  ;;  %7362 = vrcp.f32 %v8691_v35  ;;  %v403_v45 = vld [vmem:[%s13987_s3] sm:$0x3] }
 0x113   : > { %v8711_v9 = vpop.eup %7358  ;;  %v5307_v25 = vmul.f32 %v5179_v30, %v8570_v33  ;;  %vm1727_vm12 = vcmp.ge.f32.partialorder %v8609_v13, 0.0  ;;  %v2525_v16 = vadd.f32 %v7357_v57, %v2524_v23  ;;  %vm2526_vm13 = vweird.f32 %v8640_v34 }
 0x114   : > { %13996 = vst [vmem:[#allocation5_spill] sm:$0xff] %v8704_v49  ;;  %v8719_v6 = vpop.eup %7360  ;;  %v4925_v21 = vadd.f32 -0.28449672, %v4797_v55  ;;  %vm2528_vm14 = vmor %vm2526_vm13, %vm2527_vm11  ;;  %v2533_v37 = vor.u32 1.1754944e-38, %v2532_v61  ;;  %v5567_v19 = vmul.f32 %v5439_v58, %v8617_v62  ;;  %v8724_v33 = vand.u32 2147483647, %v8694_v44 }
 0x115   : > { %v5308_v30 = vmul.f32 %v5180_v7, %v8582_v18  ;;  %v4798_v34 = vmul.f32 %v4670_v12, %v8671_v38  ;;  %v2529_v27 = vsel %vm2528_vm14, %v7357_v57, %v2525_v16  ;;  %vm2531_vm15 = vcmp.eq.f32.partialorder %v2530_v28, 8.507059e+37 }
 0x116   : > { %v8728_v47 = vsel %vm2531_vm15, %v2533_v37, %v2529_v27  ;;  %v5440_v36 = vsub.f32 0.0, %v8678_v14  ;;  %v2113_v55 = vmul.f32 0.3275911, %v8724_v33  ;;  %v8732_v23 = vperm.slane %v403_v45, 0 }
 0x117   : > { %v8736_v62 = vmul.f32 %v8623_v56, %v5307_v25  ;;  %v8741_v18 = vsel %vm1727_vm12, 1.0, %v13990_v39  ;;  %v4287_v57 = vmul.f32 1.0614054, %v8728_v47  ;;  %v5053_v7 = vmul.f32 %v4925_v21, %v8650_v11  ;;  %v1289_v21 = vpop.f32.mrf.mxu3 }
 0x118   : > { %v7363_v58 = vpop.eup %7362  ;;  %v8747_v28 = vmul.f32 0.5, %v8643_v2  ;;  %v8749_v12 = vadd.f32 1.0, %v2113_v55  ;;  %v6324_v56 = vadd.f32 1.0, %v8477_v4  ;;  %v8753_v25 = vmul.f32 %v8636_v52, %v5308_v30 }
 0x119   : > { %v4926_v13 = vadd.f32 -0.28449672, %v4798_v34  ;;  %v4415_v16 = vadd.f32 -1.4531521, %v4287_v57  ;;  %v2537_v37 = vmul.f32 %v7363_v58, %v8691_v35  ;;  %v8756_v27 = vmul.f32 1.442695, %v5567_v19 }
 0x11a   : > { %13997 = vst [vmem:[#allocation6_spill] sm:$0xff] %v8747_v28  ;;  %v5568_v39 = vmul.f32 %v5440_v36, %v8678_v14  ;;  %7364 = vrcp.f32 %v8749_v12  ;;  %v620_v2 = vadd.f32 %v619_v54, %v8732_v23  ;;  %v2545_v30 = vand.u32 2147483647, %v8691_v35  ;;  %v1080_v14 = vpop.f32.mrf.mxu2 }
 0x11b   : > { %v4543_v4 = vmul.f32 %v4415_v16, %v8728_v47  ;;  %v2538_v52 = vsub.f32 1.0, %v2537_v37  ;;  %v5181_v34 = vadd.f32 0.2548296, %v5053_v7  ;;  %v2547_v55 = vand.u32 2147483648, %v8691_v35 }
 0x11c   : > { %v6452_v19 = vmul.f32 %v6324_v56, %v8235_v10  ;;  %v8768_v57 = vperm.slane %v403_v45, 1  ;;  %v5054_v61 = vmul.f32 %v4926_v13, %v8671_v38  ;;  %vm2542_vm1 = vweird.f32 %v7363_v58 }
 0x11d   : > { %v2539_v54 = vmul.f32 %v7363_v58, %v2538_v52  ;;  %v4671_v28 = vadd.f32 1.4214138, %v4543_v4  ;;  %vm2541_vm2 = vweird.f32 %v8691_v35  ;;  %v8773_v16 = vmul.f32 1.442695, %v5568_v39 }
 0x11e   : > { %v6580_v7 = vmul.f32 %v6452_v19, %v620_v2  ;;  %vm8775_vm3 = vcmp.eq.f32.partialorder %v2545_v30, 8.507059e+37  ;;  %v6325_v10 = vadd.f32 1.0, %v8493_v53  ;;  %v8781_v45 = vadd.f32 %v1080_v14, %v8182_v50  ;;  %vm2543_vm5 = vmor %vm2541_vm2, %vm2542_vm1  ;;  %v622_v30 = vpop.f32.mrf.mxu0 }
 0x11f   : > { %v2540_v37 = vadd.f32 %v7363_v58, %v2539_v54  ;;  %v5309_v13 = vmul.f32 %v5181_v34, %v8650_v11  ;;  %vm1728_vm4 = vcmp.ge.f32.partialorder %v8657_v40, 0.0  ;;  %v2548_v35 = vor.u32 1.1754944e-38, %v2547_v55 }
 0x120   : > { %v7365_v56 = vpop.eup %7364  ;;  %6708 = vst [vmem:[%s8785_s10] sm:$0xff] %v6580_v7  ;;  %v829_v39 = vadd.f32 %v8707_v22, %v8768_v57  ;;  %v8791_v2 = vadd.f32 %v1289_v21, %v8184_v51  ;;  %v5182_v53 = vadd.f32 0.2548296, %v5054_v61  ;;  %v5441_v11 = vsub.f32 0.0, %v8724_v33 }
 0x121   : > { %v2544_v4 = vsel %vm2543_vm5, %v7363_v58, %v2540_v37  ;;  %v2552_v52 = vmul.f32 %v7365_v56, %v8749_v12  ;;  %v4799_v34 = vmul.f32 %v4671_v28, %v8728_v47  ;;  %v2560_v19 = vand.u32 2147483647, %v8749_v12 }
 0x122   : > { %v8798_v55 = vsel %vm8775_vm3, %v2548_v35, %v2544_v4  ;;  %v6453_v22 = vmul.f32 %v6325_v10, %v8241_v15  ;;  %v2562_v58 = vand.u32 2147483648, %v8749_v12  ;;  %v8805_v14 = vmul.f32 0.70710677, %v8781_v45 }
 0x123   : > { %v4288_v21 = vmul.f32 1.0614054, %v8798_v55  ;;  %v2553_v61 = vsub.f32 1.0, %v2552_v52  ;;  %v8808_v28 = vmul.f32 0.70710677, %v8791_v2  ;;  %v623_v49 = vadd.f32 %v622_v30, %v8732_v23  ;;  %v348_v30 = vld [vmem:[%s8042_s9 + $0xc8] sm:$0xff] }
 0x124   : > { %v6581_v54 = vmul.f32 %v6453_v22, %v829_v39  ;;  %v6326_v7 = vadd.f32 1.0, %v8533_v20  ;;  %v5310_v37 = vmul.f32 %v5182_v53, %v8671_v38  ;;  %vm2557_vm6 = vweird.f32 %v7365_v56  ;;  %7147 = vmatmul.msk.f32.gmra.mxu2 %vm409_vm0, %v348_v30  ;;  %7211 = vmatmul.msk.f32.gmra.mxu3 %vm409_vm0, %v348_v30 }
 0x125   : > { %v4416_v15 = vadd.f32 -1.4531521, %v4288_v21  ;;  %v2554_v10 = vmul.f32 %v7365_v56, %v2553_v61  ;;  %v14000_v35 = vsub.f32 1.0, %v8701_v5  ;;  %v4927_v52 = vadd.f32 -0.28449672, %v4799_v34  ;;  %v831_v34 = vpop.f32.mrf.mxu1  ;;  %7019 = vmatmul.msk.f32.gmra.mxu0 %vm409_vm0, %v348_v30  ;;  %7083 = vmatmul.msk.f32.gmra.mxu1 %vm409_vm0, %v348_v30 }
 0x126   : > { %6709 = vst [vmem:[%s8785_s10 + $0x8] sm:$0xff] %v6581_v54  ;;  %v8820_v39 = vand.u32 2147483647, %v8805_v14  ;;  %v6454_v22 = vmul.f32 %v6326_v7, %v8345_v41  ;;  %v5949_v20 = vmul.f32 %v8711_v9, %v5309_v13  ;;  %vm2556_vm7 = vweird.f32 %v8749_v12 }
 0x127   : > { %v8816_v4 = vmul.f32 %v14000_v35, %v8518_v32  ;;  %v2555_v36 = vadd.f32 %v7365_v56, %v2554_v10  ;;  %v2563_v38 = vor.u32 1.1754944e-38, %v2562_v58  ;;  %v4544_v32 = vmul.f32 %v4416_v15, %v8798_v55  ;;  %vm2558_vm8 = vmor %vm2556_vm7, %vm2557_vm6 }
 0x128   : > { %v2114_v5 = vmul.f32 0.3275911, %v8820_v39  ;;  %v8831_v53 = vand.u32 2147483647, %v8808_v28  ;;  %v6582_v41 = vmul.f32 %v6454_v22, %v623_v49  ;;  %v5950_v9 = vmul.f32 %v8719_v6, %v5310_v37  ;;  %v1292_v22 = vpop.f32.mrf.mxu3 }
 0x129   : > { %v2559_v12 = vsel %vm2558_vm8, %v7365_v56, %v2555_v36  ;;  %vm2561_vm9 = vcmp.eq.f32.partialorder %v2560_v19, 8.507059e+37  ;;  %v5569_v13 = vmul.f32 %v5441_v11, %v8724_v33  ;;  %v5055_v21 = vmul.f32 %v4927_v52, %v8728_v47  ;;  %v1083_v52 = vpop.f32.mrf.mxu2 }
 0x12a   : > { %v8838_v61 = vsel %vm2561_vm9, %v2563_v38, %v2559_v12  ;;  %v8840_v58 = vadd.f32 1.0, %v2114_v5  ;;  %v2115_v54 = vmul.f32 0.3275911, %v8831_v53  ;;  %6710 = vst [vmem:[%s8785_s10 + $0x10] sm:$0xff] %v6582_v41  ;;  %v14001_v49 = vsub.f32 1.0, %v8736_v62 }
 0x12b   : > { %7366 = vpow2.f32 %v8756_v27  ;;  %v14002_v6 = vmov -1.0   ;;  %v4289_v36 = vmul.f32 1.0614054, %v8838_v61  ;;  %v4672_v56 = vadd.f32 1.4214138, %v4544_v32 }
 0x12c   : > { %v8847_v7 = vmul.f32 %v14001_v49, %v8529_v43  ;;  %v8853_v33 = vsel %vm1728_vm4, 1.0, %v14002_v6  ;;  %v8857_v11 = vmul.f32 0.5, %v8681_v26  ;;  %vm1729_vm10 = vcmp.ge.f32.partialorder %v8694_v44, 0.0 }
 0x12d   : > { %7368 = vrcp.f32 %v8840_v58  ;;  %v6077_v62 = vsub.f32 1.0, %v5949_v20  ;;  %v6078_v43 = vsub.f32 1.0, %v5950_v9  ;;  %v4417_v19 = vadd.f32 -1.4531521, %v4289_v36 }
 0x12e   : > { %v5710_v37 = vmul.f32 1.442695, %v5569_v13  ;;  %v14003_v27 = vsub.f32 1.0, %v8753_v25  ;;  %v5183_v15 = vadd.f32 0.2548296, %v5055_v21  ;;  %7370 = vpow2.f32 %v8773_v16 }
 0x12f   : > { %v8867_v10 = vadd.f32 1.0, %v2115_v54  ;;  %v8870_v26 = vsel %vm1729_vm10, 1.0, %v14002_v6  ;;  %vm1730_vm11 = vcmp.ge.f32.partialorder %v8805_v14, 0.0  ;;  %v5442_v44 = vsub.f32 0.0, %v8820_v39 }
 0x130   : > { %v8864_v40 = vmul.f32 %v14003_v27, %v8591_v0  ;;  %v6327_v35 = vadd.f32 1.0, %v8536_v46  ;;  %v4800_v25 = vmul.f32 %v4672_v56, %v8798_v55  ;;  %v4545_v0 = vmul.f32 %v4417_v19, %v8838_v61 }
 0x131   : > { %7372 = vrcp.f32 %v8867_v10  ;;  %v832_v16 = vadd.f32 %v831_v34, %v8768_v57  ;;  %v7367_v30 = vpop.eup %7366  ;;  %v8880_v20 = vmul.f32 %v6077_v62, %v8662_v48  ;;  %v8883_v38 = vmul.f32 %v6078_v43, %v8669_v63 }
 0x132   : > { %7374 = vpow2.f32 %v5710_v37  ;;  %v6455_v46 = vmul.f32 %v6327_v35, %v8348_v42  ;;  %v5311_v5 = vmul.f32 %v5183_v15, %v8728_v47  ;;  %v8888_v41 = vmul.f32 0.5, %v8781_v45 }
 0x133   : > { %v7369_v32 = vpop.eup %7368  ;;  %v8891_v9 = vadd.f32 %v1083_v52, %v8182_v50  ;;  %v8894_v34 = vadd.f32 %v1292_v22, %v8184_v51  ;;  %v8899_v48 = vsel %vm1730_vm11, 1.0, %v14002_v6  ;;  %v5570_v63 = vmul.f32 %v5442_v44, %v8820_v39 }
 0x134   : > { %v2567_v42 = vmul.f32 %v7369_v32, %v8840_v58  ;;  %v8904_v47 = vmul.f32 0.5, %v8791_v2  ;;  %v8906_v45 = vpop.eup %7370  ;;  %v4928_v12 = vadd.f32 -0.28449672, %v4800_v25  ;;  %v4673_v13 = vadd.f32 1.4214138, %v4545_v0 }
 0x135   : > { %v6583_v21 = vmul.f32 %v6455_v46, %v832_v16  ;;  %v8909_v54 = vmul.f32 0.70710677, %v8891_v9  ;;  %v2575_v14 = vand.u32 2147483647, %v8840_v58  ;;  %vm1731_vm12 = vcmp.ge.f32.partialorder %v8808_v28, 0.0 }
 0x136   : > { %v2568_v49 = vsub.f32 1.0, %v2567_v42  ;;  %v5443_v36 = vsub.f32 0.0, %v8831_v53  ;;  %v5951_v39 = vmul.f32 %v7367_v30, %v5311_v5  ;;  %v2577_v2 = vand.u32 2147483648, %v8840_v58  ;;  %v349_v42 = vld [vmem:[%s8042_s9 + $0xd0] sm:$0xff] }
 0x137   : > { %v7373_v56 = vpop.eup %7372  ;;  %6711 = vst [vmem:[%s8785_s10 + $0x18] sm:$0xff] %v6583_v21  ;;  %v8917_v62 = vand.u32 2147483647, %v8909_v54  ;;  %v8920_v43 = vmul.f32 0.70710677, %v8894_v34  ;;  %vm2571_vm13 = vweird.f32 %v8840_v58  ;;  %vm2572_vm14 = vweird.f32 %v7369_v32  ;;  %7148 = vmatmul.msk.f32.gmra.mxu2 %vm409_vm0, %v349_v42  ;;  %7212 = vmatmul.msk.f32.gmra.mxu3 %vm409_vm0, %v349_v42 }
 0x138   : > { %v8922_v19 = vpop.eup %7374  ;;  %v2569_v37 = vmul.f32 %v7369_v32, %v2568_v49  ;;  %v2582_v27 = vmul.f32 %v7373_v56, %v8867_v10  ;;  %v5056_v15 = vmul.f32 %v4928_v12, %v8798_v55  ;;  %v4801_v44 = vmul.f32 %v4673_v13, %v8838_v61  ;;  %vm2573_vm1 = vmor %vm2571_vm13, %vm2572_vm14 }
 0x139   : > { %v5712_v35 = vmul.f32 1.442695, %v5570_v63  ;;  %v2116_v52 = vmul.f32 0.3275911, %v8917_v62  ;;  %vm8929_vm15 = vcmp.eq.f32.partialorder %v2575_v14, 8.507059e+37  ;;  %v5571_v16 = vmul.f32 %v5443_v36, %v8831_v53  ;;  %v625_v14 = vpop.f32.mrf.mxu0  ;;  %v834_v36 = vpop.f32.mrf.mxu1  ;;  %7020 = vmatmul.msk.f32.gmra.mxu0 %vm409_vm0, %v349_v42  ;;  %7084 = vmatmul.msk.f32.gmra.mxu1 %vm409_vm0, %v349_v42 }
 0x13a   : > { %v2570_v22 = vadd.f32 %v7369_v32, %v2569_v37  ;;  %v2583_v0 = vsub.f32 1.0, %v2582_v27  ;;  %v2578_v58 = vor.u32 1.1754944e-38, %v2577_v2  ;;  %v2592_v30 = vand.u32 2147483648, %v8867_v10 }
 0x13b   : > { %v8935_v46 = vadd.f32 1.0, %v2116_v52  ;;  %v8938_v5 = vand.u32 2147483647, %v8920_v43  ;;  %vm2587_vm2 = vweird.f32 %v7373_v56  ;;  %v2590_v13 = vand.u32 2147483647, %v8867_v10 }
 0x13c   : > { %v2574_v63 = vsel %vm2573_vm1, %v7369_v32, %v2570_v22  ;;  %v2584_v12 = vmul.f32 %v7373_v56, %v2583_v0  ;;  %v5184_v53 = vadd.f32 0.2548296, %v5056_v15  ;;  %v4929_v21 = vadd.f32 -0.28449672, %v4801_v44 }
 0x13d   : > { %v8946_v49 = vsel %vm8929_vm15, %v2578_v58, %v2574_v63  ;;  %7376 = vrcp.f32 %v8935_v46  ;;  %vm2586_vm3 = vweird.f32 %v8867_v10  ;;  %v5714_v37 = vmul.f32 1.442695, %v5571_v16 }
 0x13e   : > { %v4290_v32 = vmul.f32 1.0614054, %v8946_v49  ;;  %v2585_v2 = vadd.f32 %v7373_v56, %v2584_v12  ;;  %v6079_v27 = vsub.f32 1.0, %v5951_v39  ;;  %v8956_v15 = vsel %vm1731_vm12, 1.0, %v14002_v6  ;;  %vm2588_vm4 = vmor %vm2586_vm3, %vm2587_vm2 }
 0x13f   : > { %v2593_v44 = vor.u32 1.1754944e-38, %v2592_v30  ;;  %v2117_v52 = vmul.f32 0.3275911, %v8938_v5  ;;  %7378 = vpow2.f32 %v5712_v35  ;;  %vm2591_vm5 = vcmp.eq.f32.partialorder %v2590_v13, 8.507059e+37 }
 0x140   : > { %v4418_v22 = vadd.f32 -1.4531521, %v4290_v32  ;;  %v2589_v25 = vsel %vm2588_vm4, %v7373_v56, %v2585_v2  ;;  %v5312_v0 = vmul.f32 %v5184_v53, %v8798_v55  ;;  %v5057_v10 = vmul.f32 %v4929_v21, %v8838_v61  ;;  %v1086_v21 = vpop.f32.mrf.mxu2 }
 0x141   : > { %v8962_v16 = vsel %vm2591_vm5, %v2593_v44, %v2589_v25  ;;  %v8964_v39 = vadd.f32 1.0, %v2117_v52  ;;  %7380 = vpow2.f32 %v5714_v37  ;;  %v6328_v30 = vadd.f32 1.0, %v8596_v1 }
 0x142   : > { %v4546_v28 = vmul.f32 %v4418_v22, %v8946_v49  ;;  %v4291_v58 = vmul.f32 1.0614054, %v8962_v16  ;;  %v8970_v35 = vmul.f32 %v6079_v27, %v8741_v18  ;;  %v8973_v56 = vmul.f32 0.5, %v8891_v9 }
 0x143   : > { %v7377_v42 = vpop.eup %7376  ;;  %7382 = vrcp.f32 %v8964_v39  ;;  %v626_v55 = vadd.f32 %v625_v14, %v8732_v23  ;;  %v5444_v53 = vsub.f32 0.0, %v8917_v62  ;;  %v8980_v1 = vmul.f32 %v8906_v45, %v5312_v0 }
 0x144   : > { %v4674_v63 = vadd.f32 1.4214138, %v4546_v28  ;;  %v4419_v12 = vadd.f32 -1.4531521, %v4291_v58  ;;  %v2597_v13 = vmul.f32 %v7377_v42, %v8935_v46  ;;  %v5185_v32 = vadd.f32 0.2548296, %v5057_v10 }
 0x145   : > { %v8983_v18 = vmul.f32 0.5, %v8894_v34  ;;  %v6456_v9 = vmul.f32 %v6328_v30, %v8393_v31  ;;  %v8986_v2 = vpop.eup %7378  ;;  %v2605_v27 = vand.u32 2147483647, %v8935_v46  ;;  %v2607_v44 = vand.u32 2147483648, %v8935_v46 }
 0x146   : > { %v4547_v14 = vmul.f32 %v4419_v12, %v8962_v16  ;;  %v2598_v37 = vsub.f32 1.0, %v2597_v13  ;;  %v835_v45 = vadd.f32 %v834_v36, %v8768_v57  ;;  %v6329_v22 = vadd.f32 1.0, %v8674_v60  ;;  %v1295_v12 = vpop.f32.mrf.mxu3 }
 0x147   : > { %v6584_v52 = vmul.f32 %v6456_v9, %v626_v55  ;;  %v8994_v34 = vadd.f32 %v1086_v21, %v8182_v50  ;;  %v8996_v25 = vpop.eup %7380  ;;  %v4802_v31 = vmul.f32 %v4674_v63, %v8946_v49  ;;  %vm1732_vm6 = vcmp.ge.f32.partialorder %v8909_v54, 0.0 }
 0x148   : > { %v2599_v0 = vmul.f32 %v7377_v42, %v2598_v37  ;;  %vm2602_vm7 = vweird.f32 %v7377_v42  ;;  %v5572_v10 = vmul.f32 %v5444_v53, %v8917_v62  ;;  %v5313_v58 = vmul.f32 %v5185_v32, %v8838_v61 }
 0x149   : > { %v7383_v28 = vpop.eup %7382  ;;  %v4675_v30 = vadd.f32 1.4214138, %v4547_v14  ;;  %6712 = vst [vmem:[%s8785_s10 + $0x20] sm:$0xff] %v6584_v52  ;;  %v6457_v60 = vmul.f32 %v6329_v22, %v8451_v17  ;;  %v9005_v36 = vmul.f32 0.70710677, %v8994_v34  ;;  %vm2601_vm8 = vweird.f32 %v8935_v46 }
 0x14a   : > { %v2600_v55 = vadd.f32 %v7377_v42, %v2599_v0  ;;  %vm2606_vm9 = vcmp.eq.f32.partialorder %v2605_v27, 8.507059e+37  ;;  %v2612_v63 = vmul.f32 %v7383_v28, %v8964_v39  ;;  %vm2603_vm10 = vmor %vm2601_vm8, %vm2602_vm7  ;;  %v2608_v62 = vor.u32 1.1754944e-38, %v2607_v44 }
 0x14b   : > { %v5445_v13 = vsub.f32 0.0, %v8938_v5  ;;  %v6585_v61 = vmul.f32 %v6457_v60, %v835_v45  ;;  %v9011_v53 = vand.u32 2147483647, %v9005_v36  ;;  %v4930_v17 = vadd.f32 -0.28449672, %v4802_v31 }
 0x14c   : > { %v2604_v21 = vsel %vm2603_vm10, %v7377_v42, %v2600_v55  ;;  %v2613_v32 = vsub.f32 1.0, %v2612_v63  ;;  %v2622_v9 = vand.u32 2147483648, %v8964_v39  ;;  %v4803_v46 = vmul.f32 %v4675_v30, %v8962_v16  ;;  %v350_v30 = vld [vmem:[%s8042_s9 + $0xd8] sm:$0xff] }
 0x14d   : > { %v9015_v14 = vsel %vm2606_vm9, %v2608_v62, %v2604_v21  ;;  %6713 = vst [vmem:[%s8785_s10 + $0x28] sm:$0xff] %v6585_v61  ;;  %v2118_v37 = vmul.f32 0.3275911, %v9011_v53  ;;  %v9020_v27 = vadd.f32 %v1295_v12, %v8184_v51  ;;  %vm2617_vm11 = vweird.f32 %v7383_v28  ;;  %7149 = vmatmul.msk.f32.gmra.mxu2 %vm409_vm0, %v350_v30  ;;  %7213 = vmatmul.msk.f32.gmra.mxu3 %vm409_vm0, %v350_v30 }
 0x14e   : > { %v4292_v44 = vmul.f32 1.0614054, %v9015_v14  ;;  %v2614_v52 = vmul.f32 %v7383_v28, %v2613_v32  ;;  %v2620_v42 = vand.u32 2147483647, %v8964_v39  ;;  %v6080_v45 = vsub.f32 1.0, %v8980_v1  ;;  %v837_v1 = vpop.f32.mrf.mxu1  ;;  %7085 = vmatmul.msk.f32.gmra.mxu1 %vm409_vm0, %v350_v30 }
 0x14f   : > { %v5953_v22 = vmul.f32 %v8922_v19, %v5313_v58  ;;  %v5573_v31 = vmul.f32 %v5445_v13, %v8938_v5  ;;  %v9027_v0 = vadd.f32 1.0, %v2118_v37  ;;  %vm2616_vm12 = vweird.f32 %v8964_v39  ;;  %v628_v5 = vpop.f32.mrf.mxu0  ;;  %7021 = vmatmul.msk.f32.gmra.mxu0 %vm409_vm0, %v350_v30 }
 0x150   : > { %v4420_v60 = vadd.f32 -1.4531521, %v4292_v44  ;;  %v2615_v55 = vadd.f32 %v7383_v28, %v2614_v52  ;;  %v2623_v63 = vor.u32 1.1754944e-38, %v2622_v9  ;;  %v5058_v12 = vmul.f32 %v4930_v17, %v8946_v49  ;;  %vm2618_vm13 = vmor %vm2616_vm12, %vm2617_vm11 }
 0x151   : > { %v4931_v62 = vadd.f32 -0.28449672, %v4803_v46  ;;  %7384 = vrcp.f32 %v9027_v0  ;;  %v9037_v19 = vmul.f32 0.70710677, %v9020_v27  ;;  %v5716_v58 = vmul.f32 1.442695, %v5572_v10 }
 0x152   : > { %v4548_v39 = vmul.f32 %v4420_v60, %v9015_v14  ;;  %v2619_v13 = vsel %vm2618_vm13, %v7383_v28, %v2615_v55  ;;  %vm2621_vm14 = vcmp.eq.f32.partialorder %v2620_v42, 8.507059e+37  ;;  %v6081_v61 = vsub.f32 1.0, %v5953_v22 }
 0x153   : > { %v9045_v17 = vsel %vm1732_vm6, 1.0, %v14002_v6  ;;  %vm1733_vm15 = vcmp.ge.f32.partialorder %v8920_v43, 0.0  ;;  %v9048_v21 = vsel %vm2621_vm14, %v2623_v63, %v2619_v13  ;;  %v5718_v46 = vmul.f32 1.442695, %v5573_v31  ;;  %v1089_v13 = vpop.f32.mrf.mxu2 }
 0x154   : > { %v4676_v32 = vadd.f32 1.4214138, %v4548_v39  ;;  %v4293_v9 = vmul.f32 1.0614054, %v9048_v21  ;;  %v629_v37 = vadd.f32 %v628_v5, %v8732_v23  ;;  %v5186_v44 = vadd.f32 0.2548296, %v5058_v12 }
 0x155   : > { %v5059_v10 = vmul.f32 %v4931_v62, %v8962_v16  ;;  %v9054_v28 = vand.u32 2147483647, %v9037_v19  ;;  %v6330_v54 = vadd.f32 1.0, %v8816_v4  ;;  %v9058_v52 = vmul.f32 %v6080_v45, %v8853_v33 }
 0x156   : > { %v4804_v43 = vmul.f32 %v4676_v32, %v9015_v14  ;;  %7386 = vpow2.f32 %v5716_v58  ;;  %v9062_v42 = vsel %vm1733_vm15, 1.0, %v14002_v6  ;;  %v9065_v31 = vmul.f32 %v6081_v61, %v8870_v26 }
 0x157   : > { %v7385_v22 = vpop.eup %7384  ;;  %v5446_v30 = vsub.f32 0.0, %v9011_v53  ;;  %v2119_v60 = vmul.f32 0.3275911, %v9054_v28  ;;  %v6458_v55 = vmul.f32 %v6330_v54, %v8480_v29  ;;  %v4421_v4 = vadd.f32 -1.4531521, %v4293_v9 }
 0x158   : > { %7388 = vpow2.f32 %v5718_v46  ;;  %v9071_v33 = vmul.f32 0.5, %v8994_v34  ;;  %v2627_v45 = vmul.f32 %v7385_v22, %v9027_v0  ;;  %v5314_v63 = vmul.f32 %v5186_v44, %v8946_v49 }
 0x159   : > { %v5187_v12 = vadd.f32 0.2548296, %v5059_v10  ;;  %v9075_v62 = vadd.f32 1.0, %v2119_v60  ;;  %v6586_v26 = vmul.f32 %v6458_v55, %v629_v37  ;;  %v4932_v5 = vadd.f32 -0.28449672, %v4804_v43 }
 0x15a   : > { %v2628_v39 = vsub.f32 1.0, %v2627_v45  ;;  %v2637_v58 = vand.u32 2147483648, %v9027_v0  ;;  %v6331_v29 = vadd.f32 1.0, %v8847_v7  ;;  %vm1734_vm1 = vcmp.ge.f32.partialorder %v9005_v36, 0.0 }
 0x15b   : > { %v5574_v34 = vmul.f32 %v5446_v30, %v9011_v53  ;;  %7390 = vrcp.f32 %v9075_v62  ;;  %6714 = vst [vmem:[%s8785_s10 + $0x30] sm:$0xff] %v6586_v26  ;;  %v838_v49 = vadd.f32 %v837_v1, %v8768_v57  ;;  %v4549_v32 = vmul.f32 %v4421_v4, %v9048_v21  ;;  %v1298_v30 = vpop.f32.mrf.mxu3 }
 0x15c   : > { %v9084_v61 = vpop.eup %7386  ;;  %v2629_v9 = vmul.f32 %v7385_v22, %v2628_v39  ;;  %vm2632_vm2 = vweird.f32 %v7385_v22  ;;  %v2635_v46 = vand.u32 2147483647, %v9027_v0  ;;  %v5954_v7 = vmul.f32 %v8986_v2, %v5314_v63 }
 0x15d   : > { %v5315_v37 = vmul.f32 %v5187_v12, %v8962_v16  ;;  %v6459_v44 = vmul.f32 %v6331_v29, %v8521_v24  ;;  %v9092_v53 = vadd.f32 %v1089_v13, %v8182_v50  ;;  %v5060_v1 = vmul.f32 %v4932_v5, %v9015_v14 }
 0x15e   : > { %v9094_v10 = vpop.eup %7388  ;;  %v2630_v54 = vadd.f32 %v7385_v22, %v2629_v9  ;;  %vm2631_vm3 = vweird.f32 %v9027_v0  ;;  %v2638_v43 = vor.u32 1.1754944e-38, %v2637_v58  ;;  %v5720_v60 = vmul.f32 1.442695, %v5574_v34 }
 0x15f   : > { %vm2633_vm4 = vmor %vm2631_vm3, %vm2632_vm2  ;;  %v5447_v2 = vsub.f32 0.0, %v9054_v28  ;;  %v6587_v16 = vmul.f32 %v6459_v44, %v838_v49  ;;  %v9100_v24 = vmul.f32 0.70710677, %v9092_v53  ;;  %v4677_v55 = vadd.f32 1.4214138, %v4549_v32  ;;  %v351_v44 = vld [vmem:[%s8042_s9 + $0xe0] sm:$0xff] }
 0x160   : > { %v9105_v4 = vsel %vm1734_vm1, 1.0, %v14002_v6  ;;  %v2634_v45 = vsel %vm2633_vm4, %v7385_v22, %v2630_v54  ;;  %vm2636_vm5 = vcmp.eq.f32.partialorder %v2635_v46, 8.507059e+37  ;;  %v5955_v0 = vmul.f32 %v8996_v25, %v5315_v37  ;;  %7150 = vmatmul.msk.f32.gmra.mxu2 %vm409_vm0, %v351_v44  ;;  %7214 = vmatmul.msk.f32.gmra.mxu3 %vm409_vm0, %v351_v44 }
 0x161   : > { %v7391_v63 = vpop.eup %7390  ;;  %v9108_v12 = vsel %vm2636_vm5, %v2638_v43, %v2634_v45  ;;  %6715 = vst [vmem:[%s8785_s10 + $0x38] sm:$0xff] %v6587_v16  ;;  %v9112_v26 = vand.u32 2147483647, %v9100_v24  ;;  %v9115_v5 = vadd.f32 %v1298_v30, %v8184_v51  ;;  %v6082_v39 = vsub.f32 1.0, %v5954_v7  ;;  %v840_v45 = vpop.f32.mrf.mxu1  ;;  %7086 = vmatmul.msk.f32.gmra.mxu1 %vm409_vm0, %v351_v44 }
 0x162   : > { %v5188_v58 = vadd.f32 0.2548296, %v5060_v1  ;;  %v4294_v36 = vmul.f32 1.0614054, %v9108_v12  ;;  %v2642_v22 = vmul.f32 %v7391_v63, %v9075_v62  ;;  %7392 = vpow2.f32 %v5720_v60 }
 0x163   : > { %vm1735_vm6 = vcmp.ge.f32.partialorder %v9037_v19, 0.0  ;;  %v5575_v25 = vmul.f32 %v5447_v2, %v9054_v28  ;;  %v2120_v29 = vmul.f32 0.3275911, %v9112_v26  ;;  %v4805_v13 = vmul.f32 %v4677_v55, %v9048_v21  ;;  %v631_v2 = vpop.f32.mrf.mxu0  ;;  %7022 = vmatmul.msk.f32.gmra.mxu0 %vm409_vm0, %v351_v44 }
 0x164   : > { %v4422_v34 = vadd.f32 -1.4531521, %v4294_v36  ;;  %v2643_v49 = vsub.f32 1.0, %v2642_v22  ;;  %v2650_v32 = vand.u32 2147483647, %v9075_v62  ;;  %v6083_v9 = vsub.f32 1.0, %v5955_v0 }
 0x165   : > { %v2652_v46 = vand.u32 2147483648, %v9075_v62  ;;  %v9125_v7 = vadd.f32 1.0, %v2120_v29  ;;  %v9128_v37 = vmul.f32 0.70710677, %v9115_v5  ;;  %v5316_v1 = vmul.f32 %v5188_v58, %v9015_v14 }
 0x166   : > { %v4550_v28 = vmul.f32 %v4422_v34, %v9108_v12  ;;  %v2644_v54 = vmul.f32 %v7391_v63, %v2643_v49  ;;  %vm2647_vm7 = vweird.f32 %v7391_v63  ;;  %v9135_v43 = vmul.f32 %v6082_v39, %v8899_v48  ;;  %v1092_v49 = vpop.f32.mrf.mxu2 }
 0x167   : > { %v9138_v30 = vmul.f32 0.5, %v9020_v27  ;;  %v5722_v60 = vmul.f32 1.442695, %v5575_v25  ;;  %7394 = vrcp.f32 %v9125_v7  ;;  %v4933_v14 = vadd.f32 -0.28449672, %v4805_v13 }
 0x168   : > { %v4678_v16 = vadd.f32 1.4214138, %v4550_v28  ;;  %v2645_v55 = vadd.f32 %v7391_v63, %v2644_v54  ;;  %vm2646_vm8 = vweird.f32 %v9075_v62  ;;  %v9145_v48 = vpop.eup %7392  ;;  %v9150_v27 = vsel %vm1735_vm6, 1.0, %v14002_v6 }
 0x169   : > { %vm2648_vm9 = vmor %vm2646_vm8, %vm2647_vm7  ;;  %v2653_v0 = vor.u32 1.1754944e-38, %v2652_v46  ;;  %v9154_v39 = vand.u32 2147483647, %v9128_v37  ;;  %v6332_v58 = vadd.f32 1.0, %v8864_v40  ;;  %v9158_v62 = vmul.f32 %v6083_v9, %v8956_v15 }
 0x16a   : > { %v5956_v36 = vmul.f32 %v9084_v61, %v5316_v1  ;;  %v2649_v22 = vsel %vm2648_vm9, %v7391_v63, %v2645_v55  ;;  %vm2651_vm10 = vcmp.eq.f32.partialorder %v2650_v32, 8.507059e+37  ;;  %v4806_v25 = vmul.f32 %v4678_v16, %v9108_v12 }
 0x16b   : > { %v9162_v19 = vsel %vm2651_vm10, %v2653_v0, %v2649_v22  ;;  %7396 = vpow2.f32 %v5722_v60  ;;  %v2121_v29 = vmul.f32 0.3275911, %v9154_v39  ;;  %v5061_v13 = vmul.f32 %v4933_v14, %v9048_v21 }
 0x16c   : > { %v4295_v34 = vmul.f32 1.0614054, %v9162_v19  ;;  %v9168_v40 = vmul.f32 0.5, %v9092_v53  ;;  %v632_v15 = vadd.f32 %v631_v2, %v8732_v23  ;;  %vm1736_vm11 = vcmp.ge.f32.partialorder %v9100_v24, 0.0  ;;  %v1301_v53 = vpop.f32.mrf.mxu3 }
 0x16d   : > { %v7395_v61 = vpop.eup %7394  ;;  %v9172_v63 = vadd.f32 1.0, %v2121_v29  ;;  %v6460_v32 = vmul.f32 %v6332_v58, %v8579_v59  ;;  %v6333_v9 = vadd.f32 1.0, %v8880_v20  ;;  %v6084_v46 = vsub.f32 1.0, %v5956_v36 }
 0x16e   : > { %v4423_v44 = vadd.f32 -1.4531521, %v4295_v34  ;;  %v2657_v1 = vmul.f32 %v7395_v61, %v9125_v7  ;;  %v9178_v28 = vmul.f32 0.5, %v9115_v5  ;;  %v4934_v54 = vadd.f32 -0.28449672, %v4806_v25 }
 0x16f   : > { %7398 = vrcp.f32 %v9172_v63  ;;  %v841_v60 = vadd.f32 %v840_v45, %v8768_v57  ;;  %v9183_v24 = vadd.f32 %v1092_v49, %v8182_v50  ;;  %v5189_v59 = vadd.f32 0.2548296, %v5061_v13 }
 0x170   : > { %v4551_v20 = vmul.f32 %v4423_v44, %v9162_v19  ;;  %v9187_v2 = vsel %vm1736_vm11, 1.0, %v14002_v6  ;;  %v2658_v14 = vsub.f32 1.0, %v2657_v1  ;;  %v2667_v5 = vand.u32 2147483648, %v9125_v7 }
 0x171   : > { %v9189_v16 = vpop.eup %7396  ;;  %v6588_v55 = vmul.f32 %v6460_v32, %v632_v15  ;;  %v6461_v0 = vmul.f32 %v6333_v9, %v8601_v8  ;;  %v9194_v45 = vadd.f32 %v1301_v53, %v8184_v51  ;;  %vm2662_vm12 = vweird.f32 %v7395_v61 }
 0x172   : > { %v4679_v58 = vadd.f32 1.4214138, %v4551_v20  ;;  %v2659_v36 = vmul.f32 %v7395_v61, %v2658_v14  ;;  %v2665_v22 = vand.u32 2147483647, %v9125_v7  ;;  %v5062_v25 = vmul.f32 %v4934_v54, %v9108_v12 }
 0x173   : > { %v5448_v29 = vsub.f32 0.0, %v9112_v26  ;;  %6716 = vst [vmem:[%s8785_s10 + $0x40] sm:$0xff] %v6588_v55  ;;  %v6589_v13 = vmul.f32 %v6461_v0, %v841_v60  ;;  %v9201_v34 = vmul.f32 0.70710677, %v9183_v24  ;;  %v5317_v8 = vmul.f32 %v5189_v59, %v9048_v21 }
 0x174   : > { %v2660_v15 = vadd.f32 %v7395_v61, %v2659_v36  ;;  %vm2661_vm13 = vweird.f32 %v9125_v7  ;;  %v5449_v49 = vsub.f32 0.0, %v9154_v39  ;;  %v4807_v9 = vmul.f32 %v4679_v58, %v9162_v19 }
 0x175   : > { %v7399_v32 = vpop.eup %7398  ;;  %vm2663_vm14 = vmor %vm2661_vm13, %vm2662_vm12  ;;  %v2668_v44 = vor.u32 1.1754944e-38, %v2667_v5  ;;  %6717 = vst [vmem:[%s8785_s10 + $0x48] sm:$0xff] %v6589_v13  ;;  %v9209_v1 = vand.u32 2147483647, %v9201_v34  ;;  %v9212_v53 = vmul.f32 0.70710677, %v9194_v45  ;;  %v9215_v21 = vmul.f32 %v6084_v46, %v9045_v17 }
 0x176   : > { %v2664_v54 = vsel %vm2663_vm14, %v7395_v61, %v2660_v15  ;;  %vm2666_vm15 = vcmp.eq.f32.partialorder %v2665_v22, 8.507059e+37  ;;  %v2672_v7 = vmul.f32 %v7399_v32, %v9172_v63  ;;  %v5190_v60 = vadd.f32 0.2548296, %v5062_v25  ;;  %v352_v5 = vld [vmem:[%s8042_s9 + $0xe8] sm:$0xff]  ;;  %v634_v22 = vpop.f32.mrf.mxu0  ;;  %v843_v25 = vpop.f32.mrf.mxu1 }
 0x177   : > { %v9218_v59 = vsel %vm2666_vm15, %v2668_v44, %v2664_v54  ;;  %v5576_v20 = vmul.f32 %v5448_v29, %v9112_v26  ;;  %v2122_v14 = vmul.f32 0.3275911, %v9209_v1  ;;  %v5957_v55 = vmul.f32 %v9094_v10, %v5317_v8  ;;  %7151 = vmatmul.msk.f32.gmra.mxu2 %vm409_vm0, %v352_v5  ;;  %7215 = vmatmul.msk.f32.gmra.mxu3 %vm409_vm0, %v352_v5 }
 0x178   : > { %v4296_v0 = vmul.f32 1.0614054, %v9218_v59  ;;  %v2673_v58 = vsub.f32 1.0, %v2672_v7  ;;  %v5577_v17 = vmul.f32 %v5449_v49, %v9154_v39  ;;  %v4935_v61 = vadd.f32 -0.28449672, %v4807_v9  ;;  %7023 = vmatmul.msk.f32.gmra.mxu0 %vm409_vm0, %v352_v5  ;;  %7087 = vmatmul.msk.f32.gmra.mxu1 %vm409_vm0, %v352_v5 }
 0x179   : > { %v2682_v46 = vand.u32 2147483648, %v9172_v63  ;;  %v9229_v36 = vadd.f32 1.0, %v2122_v14  ;;  %v9232_v26 = vand.u32 2147483647, %v9212_v53  ;;  %vm2677_vm1 = vweird.f32 %v7399_v32 }
 0x17a   : > { %v4424_v10 = vadd.f32 -1.4531521, %v4296_v0  ;;  %v2674_v39 = vmul.f32 %v7399_v32, %v2673_v58  ;;  %v2680_v29 = vand.u32 2147483647, %v9172_v63  ;;  %v5318_v13 = vmul.f32 %v5190_v60, %v9108_v12 }
 0x17b   : > { %v5724_v8 = vmul.f32 1.442695, %v5576_v20  ;;  %vm2676_vm2 = vweird.f32 %v9172_v63  ;;  %7400 = vrcp.f32 %v9229_v36  ;;  %v5726_v9 = vmul.f32 1.442695, %v5577_v17 }
 0x17c   : > { %v4552_v15 = vmul.f32 %v4424_v10, %v9218_v59  ;;  %v2675_v49 = vadd.f32 %v7399_v32, %v2674_v39  ;;  %v6334_v44 = vadd.f32 1.0, %v8883_v38  ;;  %v6085_v54 = vsub.f32 1.0, %v5957_v55  ;;  %vm2678_vm3 = vmor %vm2676_vm2, %vm2677_vm1  ;;  %v1095_v39 = vpop.f32.mrf.mxu2 }
 0x17d   : > { %v5063_v7 = vmul.f32 %v4935_v61, %v9162_v19  ;;  %v2683_v14 = vor.u32 1.1754944e-38, %v2682_v46  ;;  %v2123_v5 = vmul.f32 0.3275911, %v9232_v26  ;;  %vm1737_vm4 = vcmp.ge.f32.partialorder %v9128_v37, 0.0 }
 0x17e   : > { %v4680_v0 = vadd.f32 1.4214138, %v4552_v15  ;;  %v2679_v12 = vsel %vm2678_vm3, %v7399_v32, %v2675_v49  ;;  %vm2681_vm5 = vcmp.eq.f32.partialorder %v2680_v29, 8.507059e+37  ;;  %v9246_v63 = vmul.f32 %v9145_v48, %v5318_v13 }
 0x17f   : > { %7402 = vpow2.f32 %v5724_v8  ;;  %v9248_v60 = vsel %vm2681_vm5, %v2683_v14, %v2679_v12  ;;  %v9250_v20 = vadd.f32 1.0, %v2123_v5  ;;  %v635_v55 = vadd.f32 %v634_v22, %v8732_v23 }
 0x180   : > { %v4297_v38 = vmul.f32 1.0614054, %v9248_v60  ;;  %7404 = vpow2.f32 %v5726_v9  ;;  %v6462_v58 = vmul.f32 %v6334_v44, %v8605_v3  ;;  %v9256_v37 = vmul.f32 %v6085_v54, %v9062_v42 }
 0x181   : > { %v7401_v17 = vpop.eup %7400  ;;  %v5191_v32 = vadd.f32 0.2548296, %v5063_v7  ;;  %v9259_v48 = vsel %vm1737_vm4, 1.0, %v14002_v6  ;;  %7406 = vrcp.f32 %v9250_v20  ;;  %v4808_v61 = vmul.f32 %v4680_v0, %v9218_v59 }
 0x182   : > { %v4425_v46 = vadd.f32 -1.4531521, %v4297_v38  ;;  %v9264_v10 = vmul.f32 0.5, %v9183_v24  ;;  %v2687_v22 = vmul.f32 %v7401_v17, %v9229_v36  ;;  %v6086_v3 = vsub.f32 1.0, %v9246_v63 }
 0x183   : > { %v2695_v42 = vand.u32 2147483647, %v9229_v36  ;;  %v5450_v29 = vsub.f32 0.0, %v9209_v1  ;;  %v9271_v13 = vmul.f32 0.5, %v9194_v45  ;;  %v2697_v49 = vand.u32 2147483648, %v9229_v36 }
 0x184   : > { %v4553_v8 = vmul.f32 %v4425_v46, %v9248_v60  ;;  %v2688_v15 = vsub.f32 1.0, %v2687_v22  ;;  %v6590_v24 = vmul.f32 %v6462_v58, %v635_v55  ;;  %v5319_v44 = vmul.f32 %v5191_v32, %v9162_v19  ;;  %v1304_v46 = vpop.f32.mrf.mxu3 }
 0x185   : > { %v9275_v9 = vpop.eup %7402  ;;  %vm1738_vm6 = vcmp.ge.f32.partialorder %v9201_v34, 0.0  ;;  %v844_v54 = vadd.f32 %v843_v25, %v8768_v57  ;;  %v6335_v7 = vadd.f32 1.0, %v8970_v35  ;;  %v9282_v45 = vadd.f32 %v1095_v39, %v8182_v50  ;;  %v14006_v25 = vld [vmem:[#allocation5_spill] sm:$0xff] }
 0x186   : > { %v9284_v14 = vpop.eup %7404  ;;  %v4936_v5 = vadd.f32 -0.28449672, %v4808_v61  ;;  %v2689_v0 = vmul.f32 %v7401_v17, %v2688_v15  ;;  %vm2691_vm7 = vweird.f32 %v9229_v36  ;;  %vm2692_vm8 = vweird.f32 %v7401_v17  ;;  %6718 = vst [vmem:[%s8785_s10 + $0x50] sm:$0xff] %v6590_v24 }
 0x187   : > { %vm1739_vm9 = vcmp.ge.f32.partialorder %v9212_v53, 0.0  ;;  %v7407_v19 = vpop.eup %7406  ;;  %v4681_v12 = vadd.f32 1.4214138, %v4553_v8  ;;  %v5578_v38 = vmul.f32 %v5450_v29, %v9209_v1  ;;  %v6463_v55 = vmul.f32 %v6335_v7, %v14006_v25  ;;  %vm2693_vm11 = vmor %vm2691_vm7, %vm2692_vm8 }
 0x188   : > { %v9292_v35 = vmul.f32 0.70710677, %v9282_v45  ;;  %v2690_v58 = vadd.f32 %v7401_v17, %v2689_v0  ;;  %vm2696_vm10 = vcmp.eq.f32.partialorder %v2695_v42, 8.507059e+37  ;;  %v2698_v32 = vor.u32 1.1754944e-38, %v2697_v49 }
 0x189   : > { %v2702_v61 = vmul.f32 %v7407_v19, %v9250_v20  ;;  %v5959_v22 = vmul.f32 %v9189_v16, %v5319_v44  ;;  %v5451_v1 = vsub.f32 0.0, %v9232_v26  ;;  %v6591_v39 = vmul.f32 %v6463_v55, %v844_v54  ;;  %v353_v44 = vld [vmem:[%s8042_s9 + $0xf0] sm:$0xff] }
 0x18a   : > { %v9300_v29 = vand.u32 2147483647, %v9292_v35  ;;  %v5064_v8 = vmul.f32 %v4936_v5, %v9218_v59  ;;  %v2694_v15 = vsel %vm2693_vm11, %v7401_v17, %v2690_v58  ;;  %v2712_v49 = vand.u32 2147483648, %v9250_v20  ;;  %7152 = vmatmul.msk.f32.gmra.mxu2 %vm409_vm0, %v353_v44  ;;  %7216 = vmatmul.msk.f32.gmra.mxu3 %vm409_vm0, %v353_v44  ;;  %v637_v58 = vpop.f32.mrf.mxu0 }
 0x18b   : > { %v2703_v42 = vsub.f32 1.0, %v2702_v61  ;;  %v4809_v24 = vmul.f32 %v4681_v12, %v9248_v60  ;;  %v9305_v7 = vsel %vm2696_vm10, %v2698_v32, %v2694_v15  ;;  %6719 = vst [vmem:[%s8785_s10 + $0x58] sm:$0xff] %v6591_v39  ;;  %v9310_v36 = vadd.f32 %v1304_v46, %v8184_v51  ;;  %v846_v32 = vpop.f32.mrf.mxu1  ;;  %7024 = vmatmul.msk.f32.gmra.mxu0 %vm409_vm0, %v353_v44 }
 0x18c   : > { %v2124_v16 = vmul.f32 0.3275911, %v9300_v29  ;;  %v4298_v54 = vmul.f32 1.0614054, %v9305_v7  ;;  %vm2707_vm12 = vweird.f32 %v7407_v19  ;;  %v2710_v17 = vand.u32 2147483647, %v9250_v20  ;;  %7088 = vmatmul.msk.f32.gmra.mxu1 %vm409_vm0, %v353_v44 }
 0x18d   : > { %v2704_v0 = vmul.f32 %v7407_v19, %v2703_v42  ;;  %v6087_v5 = vsub.f32 1.0, %v5959_v22  ;;  %v5728_v12 = vmul.f32 1.442695, %v5578_v38  ;;  %v5579_v25 = vmul.f32 %v5451_v1, %v9232_v26 }
 0x18e   : > { %v9318_v55 = vadd.f32 1.0, %v2124_v16  ;;  %v5192_v61 = vadd.f32 0.2548296, %v5064_v8  ;;  %v4426_v46 = vadd.f32 -1.4531521, %v4298_v54  ;;  %vm2706_vm13 = vweird.f32 %v9250_v20 }
 0x18f   : > { %v2705_v39 = vadd.f32 %v7407_v19, %v2704_v0  ;;  %v4937_v15 = vadd.f32 -0.28449672, %v4809_v24  ;;  %vm2708_vm14 = vmor %vm2706_vm13, %vm2707_vm12  ;;  %v2713_v22 = vor.u32 1.1754944e-38, %v2712_v49  ;;  %v9326_v26 = vmul.f32 0.70710677, %v9310_v36 }
 0x190   : > { %7408 = vrcp.f32 %v9318_v55  ;;  %v9331_v38 = vsel %vm1738_vm6, 1.0, %v14002_v6  ;;  %v4554_v1 = vmul.f32 %v4426_v46, %v9305_v7  ;;  %vm2711_vm15 = vcmp.eq.f32.partialorder %v2710_v17, 8.507059e+37  ;;  %v1098_v46 = vpop.f32.mrf.mxu2 }
 0x191   : > { %v2709_v8 = vsel %vm2708_vm14, %v7407_v19, %v2705_v39  ;;  %v9337_v20 = vmul.f32 %v6086_v3, %v9105_v4  ;;  %v9342_v42 = vsel %vm1739_vm9, 1.0, %v14002_v6  ;;  %v5730_v24 = vmul.f32 1.442695, %v5579_v25 }
 0x192   : > { %v9344_v49 = vsel %vm2711_vm15, %v2713_v22, %v2709_v8  ;;  %v9347_v34 = vmul.f32 %v6087_v5, %v9150_v27  ;;  %v5320_v16 = vmul.f32 %v5192_v61, %v9218_v59  ;;  %7410 = vpow2.f32 %v5728_v12  ;;  %v14007_v12 = vld [vmem:[#allocation6_spill] sm:$0xff] }
 0x193   : > { %v4299_v19 = vmul.f32 1.0614054, %v9344_v49  ;;  %v5065_v63 = vmul.f32 %v4937_v15, %v9248_v60  ;;  %v9353_v4 = vand.u32 2147483647, %v9326_v26  ;;  %v638_v53 = vadd.f32 %v637_v58, %v8732_v23 }
 0x194   : > { %v6336_v3 = vadd.f32 1.0, %v9058_v52  ;;  %v4682_v44 = vadd.f32 1.4214138, %v4554_v1  ;;  %v5452_v0 = vsub.f32 0.0, %v9300_v29  ;;  %v6337_v27 = vadd.f32 1.0, %v9065_v31 }
 0x195   : > { %v4427_v54 = vadd.f32 -1.4531521, %v4299_v19  ;;  %7412 = vpow2.f32 %v5730_v24  ;;  %v9360_v59 = vmul.f32 0.5, %v9282_v45  ;;  %v2125_v5 = vmul.f32 0.3275911, %v9353_v4 }
 0x196   : > { %v7409_v17 = vpop.eup %7408  ;;  %v6464_v25 = vmul.f32 %v6336_v3, %v14007_v12  ;;  %v5960_v61 = vmul.f32 %v9275_v9, %v5320_v16  ;;  %vm1740_vm1 = vcmp.ge.f32.partialorder %v9292_v35, 0.0  ;;  %v5193_v31 = vadd.f32 0.2548296, %v5065_v63 }
 0x197   : > { %v4555_v58 = vmul.f32 %v4427_v54, %v9344_v49  ;;  %v2717_v52 = vmul.f32 %v7409_v17, %v9318_v55  ;;  %v9368_v39 = vadd.f32 1.0, %v2125_v5  ;;  %v847_v45 = vadd.f32 %v846_v32, %v8768_v57 }
 0x198   : > { %v6592_v15 = vmul.f32 %v6464_v25, %v638_v53  ;;  %v9371_v22 = vpop.eup %7410  ;;  %v4810_v1 = vmul.f32 %v4682_v44, %v9305_v7  ;;  %v5580_v9 = vmul.f32 %v5452_v0, %v9300_v29  ;;  %v6465_v24 = vmul.f32 %v6337_v27, %v8857_v11  ;;  %v1307_v25 = vpop.f32.mrf.mxu3 }
 0x199   : > { %v2718_v8 = vsub.f32 1.0, %v2717_v52  ;;  %v4683_v16 = vadd.f32 1.4214138, %v4555_v58  ;;  %v2727_v19 = vand.u32 2147483648, %v9318_v55  ;;  %7414 = vrcp.f32 %v9368_v39 }
 0x19a   : > { %6720 = vst [vmem:[%s8785_s10 + $0x60] sm:$0xff] %v6592_v15  ;;  %v9380_v63 = vadd.f32 %v1098_v46, %v8182_v50  ;;  %v6088_v53 = vsub.f32 1.0, %v5960_v61  ;;  %vm2722_vm2 = vweird.f32 %v7409_v17  ;;  %v2725_v3 = vand.u32 2147483647, %v9318_v55 }
 0x19b   : > { %v2719_v32 = vmul.f32 %v7409_v17, %v2718_v8  ;;  %v9383_v44 = vpop.eup %7412  ;;  %v5321_v29 = vmul.f32 %v5193_v31, %v9248_v60  ;;  %v9389_v11 = vsel %vm1740_vm1, 1.0, %v14002_v6  ;;  %v9392_v54 = vmul.f32 0.5, %v9310_v36 }
 0x19c   : > { %v6593_v0 = vmul.f32 %v6465_v24, %v847_v45  ;;  %v4938_v27 = vadd.f32 -0.28449672, %v4810_v1  ;;  %vm2721_vm3 = vweird.f32 %v9318_v55  ;;  %v5732_v12 = vmul.f32 1.442695, %v5580_v9 }
 0x19d   : > { %v2720_v5 = vadd.f32 %v7409_v17, %v2719_v32  ;;  %v4811_v61 = vmul.f32 %v4683_v16, %v9344_v49  ;;  %vm2723_vm4 = vmor %vm2721_vm3, %vm2722_vm2  ;;  %v2728_v58 = vor.u32 1.1754944e-38, %v2727_v19  ;;  %v5453_v60 = vsub.f32 0.0, %v9353_v4 }
 0x19e   : > { %6721 = vst [vmem:[%s8785_s10 + $0x68] sm:$0xff] %v6593_v0  ;;  %v9399_v35 = vmul.f32 0.70710677, %v9380_v63  ;;  %v9402_v36 = vmul.f32 %v6088_v53, %v9187_v2  ;;  %vm2726_vm5 = vcmp.eq.f32.partialorder %v2725_v3, 8.507059e+37  ;;  %vm1741_vm6 = vcmp.ge.f32.partialorder %v9326_v26, 0.0 }
 0x19f   : > { %v2724_v52 = vsel %vm2723_vm4, %v7409_v17, %v2720_v5  ;;  %v7415_v55 = vpop.eup %7414  ;;  %v5961_v46 = vmul.f32 %v9284_v14, %v5321_v29  ;;  %v9410_v45 = vadd.f32 %v1307_v25, %v8184_v51  ;;  %v5066_v1 = vmul.f32 %v4938_v27, %v9305_v7  ;;  %v640_v27 = vpop.f32.mrf.mxu0  ;;  %v354_v5 = vld [vmem:[%s8042_s9 + $0xf8] sm:$0xff] }
 0x1a0   : > { %v9406_v31 = vsel %vm2726_vm5, %v2728_v58, %v2724_v52  ;;  %v1998_v15 = vand.u32 2147483647, %v9399_v35  ;;  %7416 = vpow2.f32 %v5732_v12  ;;  %v2732_v2 = vmul.f32 %v7415_v55, %v9368_v39  ;;  %7153 = vmatmul.msk.f32.gmra.mxu2 %vm409_vm0, %v354_v5  ;;  %7217 = vmatmul.msk.f32.gmra.mxu3 %vm409_vm0, %v354_v5  ;;  %v849_v58 = vpop.f32.mrf.mxu1 }
 0x1a1   : > { %v4300_v8 = vmul.f32 1.0614054, %v9406_v31  ;;  %v4939_v17 = vadd.f32 -0.28449672, %v4811_v61  ;;  %v9416_v26 = vsel %vm1741_vm6, 1.0, %v14002_v6  ;;  %v5581_v14 = vmul.f32 %v5453_v60, %v9353_v4  ;;  %7025 = vmatmul.msk.f32.gmra.mxu0 %vm409_vm0, %v354_v5  ;;  %7089 = vmatmul.msk.f32.gmra.mxu1 %vm409_vm0, %v354_v5 }
 0x1a2   : > { %v2126_v9 = vmul.f32 0.3275911, %v1998_v15  ;;  %v2733_v16 = vsub.f32 1.0, %v2732_v2  ;;  %v2740_v19 = vand.u32 2147483647, %v9368_v39  ;;  %v6338_v53 = vadd.f32 1.0, %v9135_v43 }
 0x1a3   : > { %v4428_v24 = vadd.f32 -1.4531521, %v4300_v8  ;;  %v6089_v32 = vsub.f32 1.0, %v5961_v46  ;;  %v2742_v3 = vand.u32 2147483648, %v9368_v39  ;;  %v9425_v0 = vmul.f32 0.70710677, %v9410_v45 }
 0x1a4   : > { %v9422_v29 = vadd.f32 1.0, %v2126_v9  ;;  %v5194_v12 = vadd.f32 0.2548296, %v5066_v1  ;;  %v2734_v25 = vmul.f32 %v7415_v55, %v2733_v16  ;;  %vm2737_vm7 = vweird.f32 %v7415_v55 }
 0x1a5   : > { %v4556_v4 = vmul.f32 %v4428_v24, %v9406_v31  ;;  %v5067_v43 = vmul.f32 %v4939_v17, %v9344_v49  ;;  %vm2736_vm8 = vweird.f32 %v9368_v39  ;;  %v5734_v61 = vmul.f32 1.442695, %v5581_v14 }
 0x1a6   : > { %7418 = vrcp.f32 %v9422_v29  ;;  %v9436_v60 = vpop.eup %7416  ;;  %v2735_v46 = vadd.f32 %v7415_v55, %v2734_v25  ;;  %v641_v1 = vadd.f32 %v640_v27, %v8732_v23  ;;  %v6466_v8 = vmul.f32 %v6338_v53, %v8888_v41  ;;  %vm2738_vm9 = vmor %vm2736_vm8, %vm2737_vm7 }
 0x1a7   : > { %v4684_v52 = vadd.f32 1.4214138, %v4556_v4  ;;  %v2743_v2 = vor.u32 1.1754944e-38, %v2742_v3  ;;  %v5454_v39 = vsub.f32 0.0, %v1998_v15  ;;  %v9442_v17 = vand.u32 2147483647, %v9425_v0  ;;  %v1310_v4 = vpop.f32.mrf.mxu3 }
 0x1a8   : > { %v6339_v14 = vadd.f32 1.0, %v9158_v62  ;;  %v5322_v9 = vmul.f32 %v5194_v12, %v9305_v7  ;;  %v2739_v16 = vsel %vm2738_vm9, %v7415_v55, %v2735_v46  ;;  %vm2741_vm10 = vcmp.eq.f32.partialorder %v2740_v19, 8.507059e+37  ;;  %v1101_v12 = vpop.f32.mrf.mxu2 }
 0x1a9   : > { %v4812_v24 = vmul.f32 %v4684_v52, %v9406_v31  ;;  %v9448_v5 = vmul.f32 %v6089_v32, %v9259_v48  ;;  %v5195_v27 = vadd.f32 0.2548296, %v5067_v43  ;;  %v9450_v41 = vsel %vm2741_vm10, %v2743_v2, %v2739_v16 }
 0x1aa   : > { %v2127_v53 = vmul.f32 0.3275911, %v9442_v17  ;;  %v4301_v3 = vmul.f32 1.0614054, %v9450_v41  ;;  %7420 = vpow2.f32 %v5734_v61  ;;  %v9455_v62 = vmul.f32 0.5, %v9380_v63 }
 0x1ab   : > { %v6594_v7 = vmul.f32 %v6466_v8, %v641_v1  ;;  %v5582_v19 = vmul.f32 %v5454_v39, %v1998_v15  ;;  %v850_v48 = vadd.f32 %v849_v58, %v8768_v57  ;;  %v6467_v32 = vmul.f32 %v6339_v14, %v8904_v47 }
 0x1ac   : > { %v7419_v55 = vpop.eup %7418  ;;  %v9457_v25 = vadd.f32 1.0, %v2127_v53  ;;  %v9462_v43 = vmul.f32 %v9371_v22, %v5322_v9  ;;  %v4940_v52 = vadd.f32 -0.28449672, %v4812_v24  ;;  %v4429_v46 = vadd.f32 -1.4531521, %v4301_v3 }
 0x1ad   : > { %v2747_v61 = vmul.f32 %v7419_v55, %v9422_v29  ;;  %6722 = vst [vmem:[%s8785_s10 + $0x70] sm:$0xff] %v6594_v7  ;;  %v5323_v63 = vmul.f32 %v5195_v27, %v9344_v49  ;;  %v9469_v15 = vadd.f32 %v1101_v12, %v8182_v50  ;;  %v9472_v1 = vadd.f32 %v1310_v4, %v8184_v51 }
 0x1ae   : > { %7422 = vrcp.f32 %v9457_v25  ;;  %v4557_v47 = vmul.f32 %v4429_v46, %v9450_v41  ;;  %vm1742_vm11 = vcmp.ge.f32.partialorder %v9399_v35, 0.0  ;;  %v9477_v58 = vmul.f32 0.5, %v9410_v45 }
 0x1af   : > { %v2748_v22 = vsub.f32 1.0, %v2747_v61  ;;  %v2755_v8 = vand.u32 2147483647, %v9422_v29  ;;  %v2757_v49 = vand.u32 2147483648, %v9422_v29  ;;  %v5736_v2 = vmul.f32 1.442695, %v5582_v19 }
 0x1b0   : > { %v6595_v39 = vmul.f32 %v6467_v32, %v850_v48  ;;  %v9481_v14 = vpop.eup %7420  ;;  %v5068_v9 = vmul.f32 %v4940_v52, %v9406_v31  ;;  %v4685_v24 = vadd.f32 1.4214138, %v4557_v47  ;;  %vm2752_vm12 = vweird.f32 %v7419_v55  ;;  %v355_v47 = vld [vmem:[%s8042_s9 + $0x100] sm:$0xff] }
 0x1b1   : > { %v2749_v16 = vmul.f32 %v7419_v55, %v2748_v22  ;;  %v6090_v27 = vsub.f32 1.0, %v9462_v43  ;;  %v5963_v53 = vmul.f32 %v9383_v44, %v5323_v63  ;;  %v9488_v45 = vmul.f32 0.70710677, %v9469_v15  ;;  %7154 = vmatmul.msk.f32.gmra.mxu2 %vm409_vm0, %v355_v47  ;;  %7218 = vmatmul.msk.f32.gmra.mxu3 %vm409_vm0, %v355_v47 }
 0x1b2   : > { %6723 = vst [vmem:[%s8785_s10 + $0x78] sm:$0xff] %v6595_v39  ;;  %v9491_v3 = vmul.f32 0.70710677, %v9472_v1  ;;  %v4813_v7 = vmul.f32 %v4685_v24, %v9450_v41  ;;  %vm2751_vm13 = vweird.f32 %v9422_v29  ;;  %v5455_v4 = vsub.f32 0.0, %v9442_v17 }
 0x1b3   : > { %v2750_v12 = vadd.f32 %v7419_v55, %v2749_v16  ;;  %v9499_v44 = vsel %vm1742_vm11, 1.0, %v14002_v6  ;;  %vm2753_vm14 = vmor %vm2751_vm13, %vm2752_vm12  ;;  %v2758_v48 = vor.u32 1.1754944e-38, %v2757_v49  ;;  %v9502_v32 = vand.u32 2147483647, %v9488_v45  ;;  %v643_v16 = vpop.f32.mrf.mxu0  ;;  %7026 = vmatmul.msk.f32.gmra.mxu0 %vm409_vm0, %v355_v47 }
 0x1b4   : > { %v7423_v19 = vpop.eup %7422  ;;  %v9505_v43 = vand.u32 2147483647, %v9491_v3  ;;  %v5196_v52 = vadd.f32 0.2548296, %v5068_v9  ;;  %vm2756_vm15 = vcmp.eq.f32.partialorder %v2755_v8, 8.507059e+37  ;;  %v6091_v61 = vsub.f32 1.0, %v5963_v53  ;;  %v852_v53 = vpop.f32.mrf.mxu1  ;;  %7090 = vmatmul.msk.f32.gmra.mxu1 %vm409_vm0, %v355_v47 }
 0x1b5   : > { %v2754_v46 = vsel %vm2753_vm14, %v7419_v55, %v2750_v12  ;;  %v2762_v29 = vmul.f32 %v7423_v19, %v9457_v25  ;;  %7424 = vpow2.f32 %v5736_v2  ;;  %v2128_v35 = vmul.f32 0.3275911, %v9502_v32 }
 0x1b6   : > { %v9508_v63 = vsel %vm2756_vm15, %v2758_v48, %v2754_v46  ;;  %v4941_v22 = vadd.f32 -0.28449672, %v4813_v7  ;;  %v5583_v24 = vmul.f32 %v5455_v4, %v9442_v17  ;;  %v2770_v55 = vand.u32 2147483647, %v9457_v25 }
 0x1b7   : > { %v4302_v49 = vmul.f32 1.0614054, %v9508_v63  ;;  %v2763_v39 = vsub.f32 1.0, %v2762_v29  ;;  %v2772_v8 = vand.u32 2147483648, %v9457_v25  ;;  %v9518_v9 = vadd.f32 1.0, %v2128_v35 }
 0x1b8   : > { %v2129_v2 = vmul.f32 0.3275911, %v9505_v43  ;;  %v5324_v17 = vmul.f32 %v5196_v52, %v9406_v31  ;;  %vm2767_vm1 = vweird.f32 %v7423_v19  ;;  %v9525_v4 = vmul.f32 %v6090_v27, %v9331_v38 }
 0x1b9   : > { %v4430_v7 = vadd.f32 -1.4531521, %v4302_v49  ;;  %v2764_v12 = vmul.f32 %v7423_v19, %v2763_v39  ;;  %v9528_v48 = vmul.f32 %v6091_v61, %v9342_v42  ;;  %vm1743_vm2 = vcmp.ge.f32.partialorder %v9425_v0, 0.0 }
 0x1ba   : > { %7426 = vrcp.f32 %v9518_v9  ;;  %v5069_v46 = vmul.f32 %v4941_v22, %v9450_v41  ;;  %vm2766_vm3 = vweird.f32 %v9457_v25  ;;  %v2773_v52 = vor.u32 1.1754944e-38, %v2772_v8 }
 0x1bb   : > { %v4558_v29 = vmul.f32 %v4430_v7, %v9508_v63  ;;  %v2765_v35 = vadd.f32 %v7423_v19, %v2764_v12  ;;  %v9535_v31 = vpop.eup %7424  ;;  %vm2768_vm4 = vmor %vm2766_vm3, %vm2767_vm1  ;;  %v5738_v38 = vmul.f32 1.442695, %v5583_v24  ;;  %v9537_v27 = vadd.f32 1.0, %v2129_v2  ;;  %v1104_v12 = vpop.f32.mrf.mxu2 }
 0x1bc   : > { %v6340_v42 = vadd.f32 1.0, %v9215_v21  ;;  %v9541_v61 = vmul.f32 %v9436_v60, %v5324_v17  ;;  %vm2771_vm5 = vcmp.eq.f32.partialorder %v2770_v55, 8.507059e+37  ;;  %v9546_v22 = vsel %vm1743_vm2, 1.0, %v14002_v6 }
 0x1bd   : > { %v4686_v47 = vadd.f32 1.4214138, %v4558_v29  ;;  %v2769_v49 = vsel %vm2768_vm4, %v7423_v19, %v2765_v35  ;;  %7428 = vrcp.f32 %v9537_v27  ;;  %v644_v39 = vadd.f32 %v643_v16, %v8732_v23 }
 0x1be   : > { %v9548_v25 = vsel %vm2771_vm5, %v2773_v52, %v2769_v49  ;;  %v5197_v24 = vadd.f32 0.2548296, %v5069_v46  ;;  %v9554_v60 = vmul.f32 0.5, %v9469_v15  ;;  %v5456_v19 = vsub.f32 0.0, %v9502_v32 }
 0x1bf   : > { %v4303_v21 = vmul.f32 1.0614054, %v9548_v25  ;;  %v4814_v8 = vmul.f32 %v4686_v47, %v9508_v63  ;;  %7430 = vpow2.f32 %v5738_v38  ;;  %v9559_v0 = vmul.f32 0.5, %v9472_v1 }
 0x1c0   : > { %v7427_v55 = vpop.eup %7426  ;;  %v6468_v2 = vmul.f32 %v6340_v42, %v8973_v56  ;;  %v5457_v15 = vsub.f32 0.0, %v9505_v43  ;;  %vm2781_vm6 = vweird.f32 %v9518_v9  ;;  %v2785_v46 = vand.u32 2147483647, %v9518_v9 }
 0x1c1   : > { %14008 = vst [vmem:[#allocation5_spill] sm:$0xff] %v9559_v0  ;;  %v4431_v16 = vadd.f32 -1.4531521, %v4303_v21  ;;  %v2777_v7 = vmul.f32 %v7427_v55, %v9518_v9  ;;  %v2787_v29 = vand.u32 2147483648, %v9518_v9  ;;  %v5325_v1 = vmul.f32 %v5197_v24, %v9450_v41 }
 0x1c2   : > { %v6596_v35 = vmul.f32 %v6468_v2, %v644_v39  ;;  %v5584_v38 = vmul.f32 %v5456_v19, %v9502_v32  ;;  %v4942_v47 = vadd.f32 -0.28449672, %v4814_v8  ;;  %vm1744_vm7 = vcmp.ge.f32.partialorder %v9488_v45, 0.0  ;;  %v1313_v32 = vpop.f32.mrf.mxu3  ;;  %v646_v19 = vpop.f32.mrf.mxu0 }
 0x1c3   : > { %v4559_v56 = vmul.f32 %v4431_v16, %v9548_v25  ;;  %v2778_v52 = vsub.f32 1.0, %v2777_v7  ;;  %v7429_v42 = vpop.eup %7428  ;;  %v853_v49 = vadd.f32 %v852_v53, %v8768_v57  ;;  %v6341_v21 = vadd.f32 1.0, %v9256_v37 }
 0x1c4   : > { %6724 = vst [vmem:[%s8785_s10 + $0x80] sm:$0xff] %v6596_v35  ;;  %v9576_v17 = vadd.f32 %v1104_v12, %v8182_v50  ;;  %vm2782_vm8 = vweird.f32 %v7427_v55  ;;  %vm1745_vm9 = vcmp.ge.f32.partialorder %v9491_v3, 0.0  ;;  %v2792_v41 = vmul.f32 %v7429_v42, %v9537_v27 }
 0x1c5   : > { %v4687_v39 = vadd.f32 1.4214138, %v4559_v56  ;;  %v2779_v2 = vmul.f32 %v7427_v55, %v2778_v52  ;;  %v9580_v24 = vpop.eup %7430  ;;  %vm9582_vm10 = vcmp.eq.f32.partialorder %v2785_v46, 8.507059e+37  ;;  %v2788_v53 = vor.u32 1.1754944e-38, %v2787_v29  ;;  %vm2783_vm11 = vmor %vm2781_vm6, %vm2782_vm8 }
 0x1c6   : > { %v6469_v37 = vmul.f32 %v6341_v21, %v8983_v18  ;;  %v9588_v8 = vmul.f32 0.70710677, %v9576_v17  ;;  %v2793_v7 = vsub.f32 1.0, %v2792_v41  ;;  %v2800_v12 = vand.u32 2147483647, %v9537_v27 }
 0x1c7   : > { %v2780_v16 = vadd.f32 %v7427_v55, %v2779_v2  ;;  %v2802_v35 = vand.u32 2147483648, %v9537_v27  ;;  %v4815_v56 = vmul.f32 %v4687_v39, %v9548_v25  ;;  %v9599_v18 = vadd.f32 %v1313_v32, %v8184_v51 }
 0x1c8   : > { %v6597_v46 = vmul.f32 %v6469_v37, %v853_v49  ;;  %v9596_v29 = vand.u32 2147483647, %v9588_v8  ;;  %v5070_v52 = vmul.f32 %v4942_v47, %v9508_v63  ;;  %v2794_v2 = vmul.f32 %v7429_v42, %v2793_v7 }
 0x1c9   : > { %v2784_v21 = vsel %vm2783_vm11, %v7427_v55, %v2780_v16  ;;  %vm2797_vm12 = vweird.f32 %v7429_v42  ;;  %v5965_v41 = vmul.f32 %v9481_v14, %v5325_v1  ;;  %v5585_v9 = vmul.f32 %v5457_v15, %v9505_v43  ;;  %v356_v55 = vld [vmem:[%s8042_s9 + $0x108] sm:$0xff] }
 0x1ca   : > { %v9605_v39 = vsel %vm9582_vm10, %v2788_v53, %v2784_v21  ;;  %6725 = vst [vmem:[%s8785_s10 + $0x88] sm:$0xff] %v6597_v46  ;;  %v2130_v49 = vmul.f32 0.3275911, %v9596_v29  ;;  %v5740_v32 = vmul.f32 1.442695, %v5584_v38  ;;  %v2795_v0 = vadd.f32 %v7429_v42, %v2794_v2  ;;  %7155 = vmatmul.msk.f32.gmra.mxu2 %vm409_vm0, %v356_v55  ;;  %7219 = vmatmul.msk.f32.gmra.mxu3 %vm409_vm0, %v356_v55  ;;  %v855_v53 = vpop.f32.mrf.mxu1 }
 0x1cb   : > { %v4304_v37 = vmul.f32 1.0614054, %v9605_v39  ;;  %vm2796_vm13 = vweird.f32 %v9537_v27  ;;  %v4943_v47 = vadd.f32 -0.28449672, %v4815_v56  ;;  %v2803_v14 = vor.u32 1.1754944e-38, %v2802_v35  ;;  %7027 = vmatmul.msk.f32.gmra.mxu0 %vm409_vm0, %v356_v55  ;;  %7091 = vmatmul.msk.f32.gmra.mxu1 %vm409_vm0, %v356_v55 }
 0x1cc   : > { %vm9613_vm14 = vmor %vm2796_vm13, %vm2797_vm12  ;;  %v9617_v1 = vadd.f32 1.0, %v2130_v49  ;;  %v9620_v43 = vmul.f32 0.70710677, %v9599_v18  ;;  %v5198_v15 = vadd.f32 0.2548296, %v5070_v52  ;;  %vm2801_vm15 = vcmp.eq.f32.partialorder %v2800_v12, 8.507059e+37 }
 0x1cd   : > { %v4432_v38 = vadd.f32 -1.4531521, %v4304_v37  ;;  %v2799_v27 = vsel %vm9613_vm14, %v7429_v42, %v2795_v0  ;;  %v6093_v7 = vsub.f32 1.0, %v5965_v41  ;;  %v5742_v56 = vmul.f32 1.442695, %v5585_v9 }
 0x1ce   : > { %v9628_v35 = vsel %vm2801_vm15, %v2803_v14, %v2799_v27  ;;  %7432 = vrcp.f32 %v9617_v1  ;;  %v14013_v46 = vsub.f32 1.0, %v9541_v61  ;;  %v9639_v0 = vsel %vm1744_vm7, 1.0, %v14002_v6 }
 0x1cf   : > { %v4560_v42 = vmul.f32 %v4432_v38, %v9605_v39  ;;  %v4305_v12 = vmul.f32 1.0614054, %v9628_v35  ;;  %v5071_v21 = vmul.f32 %v4943_v47, %v9548_v25  ;;  %v9647_v2 = vsel %vm1745_vm9, 1.0, %v14002_v6 }
 0x1d0   : > { %v9634_v52 = vmul.f32 %v14013_v46, %v9389_v11  ;;  %v9650_v61 = vand.u32 2147483647, %v9620_v43  ;;  %v6342_v11 = vadd.f32 1.0, %v9337_v20  ;;  %v5326_v45 = vmul.f32 %v5198_v15, %v9508_v63 }
 0x1d1   : > { %v4688_v41 = vadd.f32 1.4214138, %v4560_v42  ;;  %7434 = vpow2.f32 %v5740_v32  ;;  %v4433_v9 = vadd.f32 -1.4531521, %v4305_v12  ;;  %v9655_v49 = vmul.f32 %v6093_v7, %v9416_v26  ;;  %v1107_v12 = vpop.f32.mrf.mxu2 }
 0x1d2   : > { %7436 = vpow2.f32 %v5742_v56  ;;  %v5458_v37 = vsub.f32 0.0, %v9596_v29  ;;  %v2131_v3 = vmul.f32 0.3275911, %v9650_v61  ;;  %vm1746_vm1 = vcmp.ge.f32.partialorder %v9588_v8, 0.0 }
 0x1d3   : > { %v4816_v55 = vmul.f32 %v4688_v41, %v9605_v39  ;;  %v4561_v47 = vmul.f32 %v4433_v9, %v9628_v35  ;;  %v647_v20 = vadd.f32 %v646_v19, %v8732_v23  ;;  %v5199_v16 = vadd.f32 0.2548296, %v5071_v21 }
 0x1d4   : > { %v7433_v63 = vpop.eup %7432  ;;  %v9663_v32 = vadd.f32 1.0, %v2131_v3  ;;  %v6470_v26 = vmul.f32 %v6342_v11, %v9071_v33  ;;  %v6343_v14 = vadd.f32 1.0, %v9347_v34  ;;  %v9668_v15 = vmul.f32 %v9535_v31, %v5326_v45 }
 0x1d5   : > { %v4689_v38 = vadd.f32 1.4214138, %v4561_v47  ;;  %v9671_v27 = vmul.f32 0.5, %v9576_v17  ;;  %v2807_v7 = vmul.f32 %v7433_v63, %v9617_v1  ;;  %v4944_v56 = vadd.f32 -0.28449672, %v4816_v55 }
 0x1d6   : > { %v5586_v19 = vmul.f32 %v5458_v37, %v9596_v29  ;;  %7438 = vrcp.f32 %v9663_v32  ;;  %v856_v46 = vadd.f32 %v855_v53, %v8768_v57  ;;  %v9683_v34 = vsel %vm1746_vm1, 1.0, %v14002_v6  ;;  %v1316_v37 = vpop.f32.mrf.mxu3 }
 0x1d7   : > { %v9677_v42 = vpop.eup %7434  ;;  %v4817_v33 = vmul.f32 %v4689_v38, %v9628_v35  ;;  %v2808_v31 = vsub.f32 1.0, %v2807_v7  ;;  %v9686_v17 = vmul.f32 0.5, %v9599_v18  ;;  %v5327_v21 = vmul.f32 %v5199_v16, %v9548_v25 }
 0x1d8   : > { %v9688_v29 = vpop.eup %7436  ;;  %v2817_v53 = vand.u32 2147483648, %v9617_v1  ;;  %v6598_v11 = vmul.f32 %v6470_v26, %v647_v20  ;;  %v6471_v45 = vmul.f32 %v6343_v14, %v9138_v30  ;;  %v6094_v41 = vsub.f32 1.0, %v9668_v15 }
 0x1d9   : > { %v2809_v8 = vmul.f32 %v7433_v63, %v2808_v31  ;;  %vm2812_vm2 = vweird.f32 %v7433_v63  ;;  %v2815_v9 = vand.u32 2147483647, %v9617_v1  ;;  %v5072_v18 = vmul.f32 %v4944_v56, %v9605_v39 }
 0x1da   : > { %v5744_v3 = vmul.f32 1.442695, %v5586_v19  ;;  %6726 = vst [vmem:[%s8785_s10 + $0x90] sm:$0xff] %v6598_v11  ;;  %v6599_v55 = vmul.f32 %v6471_v45, %v856_v46  ;;  %v9698_v25 = vadd.f32 %v1107_v12, %v8182_v50  ;;  %v4945_v47 = vadd.f32 -0.28449672, %v4817_v33 }
 0x1db   : > { %v2810_v20 = vadd.f32 %v7433_v63, %v2809_v8  ;;  %vm2811_vm3 = vweird.f32 %v9617_v1  ;;  %v5459_v30 = vsub.f32 0.0, %v9650_v61  ;;  %v5967_v26 = vmul.f32 %v9580_v24, %v5327_v21 }
 0x1dc   : > { %v7439_v16 = vpop.eup %7438  ;;  %vm2813_vm4 = vmor %vm2811_vm3, %vm2812_vm2  ;;  %v2818_v14 = vor.u32 1.1754944e-38, %v2817_v53  ;;  %6727 = vst [vmem:[%s8785_s10 + $0x98] sm:$0xff] %v6599_v55  ;;  %v9705_v15 = vmul.f32 0.70710677, %v9698_v25  ;;  %v9708_v38 = vadd.f32 %v1316_v37, %v8184_v51  ;;  %vm2816_vm5 = vcmp.eq.f32.partialorder %v2815_v9, 8.507059e+37 }
 0x1dd   : > { %v2814_v7 = vsel %vm2813_vm4, %v7433_v63, %v2810_v20  ;;  %vm1747_vm6 = vcmp.ge.f32.partialorder %v9620_v43, 0.0  ;;  %v2822_v1 = vmul.f32 %v7439_v16, %v9663_v32  ;;  %v5200_v56 = vadd.f32 0.2548296, %v5072_v18  ;;  %v357_v63 = vld [vmem:[%s8042_s9 + $0x110] sm:$0xff]  ;;  %v649_v18 = vpop.f32.mrf.mxu0 }
 0x1de   : > { %v9712_v19 = vsel %vm2816_vm5, %v2818_v14, %v2814_v7  ;;  %7440 = vpow2.f32 %v5744_v3  ;;  %v9715_v24 = vand.u32 2147483647, %v9705_v15  ;;  %v5073_v46 = vmul.f32 %v4945_v47, %v9628_v35  ;;  %7156 = vmatmul.msk.f32.gmra.mxu2 %vm409_vm0, %v357_v63  ;;  %7220 = vmatmul.msk.f32.gmra.mxu3 %vm409_vm0, %v357_v63 }
 0x1df   : > { %v4306_v33 = vmul.f32 1.0614054, %v9712_v19  ;;  %v2823_v31 = vsub.f32 1.0, %v2822_v1  ;;  %v5587_v12 = vmul.f32 %v5459_v30, %v9650_v61  ;;  %v6095_v21 = vsub.f32 1.0, %v5967_v26  ;;  %v858_v61 = vpop.f32.mrf.mxu1  ;;  %7028 = vmatmul.msk.f32.gmra.mxu0 %vm409_vm0, %v357_v63  ;;  %7092 = vmatmul.msk.f32.gmra.mxu1 %vm409_vm0, %v357_v63 }
 0x1e0   : > { %v2832_v53 = vand.u32 2147483648, %v9663_v32  ;;  %v2132_v11 = vmul.f32 0.3275911, %v9715_v24  ;;  %v9724_v45 = vmul.f32 0.70710677, %v9708_v38  ;;  %vm2827_vm7 = vweird.f32 %v7439_v16 }
 0x1e1   : > { %v4434_v8 = vadd.f32 -1.4531521, %v4306_v33  ;;  %v2824_v9 = vmul.f32 %v7439_v16, %v2823_v31  ;;  %v2830_v37 = vand.u32 2147483647, %v9663_v32  ;;  %v5328_v3 = vmul.f32 %v5200_v56, %v9605_v39 }
 0x1e2   : > { %vm2826_vm8 = vweird.f32 %v9663_v32  ;;  %v9733_v55 = vadd.f32 1.0, %v2132_v11  ;;  %v9736_v47 = vand.u32 2147483647, %v9724_v45  ;;  %v5201_v20 = vadd.f32 0.2548296, %v5073_v46 }
 0x1e3   : > { %v4562_v30 = vmul.f32 %v4434_v8, %v9712_v19  ;;  %v2825_v26 = vadd.f32 %v7439_v16, %v2824_v9  ;;  %v5746_v14 = vmul.f32 1.442695, %v5587_v12  ;;  %v9742_v1 = vmul.f32 %v6094_v41, %v9499_v44  ;;  %vm2828_vm9 = vmor %vm2826_vm8, %vm2827_vm7 }
 0x1e4   : > { %v9739_v7 = vpop.eup %7440  ;;  %v2833_v39 = vor.u32 1.1754944e-38, %v2832_v53  ;;  %7442 = vrcp.f32 %v9733_v55  ;;  %v6344_v32 = vadd.f32 1.0, %v9402_v36  ;;  %v9750_v46 = vsel %vm1747_vm6, 1.0, %v14002_v6  ;;  %v1110_v53 = vpop.f32.mrf.mxu2 }
 0x1e5   : > { %v4690_v56 = vadd.f32 1.4214138, %v4562_v30  ;;  %v2829_v33 = vsel %vm2828_vm9, %v7439_v16, %v2825_v26  ;;  %vm2831_vm10 = vcmp.eq.f32.partialorder %v2830_v37, 8.507059e+37  ;;  %v9753_v31 = vmul.f32 %v6095_v21, %v9546_v22 }
 0x1e6   : > { %v9756_v44 = vmul.f32 %v9677_v42, %v5328_v3  ;;  %v9758_v41 = vsel %vm2831_vm10, %v2833_v39, %v2829_v33  ;;  %v2133_v12 = vmul.f32 0.3275911, %v9736_v47  ;;  %v5329_v36 = vmul.f32 %v5201_v20, %v9628_v35  ;;  %v1319_v33 = vpop.f32.mrf.mxu3 }
 0x1e7   : > { %v4307_v63 = vmul.f32 1.0614054, %v9758_v41  ;;  %7444 = vpow2.f32 %v5746_v14  ;;  %v650_v43 = vadd.f32 %v649_v18, %v8732_v23  ;;  %v9765_v16 = vmul.f32 0.5, %v9698_v25 }
 0x1e8   : > { %v5460_v22 = vsub.f32 0.0, %v9715_v24  ;;  %v9768_v21 = vadd.f32 1.0, %v2133_v12  ;;  %v6472_v42 = vmul.f32 %v6344_v32, %v9168_v40  ;;  %v4818_v11 = vmul.f32 %v4690_v56, %v9712_v19 }
 0x1e9   : > { %v4435_v8 = vadd.f32 -1.4531521, %v4307_v63  ;;  %vm1748_vm11 = vcmp.ge.f32.partialorder %v9705_v15, 0.0  ;;  %v6345_v35 = vadd.f32 1.0, %v9448_v5  ;;  %v6096_v37 = vsub.f32 1.0, %v9756_v44 }
 0x1ea   : > { %v7443_v9 = vpop.eup %7442  ;;  %v9776_v18 = vmul.f32 0.5, %v9708_v38  ;;  %7446 = vrcp.f32 %v9768_v21  ;;  %v9780_v25 = vadd.f32 %v1110_v53, %v8182_v50  ;;  %v5969_v40 = vmul.f32 %v9688_v29, %v5329_v36 }
 0x1eb   : > { %v4563_v3 = vmul.f32 %v4435_v8, %v9758_v41  ;;  %v2837_v15 = vmul.f32 %v7443_v9, %v9733_v55  ;;  %v859_v5 = vadd.f32 %v858_v61, %v8768_v57  ;;  %v9787_v20 = vsel %vm1748_vm11, 1.0, %v14002_v6 }
 0x1ec   : > { %v2845_v38 = vand.u32 2147483647, %v9733_v55  ;;  %v5588_v30 = vmul.f32 %v5460_v22, %v9715_v24  ;;  %v6600_v26 = vmul.f32 %v6472_v42, %v650_v43  ;;  %v4946_v39 = vadd.f32 -0.28449672, %v4818_v11 }
 0x1ed   : > { %v9791_v14 = vpop.eup %7444  ;;  %v4691_v32 = vadd.f32 1.4214138, %v4563_v3  ;;  %v2838_v29 = vsub.f32 1.0, %v2837_v15  ;;  %v6473_v56 = vmul.f32 %v6345_v35, %v9178_v28  ;;  %v2847_v44 = vand.u32 2147483648, %v9733_v55 }
 0x1ee   : > { %vm1749_vm12 = vcmp.ge.f32.partialorder %v9724_v45, 0.0  ;;  %v5461_v61 = vsub.f32 0.0, %v9736_v47  ;;  %6728 = vst [vmem:[%s8785_s10 + $0xa0] sm:$0xff] %v6600_v26  ;;  %v9799_v12 = vmul.f32 0.70710677, %v9780_v25  ;;  %v6097_v24 = vsub.f32 1.0, %v5969_v40 }
 0x1ef   : > { %v2839_v36 = vmul.f32 %v7443_v9, %v2838_v29  ;;  %vm2842_vm13 = vweird.f32 %v7443_v9  ;;  %v6601_v63 = vmul.f32 %v6473_v56, %v859_v5  ;;  %v4819_v53 = vmul.f32 %v4691_v32, %v9758_v41 }
 0x1f0   : > { %v7447_v43 = vpop.eup %7446  ;;  %vm2841_vm14 = vweird.f32 %v9733_v55  ;;  %v9804_v28 = vand.u32 2147483647, %v9799_v12  ;;  %v1320_v22 = vadd.f32 %v1319_v33, %v8184_v51  ;;  %v5074_v42 = vmul.f32 %v4946_v39, %v9712_v19  ;;  %v358_v33 = vld [vmem:[%s8042_s9 + $0x118] sm:$0xff] }
 0x1f1   : > { %v2840_v11 = vadd.f32 %v7443_v9, %v2839_v36  ;;  %v5748_v8 = vmul.f32 1.442695, %v5588_v30  ;;  %v2852_v35 = vmul.f32 %v7447_v43, %v9768_v21  ;;  %6729 = vst [vmem:[%s8785_s10 + $0xa8] sm:$0xff] %v6601_v63  ;;  %vm2843_vm15 = vmor %vm2841_vm14, %vm2842_vm13  ;;  %vm2846_vm1 = vcmp.eq.f32.partialorder %v2845_v38, 8.507059e+37  ;;  %7157 = vmatmul.msk.f32.gmra.mxu2 %vm409_vm0, %v358_v33  ;;  %7221 = vmatmul.msk.f32.gmra.mxu3 %vm409_vm0, %v358_v33  ;;  %v652_v63 = vpop.f32.mrf.mxu0 }
 0x1f2   : > { %v2848_v40 = vor.u32 1.1754944e-38, %v2847_v44  ;;  %v5589_v3 = vmul.f32 %v5461_v61, %v9736_v47  ;;  %v2134_v55 = vmul.f32 0.3275911, %v9804_v28  ;;  %v2860_v26 = vand.u32 2147483647, %v9768_v21  ;;  %7029 = vmatmul.msk.f32.gmra.mxu0 %vm409_vm0, %v358_v33 }
 0x1f3   : > { %v2844_v15 = vsel %vm2843_vm15, %v7443_v9, %v2840_v11  ;;  %v2853_v5 = vsub.f32 1.0, %v2852_v35  ;;  %v2862_v32 = vand.u32 2147483648, %v9768_v21  ;;  %v4947_v39 = vadd.f32 -0.28449672, %v4819_v53  ;;  %v861_v53 = vpop.f32.mrf.mxu1  ;;  %7093 = vmatmul.msk.f32.gmra.mxu1 %vm409_vm0, %v358_v33 }
 0x1f4   : > { %v9814_v29 = vsel %vm2846_vm1, %v2848_v40, %v2844_v15  ;;  %v9816_v30 = vadd.f32 1.0, %v2134_v55  ;;  %v9818_v56 = vmul.f32 0.70710677, %v1320_v22  ;;  %v5202_v38 = vadd.f32 0.2548296, %v5074_v42 }
 0x1f5   : > { %v4308_v44 = vmul.f32 1.0614054, %v9814_v29  ;;  %v2854_v47 = vmul.f32 %v7447_v43, %v2853_v5  ;;  %vm2857_vm2 = vweird.f32 %v7447_v43  ;;  %v9825_v9 = vmul.f32 %v6096_v37, %v9639_v0 }
 0x1f6   : > { %v9828_v61 = vmul.f32 %v6097_v24, %v9647_v2  ;;  %v9833_v36 = vsel %vm1749_vm12, 1.0, %v14002_v6  ;;  %7448 = vrcp.f32 %v9816_v30  ;;  %vm2856_vm3 = vweird.f32 %v9768_v21 }
 0x1f7   : > { %v4436_v42 = vadd.f32 -1.4531521, %v4308_v44  ;;  %7450 = vpow2.f32 %v5748_v8  ;;  %v2855_v0 = vadd.f32 %v7447_v43, %v2854_v47  ;;  %v5075_v2 = vmul.f32 %v4947_v39, %v9758_v41  ;;  %vm2858_vm4 = vmor %vm2856_vm3, %vm2857_vm2 }
 0x1f8   : > { %vm2861_vm5 = vcmp.eq.f32.partialorder %v2860_v26, 8.507059e+37  ;;  %v2863_v45 = vor.u32 1.1754944e-38, %v2862_v32  ;;  %v9842_v37 = vand.u32 2147483647, %v9818_v56  ;;  %v5330_v24 = vmul.f32 %v5202_v38, %v9712_v19 }
 0x1f9   : > { %v4564_v11 = vmul.f32 %v4436_v42, %v9814_v29  ;;  %v2859_v35 = vsel %vm2858_vm4, %v7447_v43, %v2855_v0  ;;  %v5750_v40 = vmul.f32 1.442695, %v5589_v3  ;;  %v9849_v8 = vmul.f32 0.5, %v9780_v25 }
 0x1fa   : > { %v9846_v55 = vsel %vm2861_vm5, %v2863_v45, %v2859_v35  ;;  %vm1750_vm6 = vcmp.ge.f32.partialorder %v9799_v12, 0.0  ;;  %v2135_v21 = vmul.f32 0.3275911, %v9842_v37  ;;  %v5462_v26 = vsub.f32 0.0, %v9804_v28 }
 0x1fb   : > { %v4692_v15 = vadd.f32 1.4214138, %v4564_v11  ;;  %v4309_v5 = vmul.f32 1.0614054, %v9846_v55  ;;  %v9855_v32 = vmul.f32 0.5, %v1320_v22  ;;  %v6346_v3 = vadd.f32 1.0, %v9525_v4 }
 0x1fc   : > { %v7449_v19 = vpop.eup %7448  ;;  %v5203_v39 = vadd.f32 0.2548296, %v5075_v2  ;;  %v9857_v43 = vadd.f32 1.0, %v2135_v21  ;;  %v6347_v25 = vadd.f32 1.0, %v9528_v48  ;;  %v9864_v38 = vmul.f32 %v9739_v7, %v5330_v24  ;;  %v1113_v24 = vpop.f32.mrf.mxu2 }
 0x1fd   : > { %v9861_v33 = vpop.eup %7450  ;;  %v4820_v44 = vmul.f32 %v4692_v15, %v9814_v29  ;;  %v4437_v47 = vadd.f32 -1.4531521, %v4309_v5  ;;  %v2867_v42 = vmul.f32 %v7449_v19, %v9816_v30  ;;  %v9871_v22 = vsel %vm1750_vm6, 1.0, %v14002_v6 }
 0x1fe   : > { %7452 = vrcp.f32 %v9857_v43  ;;  %v653_v4 = vadd.f32 %v652_v63, %v8732_v23  ;;  %v862_v48 = vadd.f32 %v861_v53, %v8768_v57  ;;  %v2875_v2 = vand.u32 2147483647, %v9816_v30 }
 0x1ff   : > { %v4565_v0 = vmul.f32 %v4437_v47, %v9846_v55  ;;  %v2868_v7 = vsub.f32 1.0, %v2867_v42  ;;  %v5590_v45 = vmul.f32 %v5462_v26, %v9804_v28  ;;  %v5331_v11 = vmul.f32 %v5203_v39, %v9758_v41 }
 0x200   : > { %v2877_v12 = vand.u32 2147483648, %v9816_v30  ;;  %v6474_v35 = vmul.f32 %v6346_v3, %v9264_v10  ;;  %v6475_v21 = vmul.f32 %v6347_v25, %v9271_v13  ;;  %v4948_v15 = vadd.f32 -0.28449672, %v4820_v44 }
 0x201   : > { %v4693_v63 = vadd.f32 1.4214138, %v4565_v0  ;;  %v2869_v53 = vmul.f32 %v7449_v19, %v2868_v7  ;;  %vm2872_vm7 = vweird.f32 %v7449_v19  ;;  %v6098_v5 = vsub.f32 1.0, %v9864_v38 }
 0x202   : > { %v6602_v47 = vmul.f32 %v6474_v35, %v653_v4  ;;  %v6603_v42 = vmul.f32 %v6475_v21, %v862_v48  ;;  %v9885_v28 = vadd.f32 %v1113_v24, %v8182_v50  ;;  %vm2871_vm8 = vweird.f32 %v9816_v30  ;;  %v1322_v4 = vpop.f32.mrf.mxu3 }
 0x203   : > { %v4821_v41 = vmul.f32 %v4693_v63, %v9846_v55  ;;  %v2870_v26 = vadd.f32 %v7449_v19, %v2869_v53  ;;  %v9889_v10 = vmul.f32 1.442695, %v5590_v45  ;;  %vm2873_vm9 = vmor %vm2871_vm8, %vm2872_vm7  ;;  %vm2876_vm10 = vcmp.eq.f32.partialorder %v2875_v2, 8.507059e+37  ;;  %v655_v53 = vpop.f32.mrf.mxu0 }
 0x204   : > { %v7453_v13 = vpop.eup %7452  ;;  %v2878_v39 = vor.u32 1.1754944e-38, %v2877_v12  ;;  %vm1751_vm11 = vcmp.ge.f32.partialorder %v9818_v56, 0.0  ;;  %6730 = vst [vmem:[%s8785_s10 + $0xb0] sm:$0xff] %v6602_v47  ;;  %v9894_v3 = vmul.f32 0.70710677, %v9885_v28  ;;  %v5971_v25 = vmul.f32 %v9791_v14, %v5331_v11  ;;  %v359_v11 = vld [vmem:[%s8042_s9 + $0x120] sm:$0xff]  ;;  %v864_v47 = vpop.f32.mrf.mxu1 }
 0x205   : > { %v5076_v38 = vmul.f32 %v4948_v15, %v9814_v29  ;;  %v2874_v44 = vsel %vm2873_vm9, %v7449_v19, %v2870_v26  ;;  %v2882_v30 = vmul.f32 %v7453_v13, %v9857_v43  ;;  %6731 = vst [vmem:[%s8785_s10 + $0xb8] sm:$0xff] %v6603_v42  ;;  %v2892_v0 = vand.u32 2147483648, %v9857_v43  ;;  %7158 = vmatmul.msk.f32.gmra.mxu2 %vm409_vm0, %v359_v11 }
 0x206   : > { %v9900_v48 = vsel %vm2876_vm10, %v2878_v39, %v2874_v44  ;;  %v5463_v7 = vsub.f32 0.0, %v9842_v37  ;;  %v9905_v2 = vand.u32 2147483647, %v9894_v3  ;;  %v4949_v45 = vadd.f32 -0.28449672, %v4821_v41  ;;  %7222 = vmatmul.msk.f32.gmra.mxu3 %vm409_vm0, %v359_v11  ;;  %7030 = vmatmul.msk.f32.gmra.mxu0 %vm409_vm0, %v359_v11 }
 0x207   : > { %7454 = vpow2.f32 %v5750_v40  ;;  %v4310_v14 = vmul.f32 1.0614054, %v9900_v48  ;;  %v2883_v24 = vsub.f32 1.0, %v2882_v30  ;;  %v2890_v19 = vand.u32 2147483647, %v9857_v43  ;;  %7094 = vmatmul.msk.f32.gmra.mxu1 %vm409_vm0, %v359_v11 }
 0x208   : > { %v2136_v12 = vmul.f32 0.3275911, %v9905_v2  ;;  %v9912_v35 = vadd.f32 %v1322_v4, %v8184_v51  ;;  %v6348_v21 = vadd.f32 1.0, %v9634_v52  ;;  %v5204_v15 = vadd.f32 0.2548296, %v5076_v38 }
 0x209   : > { %v4438_v63 = vadd.f32 -1.4531521, %v4310_v14  ;;  %v2884_v40 = vmul.f32 %v7453_v13, %v2883_v24  ;;  %vm2887_vm12 = vweird.f32 %v7453_v13  ;;  %v6099_v42 = vsub.f32 1.0, %v5971_v25 }
 0x20a   : > { %vm2886_vm13 = vweird.f32 %v9857_v43  ;;  %v5591_v41 = vmul.f32 %v5463_v7, %v9842_v37  ;;  %v9921_v52 = vadd.f32 1.0, %v2136_v12  ;;  %v5077_v26 = vmul.f32 %v4949_v45, %v9846_v55 }
 0x20b   : > { %v4566_v39 = vmul.f32 %v4438_v63, %v9900_v48  ;;  %v2885_v38 = vadd.f32 %v7453_v13, %v2884_v40  ;;  %v2893_v44 = vor.u32 1.1754944e-38, %v2892_v0  ;;  %vm2888_vm14 = vmor %vm2886_vm13, %vm2887_vm12  ;;  %v9927_v30 = vmul.f32 0.70710677, %v9912_v35  ;;  %v1116_v63 = vpop.f32.mrf.mxu2 }
 0x20c   : > { %7456 = vrcp.f32 %v9921_v52  ;;  %v656_v25 = vadd.f32 %v655_v53, %v8732_v23  ;;  %v6476_v43 = vmul.f32 %v6348_v21, %v9360_v59  ;;  %v5332_v37 = vmul.f32 %v5204_v15, %v9814_v29 }
 0x20d   : > { %v7455_v4 = vpop.eup %7454  ;;  %v4694_v7 = vadd.f32 1.4214138, %v4566_v39  ;;  %v2889_v14 = vsel %vm2888_vm14, %v7453_v13, %v2885_v38  ;;  %vm2891_vm15 = vcmp.eq.f32.partialorder %v2890_v19, 8.507059e+37  ;;  %v9933_v45 = vmul.f32 %v6098_v5, %v9683_v34  ;;  %v1325_v38 = vpop.f32.mrf.mxu3 }
 0x20e   : > { %v9938_v0 = vsel %vm1751_vm11, 1.0, %v14002_v6  ;;  %v9940_v24 = vsel %vm2891_vm15, %v2893_v44, %v2889_v14  ;;  %v5754_v11 = vmul.f32 1.442695, %v5591_v41  ;;  %v5205_v12 = vadd.f32 0.2548296, %v5077_v26 }
 0x20f   : > { %v4822_v59 = vmul.f32 %v4694_v7, %v9900_v48  ;;  %v4311_v21 = vmul.f32 1.0614054, %v9940_v24  ;;  %vm1752_vm1 = vcmp.ge.f32.partialorder %v9894_v3, 0.0  ;;  %v9946_v29 = vmul.f32 %v6099_v42, %v9750_v46 }
 0x210   : > { %7458 = vpow2.f32 %v9889_v10  ;;  %v2009_v34 = vand.u32 2147483647, %v9927_v30  ;;  %v6604_v56 = vmul.f32 %v6476_v43, %v656_v25  ;;  %v5972_v5 = vmul.f32 %v9861_v33, %v5332_v37 }
 0x211   : > { %v4439_v13 = vadd.f32 -1.4531521, %v4311_v21  ;;  %v5464_v19 = vsub.f32 0.0, %v9905_v2  ;;  %v6349_v15 = vadd.f32 1.0, %v9655_v49  ;;  %7460 = vpow2.f32 %v5754_v11 }
 0x212   : > { %v7457_v40 = vpop.eup %7456  ;;  %v9954_v3 = vmul.f32 0.5, %v9885_v28  ;;  %v9957_v46 = vsel %vm1752_vm1, 1.0, %v14002_v6  ;;  %v2137_v10 = vmul.f32 0.3275911, %v2009_v34  ;;  %6732 = vst [vmem:[%s8785_s10 + $0xc0] sm:$0xff] %v6604_v56  ;;  %v5333_v53 = vmul.f32 %v5205_v12, %v9846_v55 }
 0x213   : > { %v4950_v42 = vadd.f32 -0.28449672, %v4822_v59  ;;  %v4567_v33 = vmul.f32 %v4439_v13, %v9940_v24  ;;  %v2897_v41 = vmul.f32 %v7457_v40, %v9921_v52  ;;  %v865_v49 = vadd.f32 %v864_v47, %v8768_v57 }
 0x214   : > { %v9963_v26 = vadd.f32 1.0, %v2137_v10  ;;  %v6477_v39 = vmul.f32 %v6349_v15, %v9392_v54  ;;  %v9968_v28 = vadd.f32 %v1116_v63, %v8182_v50  ;;  %v6100_v44 = vsub.f32 1.0, %v5972_v5 }
 0x215   : > { %v4695_v25 = vadd.f32 1.4214138, %v4567_v33  ;;  %v2898_v43 = vsub.f32 1.0, %v2897_v41  ;;  %v5592_v55 = vmul.f32 %v5464_v19, %v9905_v2  ;;  %v2905_v7 = vand.u32 2147483647, %v9921_v52 }
 0x216   : > { %v9971_v37 = vpop.eup %7458  ;;  %v2907_v14 = vand.u32 2147483648, %v9921_v52  ;;  %7462 = vrcp.f32 %v9963_v26  ;;  %v5465_v47 = vsub.f32 0.0, %v2009_v34  ;;  %v5078_v54 = vmul.f32 %v4950_v42, %v9900_v48 }
 0x217   : > { %v2899_v11 = vmul.f32 %v7457_v40, %v2898_v43  ;;  %vm2902_vm2 = vweird.f32 %v7457_v40  ;;  %v9978_v12 = vadd.f32 %v1325_v38, %v8184_v51  ;;  %v9980_v59 = vpop.eup %7460  ;;  %v5973_v2 = vmul.f32 %v7455_v4, %v5333_v53  ;;  %v360_v38 = vld [vmem:[%s8042_s9 + $0x128] sm:$0xff] }
 0x218   : > { %v4823_v21 = vmul.f32 %v4695_v25, %v9940_v24  ;;  %v6605_v56 = vmul.f32 %v6477_v39, %v865_v49  ;;  %v9984_v5 = vmul.f32 0.70710677, %v9968_v28  ;;  %vm2901_vm3 = vweird.f32 %v9921_v52  ;;  %7159 = vmatmul.msk.f32.gmra.mxu2 %vm409_vm0, %v360_v38  ;;  %7223 = vmatmul.msk.f32.gmra.mxu3 %vm409_vm0, %v360_v38 }
 0x219   : > { %v2900_v13 = vadd.f32 %v7457_v40, %v2899_v11  ;;  %v5756_v19 = vmul.f32 1.442695, %v5592_v55  ;;  %v9988_v15 = vmul.f32 0.5, %v9912_v35  ;;  %v9991_v63 = vmul.f32 %v6100_v44, %v9787_v20  ;;  %vm2903_vm4 = vmor %vm2901_vm3, %vm2902_vm2 }
 0x21a   : > { %v2908_v10 = vor.u32 1.1754944e-38, %v2907_v14  ;;  %v5593_v4 = vmul.f32 %v5465_v47, %v2009_v34  ;;  %6733 = vst [vmem:[%s8785_s10 + $0xc8] sm:$0xff] %v6605_v56  ;;  %v9995_v53 = vand.u32 2147483647, %v9984_v5  ;;  %v5206_v42 = vadd.f32 0.2548296, %v5078_v54  ;;  %v867_v14 = vpop.f32.mrf.mxu1  ;;  %7095 = vmatmul.msk.f32.gmra.mxu1 %vm409_vm0, %v360_v38 }
 0x21b   : > { %v2904_v33 = vsel %vm2903_vm4, %v7457_v40, %v2900_v13  ;;  %vm2906_vm5 = vcmp.eq.f32.partialorder %v2905_v7, 8.507059e+37  ;;  %v9998_v52 = vmul.f32 0.70710677, %v9978_v12  ;;  %v6101_v35 = vsub.f32 1.0, %v5973_v2  ;;  %v658_v7 = vpop.f32.mrf.mxu0  ;;  %7031 = vmatmul.msk.f32.gmra.mxu0 %vm409_vm0, %v360_v38 }
 0x21c   : > { %v7463_v41 = vpop.eup %7462  ;;  %v4951_v49 = vadd.f32 -0.28449672, %v4823_v21  ;;  %v10000_v39 = vsel %vm2906_vm5, %v2908_v10, %v2904_v33  ;;  %v2138_v20 = vmul.f32 0.3275911, %v9995_v53  ;;  %7464 = vpow2.f32 %v5756_v19 }
 0x21d   : > { %v4312_v34 = vmul.f32 1.0614054, %v10000_v39  ;;  %vm1753_vm6 = vcmp.ge.f32.partialorder %v9927_v30, 0.0  ;;  %v2912_v44 = vmul.f32 %v7463_v41, %v9963_v26  ;;  %v2920_v40 = vand.u32 2147483647, %v9963_v26 }
 0x21e   : > { %v2922_v25 = vand.u32 2147483648, %v9963_v26  ;;  %v5758_v43 = vmul.f32 1.442695, %v5593_v4  ;;  %v10011_v55 = vadd.f32 1.0, %v2138_v20  ;;  %v5334_v47 = vmul.f32 %v5206_v42, %v9900_v48 }
 0x21f   : > { %v4440_v54 = vadd.f32 -1.4531521, %v4312_v34  ;;  %v2913_v11 = vsub.f32 1.0, %v2912_v44  ;;  %v10017_v2 = vand.u32 2147483647, %v9998_v52  ;;  %v10020_v21 = vmul.f32 %v6101_v35, %v9833_v36 }
 0x220   : > { %v5079_v56 = vmul.f32 %v4951_v49, %v9940_v24  ;;  %v10026_v13 = vsel %vm1753_vm6, 1.0, %v14002_v6  ;;  %7466 = vrcp.f32 %v10011_v55  ;;  %vm2917_vm7 = vweird.f32 %v7463_v41 }
 0x221   : > { %v4568_v19 = vmul.f32 %v4440_v54, %v10000_v39  ;;  %v2914_v48 = vmul.f32 %v7463_v41, %v2913_v11  ;;  %v10031_v10 = vmul.f32 0.5, %v9968_v28  ;;  %vm2916_vm8 = vweird.f32 %v9963_v26  ;;  %v1119_v11 = vpop.f32.mrf.mxu2 }
 0x222   : > { %vm10034_vm9 = vcmp.eq.f32.partialorder %v2920_v40, 8.507059e+37  ;;  %v2923_v4 = vor.u32 1.1754944e-38, %v2922_v25  ;;  %v2139_v30 = vmul.f32 0.3275911, %v10017_v2  ;;  %v10039_v42 = vpop.eup %7464  ;;  %v10042_v33 = vmul.f32 %v9971_v37, %v5334_v47  ;;  %vm2918_vm10 = vmor %vm2916_vm8, %vm2917_vm7 }
 0x223   : > { %v4696_v35 = vadd.f32 1.4214138, %v4568_v19  ;;  %v2915_v49 = vadd.f32 %v7463_v41, %v2914_v48  ;;  %7468 = vpow2.f32 %v5758_v43  ;;  %v5207_v20 = vadd.f32 0.2548296, %v5079_v56 }
 0x224   : > { %vm1754_vm11 = vcmp.ge.f32.partialorder %v9984_v5, 0.0  ;;  %v10045_v26 = vadd.f32 1.0, %v2139_v30  ;;  %v6350_v28 = vadd.f32 1.0, %v9742_v1  ;;  %v5466_v44 = vsub.f32 0.0, %v9995_v53 }
 0x225   : > { %v4824_v38 = vmul.f32 %v4696_v35, %v10000_v39  ;;  %v2919_v34 = vsel %vm2918_vm10, %v7463_v41, %v2915_v49  ;;  %v6351_v40 = vadd.f32 1.0, %v9753_v31  ;;  %v10056_v43 = vmul.f32 0.5, %v9978_v12 }
 0x226   : > { %v7467_v37 = vpop.eup %7466  ;;  %v10053_v25 = vsel %vm10034_vm9, %v2923_v4, %v2919_v34  ;;  %7470 = vrcp.f32 %v10045_v26  ;;  %v659_v47 = vadd.f32 %v658_v7, %v8732_v23  ;;  %v6102_v1 = vsub.f32 1.0, %v10042_v33 }
 0x227   : > { %v4313_v41 = vmul.f32 1.0614054, %v10053_v25  ;;  %v2927_v54 = vmul.f32 %v7467_v37, %v10011_v55  ;;  %v868_v31 = vadd.f32 %v867_v14, %v8768_v57  ;;  %v5335_v56 = vmul.f32 %v5207_v20, %v9940_v24 }
 0x228   : > { %v4952_v19 = vadd.f32 -0.28449672, %v4824_v38  ;;  %v10068_v12 = vsel %vm1754_vm11, 1.0, %v14002_v6  ;;  %v6478_v48 = vmul.f32 %v6350_v28, %v9455_v62  ;;  %v5594_v30 = vmul.f32 %v5466_v44, %v9995_v53 }
 0x229   : > { %v10071_v7 = vpop.eup %7468  ;;  %v4441_v36 = vadd.f32 -1.4531521, %v4313_v41  ;;  %v2928_v4 = vsub.f32 1.0, %v2927_v54  ;;  %v6479_v14 = vmul.f32 %v6351_v40, %v9477_v58  ;;  %v2935_v35 = vand.u32 2147483647, %v10011_v55  ;;  %v1328_v54 = vpop.f32.mrf.mxu3 }
 0x22a   : > { %v2937_v24 = vand.u32 2147483648, %v10011_v55  ;;  %v6606_v49 = vmul.f32 %v6478_v48, %v659_v47  ;;  %v10078_v5 = vadd.f32 %v1119_v11, %v8182_v50  ;;  %vm2932_vm12 = vweird.f32 %v7467_v37 }
 0x22b   : > { %v4569_v62 = vmul.f32 %v4441_v36, %v10053_v25  ;;  %v2929_v20 = vmul.f32 %v7467_v37, %v2928_v4  ;;  %v6607_v28 = vmul.f32 %v6479_v14, %v868_v31  ;;  %v5975_v34 = vmul.f32 %v9980_v59, %v5335_v56 }
 0x22c   : > { %v7471_v38 = vpop.eup %7470  ;;  %v5080_v53 = vmul.f32 %v4952_v19, %v10000_v39  ;;  %vm2931_vm13 = vweird.f32 %v10011_v55  ;;  %vm1755_vm14 = vcmp.ge.f32.partialorder %v9998_v52, 0.0  ;;  %6734 = vst [vmem:[%s8785_s10 + $0xd0] sm:$0xff] %v6606_v49  ;;  %v10087_v58 = vmul.f32 0.70710677, %v10078_v5 }
 0x22d   : > { %v4697_v44 = vadd.f32 1.4214138, %v4569_v62  ;;  %v2930_v40 = vadd.f32 %v7467_v37, %v2929_v20  ;;  %v5760_v47 = vmul.f32 1.442695, %v5594_v30  ;;  %v2942_v41 = vmul.f32 %v7471_v38, %v10045_v26  ;;  %6735 = vst [vmem:[%s8785_s10 + $0xd8] sm:$0xff] %v6607_v28  ;;  %vm2933_vm15 = vmor %vm2931_vm13, %vm2932_vm12 }
 0x22e   : > { %vm2936_vm1 = vcmp.eq.f32.partialorder %v2935_v35, 8.507059e+37  ;;  %v2938_v59 = vor.u32 1.1754944e-38, %v2937_v24  ;;  %v5467_v55 = vsub.f32 0.0, %v10017_v2  ;;  %v10094_v31 = vand.u32 2147483647, %v10087_v58  ;;  %v361_v35 = vld [vmem:[%s8042_s9 + $0x130] sm:$0xff] }
 0x22f   : > { %v4825_v11 = vmul.f32 %v4697_v44, %v10053_v25  ;;  %v2934_v56 = vsel %vm2933_vm15, %v7467_v37, %v2930_v40  ;;  %v2943_v19 = vsub.f32 1.0, %v2942_v41  ;;  %v2952_v48 = vand.u32 2147483648, %v10045_v26  ;;  %7160 = vmatmul.msk.f32.gmra.mxu2 %vm409_vm0, %v361_v35  ;;  %7224 = vmatmul.msk.f32.gmra.mxu3 %vm409_vm0, %v361_v35  ;;  %v661_v44 = vpop.f32.mrf.mxu0  ;;  %v870_v40 = vpop.f32.mrf.mxu1 }
 0x230   : > { %v5208_v36 = vadd.f32 0.2548296, %v5080_v53  ;;  %v10098_v4 = vsel %vm2936_vm1, %v2938_v59, %v2934_v56  ;;  %v2140_v30 = vmul.f32 0.3275911, %v10094_v31  ;;  %v10102_v14 = vadd.f32 %v1328_v54, %v8184_v51  ;;  %7032 = vmatmul.msk.f32.gmra.mxu0 %vm409_vm0, %v361_v35  ;;  %7096 = vmatmul.msk.f32.gmra.mxu1 %vm409_vm0, %v361_v35 }
 0x231   : > { %v4314_v24 = vmul.f32 1.0614054, %v10098_v4  ;;  %v2944_v49 = vmul.f32 %v7471_v38, %v2943_v19  ;;  %vm2947_vm2 = vweird.f32 %v7471_v38  ;;  %v2950_v62 = vand.u32 2147483647, %v10045_v26 }
 0x232   : > { %v6103_v37 = vsub.f32 1.0, %v5975_v34  ;;  %v4953_v20 = vadd.f32 -0.28449672, %v4825_v11  ;;  %v5595_v28 = vmul.f32 %v5467_v55, %v10017_v2  ;;  %v10110_v53 = vadd.f32 1.0, %v2140_v30 }
 0x233   : > { %v4442_v41 = vadd.f32 -1.4531521, %v4314_v24  ;;  %v2945_v54 = vadd.f32 %v7471_v38, %v2944_v49  ;;  %vm2946_vm3 = vweird.f32 %v10045_v26  ;;  %v2953_v59 = vor.u32 1.1754944e-38, %v2952_v48 }
 0x234   : > { %v5336_v56 = vmul.f32 %v5208_v36, %v10000_v39  ;;  %vm2948_vm4 = vmor %vm2946_vm3, %vm2947_vm2  ;;  %7472 = vrcp.f32 %v10110_v53  ;;  %v10119_v2 = vmul.f32 0.70710677, %v10102_v14  ;;  %v6352_v34 = vadd.f32 1.0, %v9825_v9 }
 0x235   : > { %v10125_v55 = vmul.f32 %v6102_v1, %v9871_v22  ;;  %v4570_v11 = vmul.f32 %v4442_v41, %v10098_v4  ;;  %v2949_v26 = vsel %vm2948_vm4, %v7471_v38, %v2945_v54  ;;  %vm2951_vm5 = vcmp.eq.f32.partialorder %v2950_v62, 8.507059e+37 }
 0x236   : > { %v5081_v39 = vmul.f32 %v4953_v20, %v10053_v25  ;;  %v10129_v19 = vsel %vm2951_vm5, %v2953_v59, %v2949_v26  ;;  %v5762_v48 = vmul.f32 1.442695, %v5595_v28  ;;  %v662_v36 = vadd.f32 %v661_v44, %v8732_v23  ;;  %v1122_v44 = vpop.f32.mrf.mxu2  ;;  %v14016_v59 = vld [vmem:[#allocation5_spill] sm:$0xff] }
 0x237   : > { %v4698_v30 = vadd.f32 1.4214138, %v4570_v11  ;;  %7474 = vpow2.f32 %v5760_v47  ;;  %v10135_v9 = vsel %vm1755_vm14, 1.0, %v14002_v6  ;;  %v4315_v22 = vmul.f32 1.0614054, %v10129_v19 }
 0x238   : > { %v10139_v33 = vmul.f32 %v6103_v37, %v9938_v0  ;;  %v5976_v1 = vmul.f32 %v10039_v42, %v5336_v56  ;;  %v10143_v38 = vand.u32 2147483647, %v10119_v2  ;;  %v6480_v35 = vmul.f32 %v6352_v34, %v9554_v60 }
 0x239   : > { %v4826_v24 = vmul.f32 %v4698_v30, %v10098_v4  ;;  %v4443_v47 = vadd.f32 -1.4531521, %v4315_v22  ;;  %v5468_v52 = vsub.f32 0.0, %v10094_v31  ;;  %v6353_v49 = vadd.f32 1.0, %v9828_v61 }
 0x23a   : > { %v7473_v62 = vpop.eup %7472  ;;  %v5209_v20 = vadd.f32 0.2548296, %v5081_v39  ;;  %7476 = vpow2.f32 %v5762_v48  ;;  %v2141_v0 = vmul.f32 0.3275911, %v10143_v38  ;;  %v6608_v37 = vmul.f32 %v6480_v35, %v662_v36 }
 0x23b   : > { %v4571_v42 = vmul.f32 %v4443_v47, %v10129_v19  ;;  %v10152_v28 = vmul.f32 0.5, %v10078_v5  ;;  %vm1756_vm6 = vcmp.ge.f32.partialorder %v10087_v58, 0.0  ;;  %v2957_v60 = vmul.f32 %v7473_v62, %v10110_v53 }
 0x23c   : > { %v4954_v41 = vadd.f32 -0.28449672, %v4826_v24  ;;  %v10156_v54 = vadd.f32 1.0, %v2141_v0  ;;  %6736 = vst [vmem:[%s8785_s10 + $0xe0] sm:$0xff] %v6608_v37  ;;  %v871_v61 = vadd.f32 %v870_v40, %v8768_v57  ;;  %v6481_v56 = vmul.f32 %v6353_v49, %v14016_v59  ;;  %v1331_v0 = vpop.f32.mrf.mxu3 }
 0x23d   : > { %v10161_v34 = vpop.eup %7474  ;;  %v6104_v11 = vsub.f32 1.0, %v5976_v1  ;;  %v4699_v26 = vadd.f32 1.4214138, %v4571_v42  ;;  %v2958_v39 = vsub.f32 1.0, %v2957_v60  ;;  %v5596_v5 = vmul.f32 %v5468_v52, %v10094_v31 }
 0x23e   : > { %v5337_v48 = vmul.f32 %v5209_v20, %v10053_v25  ;;  %v2967_v36 = vand.u32 2147483648, %v10110_v53  ;;  %7478 = vrcp.f32 %v10156_v54  ;;  %v10168_v30 = vadd.f32 %v1122_v44, %v8182_v50 }
 0x23f   : > { %v4827_v40 = vmul.f32 %v4699_v26, %v10129_v19  ;;  %v2959_v22 = vmul.f32 %v7473_v62, %v2958_v39  ;;  %vm2962_vm7 = vweird.f32 %v7473_v62  ;;  %v2965_v1 = vand.u32 2147483647, %v10110_v53 }
 0x240   : > { %v10172_v35 = vpop.eup %7476  ;;  %v5082_v31 = vmul.f32 %v4954_v41, %v10098_v4  ;;  %v10178_v25 = vsel %vm1756_vm6, 1.0, %v14002_v6  ;;  %v10181_v24 = vmul.f32 0.5, %v10102_v14  ;;  %v6609_v47 = vmul.f32 %v6481_v56, %v871_v61 }
 0x241   : > { %v4955_v52 = vadd.f32 -0.28449672, %v4827_v40  ;;  %v2960_v49 = vadd.f32 %v7473_v62, %v2959_v22  ;;  %vm2961_vm8 = vweird.f32 %v10110_v53  ;;  %v5764_v20 = vmul.f32 1.442695, %v5596_v5 }
 0x242   : > { %v5977_v37 = vmul.f32 %v10071_v7, %v5337_v48  ;;  %vm2963_vm9 = vmor %vm2961_vm8, %vm2962_vm7  ;;  %v2968_v42 = vor.u32 1.1754944e-38, %v2967_v36  ;;  %v5469_v60 = vsub.f32 0.0, %v10143_v38  ;;  %6737 = vst [vmem:[%s8785_s10 + $0xe8] sm:$0xff] %v6609_v47  ;;  %v10188_v58 = vmul.f32 0.70710677, %v10168_v30 }
 0x243   : > { %v10191_v14 = vmul.f32 %v6104_v11, %v9957_v46  ;;  %v2964_v44 = vsel %vm2963_vm9, %v7473_v62, %v2960_v49  ;;  %vm2966_vm10 = vcmp.eq.f32.partialorder %v2965_v1, 8.507059e+37  ;;  %vm1757_vm11 = vcmp.ge.f32.partialorder %v10119_v2, 0.0  ;;  %v362_v49 = vld [vmem:[%s8042_s9 + $0x138] sm:$0xff] }
 0x244   : > { %v7479_v53 = vpop.eup %7478  ;;  %v5210_v41 = vadd.f32 0.2548296, %v5082_v31  ;;  %v10194_v61 = vsel %vm2966_vm10, %v2968_v42, %v2964_v44  ;;  %v10197_v7 = vand.u32 2147483647, %v10188_v58  ;;  %v10200_v59 = vadd.f32 %v1331_v0, %v8184_v51  ;;  %7161 = vmatmul.msk.f32.gmra.mxu2 %vm409_vm0, %v362_v49  ;;  %7225 = vmatmul.msk.f32.gmra.mxu3 %vm409_vm0, %v362_v49 }
 0x245   : > { %v5083_v56 = vmul.f32 %v4955_v52, %v10129_v19  ;;  %v4316_v26 = vmul.f32 1.0614054, %v10194_v61  ;;  %7480 = vpow2.f32 %v5764_v20  ;;  %v2972_v46 = vmul.f32 %v7479_v53, %v10156_v54  ;;  %v664_v52 = vpop.f32.mrf.mxu0  ;;  %7033 = vmatmul.msk.f32.gmra.mxu0 %vm409_vm0, %v362_v49 }
 0x246   : > { %v6105_v62 = vsub.f32 1.0, %v5977_v37  ;;  %v10206_v2 = vsel %vm1757_vm11, 1.0, %v14002_v6  ;;  %v5597_v11 = vmul.f32 %v5469_v60, %v10143_v38  ;;  %v2142_v39 = vmul.f32 0.3275911, %v10197_v7  ;;  %v873_v37 = vpop.f32.mrf.mxu1  ;;  %7097 = vmatmul.msk.f32.gmra.mxu1 %vm409_vm0, %v362_v49 }
 0x247   : > { %v4444_v5 = vadd.f32 -1.4531521, %v4316_v26  ;;  %v2973_v48 = vsub.f32 1.0, %v2972_v46  ;;  %v2982_v36 = vand.u32 2147483648, %v10156_v54  ;;  %v6354_v40 = vadd.f32 1.0, %v9933_v45 }
 0x248   : > { %v5338_v22 = vmul.f32 %v5210_v41, %v10098_v4  ;;  %v2980_v1 = vand.u32 2147483647, %v10156_v54  ;;  %v10214_v31 = vadd.f32 1.0, %v2142_v39  ;;  %v10217_v47 = vmul.f32 0.70710677, %v10200_v59 }
 0x249   : > { %v5211_v38 = vadd.f32 0.2548296, %v5083_v56  ;;  %v4572_v20 = vmul.f32 %v4444_v5, %v10194_v61  ;;  %v2974_v0 = vmul.f32 %v7479_v53, %v2973_v48  ;;  %vm2977_vm12 = vweird.f32 %v7479_v53 }
 0x24a   : > { %v10224_v45 = vmul.f32 %v6105_v62, %v10026_v13  ;;  %vm2976_vm13 = vweird.f32 %v10156_v54  ;;  %v5766_v4 = vmul.f32 1.442695, %v5597_v11  ;;  %7482 = vrcp.f32 %v10214_v31 }
 0x24b   : > { %v10230_v42 = vpop.eup %7480  ;;  %v2975_v60 = vadd.f32 %v7479_v53, %v2974_v0  ;;  %v2983_v44 = vor.u32 1.1754944e-38, %v2982_v36  ;;  %v665_v41 = vadd.f32 %v664_v52, %v8732_v23  ;;  %v6482_v56 = vmul.f32 %v6354_v40, %v9671_v27  ;;  %vm2978_vm14 = vmor %vm2976_vm13, %vm2977_vm12  ;;  %v1334_v36 = vpop.f32.mrf.mxu3 }
 0x24c   : > { %v5978_v13 = vmul.f32 %v10161_v34, %v5338_v22  ;;  %v4700_v26 = vadd.f32 1.4214138, %v4572_v20  ;;  %v10237_v54 = vand.u32 2147483647, %v10217_v47  ;;  %v6355_v46 = vadd.f32 1.0, %v9946_v29 }
 0x24d   : > { %v5339_v62 = vmul.f32 %v5211_v38, %v10129_v19  ;;  %v2979_v11 = vsel %vm2978_vm14, %v7479_v53, %v2975_v60  ;;  %vm2981_vm15 = vcmp.eq.f32.partialorder %v2980_v1, 8.507059e+37  ;;  %v10242_v39 = vmul.f32 0.5, %v10168_v30  ;;  %v1125_v53 = vpop.f32.mrf.mxu2 }
 0x24e   : > { %v10244_v5 = vsel %vm2981_vm15, %v2983_v44, %v2979_v11  ;;  %7484 = vpow2.f32 %v5766_v4  ;;  %v2143_v27 = vmul.f32 0.3275911, %v10237_v54  ;;  %v874_v34 = vadd.f32 %v873_v37, %v8768_v57 }
 0x24f   : > { %v4317_v48 = vmul.f32 1.0614054, %v10244_v5  ;;  %vm1758_vm1 = vcmp.ge.f32.partialorder %v10188_v58, 0.0  ;;  %v5470_v29 = vsub.f32 0.0, %v10197_v7  ;;  %v6610_v19 = vmul.f32 %v6482_v56, %v665_v41 }
 0x250   : > { %v7483_v40 = vpop.eup %7482  ;;  %v6106_v30 = vsub.f32 1.0, %v5978_v13  ;;  %v4828_v22 = vmul.f32 %v4700_v26, %v10194_v61  ;;  %v10252_v1 = vadd.f32 1.0, %v2143_v27  ;;  %v6483_v52 = vmul.f32 %v6355_v46, %v9686_v17 }
 0x251   : > { %v5979_v49 = vmul.f32 %v10172_v35, %v5339_v62  ;;  %v4445_v38 = vadd.f32 -1.4531521, %v4317_v48  ;;  %v2987_v20 = vmul.f32 %v7483_v40, %v10214_v31  ;;  %v10258_v58 = vmul.f32 0.5, %v10200_v59  ;;  %6738 = vst [vmem:[%s8785_s10 + $0xf0] sm:$0xff] %v6610_v19 }
 0x252   : > { %v10262_v0 = vsel %vm1758_vm1, 1.0, %v14002_v6  ;;  %7486 = vrcp.f32 %v10252_v1  ;;  %v10266_v4 = vadd.f32 %v1125_v53, %v8182_v50  ;;  %v10269_v37 = vadd.f32 %v1334_v36, %v8184_v51 }
 0x253   : > { %v4573_v17 = vmul.f32 %v4445_v38, %v10244_v5  ;;  %v2988_v35 = vsub.f32 1.0, %v2987_v20  ;;  %v2995_v60 = vand.u32 2147483647, %v10214_v31  ;;  %v5598_v59 = vmul.f32 %v5470_v29, %v10197_v7 }
 0x254   : > { %v10274_v44 = vpop.eup %7484  ;;  %v10277_v41 = vmul.f32 %v6106_v30, %v10068_v12  ;;  %v4956_v56 = vadd.f32 -0.28449672, %v4828_v22  ;;  %v2997_v13 = vand.u32 2147483648, %v10214_v31  ;;  %v6611_v26 = vmul.f32 %v6483_v52, %v874_v34 }
 0x255   : > { %v6107_v46 = vsub.f32 1.0, %v5979_v49  ;;  %v4701_v62 = vadd.f32 1.4214138, %v4573_v17  ;;  %v2989_v11 = vmul.f32 %v7483_v40, %v2988_v35  ;;  %vm2992_vm2 = vweird.f32 %v7483_v40 }
 0x256   : > { %vm2991_vm3 = vweird.f32 %v10214_v31  ;;  %v5471_v27 = vsub.f32 0.0, %v10237_v54  ;;  %6739 = vst [vmem:[%s8785_s10 + $0xf8] sm:$0xff] %v6611_v26  ;;  %v10284_v7 = vmul.f32 0.70710677, %v10266_v4  ;;  %v10287_v48 = vmul.f32 0.70710677, %v10269_v37 }
 0x257   : > { %v4829_v12 = vmul.f32 %v4701_v62, %v10244_v5  ;;  %v2990_v29 = vadd.f32 %v7483_v40, %v2989_v11  ;;  %vm2996_vm4 = vcmp.eq.f32.partialorder %v2995_v60, 8.507059e+37  ;;  %v5768_v34 = vmul.f32 1.442695, %v5598_v59  ;;  %vm2993_vm5 = vmor %vm2991_vm3, %vm2992_vm2  ;;  %v363_v60 = vld [vmem:[%s8042_s9 + $0x140] sm:$0xff]  ;;  %v876_v62 = vpop.f32.mrf.mxu1 }
 0x258   : > { %v7487_v19 = vpop.eup %7486  ;;  %v5084_v53 = vmul.f32 %v4956_v56, %v10194_v61  ;;  %v2998_v31 = vor.u32 1.1754944e-38, %v2997_v13  ;;  %v10292_v36 = vand.u32 2147483647, %v10284_v7  ;;  %v10295_v30 = vand.u32 2147483647, %v10287_v48  ;;  %7162 = vmatmul.msk.f32.gmra.mxu2 %vm409_vm0, %v363_v60  ;;  %7226 = vmatmul.msk.f32.gmra.mxu3 %vm409_vm0, %v363_v60 }
 0x259   : > { %v10298_v22 = vmul.f32 %v6107_v46, %v10135_v9  ;;  %v2994_v52 = vsel %vm2993_vm5, %v7483_v40, %v2990_v29  ;;  %vm1759_vm6 = vcmp.ge.f32.partialorder %v10217_v47, 0.0  ;;  %v3002_v49 = vmul.f32 %v7487_v19, %v10252_v1  ;;  %v667_v46 = vpop.f32.mrf.mxu0  ;;  %7034 = vmatmul.msk.f32.gmra.mxu0 %vm409_vm0, %v363_v60  ;;  %7098 = vmatmul.msk.f32.gmra.mxu1 %vm409_vm0, %v363_v60 }
 0x25a   : > { %v4957_v38 = vadd.f32 -0.28449672, %v4829_v12  ;;  %v10302_v20 = vsel %vm2996_vm4, %v2998_v31, %v2994_v52  ;;  %v5599_v17 = vmul.f32 %v5471_v27, %v10237_v54  ;;  %v2144_v35 = vmul.f32 0.3275911, %v10292_v36 }
 0x25b   : > { %v4318_v59 = vmul.f32 1.0614054, %v10302_v20  ;;  %v3003_v56 = vsub.f32 1.0, %v3002_v49  ;;  %v3010_v13 = vand.u32 2147483647, %v10252_v1  ;;  %v3012_v9 = vand.u32 2147483648, %v10252_v1 }
 0x25c   : > { %v5212_v40 = vadd.f32 0.2548296, %v5084_v53  ;;  %7488 = vpow2.f32 %v5768_v34  ;;  %v10312_v26 = vadd.f32 1.0, %v2144_v35  ;;  %v2145_v54 = vmul.f32 0.3275911, %v10295_v30 }
 0x25d   : > { %v4446_v11 = vadd.f32 -1.4531521, %v4318_v59  ;;  %v10320_v27 = vsel %vm1759_vm6, 1.0, %v14002_v6  ;;  %v3004_v12 = vmul.f32 %v7487_v19, %v3003_v56  ;;  %vm3007_vm7 = vweird.f32 %v7487_v19 }
 0x25e   : > { %v5085_v29 = vmul.f32 %v4957_v38, %v10244_v5  ;;  %vm3006_vm8 = vweird.f32 %v10252_v1  ;;  %v5770_v34 = vmul.f32 1.442695, %v5599_v17  ;;  %7490 = vrcp.f32 %v10312_v26 }
 0x25f   : > { %v4574_v53 = vmul.f32 %v4446_v11, %v10302_v20  ;;  %v3005_v31 = vadd.f32 %v7487_v19, %v3004_v12  ;;  %vm3011_vm9 = vcmp.eq.f32.partialorder %v3010_v13, 8.507059e+37  ;;  %v3013_v52 = vor.u32 1.1754944e-38, %v3012_v9  ;;  %vm3008_vm10 = vmor %vm3006_vm8, %vm3007_vm7 }
 0x260   : > { %v5340_v49 = vmul.f32 %v5212_v40, %v10194_v61  ;;  %v10328_v47 = vmul.f32 0.5, %v10266_v4  ;;  %v10330_v35 = vadd.f32 1.0, %v2145_v54  ;;  %v6356_v38 = vadd.f32 1.0, %v9991_v63 }
 0x261   : > { %v4702_v60 = vadd.f32 1.4214138, %v4574_v53  ;;  %v3009_v1 = vsel %vm3008_vm10, %v7487_v19, %v3005_v31  ;;  %v5472_v17 = vsub.f32 0.0, %v10292_v36  ;;  %v668_v59 = vadd.f32 %v667_v46, %v8732_v23 }
 0x262   : > { %v10335_v56 = vpop.eup %7488  ;;  %v5213_v13 = vadd.f32 0.2548296, %v5085_v29  ;;  %v10337_v9 = vsel %vm3011_vm9, %v3013_v52, %v3009_v1  ;;  %v3025_v61 = vand.u32 2147483647, %v10312_v26  ;;  %7492 = vrcp.f32 %v10330_v35  ;;  %v1128_v52 = vpop.f32.mrf.mxu2 }
 0x263   : > { %v4830_v4 = vmul.f32 %v4702_v60, %v10302_v20  ;;  %v4319_v40 = vmul.f32 1.0614054, %v10337_v9  ;;  %v3027_v63 = vand.u32 2147483648, %v10312_v26  ;;  %v5473_v19 = vsub.f32 0.0, %v10295_v30 }
 0x264   : > { %v7491_v54 = vpop.eup %7490  ;;  %v10346_v46 = vmul.f32 %v10230_v42, %v5340_v49  ;;  %7494 = vpow2.f32 %v5770_v34  ;;  %v10349_v11 = vmul.f32 0.5, %v10269_v37  ;;  %v6484_v12 = vmul.f32 %v6356_v38, %v9765_v16 }
 0x265   : > { %v4958_v29 = vadd.f32 -0.28449672, %v4830_v4  ;;  %v4447_v53 = vadd.f32 -1.4531521, %v4319_v40  ;;  %v3017_v31 = vmul.f32 %v7491_v54, %v10312_v26  ;;  %vm3021_vm11 = vweird.f32 %v10312_v26 }
 0x266   : > { %v5341_v60 = vmul.f32 %v5213_v13, %v10244_v5  ;;  %vm10355_vm12 = vcmp.eq.f32.partialorder %v3025_v61, 8.507059e+37  ;;  %v5600_v42 = vmul.f32 %v5472_v17, %v10292_v36  ;;  %v6612_v37 = vmul.f32 %v6484_v12, %v668_v59 }
 0x267   : > { %v4575_v34 = vmul.f32 %v4447_v53, %v10337_v9  ;;  %vm1760_vm13 = vcmp.ge.f32.partialorder %v10284_v7, 0.0  ;;  %v3018_v16 = vsub.f32 1.0, %v3017_v31  ;;  %v3028_v49 = vor.u32 1.1754944e-38, %v3027_v63  ;;  %v1337_v63 = vpop.f32.mrf.mxu3 }
 0x268   : > { %v5601_v38 = vmul.f32 %v5473_v19, %v10295_v30  ;;  %v7493_v4 = vpop.eup %7492  ;;  %v5086_v40 = vmul.f32 %v4958_v29, %v10302_v20  ;;  %vm1761_vm14 = vcmp.ge.f32.partialorder %v10287_v48, 0.0  ;;  %6740 = vst [vmem:[%s8785_s10 + $0x100] sm:$0xff] %v6612_v37  ;;  %v877_v5 = vadd.f32 %v876_v62, %v8768_v57 }
 0x269   : > { %v6357_v13 = vadd.f32 1.0, %v10020_v21  ;;  %v10369_v36 = vadd.f32 %v1128_v52, %v8182_v50  ;;  %v4703_v17 = vadd.f32 1.4214138, %v4575_v34  ;;  %v3019_v59 = vmul.f32 %v7491_v54, %v3018_v16 }
 0x26a   : > { %vm3022_vm15 = vweird.f32 %v7491_v54  ;;  %v3032_v61 = vmul.f32 %v7493_v4, %v10330_v35  ;;  %v10372_v30 = vpop.eup %7494  ;;  %v5981_v19 = vmul.f32 %v10274_v44, %v5341_v60  ;;  %v5772_v12 = vmul.f32 1.442695, %v5600_v42 }
 0x26b   : > { %v6485_v29 = vmul.f32 %v6357_v13, %v9776_v18  ;;  %v10377_v62 = vmul.f32 0.70710677, %v10369_v36  ;;  %v4831_v21 = vmul.f32 %v4703_v17, %v10337_v9  ;;  %v3020_v53 = vadd.f32 %v7491_v54, %v3019_v59  ;;  %vm3023_vm1 = vmor %vm3021_vm11, %vm3022_vm15 }
 0x26c   : > { %v3033_v31 = vsub.f32 1.0, %v3032_v61  ;;  %v3042_v52 = vand.u32 2147483648, %v10330_v35  ;;  %v5214_v37 = vadd.f32 0.2548296, %v5086_v40  ;;  %v1338_v18 = vadd.f32 %v1337_v63, %v8184_v51 }
 0x26d   : > { %v6613_v34 = vmul.f32 %v6485_v29, %v877_v5  ;;  %v10384_v44 = vand.u32 2147483647, %v10377_v62  ;;  %v3024_v60 = vsel %vm3023_vm1, %v7491_v54, %v3020_v53  ;;  %vm3037_vm2 = vweird.f32 %v7493_v4  ;;  %v364_v54 = vld [vmem:[%s8042_s9 + $0x148] sm:$0xff]  ;;  %v879_v53 = vpop.f32.mrf.mxu1 }
 0x26e   : > { %v3034_v42 = vmul.f32 %v7493_v4, %v3033_v31  ;;  %v3040_v16 = vand.u32 2147483647, %v10330_v35  ;;  %v6108_v13 = vsub.f32 1.0, %v10346_v46  ;;  %v4959_v17 = vadd.f32 -0.28449672, %v4831_v21  ;;  %7163 = vmatmul.msk.f32.gmra.mxu2 %vm409_vm0, %v364_v54  ;;  %7227 = vmatmul.msk.f32.gmra.mxu3 %vm409_vm0, %v364_v54 }
 0x26f   : > { %v10391_v40 = vsel %vm10355_vm12, %v3028_v49, %v3024_v60  ;;  %6741 = vst [vmem:[%s8785_s10 + $0x108] sm:$0xff] %v6613_v34  ;;  %v2146_v26 = vmul.f32 0.3275911, %v10384_v44  ;;  %v6109_v5 = vsub.f32 1.0, %v5981_v19  ;;  %vm3036_vm3 = vweird.f32 %v10330_v35  ;;  %7099 = vmatmul.msk.f32.gmra.mxu1 %vm409_vm0, %v364_v54 }
 0x270   : > { %v4320_v59 = vmul.f32 1.0614054, %v10391_v40  ;;  %v3035_v61 = vadd.f32 %v7493_v4, %v3034_v42  ;;  %v5342_v63 = vmul.f32 %v5214_v37, %v10302_v20  ;;  %vm10399_vm4 = vmor %vm3036_vm3, %vm3037_vm2  ;;  %v3043_v46 = vor.u32 1.1754944e-38, %v3042_v52  ;;  %v670_v20 = vpop.f32.mrf.mxu0  ;;  %7035 = vmatmul.msk.f32.gmra.mxu0 %vm409_vm0, %v364_v54 }
 0x271   : > { %v10403_v1 = vadd.f32 1.0, %v2146_v26  ;;  %v10405_v49 = vmul.f32 0.70710677, %v1338_v18  ;;  %vm3041_vm5 = vcmp.eq.f32.partialorder %v3040_v16, 8.507059e+37  ;;  %v5774_v21 = vmul.f32 1.442695, %v5601_v38 }
 0x272   : > { %v4448_v19 = vadd.f32 -1.4531521, %v4320_v59  ;;  %v3039_v35 = vsel %vm10399_vm4, %v7493_v4, %v3035_v61  ;;  %v5087_v31 = vmul.f32 %v4959_v17, %v10337_v9  ;;  %v10417_v52 = vsel %vm1760_vm13, 1.0, %v14002_v6 }
 0x273   : > { %v10419_v37 = vsel %vm3041_vm5, %v3043_v46, %v3039_v35  ;;  %7496 = vrcp.f32 %v10403_v1  ;;  %v10423_v4 = vmul.f32 %v6108_v13, %v10178_v25  ;;  %v10429_v34 = vsel %vm1761_vm14, 1.0, %v14002_v6 }
 0x274   : > { %v4576_v38 = vmul.f32 %v4448_v19, %v10391_v40  ;;  %v4321_v60 = vmul.f32 1.0614054, %v10419_v37  ;;  %v5982_v7 = vmul.f32 %v10335_v56, %v5342_v63  ;;  %7498 = vpow2.f32 %v5772_v12 }
 0x275   : > { %v10434_v42 = vand.u32 2147483647, %v10405_v49  ;;  %v6358_v16 = vadd.f32 1.0, %v10125_v55  ;;  %v10438_v25 = vmul.f32 %v6109_v5, %v10206_v2  ;;  %7500 = vpow2.f32 %v5774_v21 }
 0x276   : > { %v4704_v13 = vadd.f32 1.4214138, %v4576_v38  ;;  %v4449_v17 = vadd.f32 -1.4531521, %v4321_v60  ;;  %v5215_v26 = vadd.f32 0.2548296, %v5087_v31  ;;  %v671_v61 = vadd.f32 %v670_v20, %v8732_v23 }
 0x277   : > { %v5474_v48 = vsub.f32 0.0, %v10384_v44  ;;  %v2147_v59 = vmul.f32 0.3275911, %v10434_v42  ;;  %v10446_v54 = vmul.f32 0.5, %v10369_v36  ;;  %vm1762_vm6 = vcmp.ge.f32.partialorder %v10377_v62, 0.0 }
 0x278   : > { %v4832_v56 = vmul.f32 %v4704_v13, %v10391_v40  ;;  %v4577_v12 = vmul.f32 %v4449_v17, %v10419_v37  ;;  %v6110_v2 = vsub.f32 1.0, %v5982_v7  ;;  %v6486_v63 = vmul.f32 %v6358_v16, %v9849_v8  ;;  %v1131_v16 = vpop.f32.mrf.mxu2 }
 0x279   : > { %v7497_v55 = vpop.eup %7496  ;;  %v10449_v5 = vadd.f32 1.0, %v2147_v59  ;;  %v6359_v29 = vadd.f32 1.0, %v10139_v33  ;;  %v10454_v21 = vmul.f32 0.5, %v1338_v18  ;;  %v5343_v36 = vmul.f32 %v5215_v26, %v10337_v9  ;;  %v1340_v59 = vpop.f32.mrf.mxu3 }
 0x27a   : > { %v4960_v46 = vadd.f32 -0.28449672, %v4832_v56  ;;  %v4705_v19 = vadd.f32 1.4214138, %v4577_v12  ;;  %v3047_v35 = vmul.f32 %v7497_v55, %v10403_v1  ;;  %v10456_v20 = vpop.eup %7498  ;;  %v5602_v31 = vmul.f32 %v5474_v48, %v10384_v44 }
 0x27b   : > { %7502 = vrcp.f32 %v10449_v5  ;;  %v880_v38 = vadd.f32 %v879_v53, %v8768_v57  ;;  %v10462_v60 = vpop.eup %7500  ;;  %v3055_v7 = vand.u32 2147483647, %v10403_v1  ;;  %v3057_v18 = vand.u32 2147483648, %v10403_v1 }
 0x27c   : > { %v4833_v8 = vmul.f32 %v4705_v19, %v10419_v37  ;;  %v3048_v33 = vsub.f32 1.0, %v3047_v35  ;;  %v10468_v13 = vmul.f32 %v6110_v2, %v10262_v0  ;;  %v10473_v9 = vsel %vm1762_vm6, 1.0, %v14002_v6 }
 0x27d   : > { %v6614_v44 = vmul.f32 %v6486_v63, %v671_v61  ;;  %v6487_v53 = vmul.f32 %v6359_v29, %v9855_v32  ;;  %v5088_v17 = vmul.f32 %v4960_v46, %v10391_v40  ;;  %vm3052_vm7 = vweird.f32 %v7497_v55 }
 0x27e   : > { %v4961_v26 = vadd.f32 -0.28449672, %v4833_v8  ;;  %v3049_v48 = vmul.f32 %v7497_v55, %v3048_v33  ;;  %v5983_v56 = vmul.f32 %v10372_v30, %v5343_v36  ;;  %vm3051_vm8 = vweird.f32 %v10403_v1 }
 0x27f   : > { %6742 = vst [vmem:[%s8785_s10 + $0x110] sm:$0xff] %v6614_v44  ;;  %v6615_v0 = vmul.f32 %v6487_v53, %v880_v38  ;;  %v1132_v62 = vadd.f32 %v1131_v16, %v8182_v50  ;;  %vm3056_vm9 = vcmp.eq.f32.partialorder %v3055_v7, 8.507059e+37  ;;  %v3058_v61 = vor.u32 1.1754944e-38, %v3057_v18  ;;  %vm3053_vm10 = vmor %vm3051_vm8, %vm3052_vm7  ;;  %v365_v16 = vld [vmem:[%s8042_s9 + $0x150] sm:$0xff] }
 0x280   : > { %v3050_v12 = vadd.f32 %v7497_v55, %v3049_v48  ;;  %v5776_v2 = vmul.f32 1.442695, %v5602_v31  ;;  %v5089_v63 = vmul.f32 %v4961_v26, %v10419_v37  ;;  %v5475_v29 = vsub.f32 0.0, %v10434_v42  ;;  %7164 = vmatmul.msk.f32.gmra.mxu2 %vm409_vm0, %v365_v16  ;;  %7228 = vmatmul.msk.f32.gmra.mxu3 %vm409_vm0, %v365_v16 }
 0x281   : > { %v7503_v32 = vpop.eup %7502  ;;  %6743 = vst [vmem:[%s8785_s10 + $0x118] sm:$0xff] %v6615_v0  ;;  %v10484_v46 = vmul.f32 0.70710677, %v1132_v62  ;;  %v1341_v30 = vadd.f32 %v1340_v59, %v8184_v51  ;;  %v5216_v1 = vadd.f32 0.2548296, %v5088_v17  ;;  %vm1763_vm11 = vcmp.ge.f32.partialorder %v10405_v49, 0.0  ;;  %v882_v0 = vpop.f32.mrf.mxu1  ;;  %7100 = vmatmul.msk.f32.gmra.mxu1 %vm409_vm0, %v365_v16 }
 0x282   : > { %v3054_v19 = vsel %vm3053_vm10, %v7497_v55, %v3050_v12  ;;  %v3062_v35 = vmul.f32 %v7503_v32, %v10449_v5  ;;  %v6111_v36 = vsub.f32 1.0, %v5983_v56  ;;  %v3070_v38 = vand.u32 2147483647, %v10449_v5  ;;  %v673_v56 = vpop.f32.mrf.mxu0  ;;  %7036 = vmatmul.msk.f32.gmra.mxu0 %vm409_vm0, %v365_v16 }
 0x283   : > { %v10489_v31 = vsel %vm3056_vm9, %v3058_v61, %v3054_v19  ;;  %v2020_v8 = vand.u32 2147483647, %v10484_v46  ;;  %7504 = vpow2.f32 %v5776_v2  ;;  %v3072_v18 = vand.u32 2147483648, %v10449_v5 }
 0x284   : > { %v4322_v33 = vmul.f32 1.0614054, %v10489_v31  ;;  %v3063_v7 = vsub.f32 1.0, %v3062_v35  ;;  %v5217_v44 = vadd.f32 0.2548296, %v5089_v63  ;;  %v5603_v55 = vmul.f32 %v5475_v29, %v10434_v42 }
 0x285   : > { %v2148_v53 = vmul.f32 0.3275911, %v2020_v8  ;;  %v10497_v17 = vmul.f32 0.70710677, %v1341_v30  ;;  %v5344_v26 = vmul.f32 %v5216_v1, %v10391_v40  ;;  %vm3067_vm12 = vweird.f32 %v7503_v32 }
 0x286   : > { %v4450_v48 = vadd.f32 -1.4531521, %v4322_v33  ;;  %v3064_v59 = vmul.f32 %v7503_v32, %v3063_v7  ;;  %v10505_v42 = vmul.f32 %v6111_v36, %v10320_v27  ;;  %v10510_v12 = vsel %vm1763_vm11, 1.0, %v14002_v6 }
 0x287   : > { %v10512_v61 = vadd.f32 1.0, %v2148_v53  ;;  %v2021_v40 = vand.u32 2147483647, %v10497_v17  ;;  %vm3066_vm13 = vweird.f32 %v10449_v5  ;;  %vm3071_vm14 = vcmp.eq.f32.partialorder %v3070_v38, 8.507059e+37 }
 0x288   : > { %v4578_v2 = vmul.f32 %v4450_v48, %v10489_v31  ;;  %v3065_v63 = vadd.f32 %v7503_v32, %v3064_v59  ;;  %v5345_v29 = vmul.f32 %v5217_v44, %v10419_v37  ;;  %vm3068_vm15 = vmor %vm3066_vm13, %vm3067_vm12  ;;  %v3073_v27 = vor.u32 1.1754944e-38, %v3072_v18 }
 0x289   : > { %7506 = vrcp.f32 %v10512_v61  ;;  %v6360_v49 = vadd.f32 1.0, %v10191_v14  ;;  %v10520_v1 = vpop.eup %7504  ;;  %v10523_v19 = vmul.f32 %v10456_v20, %v5344_v26  ;;  %v5778_v33 = vmul.f32 1.442695, %v5603_v55  ;;  %v1134_v14 = vpop.f32.mrf.mxu2 }
 0x28a   : > { %v4706_v35 = vadd.f32 1.4214138, %v4578_v2  ;;  %v3069_v36 = vsel %vm3068_vm15, %v7503_v32, %v3065_v63  ;;  %v5476_v5 = vsub.f32 0.0, %v2020_v8  ;;  %v2149_v38 = vmul.f32 0.3275911, %v2021_v40 }
 0x28b   : > { %v10525_v7 = vsel %vm3071_vm14, %v3073_v27, %v3069_v36  ;;  %v674_v37 = vadd.f32 %v673_v56, %v8732_v23  ;;  %v10530_v44 = vmul.f32 0.5, %v1132_v62  ;;  %vm1764_vm1 = vcmp.ge.f32.partialorder %v10484_v46, 0.0 }
 0x28c   : > { %v4834_v18 = vmul.f32 %v4706_v35, %v10489_v31  ;;  %v4323_v16 = vmul.f32 1.0614054, %v10525_v7  ;;  %v10534_v20 = vmul.f32 %v10462_v60, %v5345_v29  ;;  %v10536_v32 = vmul.f32 0.5, %v1341_v30 }
 0x28d   : > { %v10538_v55 = vadd.f32 1.0, %v2149_v38  ;;  %v6488_v53 = vmul.f32 %v6360_v49, %v9954_v3  ;;  %v6112_v26 = vsub.f32 1.0, %v10523_v19  ;;  %v6361_v56 = vadd.f32 1.0, %v10224_v45 }
 0x28e   : > { %v4962_v48 = vadd.f32 -0.28449672, %v4834_v18  ;;  %v4451_v59 = vadd.f32 -1.4531521, %v4323_v16  ;;  %v10544_v2 = vsel %vm1764_vm1, 1.0, %v14002_v6  ;;  %v5604_v46 = vmul.f32 %v5476_v5, %v2020_v8  ;;  %v1343_v5 = vpop.f32.mrf.mxu3 }
 0x28f   : > { %v7507_v62 = vpop.eup %7506  ;;  %7508 = vrcp.f32 %v10538_v55  ;;  %v10548_v60 = vadd.f32 %v1134_v14, %v8182_v50  ;;  %v5477_v63 = vsub.f32 0.0, %v2021_v40  ;;  %v883_v29 = vadd.f32 %v882_v0, %v8768_v57 }
 0x290   : > { %v4579_v30 = vmul.f32 %v4451_v59, %v10525_v7  ;;  %v3077_v3 = vmul.f32 %v7507_v62, %v10512_v61  ;;  %v6113_v45 = vsub.f32 1.0, %v10534_v20  ;;  %v3085_v27 = vand.u32 2147483647, %v10512_v61 }
 0x291   : > { %vm1765_vm2 = vcmp.ge.f32.partialorder %v10497_v17, 0.0  ;;  %v6616_v8 = vmul.f32 %v6488_v53, %v674_v37  ;;  %v5090_v49 = vmul.f32 %v4962_v48, %v10489_v31  ;;  %v6489_v36 = vmul.f32 %v6361_v56, %v9988_v15 }
 0x292   : > { %v4707_v19 = vadd.f32 1.4214138, %v4579_v30  ;;  %v3078_v35 = vsub.f32 1.0, %v3077_v3  ;;  %7510 = vpow2.f32 %v5778_v33  ;;  %v3087_v38 = vand.u32 2147483648, %v10512_v61 }
 0x293   : > { %v5780_v18 = vmul.f32 1.442695, %v5604_v46  ;;  %6744 = vst [vmem:[%s8785_s10 + $0x120] sm:$0xff] %v6616_v8  ;;  %v10561_v0 = vmul.f32 0.70710677, %v10548_v60  ;;  %vm3082_vm3 = vweird.f32 %v7507_v62  ;;  %v5605_v14 = vmul.f32 %v5477_v63, %v2021_v40 }
 0x294   : > { %v3079_v16 = vmul.f32 %v7507_v62, %v3078_v35  ;;  %v6617_v37 = vmul.f32 %v6489_v36, %v883_v29  ;;  %v4835_v53 = vmul.f32 %v4707_v19, %v10525_v7  ;;  %vm3081_vm4 = vweird.f32 %v10512_v61  ;;  %v366_v36 = vld [vmem:[%s8042_s9 + $0x158] sm:$0xff] }
 0x295   : > { %v7509_v20 = vpop.eup %7508  ;;  %v10566_v15 = vand.u32 2147483647, %v10561_v0  ;;  %v1344_v33 = vadd.f32 %v1343_v5, %v8184_v51  ;;  %v5218_v48 = vadd.f32 0.2548296, %v5090_v49  ;;  %vm3086_vm5 = vcmp.eq.f32.partialorder %v3085_v27, 8.507059e+37  ;;  %vm3083_vm6 = vmor %vm3081_vm4, %vm3082_vm3  ;;  %7165 = vmatmul.msk.f32.gmra.mxu2 %vm409_vm0, %v366_v36  ;;  %7229 = vmatmul.msk.f32.gmra.mxu3 %vm409_vm0, %v366_v36 }
 0x296   : > { %v3080_v59 = vadd.f32 %v7507_v62, %v3079_v16  ;;  %v3092_v56 = vmul.f32 %v7509_v20, %v10538_v55  ;;  %6745 = vst [vmem:[%s8785_s10 + $0x128] sm:$0xff] %v6617_v37  ;;  %v3088_v40 = vor.u32 1.1754944e-38, %v3087_v38  ;;  %7512 = vpow2.f32 %v5780_v18  ;;  %v885_v37 = vpop.f32.mrf.mxu1  ;;  %7101 = vmatmul.msk.f32.gmra.mxu1 %vm409_vm0, %v366_v36 }
 0x297   : > { %v3100_v46 = vand.u32 2147483647, %v10538_v55  ;;  %v2150_v30 = vmul.f32 0.3275911, %v10566_v15  ;;  %v3102_v63 = vand.u32 2147483648, %v10538_v55  ;;  %v5346_v5 = vmul.f32 %v5218_v48, %v10489_v31  ;;  %v676_v31 = vpop.f32.mrf.mxu0  ;;  %7037 = vmatmul.msk.f32.gmra.mxu0 %vm409_vm0, %v366_v36 }
 0x298   : > { %v3084_v61 = vsel %vm3083_vm6, %v7507_v62, %v3080_v59  ;;  %v3093_v3 = vsub.f32 1.0, %v3092_v56  ;;  %v5782_v29 = vmul.f32 1.442695, %v5605_v14  ;;  %v10574_v8 = vpop.eup %7510  ;;  %v4963_v49 = vadd.f32 -0.28449672, %v4835_v53 }
 0x299   : > { %v10576_v27 = vsel %vm3086_vm5, %v3088_v40, %v3084_v61  ;;  %v10578_v19 = vadd.f32 1.0, %v2150_v30  ;;  %v10580_v35 = vmul.f32 0.70710677, %v1344_v33  ;;  %vm3097_vm7 = vweird.f32 %v7509_v20 }
 0x29a   : > { %v4324_v38 = vmul.f32 1.0614054, %v10576_v27  ;;  %v3094_v18 = vmul.f32 %v7509_v20, %v3093_v3  ;;  %v10588_v62 = vmul.f32 %v6112_v26, %v10417_v52  ;;  %v10591_v16 = vmul.f32 %v6113_v45, %v10429_v34 }
 0x29b   : > { %v10596_v14 = vsel %vm1765_vm2, 1.0, %v14002_v6  ;;  %7514 = vrcp.f32 %v10578_v19  ;;  %vm3096_vm8 = vweird.f32 %v10538_v55  ;;  %vm3101_vm9 = vcmp.eq.f32.partialorder %v3100_v46, 8.507059e+37 }
 0x29c   : > { %v4452_v53 = vadd.f32 -1.4531521, %v4324_v38  ;;  %v3095_v48 = vadd.f32 %v7509_v20, %v3094_v18  ;;  %v10602_v52 = vpop.eup %7512  ;;  %v5091_v34 = vmul.f32 %v4963_v49, %v10525_v7  ;;  %vm3098_vm10 = vmor %vm3096_vm8, %vm3097_vm7  ;;  %v3103_v17 = vor.u32 1.1754944e-38, %v3102_v63 }
 0x29d   : > { %vm1766_vm11 = vcmp.ge.f32.partialorder %v10561_v0, 0.0  ;;  %v10608_v26 = vand.u32 2147483647, %v10580_v35  ;;  %v10611_v45 = vmul.f32 %v10520_v1, %v5346_v5  ;;  %7516 = vpow2.f32 %v5782_v29 }
 0x29e   : > { %v4580_v59 = vmul.f32 %v4452_v53, %v10576_v27  ;;  %v3099_v56 = vsel %vm3098_vm10, %v7509_v20, %v3095_v48  ;;  %v10617_v40 = vmul.f32 0.5, %v10548_v60  ;;  %v5478_v46 = vsub.f32 0.0, %v10566_v15 }
 0x29f   : > { %v10614_v55 = vsel %vm3101_vm9, %v3103_v17, %v3099_v56  ;;  %v2151_v30 = vmul.f32 0.3275911, %v10608_v26  ;;  %v10623_v3 = vsel %vm1766_vm11, 1.0, %v14002_v6  ;;  %v10625_v1 = vmul.f32 0.5, %v1344_v33 }
 0x2a0   : > { %v4708_v0 = vadd.f32 1.4214138, %v4580_v59  ;;  %v4325_v61 = vmul.f32 1.0614054, %v10614_v55  ;;  %v5219_v20 = vadd.f32 0.2548296, %v5091_v34  ;;  %v5606_v53 = vmul.f32 %v5478_v46, %v10566_v15 }
 0x2a1   : > { %v7515_v63 = vpop.eup %7514  ;;  %v10627_v29 = vadd.f32 1.0, %v2151_v30  ;;  %v6362_v49 = vadd.f32 1.0, %v10277_v41  ;;  %v6363_v60 = vadd.f32 1.0, %v10298_v22  ;;  %v6114_v36 = vsub.f32 1.0, %v10611_v45  ;;  %v1137_v45 = vpop.f32.mrf.mxu2 }
 0x2a2   : > { %v4836_v5 = vmul.f32 %v4708_v0, %v10576_v27  ;;  %v4453_v38 = vadd.f32 -1.4531521, %v4325_v61  ;;  %v3107_v18 = vmul.f32 %v7515_v63, %v10578_v19  ;;  %v677_v33 = vadd.f32 %v676_v31, %v8732_v23 }
 0x2a3   : > { %7518 = vrcp.f32 %v10627_v29  ;;  %v886_v48 = vadd.f32 %v885_v37, %v8768_v57  ;;  %v10638_v34 = vpop.eup %7516  ;;  %v3115_v17 = vand.u32 2147483647, %v10578_v19  ;;  %vm1767_vm12 = vcmp.ge.f32.partialorder %v10580_v35, 0.0 }
 0x2a4   : > { %v4581_v41 = vmul.f32 %v4453_v38, %v10614_v55  ;;  %v3108_v22 = vsub.f32 1.0, %v3107_v18  ;;  %v5347_v59 = vmul.f32 %v5219_v20, %v10525_v7  ;;  %v3117_v15 = vand.u32 2147483648, %v10578_v19 }
 0x2a5   : > { %v6490_v56 = vmul.f32 %v6362_v49, %v10031_v10  ;;  %v6491_v31 = vmul.f32 %v6363_v60, %v10056_v43  ;;  %v4964_v46 = vadd.f32 -0.28449672, %v4836_v5  ;;  %vm3112_vm13 = vweird.f32 %v7515_v63 }
 0x2a6   : > { %v4709_v37 = vadd.f32 1.4214138, %v4581_v41  ;;  %v3109_v30 = vmul.f32 %v7515_v63, %v3108_v22  ;;  %v5479_v0 = vsub.f32 0.0, %v10608_v26  ;;  %v10649_v18 = vadd.f32 %v1137_v45, %v8182_v50  ;;  %v1346_v41 = vpop.f32.mrf.mxu3 }
 0x2a7   : > { %v6618_v61 = vmul.f32 %v6490_v56, %v677_v33  ;;  %v6619_v38 = vmul.f32 %v6491_v31, %v886_v48  ;;  %vm3111_vm14 = vweird.f32 %v10578_v19  ;;  %v5784_v10 = vmul.f32 1.442695, %v5606_v53 }
 0x2a8   : > { %v4837_v7 = vmul.f32 %v4709_v37, %v10614_v55  ;;  %v3110_v20 = vadd.f32 %v7515_v63, %v3109_v30  ;;  %vm3113_vm15 = vmor %vm3111_vm14, %vm3112_vm13  ;;  %vm3116_vm1 = vcmp.eq.f32.partialorder %v3115_v17, 8.507059e+37  ;;  %v3118_v49 = vor.u32 1.1754944e-38, %v3117_v15 }
 0x2a9   : > { %v7519_v43 = vpop.eup %7518  ;;  %v10656_v60 = vsel %vm1767_vm12, 1.0, %v14002_v6  ;;  %6746 = vst [vmem:[%s8785_s10 + $0x130] sm:$0xff] %v6618_v61  ;;  %v10660_v5 = vmul.f32 0.70710677, %v10649_v18  ;;  %v5987_v33 = vmul.f32 %v10574_v8, %v5347_v59  ;;  %v5092_v48 = vmul.f32 %v4964_v46, %v10576_v27  ;;  %v888_v61 = vpop.f32.mrf.mxu1 }
 0x2aa   : > { %v3114_v19 = vsel %vm3113_vm15, %v7515_v63, %v3110_v20  ;;  %v3122_v53 = vmul.f32 %v7519_v43, %v10627_v29  ;;  %6747 = vst [vmem:[%s8785_s10 + $0x138] sm:$0xff] %v6619_v38  ;;  %v3132_v35 = vand.u32 2147483648, %v10627_v29  ;;  %v5607_v17 = vmul.f32 %v5479_v0, %v10608_v26  ;;  %v367_v63 = vld [vmem:[%s8042_s9 + $0x160] sm:$0xff] }
 0x2ab   : > { %v10666_v22 = vsel %vm3116_vm1, %v3118_v49, %v3114_v19  ;;  %v2024_v45 = vand.u32 2147483647, %v10660_v5  ;;  %v10672_v15 = vmul.f32 %v6114_v36, %v10473_v9  ;;  %v4965_v56 = vadd.f32 -0.28449672, %v4837_v7  ;;  %7166 = vmatmul.msk.f32.gmra.mxu2 %vm409_vm0, %v367_v63  ;;  %7230 = vmatmul.msk.f32.gmra.mxu3 %vm409_vm0, %v367_v63  ;;  %v679_v36 = vpop.f32.mrf.mxu0 }
 0x2ac   : > { %v4326_v8 = vmul.f32 1.0614054, %v10666_v22  ;;  %v3123_v59 = vsub.f32 1.0, %v3122_v53  ;;  %v3130_v31 = vand.u32 2147483647, %v10627_v29  ;;  %v1347_v37 = vadd.f32 %v1346_v41, %v8184_v51  ;;  %7038 = vmatmul.msk.f32.gmra.mxu0 %vm409_vm0, %v367_v63  ;;  %7102 = vmatmul.msk.f32.gmra.mxu1 %vm409_vm0, %v367_v63 }
 0x2ad   : > { %v2152_v46 = vmul.f32 0.3275911, %v2024_v45  ;;  %v6364_v30 = vadd.f32 1.0, %v10423_v4  ;;  %v5220_v26 = vadd.f32 0.2548296, %v5092_v48  ;;  %vm3127_vm2 = vweird.f32 %v7519_v43 }
 0x2ae   : > { %v4454_v0 = vadd.f32 -1.4531521, %v4326_v8  ;;  %v3124_v9 = vmul.f32 %v7519_v43, %v3123_v59  ;;  %v6115_v38 = vsub.f32 1.0, %v5987_v33  ;;  %vm3126_vm3 = vweird.f32 %v10627_v29 }
 0x2af   : > { %v5786_v7 = vmul.f32 1.442695, %v5607_v17  ;;  %v10684_v20 = vadd.f32 1.0, %v2152_v46  ;;  %v5093_v4 = vmul.f32 %v4965_v56, %v10614_v55  ;;  %v3133_v19 = vor.u32 1.1754944e-38, %v3132_v35  ;;  %vm3128_vm4 = vmor %vm3126_vm3, %vm3127_vm2 }
 0x2b0   : > { %v4582_v49 = vmul.f32 %v4454_v0, %v10666_v22  ;;  %v3125_v48 = vadd.f32 %v7519_v43, %v3124_v9  ;;  %v10689_v53 = vmul.f32 0.70710677, %v1347_v37  ;;  %v680_v41 = vadd.f32 %v679_v36, %v8732_v23 }
 0x2b1   : > { %7520 = vrcp.f32 %v10684_v20  ;;  %v6492_v33 = vmul.f32 %v6364_v30, %v10152_v28  ;;  %v5348_v29 = vmul.f32 %v5220_v26, %v10576_v27  ;;  %vm3131_vm5 = vcmp.eq.f32.partialorder %v3130_v31, 8.507059e+37  ;;  %v1140_v26 = vpop.f32.mrf.mxu2 }
 0x2b2   : > { %v4710_v17 = vadd.f32 1.4214138, %v4582_v49  ;;  %v3129_v8 = vsel %vm3128_vm4, %v7519_v43, %v3125_v48  ;;  %v10695_v56 = vmul.f32 %v6115_v38, %v10510_v12  ;;  %7522 = vpow2.f32 %v5784_v10 }
 0x2b3   : > { %v10697_v59 = vsel %vm3131_vm5, %v3133_v19, %v3129_v8  ;;  %v5480_v35 = vsub.f32 0.0, %v2024_v45  ;;  %v5221_v63 = vadd.f32 0.2548296, %v5093_v4  ;;  %vm1768_vm6 = vcmp.ge.f32.partialorder %v10660_v5, 0.0 }
 0x2b4   : > { %v4838_v46 = vmul.f32 %v4710_v17, %v10666_v22  ;;  %v4327_v0 = vmul.f32 1.0614054, %v10697_v59  ;;  %7524 = vpow2.f32 %v5786_v7  ;;  %v10703_v28 = vmul.f32 0.5, %v10649_v18 }
 0x2b5   : > { %v2025_v27 = vand.u32 2147483647, %v10689_v53  ;;  %v6620_v12 = vmul.f32 %v6492_v33, %v680_v41  ;;  %v5988_v10 = vmul.f32 %v10602_v52, %v5348_v29  ;;  %v6365_v30 = vadd.f32 1.0, %v10438_v25 }
 0x2b6   : > { %v4966_v43 = vadd.f32 -0.28449672, %v4838_v46  ;;  %v4455_v31 = vadd.f32 -1.4531521, %v4327_v0  ;;  %v10709_v36 = vsel %vm1768_vm6, 1.0, %v14002_v6  ;;  %v5608_v38 = vmul.f32 %v5480_v35, %v2024_v45 }
 0x2b7   : > { %v7521_v9 = vpop.eup %7520  ;;  %v10711_v5 = vmul.f32 0.5, %v1347_v37  ;;  %v2153_v7 = vmul.f32 0.3275911, %v2025_v27  ;;  %6748 = vst [vmem:[%s8785_s10 + $0x140] sm:$0xff] %v6620_v12  ;;  %v5349_v18 = vmul.f32 %v5221_v63, %v10614_v55  ;;  %v889_v19 = vadd.f32 %v888_v61, %v8768_v57  ;;  %v1349_v37 = vpop.f32.mrf.mxu3 }
 0x2b8   : > { %v5094_v4 = vmul.f32 %v4966_v43, %v10666_v22  ;;  %v4583_v52 = vmul.f32 %v4455_v31, %v10697_v59  ;;  %v3137_v49 = vmul.f32 %v7521_v9, %v10684_v20  ;;  %v7523_v48 = vpop.eup %7522  ;;  %v6493_v41 = vmul.f32 %v6365_v30, %v10181_v24 }
 0x2b9   : > { %v10718_v25 = vadd.f32 1.0, %v2153_v7  ;;  %v1141_v45 = vadd.f32 %v1140_v26, %v8182_v50  ;;  %v6116_v33 = vsub.f32 1.0, %v5988_v10  ;;  %v3147_v55 = vand.u32 2147483648, %v10684_v20 }
 0x2ba   : > { %v4711_v29 = vadd.f32 1.4214138, %v4583_v52  ;;  %v3138_v17 = vsub.f32 1.0, %v3137_v49  ;;  %v10724_v8 = vpop.eup %7524  ;;  %v5222_v35 = vadd.f32 0.2548296, %v5094_v4  ;;  %v5481_v46 = vsub.f32 0.0, %v2025_v27 }
 0x2bb   : > { %v3145_v63 = vand.u32 2147483647, %v10684_v20  ;;  %7526 = vrcp.f32 %v10718_v25  ;;  %v5989_v61 = vmul.f32 %v10638_v34, %v5349_v18  ;;  %vm3142_vm7 = vweird.f32 %v7521_v9 }
 0x2bc   : > { %v3139_v24 = vmul.f32 %v7521_v9, %v3138_v17  ;;  %v1350_v0 = vadd.f32 %v1349_v37, %v8184_v51  ;;  %v4839_v12 = vmul.f32 %v4711_v29, %v10697_v59  ;;  %v5788_v10 = vmul.f32 1.442695, %v5608_v38 }
 0x2bd   : > { %v6621_v43 = vmul.f32 %v6493_v41, %v889_v19  ;;  %v10731_v31 = vmul.f32 0.70710677, %v1141_v45  ;;  %v10734_v30 = vmul.f32 %v6116_v33, %v10544_v2  ;;  %vm3141_vm8 = vweird.f32 %v10684_v20  ;;  %v368_v41 = vld [vmem:[%s8042_s9 + $0x168] sm:$0xff] }
 0x2be   : > { %v3140_v26 = vadd.f32 %v7521_v9, %v3139_v24  ;;  %v3148_v7 = vor.u32 1.1754944e-38, %v3147_v55  ;;  %v5350_v34 = vmul.f32 %v5222_v35, %v10666_v22  ;;  %vm3143_vm9 = vmor %vm3141_vm8, %vm3142_vm7  ;;  %vm1769_vm10 = vcmp.ge.f32.partialorder %v10689_v53, 0.0  ;;  %7167 = vmatmul.msk.f32.gmra.mxu2 %vm409_vm0, %v368_v41  ;;  %7231 = vmatmul.msk.f32.gmra.mxu3 %vm409_vm0, %v368_v41  ;;  %v682_v35 = vpop.f32.mrf.mxu0 }
 0x2bf   : > { %v5609_v18 = vmul.f32 %v5481_v46, %v2025_v27  ;;  %6749 = vst [vmem:[%s8785_s10 + $0x148] sm:$0xff] %v6621_v43  ;;  %v10741_v38 = vand.u32 2147483647, %v10731_v31  ;;  %v6117_v4 = vsub.f32 1.0, %v5989_v61  ;;  %vm3146_vm11 = vcmp.eq.f32.partialorder %v3145_v63, 8.507059e+37  ;;  %v891_v63 = vpop.f32.mrf.mxu1  ;;  %7039 = vmatmul.msk.f32.gmra.mxu0 %vm409_vm0, %v368_v41  ;;  %7103 = vmatmul.msk.f32.gmra.mxu1 %vm409_vm0, %v368_v41 }
 0x2c0   : > { %v3144_v52 = vsel %vm3143_vm9, %v7521_v9, %v3140_v26  ;;  %v10743_v2 = vmul.f32 0.70710677, %v1350_v0  ;;  %v4967_v19 = vadd.f32 -0.28449672, %v4839_v12  ;;  %7528 = vpow2.f32 %v5788_v10 }
 0x2c1   : > { %v7527_v49 = vpop.eup %7526  ;;  %v10745_v20 = vsel %vm3146_vm11, %v3148_v7, %v3144_v52  ;;  %v2154_v22 = vmul.f32 0.3275911, %v10741_v38  ;;  %v10751_v27 = vsel %vm1769_vm10, 1.0, %v14002_v6  ;;  %v3160_v9 = vand.u32 2147483647, %v10718_v25 }
 0x2c2   : > { %v4328_v53 = vmul.f32 1.0614054, %v10745_v20  ;;  %v3152_v37 = vmul.f32 %v7527_v49, %v10718_v25  ;;  %v5990_v33 = vmul.f32 %v7523_v48, %v5350_v34  ;;  %v3162_v29 = vand.u32 2147483648, %v10718_v25 }
 0x2c3   : > { %v5790_v17 = vmul.f32 1.442695, %v5609_v18  ;;  %v10758_v55 = vadd.f32 1.0, %v2154_v22  ;;  %v10763_v46 = vmul.f32 %v6117_v4, %v10596_v14  ;;  %v10766_v12 = vand.u32 2147483647, %v10743_v2 }
 0x2c4   : > { %v4456_v61 = vadd.f32 -1.4531521, %v4328_v53  ;;  %v3153_v24 = vsub.f32 1.0, %v3152_v37  ;;  %v5095_v48 = vmul.f32 %v4967_v19, %v10697_v59  ;;  %v10769_v10 = vmul.f32 0.5, %v1141_v45 }
 0x2c5   : > { %7530 = vrcp.f32 %v10758_v55  ;;  %v10772_v43 = vmul.f32 0.5, %v1350_v0  ;;  %vm3156_vm12 = vweird.f32 %v10718_v25  ;;  %vm3157_vm13 = vweird.f32 %v7527_v49 }
 0x2c6   : > { %v4584_v26 = vmul.f32 %v4456_v61, %v10745_v20  ;;  %v3154_v7 = vmul.f32 %v7527_v49, %v3153_v24  ;;  %v10776_v14 = vpop.eup %7528  ;;  %v6118_v34 = vsub.f32 1.0, %v5990_v33  ;;  %vm10778_vm14 = vcmp.eq.f32.partialorder %v3160_v9, 8.507059e+37  ;;  %vm3158_vm1 = vmor %vm3156_vm12, %vm3157_vm13  ;;  %v1143_v24 = vpop.f32.mrf.mxu2 }
 0x2c7   : > { %v3163_v4 = vor.u32 1.1754944e-38, %v3162_v29  ;;  %v2155_v45 = vmul.f32 0.3275911, %v10766_v12  ;;  %7532 = vpow2.f32 %v5790_v17  ;;  %vm1770_vm15 = vcmp.ge.f32.partialorder %v10731_v31, 0.0 }
 0x2c8   : > { %v4712_v52 = vadd.f32 1.4214138, %v4584_v26  ;;  %v3155_v19 = vadd.f32 %v7527_v49, %v3154_v7  ;;  %v5223_v0 = vadd.f32 0.2548296, %v5095_v48  ;;  %v5482_v25 = vsub.f32 0.0, %v10741_v38 }
 0x2c9   : > { %v10785_v22 = vadd.f32 1.0, %v2155_v45  ;;  %v6366_v41 = vadd.f32 1.0, %v10468_v13  ;;  %v683_v9 = vadd.f32 %v682_v35, %v8732_v23  ;;  %v6367_v33 = vadd.f32 1.0, %v10505_v42 }
 0x2ca   : > { %v4840_v53 = vmul.f32 %v4712_v52, %v10745_v20  ;;  %v3159_v37 = vsel %vm3158_vm1, %v7527_v49, %v3155_v19  ;;  %v10792_v17 = vmul.f32 %v6118_v34, %v10623_v3  ;;  %v10799_v61 = vsel %vm1770_vm15, 1.0, %v14002_v6 }
 0x2cb   : > { %v7531_v29 = vpop.eup %7530  ;;  %v10796_v31 = vsel %vm10778_vm14, %v3163_v4, %v3159_v37  ;;  %7534 = vrcp.f32 %v10785_v22  ;;  %v892_v42 = vadd.f32 %v891_v63, %v8768_v57  ;;  %v5351_v3 = vmul.f32 %v5223_v0, %v10697_v59 }
 0x2cc   : > { %v4968_v13 = vadd.f32 -0.28449672, %v4840_v53  ;;  %v4329_v49 = vmul.f32 1.0614054, %v10796_v31  ;;  %v3167_v35 = vmul.f32 %v7531_v29, %v10758_v55  ;;  %v3175_v48 = vand.u32 2147483647, %v10758_v55 }
 0x2cd   : > { %v5610_v26 = vmul.f32 %v5482_v25, %v10741_v38  ;;  %v6494_v7 = vmul.f32 %v6366_v41, %v10242_v39  ;;  %v10809_v34 = vpop.eup %7532  ;;  %v3177_v45 = vand.u32 2147483648, %v10758_v55  ;;  %v6495_v52 = vmul.f32 %v6367_v33, %v10258_v58 }
 0x2ce   : > { %v4457_v18 = vadd.f32 -1.4531521, %v4329_v49  ;;  %v3168_v4 = vsub.f32 1.0, %v3167_v35  ;;  %vm3172_vm2 = vweird.f32 %v7531_v29  ;;  %vm1771_vm3 = vcmp.ge.f32.partialorder %v10743_v2, 0.0 }
 0x2cf   : > { %v5483_v59 = vsub.f32 0.0, %v10766_v12  ;;  %v6622_v63 = vmul.f32 %v6494_v7, %v683_v9  ;;  %v10816_v38 = vadd.f32 %v1143_v24, %v8182_v50  ;;  %v5096_v39 = vmul.f32 %v4968_v13, %v10745_v20  ;;  %v1352_v13 = vpop.f32.mrf.mxu3 }
 0x2d0   : > { %v4585_v19 = vmul.f32 %v4457_v18, %v10796_v31  ;;  %v3169_v0 = vmul.f32 %v7531_v29, %v3168_v4  ;;  %v6623_v25 = vmul.f32 %v6495_v52, %v892_v42  ;;  %v5991_v53 = vmul.f32 %v10724_v8, %v5351_v3 }
 0x2d1   : > { %v7535_v41 = vpop.eup %7534  ;;  %vm3171_vm4 = vweird.f32 %v10758_v55  ;;  %v5792_v58 = vmul.f32 1.442695, %v5610_v26  ;;  %6750 = vst [vmem:[%s8785_s10 + $0x150] sm:$0xff] %v6622_v63  ;;  %v10824_v37 = vmul.f32 0.70710677, %v10816_v38  ;;  %vm3176_vm5 = vcmp.eq.f32.partialorder %v3175_v48, 8.507059e+37 }
 0x2d2   : > { %v4713_v9 = vadd.f32 1.4214138, %v4585_v19  ;;  %v3170_v33 = vadd.f32 %v7531_v29, %v3169_v0  ;;  %v3182_v49 = vmul.f32 %v7535_v41, %v10785_v22  ;;  %6751 = vst [vmem:[%s8785_s10 + $0x158] sm:$0xff] %v6623_v25  ;;  %vm3173_vm6 = vmor %vm3171_vm4, %vm3172_vm2  ;;  %v3178_v35 = vor.u32 1.1754944e-38, %v3177_v45  ;;  %v369_v45 = vld [vmem:[%s8042_s9 + $0x170] sm:$0xff]  ;;  %v685_v0 = vpop.f32.mrf.mxu0  ;;  %v894_v25 = vpop.f32.mrf.mxu1 }
 0x2d3   : > { %v3190_v8 = vand.u32 2147483647, %v10785_v22  ;;  %v5611_v55 = vmul.f32 %v5483_v59, %v10766_v12  ;;  %v2028_v42 = vand.u32 2147483647, %v10824_v37  ;;  %v5224_v24 = vadd.f32 0.2548296, %v5096_v39  ;;  %7168 = vmatmul.msk.f32.gmra.mxu2 %vm409_vm0, %v369_v45  ;;  %7232 = vmatmul.msk.f32.gmra.mxu3 %vm409_vm0, %v369_v45 }
 0x2d4   : > { %v4841_v3 = vmul.f32 %v4713_v9, %v10796_v31  ;;  %v3174_v26 = vsel %vm3173_vm6, %v7531_v29, %v3170_v33  ;;  %v3183_v7 = vsub.f32 1.0, %v3182_v49  ;;  %v3192_v18 = vand.u32 2147483648, %v10785_v22  ;;  %7040 = vmatmul.msk.f32.gmra.mxu0 %vm409_vm0, %v369_v45  ;;  %7104 = vmatmul.msk.f32.gmra.mxu1 %vm409_vm0, %v369_v45 }
 0x2d5   : > { %v10833_v48 = vsel %vm3176_vm5, %v3178_v35, %v3174_v26  ;;  %v2156_v4 = vmul.f32 0.3275911, %v2028_v42  ;;  %v10837_v52 = vadd.f32 %v1352_v13, %v8184_v51  ;;  %vm3187_vm7 = vweird.f32 %v7535_v41 }
 0x2d6   : > { %v4969_v63 = vadd.f32 -0.28449672, %v4841_v3  ;;  %v4330_v19 = vmul.f32 1.0614054, %v10833_v48  ;;  %v3184_v12 = vmul.f32 %v7535_v41, %v3183_v7  ;;  %v6119_v29 = vsub.f32 1.0, %v5991_v53 }
 0x2d7   : > { %vm3186_vm8 = vweird.f32 %v10785_v22  ;;  %v5794_v59 = vmul.f32 1.442695, %v5611_v55  ;;  %v10844_v39 = vadd.f32 1.0, %v2156_v4  ;;  %v5352_v9 = vmul.f32 %v5224_v24, %v10745_v20 }
 0x2d8   : > { %v5097_v33 = vmul.f32 %v4969_v63, %v10796_v31  ;;  %v4458_v49 = vadd.f32 -1.4531521, %v4330_v19  ;;  %v3185_v13 = vadd.f32 %v7535_v41, %v3184_v12  ;;  %vm3188_vm9 = vmor %vm3186_vm8, %vm3187_vm7  ;;  %v3193_v53 = vor.u32 1.1754944e-38, %v3192_v18 }
 0x2d9   : > { %7536 = vrcp.f32 %v10844_v39  ;;  %v10853_v22 = vmul.f32 0.70710677, %v10837_v52  ;;  %v6368_v35 = vadd.f32 1.0, %v10588_v62  ;;  %v10860_v20 = vsel %vm1771_vm3, 1.0, %v14002_v6 }
 0x2da   : > { %v4586_v55 = vmul.f32 %v4458_v49, %v10833_v48  ;;  %v3189_v24 = vsel %vm3188_vm9, %v7535_v41, %v3185_v13  ;;  %vm3191_vm10 = vcmp.eq.f32.partialorder %v3190_v8, 8.507059e+37  ;;  %v5225_v3 = vadd.f32 0.2548296, %v5097_v33  ;;  %v1146_v49 = vpop.f32.mrf.mxu2 }
 0x2db   : > { %v10862_v26 = vsel %vm3191_vm10, %v3193_v53, %v3189_v24  ;;  %v5484_v7 = vsub.f32 0.0, %v2028_v42  ;;  %v686_v18 = vadd.f32 %v685_v0, %v8732_v23  ;;  %v5992_v4 = vmul.f32 %v10776_v14, %v5352_v9 }
 0x2dc   : > { %v4714_v45 = vadd.f32 1.4214138, %v4586_v55  ;;  %7538 = vpow2.f32 %v5792_v58  ;;  %v4331_v62 = vmul.f32 1.0614054, %v10862_v26  ;;  %v10868_v63 = vmul.f32 %v6119_v29, %v10656_v60 }
 0x2dd   : > { %7540 = vpow2.f32 %v5794_v59  ;;  %v2029_v2 = vand.u32 2147483647, %v10853_v22  ;;  %v6496_v41 = vmul.f32 %v6368_v35, %v10328_v47  ;;  %v10874_v12 = vmul.f32 0.5, %v10816_v38 }
 0x2de   : > { %v4842_v8 = vmul.f32 %v4714_v45, %v10833_v48  ;;  %v4459_v19 = vadd.f32 -1.4531521, %v4331_v62  ;;  %v6369_v14 = vadd.f32 1.0, %v10591_v16  ;;  %v5353_v0 = vmul.f32 %v5225_v3, %v10796_v31 }
 0x2df   : > { %v7537_v58 = vpop.eup %7536  ;;  %v5612_v9 = vmul.f32 %v5484_v7, %v2028_v42  ;;  %v2157_v60 = vmul.f32 0.3275911, %v2029_v2  ;;  %v6624_v29 = vmul.f32 %v6496_v41, %v686_v18  ;;  %v6120_v59 = vsub.f32 1.0, %v5992_v4 }
 0x2e0   : > { %v4587_v33 = vmul.f32 %v4459_v19, %v10862_v26  ;;  %vm1772_vm11 = vcmp.ge.f32.partialorder %v10824_v37, 0.0  ;;  %v3197_v47 = vmul.f32 %v7537_v58, %v10844_v39  ;;  %v4970_v13 = vadd.f32 -0.28449672, %v4842_v8 }
 0x2e1   : > { %v10881_v53 = vadd.f32 1.0, %v2157_v60  ;;  %6752 = vst [vmem:[%s8785_s10 + $0x160] sm:$0xff] %v6624_v29  ;;  %v895_v16 = vadd.f32 %v894_v25, %v8768_v57  ;;  %v6497_v38 = vmul.f32 %v6369_v14, %v10349_v11  ;;  %v3205_v55 = vand.u32 2147483647, %v10844_v39 }
 0x2e2   : > { %v10886_v31 = vpop.eup %7538  ;;  %v4715_v42 = vadd.f32 1.4214138, %v4587_v33  ;;  %v3198_v35 = vsub.f32 1.0, %v3197_v47  ;;  %v3207_v24 = vand.u32 2147483648, %v10844_v39  ;;  %v5993_v7 = vmul.f32 %v10809_v34, %v5353_v0  ;;  %v1355_v0 = vpop.f32.mrf.mxu3 }
 0x2e3   : > { %v10890_v3 = vpop.eup %7540  ;;  %v5796_v18 = vmul.f32 1.442695, %v5612_v9  ;;  %7542 = vrcp.f32 %v10881_v53  ;;  %v1147_v4 = vadd.f32 %v1146_v49, %v8182_v50  ;;  %vm3202_vm12 = vweird.f32 %v7537_v58 }
 0x2e4   : > { %v4843_v25 = vmul.f32 %v4715_v42, %v10862_v26  ;;  %v3199_v11 = vmul.f32 %v7537_v58, %v3198_v35  ;;  %v5485_v45 = vsub.f32 0.0, %v2029_v2  ;;  %v5098_v62 = vmul.f32 %v4970_v13, %v10833_v48 }
 0x2e5   : > { %v10900_v41 = vsel %vm1772_vm11, 1.0, %v14002_v6  ;;  %v10903_v34 = vmul.f32 0.5, %v10837_v52  ;;  %v6625_v8 = vmul.f32 %v6497_v38, %v895_v16  ;;  %vm3201_vm13 = vweird.f32 %v10844_v39 }
 0x2e6   : > { %v3200_v19 = vadd.f32 %v7537_v58, %v3199_v11  ;;  %v3208_v14 = vor.u32 1.1754944e-38, %v3207_v24  ;;  %vm1773_vm14 = vcmp.ge.f32.partialorder %v10853_v22, 0.0  ;;  %v10908_v9 = vmul.f32 %v6120_v59, %v10709_v36  ;;  %vm3203_vm15 = vmor %vm3201_vm13, %vm3202_vm12 }
 0x2e7   : > { %v6121_v60 = vsub.f32 1.0, %v5993_v7  ;;  %v4971_v29 = vadd.f32 -0.28449672, %v4843_v25  ;;  %6753 = vst [vmem:[%s8785_s10 + $0x168] sm:$0xff] %v6625_v8  ;;  %v10911_v37 = vmul.f32 0.70710677, %v1147_v4  ;;  %7544 = vpow2.f32 %v5796_v18 }
 0x2e8   : > { %v3204_v33 = vsel %vm3203_vm15, %v7537_v58, %v3200_v19  ;;  %vm3206_vm1 = vcmp.eq.f32.partialorder %v3205_v55, 8.507059e+37  ;;  %v5613_v52 = vmul.f32 %v5485_v45, %v2029_v2  ;;  %v5226_v49 = vadd.f32 0.2548296, %v5098_v62  ;;  %v370_v62 = vld [vmem:[%s8042_s9 + $0x178] sm:$0xff] }
 0x2e9   : > { %v7543_v47 = vpop.eup %7542  ;;  %v10913_v39 = vsel %vm3206_vm1, %v3208_v14, %v3204_v33  ;;  %v10916_v13 = vand.u32 2147483647, %v10911_v37  ;;  %v1356_v36 = vadd.f32 %v1355_v0, %v8184_v51  ;;  %v10923_v16 = vsel %vm1773_vm14, 1.0, %v14002_v6  ;;  %7169 = vmatmul.msk.f32.gmra.mxu2 %vm409_vm0, %v370_v62  ;;  %7233 = vmatmul.msk.f32.gmra.mxu3 %vm409_vm0, %v370_v62 }
 0x2ea   : > { %v4332_v59 = vmul.f32 1.0614054, %v10913_v39  ;;  %v3212_v58 = vmul.f32 %v7543_v47, %v10881_v53  ;;  %v3220_v2 = vand.u32 2147483647, %v10881_v53  ;;  %v10928_v38 = vmul.f32 %v6121_v60, %v10751_v27  ;;  %v688_v27 = vpop.f32.mrf.mxu0  ;;  %7041 = vmatmul.msk.f32.gmra.mxu0 %vm409_vm0, %v370_v62 }
 0x2eb   : > { %v5099_v42 = vmul.f32 %v4971_v29, %v10862_v26  ;;  %v3222_v35 = vand.u32 2147483648, %v10881_v53  ;;  %v2158_v55 = vmul.f32 0.3275911, %v10916_v13  ;;  %vm3216_vm2 = vweird.f32 %v10881_v53  ;;  %v897_v29 = vpop.f32.mrf.mxu1  ;;  %7105 = vmatmul.msk.f32.gmra.mxu1 %vm409_vm0, %v370_v62 }
 0x2ec   : > { %v4460_v24 = vadd.f32 -1.4531521, %v4332_v59  ;;  %v3213_v7 = vsub.f32 1.0, %v3212_v58  ;;  %v6370_v22 = vadd.f32 1.0, %v10672_v15  ;;  %v5354_v18 = vmul.f32 %v5226_v49, %v10833_v48 }
 0x2ed   : > { %v5798_v25 = vmul.f32 1.442695, %v5613_v52  ;;  %v10936_v11 = vadd.f32 1.0, %v2158_v55  ;;  %v10938_v45 = vmul.f32 0.70710677, %v1356_v36  ;;  %v10941_v8 = vpop.eup %7544  ;;  %vm3217_vm3 = vweird.f32 %v7543_v47 }
 0x2ee   : > { %v4588_v19 = vmul.f32 %v4460_v24, %v10913_v39  ;;  %v3214_v14 = vmul.f32 %v7543_v47, %v3213_v7  ;;  %vm10944_vm4 = vcmp.eq.f32.partialorder %v3220_v2, 8.507059e+37  ;;  %v5227_v15 = vadd.f32 0.2548296, %v5099_v42  ;;  %vm3218_vm5 = vmor %vm3216_vm2, %vm3217_vm3 }
 0x2ef   : > { %v3223_v48 = vor.u32 1.1754944e-38, %v3222_v35  ;;  %v10950_v60 = vmul.f32 0.5, %v1147_v4  ;;  %7546 = vrcp.f32 %v10936_v11  ;;  %v689_v49 = vadd.f32 %v688_v27, %v8732_v23 }
 0x2f0   : > { %v4716_v33 = vadd.f32 1.4214138, %v4588_v19  ;;  %v3215_v52 = vadd.f32 %v7543_v47, %v3214_v14  ;;  %v6498_v59 = vmul.f32 %v6370_v22, %v10446_v54  ;;  %v5994_v58 = vmul.f32 %v10886_v31, %v5354_v18  ;;  %v1149_v18 = vpop.f32.mrf.mxu2 }
 0x2f1   : > { %7548 = vpow2.f32 %v5798_v25  ;;  %v2031_v4 = vand.u32 2147483647, %v10938_v45  ;;  %v6371_v2 = vadd.f32 1.0, %v10695_v56  ;;  %vm1774_vm6 = vcmp.ge.f32.partialorder %v10911_v37, 0.0  ;;  %v1358_v37 = vpop.f32.mrf.mxu3 }
 0x2f2   : > { %v4844_v42 = vmul.f32 %v4716_v33, %v10913_v39  ;;  %v3219_v35 = vsel %vm3218_vm5, %v7543_v47, %v3215_v52  ;;  %v5486_v55 = vsub.f32 0.0, %v10916_v13  ;;  %v5355_v54 = vmul.f32 %v5227_v15, %v10862_v26 }
 0x2f3   : > { %v10969_v31 = vsel %vm10944_vm4, %v3223_v48, %v3219_v35  ;;  %v2159_v53 = vmul.f32 0.3275911, %v2031_v4  ;;  %v898_v24 = vadd.f32 %v897_v29, %v8768_v57  ;;  %v10973_v22 = vmul.f32 0.5, %v1356_v36 }
 0x2f4   : > { %v4972_v7 = vadd.f32 -0.28449672, %v4844_v42  ;;  %v4333_v56 = vmul.f32 1.0614054, %v10969_v31  ;;  %v6626_v47 = vmul.f32 %v6498_v59, %v689_v49  ;;  %v6122_v27 = vsub.f32 1.0, %v5994_v58 }
 0x2f5   : > { %v7547_v25 = vpop.eup %7546  ;;  %v10976_v26 = vsel %vm1774_vm6, 1.0, %v14002_v6  ;;  %v10978_v62 = vadd.f32 1.0, %v2159_v53  ;;  %v6499_v19 = vmul.f32 %v6371_v2, %v10454_v21  ;;  %v5614_v36 = vmul.f32 %v5486_v55, %v10916_v13 }
 0x2f6   : > { %v5100_v14 = vmul.f32 %v4972_v7, %v10913_v39  ;;  %v4461_v0 = vadd.f32 -1.4531521, %v4333_v56  ;;  %v3227_v15 = vmul.f32 %v7547_v25, %v10936_v11  ;;  %6754 = vst [vmem:[%s8785_s10 + $0x170] sm:$0xff] %v6626_v47  ;;  %v5995_v29 = vmul.f32 %v10890_v3, %v5355_v54 }
 0x2f7   : > { %v10985_v48 = vpop.eup %7548  ;;  %7550 = vrcp.f32 %v10978_v62  ;;  %v1150_v33 = vadd.f32 %v1149_v18, %v8182_v50  ;;  %v10991_v52 = vadd.f32 %v1358_v37, %v8184_v51  ;;  %v3235_v59 = vand.u32 2147483647, %v10936_v11 }
 0x2f8   : > { %v4589_v21 = vmul.f32 %v4461_v0, %v10969_v31  ;;  %v3228_v49 = vsub.f32 1.0, %v3227_v15  ;;  %v3237_v13 = vand.u32 2147483648, %v10936_v11  ;;  %v10997_v58 = vmul.f32 %v6122_v27, %v10799_v61 }
 0x2f9   : > { %v5228_v2 = vadd.f32 0.2548296, %v5100_v14  ;;  %v5487_v3 = vsub.f32 0.0, %v2031_v4  ;;  %v6627_v42 = vmul.f32 %v6499_v19, %v898_v24  ;;  %vm3232_vm7 = vweird.f32 %v7547_v25 }
 0x2fa   : > { %v4717_v35 = vadd.f32 1.4214138, %v4589_v21  ;;  %v3229_v55 = vmul.f32 %v7547_v25, %v3228_v49  ;;  %v5800_v54 = vmul.f32 1.442695, %v5614_v36  ;;  %v6123_v53 = vsub.f32 1.0, %v5995_v29  ;;  %v371_v21 = vld [vmem:[%s8042_s9 + $0x180] sm:$0xff] }
 0x2fb   : > { %vm3231_vm8 = vweird.f32 %v10936_v11  ;;  %6755 = vst [vmem:[%s8785_s10 + $0x178] sm:$0xff] %v6627_v42  ;;  %v11001_v7 = vmul.f32 0.70710677, %v1150_v33  ;;  %v11004_v56 = vmul.f32 0.70710677, %v10991_v52  ;;  %vm3236_vm9 = vcmp.eq.f32.partialorder %v3235_v59, 8.507059e+37  ;;  %7170 = vmatmul.msk.f32.gmra.mxu2 %vm409_vm0, %v371_v21  ;;  %7234 = vmatmul.msk.f32.gmra.mxu3 %vm409_vm0, %v371_v21  ;;  %v691_v42 = vpop.f32.mrf.mxu0 }
 0x2fc   : > { %v4845_v47 = vmul.f32 %v4717_v35, %v10969_v31  ;;  %v3230_v61 = vadd.f32 %v7547_v25, %v3229_v55  ;;  %v3238_v18 = vor.u32 1.1754944e-38, %v3237_v13  ;;  %v5356_v37 = vmul.f32 %v5228_v2, %v10913_v39  ;;  %vm3233_vm10 = vmor %vm3231_vm8, %vm3232_vm7  ;;  %v900_v35 = vpop.f32.mrf.mxu1  ;;  %7042 = vmatmul.msk.f32.gmra.mxu0 %vm409_vm0, %v371_v21  ;;  %7106 = vmatmul.msk.f32.gmra.mxu1 %vm409_vm0, %v371_v21 }
 0x2fd   : > { %v7551_v24 = vpop.eup %7550  ;;  %v5615_v27 = vmul.f32 %v5487_v3, %v2031_v4  ;;  %v11009_v19 = vand.u32 2147483647, %v11001_v7  ;;  %v11012_v11 = vand.u32 2147483647, %v11004_v56  ;;  %vm1775_vm11 = vcmp.ge.f32.partialorder %v10938_v45, 0.0 }
 0x2fe   : > { %v3234_v14 = vsel %vm3233_vm10, %v7547_v25, %v3230_v61  ;;  %v3242_v0 = vmul.f32 %v7551_v24, %v10978_v62  ;;  %v3250_v15 = vand.u32 2147483647, %v10978_v62  ;;  %v11018_v36 = vmul.f32 %v6123_v53, %v10860_v20 }
 0x2ff   : > { %v4973_v29 = vadd.f32 -0.28449672, %v4845_v47  ;;  %v11020_v39 = vsel %vm3236_vm9, %v3238_v18, %v3234_v14  ;;  %v2160_v4 = vmul.f32 0.3275911, %v11009_v19  ;;  %7552 = vpow2.f32 %v5800_v54 }
 0x300   : > { %v4334_v49 = vmul.f32 1.0614054, %v11020_v39  ;;  %v3243_v59 = vsub.f32 1.0, %v3242_v0  ;;  %v3252_v25 = vand.u32 2147483648, %v10978_v62  ;;  %v5996_v13 = vmul.f32 %v10941_v8, %v5356_v37 }
 0x301   : > { %v5802_v20 = vmul.f32 1.442695, %v5615_v27  ;;  %v11029_v2 = vadd.f32 1.0, %v2160_v4  ;;  %v2161_v3 = vmul.f32 0.3275911, %v11012_v11  ;;  %v11037_v54 = vsel %vm1775_vm11, 1.0, %v14002_v6 }
 0x302   : > { %v4462_v55 = vadd.f32 -1.4531521, %v4334_v49  ;;  %v3244_v53 = vmul.f32 %v7551_v24, %v3243_v59  ;;  %vm3247_vm12 = vweird.f32 %v7551_v24  ;;  %v5101_v8 = vmul.f32 %v4973_v29, %v10969_v31 }
 0x303   : > { %vm3246_vm13 = vweird.f32 %v10978_v62  ;;  %vm11041_vm14 = vcmp.eq.f32.partialorder %v3250_v15, 8.507059e+37  ;;  %7554 = vrcp.f32 %v11029_v2  ;;  %v3253_v37 = vor.u32 1.1754944e-38, %v3252_v25 }
 0x304   : > { %v4590_v61 = vmul.f32 %v4462_v55, %v11020_v39  ;;  %v3245_v18 = vadd.f32 %v7551_v24, %v3244_v53  ;;  %v11047_v27 = vmul.f32 0.5, %v1150_v33  ;;  %v6124_v45 = vsub.f32 1.0, %v5996_v13  ;;  %vm3248_vm15 = vmor %vm3246_vm13, %vm3247_vm12 }
 0x305   : > { %7556 = vpow2.f32 %v5802_v20  ;;  %v11049_v14 = vadd.f32 1.0, %v2161_v3  ;;  %v6372_v0 = vadd.f32 1.0, %v10734_v30  ;;  %v11052_v62 = vpop.eup %7552  ;;  %vm1776_vm1 = vcmp.ge.f32.partialorder %v11001_v7, 0.0 }
 0x306   : > { %v4718_v15 = vadd.f32 1.4214138, %v4590_v61  ;;  %v3249_v29 = vsel %vm3248_vm15, %v7551_v24, %v3245_v18  ;;  %v692_v4 = vadd.f32 %v691_v42, %v8732_v23  ;;  %v5229_v21 = vadd.f32 0.2548296, %v5101_v8 }
 0x307   : > { %v11058_v33 = vsel %vm11041_vm14, %v3253_v37, %v3249_v29  ;;  %v5488_v49 = vsub.f32 0.0, %v11009_v19  ;;  %7558 = vrcp.f32 %v11049_v14  ;;  %v3265_v25 = vand.u32 2147483647, %v11029_v2 }
 0x308   : > { %v4846_v59 = vmul.f32 %v4718_v15, %v11020_v39  ;;  %v4335_v30 = vmul.f32 1.0614054, %v11058_v33  ;;  %v11066_v24 = vmul.f32 0.5, %v10991_v52  ;;  %v11069_v13 = vmul.f32 %v6124_v45, %v10900_v41  ;;  %v1152_v52 = vpop.f32.mrf.mxu2 }
 0x309   : > { %v7555_v7 = vpop.eup %7554  ;;  %v11072_v20 = vsel %vm1776_vm1, 1.0, %v14002_v6  ;;  %v3267_v3 = vand.u32 2147483648, %v11029_v2  ;;  %v6500_v42 = vmul.f32 %v6372_v0, %v10530_v44  ;;  %v5489_v47 = vsub.f32 0.0, %v11012_v11 }
 0x30a   : > { %v4974_v55 = vadd.f32 -0.28449672, %v4846_v59  ;;  %v4463_v53 = vadd.f32 -1.4531521, %v4335_v30  ;;  %v3257_v8 = vmul.f32 %v7555_v7, %v11029_v2  ;;  %v5357_v41 = vmul.f32 %v5229_v21, %v10969_v31 }
 0x30b   : > { %v11078_v61 = vpop.eup %7556  ;;  %vm3261_vm2 = vweird.f32 %v11029_v2  ;;  %v5616_v18 = vmul.f32 %v5488_v49, %v11009_v19  ;;  %v6628_v37 = vmul.f32 %v6500_v42, %v692_v4  ;;  %vm11085_vm3 = vcmp.eq.f32.partialorder %v3265_v25, 8.507059e+37  ;;  %v1361_v25 = vpop.f32.mrf.mxu3 }
 0x30c   : > { %v5102_v45 = vmul.f32 %v4974_v55, %v11020_v39  ;;  %v4591_v44 = vmul.f32 %v4463_v53, %v11058_v33  ;;  %v3258_v0 = vsub.f32 1.0, %v3257_v8  ;;  %v3268_v59 = vor.u32 1.1754944e-38, %v3267_v3 }
 0x30d   : > { %v7559_v29 = vpop.eup %7558  ;;  %vm1777_vm4 = vcmp.ge.f32.partialorder %v11004_v56, 0.0  ;;  %6756 = vst [vmem:[%s8785_s10 + $0x180] sm:$0xff] %v6628_v37  ;;  %v901_v31 = vadd.f32 %v900_v35, %v8768_v57  ;;  %v6373_v21 = vadd.f32 1.0, %v10763_v46  ;;  %v11094_v19 = vadd.f32 %v1152_v52, %v8182_v50 }
 0x30e   : > { %v4719_v4 = vadd.f32 1.4214138, %v4591_v44  ;;  %v3259_v49 = vmul.f32 %v7555_v7, %v3258_v0  ;;  %vm3262_vm5 = vweird.f32 %v7555_v7  ;;  %v3272_v30 = vmul.f32 %v7559_v29, %v11049_v14 }
 0x30f   : > { %v5230_v42 = vadd.f32 0.2548296, %v5102_v45  ;;  %v5617_v55 = vmul.f32 %v5489_v47, %v11012_v11  ;;  %v6501_v3 = vmul.f32 %v6373_v21, %v10536_v32  ;;  %v11100_v53 = vmul.f32 0.70710677, %v11094_v19  ;;  %vm3263_vm6 = vmor %vm3261_vm2, %vm3262_vm5 }
 0x310   : > { %v5997_v35 = vmul.f32 %v10985_v48, %v5357_v41  ;;  %v4847_v46 = vmul.f32 %v4719_v4, %v11058_v33  ;;  %v3260_v8 = vadd.f32 %v7555_v7, %v3259_v49  ;;  %v3273_v52 = vsub.f32 1.0, %v3272_v30 }
 0x311   : > { %v3282_v37 = vand.u32 2147483648, %v11049_v14  ;;  %v6629_v45 = vmul.f32 %v6501_v3, %v901_v31  ;;  %v2034_v11 = vand.u32 2147483647, %v11100_v53  ;;  %v1362_v32 = vadd.f32 %v1361_v25, %v8184_v51  ;;  %v694_v3 = vpop.f32.mrf.mxu0 }
 0x312   : > { %v3264_v47 = vsel %vm3263_vm6, %v7555_v7, %v3260_v8  ;;  %v3274_v44 = vmul.f32 %v7559_v29, %v3273_v52  ;;  %vm3277_vm7 = vweird.f32 %v7559_v29  ;;  %v3280_v48 = vand.u32 2147483647, %v11049_v14  ;;  %v372_v7 = vld [vmem:[%s8042_s9 + $0x188] sm:$0xff] }
 0x313   : > { %v5358_v41 = vmul.f32 %v5230_v42, %v11020_v39  ;;  %v4975_v0 = vadd.f32 -0.28449672, %v4847_v46  ;;  %v11113_v2 = vsel %vm11085_vm3, %v3268_v59, %v3264_v47  ;;  %6757 = vst [vmem:[%s8785_s10 + $0x188] sm:$0xff] %v6629_v45  ;;  %v2162_v21 = vmul.f32 0.3275911, %v2034_v11  ;;  %7171 = vmatmul.msk.f32.gmra.mxu2 %vm409_vm0, %v372_v7  ;;  %7235 = vmatmul.msk.f32.gmra.mxu3 %vm409_vm0, %v372_v7 }
 0x314   : > { %v4336_v31 = vmul.f32 1.0614054, %v11113_v2  ;;  %v5804_v4 = vmul.f32 1.442695, %v5616_v18  ;;  %v3275_v49 = vadd.f32 %v7559_v29, %v3274_v44  ;;  %vm3276_vm8 = vweird.f32 %v11049_v14  ;;  %7043 = vmatmul.msk.f32.gmra.mxu0 %vm409_vm0, %v372_v7 }
 0x315   : > { %v6125_v30 = vsub.f32 1.0, %v5997_v35  ;;  %vm11119_vm9 = vmor %vm3276_vm8, %vm3277_vm7  ;;  %v3283_v39 = vor.u32 1.1754944e-38, %v3282_v37  ;;  %v11123_v42 = vadd.f32 1.0, %v2162_v21  ;;  %v11125_v15 = vmul.f32 0.70710677, %v1362_v32  ;;  %v903_v35 = vpop.f32.mrf.mxu1  ;;  %7107 = vmatmul.msk.f32.gmra.mxu1 %vm409_vm0, %v372_v7 }
 0x316   : > { %v4464_v59 = vadd.f32 -1.4531521, %v4336_v31  ;;  %v3279_v18 = vsel %vm11119_vm9, %v7559_v29, %v3275_v49  ;;  %vm3281_vm10 = vcmp.eq.f32.partialorder %v3280_v48, 8.507059e+37  ;;  %v5806_v14 = vmul.f32 1.442695, %v5617_v55 }
 0x317   : > { %v5998_v46 = vmul.f32 %v11052_v62, %v5358_v41  ;;  %v5103_v8 = vmul.f32 %v4975_v0, %v11058_v33  ;;  %v11135_v52 = vsel %vm3281_vm10, %v3283_v39, %v3279_v18  ;;  %7560 = vrcp.f32 %v11123_v42 }
 0x318   : > { %v4592_v37 = vmul.f32 %v4464_v59, %v11113_v2  ;;  %7562 = vpow2.f32 %v5804_v4  ;;  %v11142_v29 = vsel %vm1777_vm4, 1.0, %v14002_v6  ;;  %v4337_v55 = vmul.f32 1.0614054, %v11135_v52 }
 0x319   : > { %v11146_v45 = vmul.f32 %v6125_v30, %v10923_v16  ;;  %v5490_v62 = vsub.f32 0.0, %v2034_v11  ;;  %v2035_v47 = vand.u32 2147483647, %v11125_v15  ;;  %v6374_v44 = vadd.f32 1.0, %v10792_v17 }
 0x31a   : > { %v4720_v48 = vadd.f32 1.4214138, %v4592_v37  ;;  %v4465_v41 = vadd.f32 -1.4531521, %v4337_v55  ;;  %7564 = vpow2.f32 %v5806_v14  ;;  %v695_v0 = vadd.f32 %v694_v3, %v8732_v23 }
 0x31b   : > { %v6126_v21 = vsub.f32 1.0, %v5998_v46  ;;  %v5231_v31 = vadd.f32 0.2548296, %v5103_v8  ;;  %vm1778_vm11 = vcmp.ge.f32.partialorder %v11100_v53, 0.0  ;;  %v2163_v56 = vmul.f32 0.3275911, %v2035_v47 }
 0x31c   : > { %v4848_v4 = vmul.f32 %v4720_v48, %v11113_v2  ;;  %v4593_v16 = vmul.f32 %v4465_v41, %v11135_v52  ;;  %v11155_v49 = vmul.f32 0.5, %v11094_v19  ;;  %v11157_v7 = vmul.f32 0.5, %v1362_v32 }
 0x31d   : > { %v7561_v17 = vpop.eup %7560  ;;  %v5618_v30 = vmul.f32 %v5490_v62, %v2034_v11  ;;  %v11159_v25 = vadd.f32 1.0, %v2163_v56  ;;  %v6502_v39 = vmul.f32 %v6374_v44, %v10617_v40  ;;  %v6375_v59 = vadd.f32 1.0, %v10868_v63  ;;  %v1155_v62 = vpop.f32.mrf.mxu2 }
 0x31e   : > { %v11163_v18 = vpop.eup %7562  ;;  %v4976_v53 = vadd.f32 -0.28449672, %v4848_v4  ;;  %v4721_v14 = vadd.f32 1.4214138, %v4593_v16  ;;  %v11166_v3 = vsel %vm1778_vm11, 1.0, %v14002_v6  ;;  %v3287_v19 = vmul.f32 %v7561_v17, %v11123_v42 }
 0x31f   : > { %v11170_v32 = vmul.f32 %v6126_v21, %v10976_v26  ;;  %v5359_v11 = vmul.f32 %v5231_v31, %v11058_v33  ;;  %7566 = vrcp.f32 %v11159_v25  ;;  %v904_v40 = vadd.f32 %v903_v35, %v8768_v57  ;;  %v1364_v31 = vpop.f32.mrf.mxu3 }
 0x320   : > { %v11175_v46 = vpop.eup %7564  ;;  %v4849_v63 = vmul.f32 %v4721_v14, %v11135_v52  ;;  %v3288_v8 = vsub.f32 1.0, %v3287_v19  ;;  %v3295_v37 = vand.u32 2147483647, %v11123_v42  ;;  %v3297_v55 = vand.u32 2147483648, %v11123_v42 }
 0x321   : > { %v5104_v26 = vmul.f32 %v4976_v53, %v11113_v2  ;;  %v5808_v44 = vmul.f32 1.442695, %v5618_v30  ;;  %v6630_v48 = vmul.f32 %v6502_v39, %v695_v0  ;;  %v6503_v33 = vmul.f32 %v6375_v59, %v10625_v1 }
 0x322   : > { %v4977_v41 = vadd.f32 -0.28449672, %v4849_v63  ;;  %v3289_v21 = vmul.f32 %v7561_v17, %v3288_v8  ;;  %vm3292_vm12 = vweird.f32 %v7561_v17  ;;  %v5491_v35 = vsub.f32 0.0, %v2035_v47 }
 0x323   : > { %v5999_v56 = vmul.f32 %v11078_v61, %v5359_v11  ;;  %vm3291_vm13 = vweird.f32 %v11123_v42  ;;  %6758 = vst [vmem:[%s8785_s10 + $0x190] sm:$0xff] %v6630_v48  ;;  %v6631_v4 = vmul.f32 %v6503_v33, %v904_v40  ;;  %v1156_v16 = vadd.f32 %v1155_v62, %v8182_v50 }
 0x324   : > { %v3290_v14 = vadd.f32 %v7561_v17, %v3289_v21  ;;  %vm3296_vm14 = vcmp.eq.f32.partialorder %v3295_v37, 8.507059e+37  ;;  %v3298_v30 = vor.u32 1.1754944e-38, %v3297_v55  ;;  %vm1779_vm15 = vcmp.ge.f32.partialorder %v11125_v15, 0.0  ;;  %vm3293_vm1 = vmor %vm3291_vm13, %vm3292_vm12  ;;  %v697_v15 = vpop.f32.mrf.mxu0 }
 0x325   : > { %v7567_v1 = vpop.eup %7566  ;;  %v5232_v0 = vadd.f32 0.2548296, %v5104_v26  ;;  %v5105_v39 = vmul.f32 %v4977_v41, %v11135_v52  ;;  %6759 = vst [vmem:[%s8785_s10 + $0x198] sm:$0xff] %v6631_v4  ;;  %v11190_v61 = vmul.f32 0.70710677, %v1156_v16  ;;  %v1365_v42 = vadd.f32 %v1364_v31, %v8184_v51  ;;  %v373_v26 = vld [vmem:[%s8042_s9 + $0x190] sm:$0xff]  ;;  %v906_v31 = vpop.f32.mrf.mxu1 }
 0x326   : > { %v3294_v59 = vsel %vm3293_vm1, %v7561_v17, %v3290_v14  ;;  %7568 = vpow2.f32 %v5808_v44  ;;  %v3302_v53 = vmul.f32 %v7567_v1, %v11159_v25  ;;  %v5619_v19 = vmul.f32 %v5491_v35, %v2035_v47  ;;  %7172 = vmatmul.msk.f32.gmra.mxu2 %vm409_vm0, %v373_v26  ;;  %7236 = vmatmul.msk.f32.gmra.mxu3 %vm409_vm0, %v373_v26 }
 0x327   : > { %v6127_v11 = vsub.f32 1.0, %v5999_v56  ;;  %v11194_v40 = vsel %vm3296_vm14, %v3298_v30, %v3294_v59  ;;  %v3310_v63 = vand.u32 2147483647, %v11159_v25  ;;  %v2036_v8 = vand.u32 2147483647, %v11190_v61  ;;  %7044 = vmatmul.msk.f32.gmra.mxu0 %vm409_vm0, %v373_v26  ;;  %7108 = vmatmul.msk.f32.gmra.mxu1 %vm409_vm0, %v373_v26 }
 0x328   : > { %v4338_v37 = vmul.f32 1.0614054, %v11194_v40  ;;  %v11202_v55 = vsel %vm1779_vm15, 1.0, %v14002_v6  ;;  %v3303_v62 = vsub.f32 1.0, %v3302_v53  ;;  %v3312_v17 = vand.u32 2147483648, %v11159_v25 }
 0x329   : > { %v5360_v47 = vmul.f32 %v5232_v0, %v11113_v2  ;;  %v5233_v44 = vadd.f32 0.2548296, %v5105_v39  ;;  %v2164_v48 = vmul.f32 0.3275911, %v2036_v8  ;;  %v1653_v33 = vmul.f32 0.70710677, %v1365_v42 }
 0x32a   : > { %v4466_v41 = vadd.f32 -1.4531521, %v4338_v37  ;;  %v3304_v21 = vmul.f32 %v7567_v1, %v3303_v62  ;;  %vm3307_vm2 = vweird.f32 %v7567_v1  ;;  %v5810_v35 = vmul.f32 1.442695, %v5619_v19 }
 0x32b   : > { %v11212_v56 = vmul.f32 %v6127_v11, %v11037_v54  ;;  %vm3306_vm3 = vweird.f32 %v11159_v25  ;;  %v11215_v2 = vadd.f32 1.0, %v2164_v48  ;;  %v11217_v4 = vand.u32 2147483647, %v1653_v33 }
 0x32c   : > { %v11219_v14 = vpop.eup %7568  ;;  %v4594_v30 = vmul.f32 %v4466_v41, %v11194_v40  ;;  %v3305_v0 = vadd.f32 %v7567_v1, %v3304_v21  ;;  %vm3311_vm4 = vcmp.eq.f32.partialorder %v3310_v63, 8.507059e+37  ;;  %v3313_v39 = vor.u32 1.1754944e-38, %v3312_v17  ;;  %vm3308_vm5 = vmor %vm3306_vm3, %vm3307_vm2 }
 0x32d   : > { %v6000_v59 = vmul.f32 %v11163_v18, %v5360_v47  ;;  %v5361_v53 = vmul.f32 %v5233_v44, %v11135_v52  ;;  %7570 = vrcp.f32 %v11215_v2  ;;  %v6376_v54 = vadd.f32 1.0, %v10908_v9  ;;  %v1158_v9 = vpop.f32.mrf.mxu2 }
 0x32e   : > { %v4722_v25 = vadd.f32 1.4214138, %v4594_v30  ;;  %v3309_v19 = vsel %vm3308_vm5, %v7567_v1, %v3305_v0  ;;  %7572 = vpow2.f32 %v5810_v35  ;;  %v698_v11 = vadd.f32 %v697_v15, %v8732_v23 }
 0x32f   : > { %v11228_v37 = vsel %vm3311_vm4, %v3313_v39, %v3309_v19  ;;  %v11230_v62 = vmul.f32 0.5, %v1156_v16  ;;  %v5492_v63 = vsub.f32 0.0, %v2036_v8  ;;  %v2165_v18 = vmul.f32 0.3275911, %v11217_v4 }
 0x330   : > { %v4850_v52 = vmul.f32 %v4722_v25, %v11194_v40  ;;  %v4339_v17 = vmul.f32 1.0614054, %v11228_v37  ;;  %vm1780_vm6 = vcmp.ge.f32.partialorder %v11190_v61, 0.0  ;;  %v11236_v26 = vmul.f32 0.5, %v1365_v42 }
 0x331   : > { %v6128_v1 = vsub.f32 1.0, %v6000_v59  ;;  %v11239_v47 = vmul.f32 %v11175_v46, %v5361_v53  ;;  %v11241_v44 = vadd.f32 1.0, %v2165_v18  ;;  %v6504_v16 = vmul.f32 %v6376_v54, %v10703_v28 }
 0x332   : > { %v4978_v48 = vadd.f32 -0.28449672, %v4850_v52  ;;  %v4467_v41 = vadd.f32 -1.4531521, %v4339_v17  ;;  %vm1781_vm7 = vcmp.ge.f32.partialorder %v1653_v33, 0.0  ;;  %v6377_v21 = vadd.f32 1.0, %v10928_v38 }
 0x333   : > { %v7571_v35 = vpop.eup %7570  ;;  %v11246_v15 = vsel %vm1780_vm6, 1.0, %v14002_v6  ;;  %v5620_v61 = vmul.f32 %v5492_v63, %v2036_v8  ;;  %7574 = vrcp.f32 %v11241_v44  ;;  %v11250_v42 = vadd.f32 %v1158_v9, %v8182_v50  ;;  %v1367_v63 = vpop.f32.mrf.mxu3 }
 0x334   : > { %v11252_v46 = vpop.eup %7572  ;;  %v5106_v30 = vmul.f32 %v4978_v48, %v11194_v40  ;;  %v4595_v28 = vmul.f32 %v4467_v41, %v11228_v37  ;;  %v3317_v33 = vmul.f32 %v7571_v35, %v11215_v2  ;;  %v907_v38 = vadd.f32 %v906_v31, %v8768_v57 }
 0x335   : > { %v6129_v0 = vsub.f32 1.0, %v11239_v47  ;;  %v3325_v8 = vand.u32 2147483647, %v11215_v2  ;;  %v11261_v39 = vsel %vm1781_vm7, 1.0, %v14002_v6  ;;  %v6632_v59 = vmul.f32 %v6504_v16, %v698_v11 }
 0x336   : > { %v4723_v53 = vadd.f32 1.4214138, %v4595_v28  ;;  %v3318_v54 = vsub.f32 1.0, %v3317_v33  ;;  %v5493_v25 = vsub.f32 0.0, %v11217_v4  ;;  %v6505_v19 = vmul.f32 %v6377_v21, %v10711_v5 }
 0x337   : > { %v11266_v18 = vmul.f32 %v6128_v1, %v11072_v20  ;;  %v3327_v31 = vand.u32 2147483648, %v11215_v2  ;;  %v5812_v52 = vmul.f32 1.442695, %v5620_v61  ;;  %6760 = vst [vmem:[%s8785_s10 + $0x1a0] sm:$0xff] %v6632_v59  ;;  %v1654_v17 = vmul.f32 0.70710677, %v11250_v42 }
 0x338   : > { %v5234_v9 = vadd.f32 0.2548296, %v5106_v30  ;;  %v3319_v47 = vmul.f32 %v7571_v35, %v3318_v54  ;;  %vm3322_vm8 = vweird.f32 %v7571_v35  ;;  %v6633_v11 = vmul.f32 %v6505_v19, %v907_v38 }
 0x339   : > { %v7575_v16 = vpop.eup %7574  ;;  %v4851_v48 = vmul.f32 %v4723_v53, %v11228_v37  ;;  %vm3321_vm9 = vweird.f32 %v11215_v2  ;;  %v2038_v5 = vand.u32 2147483647, %v1654_v17  ;;  %v1368_v20 = vadd.f32 %v1367_v63, %v8184_v51 }
 0x33a   : > { %v3320_v1 = vadd.f32 %v7571_v35, %v3319_v47  ;;  %vm3326_vm10 = vcmp.eq.f32.partialorder %v3325_v8, 8.507059e+37  ;;  %v3332_v41 = vmul.f32 %v7575_v16, %v11241_v44  ;;  %v5621_v21 = vmul.f32 %v5493_v25, %v11217_v4  ;;  %6761 = vst [vmem:[%s8785_s10 + $0x1a8] sm:$0xff] %v6633_v11  ;;  %vm3323_vm11 = vmor %vm3321_vm9, %vm3322_vm8  ;;  %v374_v4 = vld [vmem:[%s8042_s9 + $0x198] sm:$0xff] }
 0x33b   : > { %v3328_v61 = vor.u32 1.1754944e-38, %v3327_v31  ;;  %7576 = vpow2.f32 %v5812_v52  ;;  %v3340_v30 = vand.u32 2147483647, %v11241_v44  ;;  %v2166_v28 = vmul.f32 0.3275911, %v2038_v5  ;;  %7173 = vmatmul.msk.f32.gmra.mxu2 %vm409_vm0, %v374_v4  ;;  %7237 = vmatmul.msk.f32.gmra.mxu3 %vm409_vm0, %v374_v4  ;;  %v909_v52 = vpop.f32.mrf.mxu1 }
 0x33c   : > { %v5362_v33 = vmul.f32 %v5234_v9, %v11194_v40  ;;  %v3324_v2 = vsel %vm3323_vm11, %v7571_v35, %v3320_v1  ;;  %v3333_v38 = vsub.f32 1.0, %v3332_v41  ;;  %v3342_v59 = vand.u32 2147483648, %v11241_v44  ;;  %v700_v35 = vpop.f32.mrf.mxu0  ;;  %7045 = vmatmul.msk.f32.gmra.mxu0 %vm409_vm0, %v374_v4  ;;  %7109 = vmatmul.msk.f32.gmra.mxu1 %vm409_vm0, %v374_v4 }
 0x33d   : > { %v4979_v53 = vadd.f32 -0.28449672, %v4851_v48  ;;  %v11280_v8 = vsel %vm3326_vm10, %v3328_v61, %v3324_v2  ;;  %v11282_v54 = vadd.f32 1.0, %v2166_v28  ;;  %v11284_v19 = vmul.f32 0.70710677, %v1368_v20 }
 0x33e   : > { %v4340_v25 = vmul.f32 1.0614054, %v11280_v8  ;;  %v3334_v63 = vmul.f32 %v7575_v16, %v3333_v38  ;;  %vm3337_vm12 = vweird.f32 %v7575_v16  ;;  %v5814_v31 = vmul.f32 1.442695, %v5621_v21 }
 0x33f   : > { %v11291_v40 = vmul.f32 %v6129_v0, %v11142_v29  ;;  %vm3336_vm13 = vweird.f32 %v11241_v44  ;;  %vm1782_vm14 = vcmp.ge.f32.partialorder %v1654_v17, 0.0  ;;  %7578 = vrcp.f32 %v11282_v54 }
 0x340   : > { %v6002_v9 = vmul.f32 %v11219_v14, %v5362_v33  ;;  %v4468_v47 = vadd.f32 -1.4531521, %v4340_v25  ;;  %v3335_v11 = vadd.f32 %v7575_v16, %v3334_v63  ;;  %v5494_v48 = vsub.f32 0.0, %v2038_v5  ;;  %vm3338_vm15 = vmor %vm3336_vm13, %vm3337_vm12 }
 0x341   : > { %v11298_v1 = vpop.eup %7576  ;;  %v5107_v29 = vmul.f32 %v4979_v53, %v11228_v37  ;;  %vm3341_vm1 = vcmp.eq.f32.partialorder %v3340_v30, 8.507059e+37  ;;  %v3343_v44 = vor.u32 1.1754944e-38, %v3342_v59  ;;  %v11303_v0 = vand.u32 2147483647, %v11284_v19 }
 0x342   : > { %v4596_v41 = vmul.f32 %v4468_v47, %v11280_v8  ;;  %v3339_v21 = vsel %vm3338_vm15, %v7575_v16, %v3335_v11  ;;  %7580 = vpow2.f32 %v5814_v31  ;;  %v11307_v14 = vmul.f32 0.5, %v11250_v42 }
 0x343   : > { %v11309_v61 = vsel %vm3341_vm1, %v3343_v44, %v3339_v21  ;;  %v11313_v28 = vsel %vm1782_vm14, 1.0, %v14002_v6  ;;  %v11315_v33 = vmul.f32 0.5, %v1368_v20  ;;  %v2167_v30 = vmul.f32 0.3275911, %v11303_v0 }
 0x344   : > { %v6130_v2 = vsub.f32 1.0, %v6002_v9  ;;  %v4724_v38 = vadd.f32 1.4214138, %v4596_v41  ;;  %v4341_v59 = vmul.f32 1.0614054, %v11309_v61  ;;  %v5622_v53 = vmul.f32 %v5494_v48, %v2038_v5 }
 0x345   : > { %v7579_v16 = vpop.eup %7578  ;;  %v5235_v4 = vadd.f32 0.2548296, %v5107_v29  ;;  %v11319_v25 = vadd.f32 1.0, %v2167_v30  ;;  %v6378_v42 = vadd.f32 1.0, %v10997_v58  ;;  %v6379_v63 = vadd.f32 1.0, %v11018_v36  ;;  %v1161_v29 = vpop.f32.mrf.mxu2 }
 0x346   : > { %v4852_v17 = vmul.f32 %v4724_v38, %v11280_v8  ;;  %v4469_v31 = vadd.f32 -1.4531521, %v4341_v59  ;;  %v3347_v20 = vmul.f32 %v7579_v16, %v11282_v54  ;;  %vm1783_vm2 = vcmp.ge.f32.partialorder %v11284_v19, 0.0 }
 0x347   : > { %vm3351_vm3 = vweird.f32 %v11282_v54  ;;  %7582 = vrcp.f32 %v11319_v25  ;;  %v701_v5 = vadd.f32 %v700_v35, %v8732_v23  ;;  %v910_v9 = vadd.f32 %v909_v52, %v8768_v57 }
 0x348   : > { %v11330_v47 = vpop.eup %7580  ;;  %v4980_v58 = vadd.f32 -0.28449672, %v4852_v17  ;;  %v4597_v36 = vmul.f32 %v4469_v31, %v11309_v61  ;;  %v3348_v11 = vsub.f32 1.0, %v3347_v20  ;;  %v3355_v48 = vand.u32 2147483647, %v11282_v54 }
 0x349   : > { %v5363_v44 = vmul.f32 %v5235_v4, %v11228_v37  ;;  %v3357_v41 = vand.u32 2147483648, %v11282_v54  ;;  %v6506_v21 = vmul.f32 %v6378_v42, %v10769_v10  ;;  %v6507_v30 = vmul.f32 %v6379_v63, %v10772_v43 }
 0x34a   : > { %v5108_v35 = vmul.f32 %v4980_v58, %v11280_v8  ;;  %v4725_v52 = vadd.f32 1.4214138, %v4597_v36  ;;  %v3349_v38 = vmul.f32 %v7579_v16, %v3348_v11  ;;  %vm3352_vm4 = vweird.f32 %v7579_v16 }
 0x34b   : > { %v5495_v59 = vsub.f32 0.0, %v11303_v0  ;;  %v6634_v17 = vmul.f32 %v6506_v21, %v701_v5  ;;  %v6635_v31 = vmul.f32 %v6507_v30, %v910_v9  ;;  %v11341_v20 = vadd.f32 %v1161_v29, %v8182_v50  ;;  %vm3353_vm5 = vmor %vm3351_vm3, %vm3352_vm4  ;;  %v375_v30 = vld [vmem:[%s8042_s9 + $0x1a0] sm:$0xff] }
 0x34c   : > { %v5236_v37 = vadd.f32 0.2548296, %v5108_v35  ;;  %v4853_v4 = vmul.f32 %v4725_v52, %v11309_v61  ;;  %v3350_v10 = vadd.f32 %v7579_v16, %v3349_v38  ;;  %v5816_v42 = vmul.f32 1.442695, %v5622_v53  ;;  %7174 = vmatmul.msk.f32.gmra.mxu2 %vm409_vm0, %v375_v30  ;;  %7238 = vmatmul.msk.f32.gmra.mxu3 %vm409_vm0, %v375_v30 }
 0x34d   : > { %v7583_v43 = vpop.eup %7582  ;;  %v11345_v63 = vmul.f32 %v6130_v2, %v11166_v3  ;;  %vm3356_vm6 = vcmp.eq.f32.partialorder %v3355_v48, 8.507059e+37  ;;  %v3358_v58 = vor.u32 1.1754944e-38, %v3357_v41  ;;  %6762 = vst [vmem:[%s8785_s10 + $0x1b0] sm:$0xff] %v6634_v17  ;;  %v11351_v5 = vmul.f32 0.70710677, %v11341_v20  ;;  %v1370_v2 = vpop.f32.mrf.mxu3 }
 0x34e   : > { %v4981_v9 = vadd.f32 -0.28449672, %v4853_v4  ;;  %v3354_v36 = vsel %vm3353_vm5, %v7579_v16, %v3350_v10  ;;  %v11356_v53 = vsel %vm1783_vm2, 1.0, %v14002_v6  ;;  %v3362_v3 = vmul.f32 %v7583_v43, %v11319_v25  ;;  %6763 = vst [vmem:[%s8785_s10 + $0x1b8] sm:$0xff] %v6635_v31  ;;  %v912_v17 = vpop.f32.mrf.mxu1  ;;  %7110 = vmatmul.msk.f32.gmra.mxu1 %vm409_vm0, %v375_v30 }
 0x34f   : > { %v6003_v54 = vmul.f32 %v11252_v46, %v5363_v44  ;;  %v11361_v11 = vsel %vm3356_vm6, %v3358_v58, %v3354_v36  ;;  %v5623_v48 = vmul.f32 %v5495_v59, %v11303_v0  ;;  %v2040_v29 = vand.u32 2147483647, %v11351_v5  ;;  %v703_v59 = vpop.f32.mrf.mxu0  ;;  %7046 = vmatmul.msk.f32.gmra.mxu0 %vm409_vm0, %v375_v30 }
 0x350   : > { %v5364_v41 = vmul.f32 %v5236_v37, %v11280_v8  ;;  %v4342_v16 = vmul.f32 1.0614054, %v11361_v11  ;;  %v3363_v21 = vsub.f32 1.0, %v3362_v3  ;;  %v3372_v19 = vand.u32 2147483648, %v11319_v25 }
 0x351   : > { %v3370_v35 = vand.u32 2147483647, %v11319_v25  ;;  %v2168_v52 = vmul.f32 0.3275911, %v2040_v29  ;;  %v1371_v38 = vadd.f32 %v1370_v2, %v8184_v51  ;;  %v6380_v46 = vadd.f32 1.0, %v11069_v13 }
 0x352   : > { %v5109_v0 = vmul.f32 %v4981_v9, %v11309_v61  ;;  %v4470_v8 = vadd.f32 -1.4531521, %v4342_v16  ;;  %v3364_v44 = vmul.f32 %v7583_v43, %v3363_v21  ;;  %vm3367_vm7 = vweird.f32 %v7583_v43 }
 0x353   : > { %v6131_v31 = vsub.f32 1.0, %v6003_v54  ;;  %vm3366_vm8 = vweird.f32 %v11319_v25  ;;  %v5818_v37 = vmul.f32 1.442695, %v5623_v48  ;;  %v11378_v13 = vadd.f32 1.0, %v2168_v52 }
 0x354   : > { %v6004_v4 = vmul.f32 %v11298_v1, %v5364_v41  ;;  %v4598_v10 = vmul.f32 %v4470_v8, %v11361_v11  ;;  %v3365_v58 = vadd.f32 %v7583_v43, %v3364_v44  ;;  %v3373_v9 = vor.u32 1.1754944e-38, %v3372_v19  ;;  %vm3368_vm9 = vmor %vm3366_vm8, %vm3367_vm7 }
 0x355   : > { %7584 = vrcp.f32 %v11378_v13  ;;  %v11383_v36 = vmul.f32 0.70710677, %v1371_v38  ;;  %v704_v3 = vadd.f32 %v703_v59, %v8732_v23  ;;  %v6508_v2 = vmul.f32 %v6380_v46, %v10874_v12 }
 0x356   : > { %v5237_v54 = vadd.f32 0.2548296, %v5109_v0  ;;  %v4726_v25 = vadd.f32 1.4214138, %v4598_v10  ;;  %v3369_v48 = vsel %vm3368_vm9, %v7583_v43, %v3365_v58  ;;  %vm3371_vm10 = vcmp.eq.f32.partialorder %v3370_v35, 8.507059e+37  ;;  %v1164_v0 = vpop.f32.mrf.mxu2 }
 0x357   : > { %v11388_v16 = vmul.f32 %v6131_v31, %v11202_v55  ;;  %7586 = vpow2.f32 %v5816_v42  ;;  %v11390_v1 = vsel %vm3371_vm10, %v3373_v9, %v3369_v48  ;;  %v5496_v41 = vsub.f32 0.0, %v2040_v29  ;;  %v1373_v9 = vpop.f32.mrf.mxu3 }
 0x358   : > { %v6132_v21 = vsub.f32 1.0, %v6004_v4  ;;  %v4854_v19 = vmul.f32 %v4726_v25, %v11361_v11  ;;  %v4343_v30 = vmul.f32 1.0614054, %v11390_v1  ;;  %vm1784_vm11 = vcmp.ge.f32.partialorder %v11351_v5, 0.0 }
 0x359   : > { %7588 = vpow2.f32 %v5818_v37  ;;  %v11396_v12 = vmul.f32 0.5, %v11341_v20  ;;  %v2041_v43 = vand.u32 2147483647, %v11383_v36  ;;  %v6636_v55 = vmul.f32 %v6508_v2, %v704_v3 }
 0x35a   : > { %v5365_v42 = vmul.f32 %v5237_v54, %v11309_v61  ;;  %v4982_v35 = vadd.f32 -0.28449672, %v4854_v19  ;;  %v4471_v52 = vadd.f32 -1.4531521, %v4343_v30  ;;  %v6381_v46 = vadd.f32 1.0, %v11146_v45 }
 0x35b   : > { %v7585_v8 = vpop.eup %7584  ;;  %v11402_v44 = vsel %vm1784_vm11, 1.0, %v14002_v6  ;;  %v5624_v59 = vmul.f32 %v5496_v41, %v2040_v29  ;;  %v11404_v5 = vmul.f32 0.5, %v1371_v38  ;;  %v2169_v31 = vmul.f32 0.3275911, %v2041_v43  ;;  %6764 = vst [vmem:[%s8785_s10 + $0x1c0] sm:$0xff] %v6636_v55 }
 0x35c   : > { %v11408_v20 = vmul.f32 %v6132_v21, %v11246_v15  ;;  %v5110_v37 = vmul.f32 %v4982_v35, %v11361_v11  ;;  %v4599_v61 = vmul.f32 %v4471_v52, %v11390_v1  ;;  %v3377_v4 = vmul.f32 %v7585_v8, %v11378_v13 }
 0x35d   : > { %v7587_v45 = vpop.eup %7586  ;;  %v11413_v10 = vadd.f32 1.0, %v2169_v31  ;;  %v913_v58 = vadd.f32 %v912_v17, %v8768_v57  ;;  %v6509_v29 = vmul.f32 %v6381_v46, %v10903_v34  ;;  %v1165_v38 = vadd.f32 %v1164_v0, %v8182_v50 }
 0x35e   : > { %v6005_v3 = vmul.f32 %v11330_v47, %v5365_v42  ;;  %v4727_v15 = vadd.f32 1.4214138, %v4599_v61  ;;  %v3378_v2 = vsub.f32 1.0, %v3377_v4  ;;  %v3385_v54 = vand.u32 2147483647, %v11378_v13 }
 0x35f   : > { %v11420_v25 = vpop.eup %7588  ;;  %v5238_v48 = vadd.f32 0.2548296, %v5110_v37  ;;  %v3387_v41 = vand.u32 2147483648, %v11378_v13  ;;  %7590 = vrcp.f32 %v11413_v10  ;;  %v5497_v21 = vsub.f32 0.0, %v2041_v43 }
 0x360   : > { %v3379_v17 = vmul.f32 %v7585_v8, %v3378_v2  ;;  %vm3382_vm12 = vweird.f32 %v7585_v8  ;;  %v5820_v34 = vmul.f32 1.442695, %v5624_v59  ;;  %v1374_v19 = vadd.f32 %v1373_v9, %v8184_v51 }
 0x361   : > { %v4855_v47 = vmul.f32 %v4727_v15, %v11390_v1  ;;  %vm3381_vm13 = vweird.f32 %v11378_v13  ;;  %v6637_v30 = vmul.f32 %v6509_v29, %v913_v58  ;;  %v1658_v55 = vmul.f32 0.70710677, %v1165_v38 }
 0x362   : > { %v6133_v42 = vsub.f32 1.0, %v6005_v3  ;;  %v3380_v35 = vadd.f32 %v7585_v8, %v3379_v17  ;;  %vm3386_vm14 = vcmp.eq.f32.partialorder %v3385_v54, 8.507059e+37  ;;  %vm1785_vm15 = vcmp.ge.f32.partialorder %v11383_v36, 0.0  ;;  %vm3383_vm1 = vmor %vm3381_vm13, %vm3382_vm12 }
 0x363   : > { %v5366_v52 = vmul.f32 %v5238_v48, %v11361_v11  ;;  %v3388_v46 = vor.u32 1.1754944e-38, %v3387_v41  ;;  %v5625_v0 = vmul.f32 %v5497_v21, %v2041_v43  ;;  %6765 = vst [vmem:[%s8785_s10 + $0x1c8] sm:$0xff] %v6637_v30  ;;  %v2042_v59 = vand.u32 2147483647, %v1658_v55  ;;  %v376_v11 = vld [vmem:[%s8042_s9 + $0x1a8] sm:$0xff]  ;;  %v706_v41 = vpop.f32.mrf.mxu0  ;;  %v915_v21 = vpop.f32.mrf.mxu1 }
 0x364   : > { %v3384_v31 = vsel %vm3383_vm1, %v7585_v8, %v3380_v35  ;;  %7592 = vpow2.f32 %v5820_v34  ;;  %v3400_v37 = vand.u32 2147483647, %v11413_v10  ;;  %v11431_v13 = vmul.f32 0.70710677, %v1374_v19  ;;  %7175 = vmatmul.msk.f32.gmra.mxu2 %vm409_vm0, %v376_v11  ;;  %7239 = vmatmul.msk.f32.gmra.mxu3 %vm409_vm0, %v376_v11 }
 0x365   : > { %v7591_v61 = vpop.eup %7590  ;;  %v4983_v4 = vadd.f32 -0.28449672, %v4855_v47  ;;  %v11433_v58 = vsel %vm3386_vm14, %v3388_v46, %v3384_v31  ;;  %v11436_v36 = vsel %vm1785_vm15, 1.0, %v14002_v6  ;;  %v2170_v29 = vmul.f32 0.3275911, %v2042_v59  ;;  %7047 = vmatmul.msk.f32.gmra.mxu0 %vm409_vm0, %v376_v11  ;;  %7111 = vmatmul.msk.f32.gmra.mxu1 %vm409_vm0, %v376_v11 }
 0x366   : > { %v11440_v9 = vmul.f32 %v6133_v42, %v11261_v39  ;;  %v4344_v43 = vmul.f32 1.0614054, %v11433_v58  ;;  %v3392_v8 = vmul.f32 %v7591_v61, %v11413_v10  ;;  %v11444_v3 = vmul.f32 0.5, %v1165_v38 }
 0x367   : > { %v6006_v15 = vmul.f32 %v7587_v45, %v5366_v52  ;;  %v3402_v2 = vand.u32 2147483648, %v11413_v10  ;;  %v5822_v54 = vmul.f32 1.442695, %v5625_v0  ;;  %v11449_v48 = vadd.f32 1.0, %v2170_v29 }
 0x368   : > { %v4472_v39 = vadd.f32 -1.4531521, %v4344_v43  ;;  %v3393_v17 = vsub.f32 1.0, %v3392_v8  ;;  %v11453_v38 = vmul.f32 0.5, %v1374_v19  ;;  %v11456_v34 = vand.u32 2147483647, %v11431_v13 }
 0x369   : > { %v5111_v45 = vmul.f32 %v4983_v4, %v11390_v1  ;;  %vm3396_vm2 = vweird.f32 %v11413_v10  ;;  %vm11460_vm3 = vcmp.eq.f32.partialorder %v3400_v37, 8.507059e+37  ;;  %7594 = vrcp.f32 %v11449_v48 }
 0x36a   : > { %v11465_v30 = vpop.eup %7592  ;;  %v4600_v42 = vmul.f32 %v4472_v39, %v11433_v58  ;;  %v3394_v35 = vmul.f32 %v7591_v61, %v3393_v17  ;;  %vm3397_vm4 = vweird.f32 %v7591_v61  ;;  %vm1786_vm5 = vcmp.ge.f32.partialorder %v1658_v55, 0.0 }
 0x36b   : > { %v6134_v19 = vsub.f32 1.0, %v6006_v15  ;;  %v3403_v52 = vor.u32 1.1754944e-38, %v3402_v2  ;;  %v5498_v46 = vsub.f32 0.0, %v2042_v59  ;;  %v2171_v0 = vmul.f32 0.3275911, %v11456_v34  ;;  %vm3398_vm6 = vmor %vm3396_vm2, %vm3397_vm4 }
 0x36c   : > { %v4728_v31 = vadd.f32 1.4214138, %v4600_v42  ;;  %v3395_v4 = vadd.f32 %v7591_v61, %v3394_v35  ;;  %7596 = vpow2.f32 %v5822_v54  ;;  %v707_v37 = vadd.f32 %v706_v41, %v8732_v23 }
 0x36d   : > { %v5239_v29 = vadd.f32 0.2548296, %v5111_v45  ;;  %v11473_v11 = vsel %vm1786_vm5, 1.0, %v14002_v6  ;;  %v11475_v43 = vadd.f32 1.0, %v2171_v0  ;;  %v6382_v55 = vadd.f32 1.0, %v11170_v32  ;;  %v1167_v45 = vpop.f32.mrf.mxu2 }
 0x36e   : > { %v4856_v8 = vmul.f32 %v4728_v31, %v11433_v58  ;;  %v3399_v15 = vsel %vm3398_vm6, %v7591_v61, %v3395_v4  ;;  %vm1787_vm7 = vcmp.ge.f32.partialorder %v11431_v13, 0.0  ;;  %v6383_v2 = vadd.f32 1.0, %v11212_v56 }
 0x36f   : > { %v7595_v54 = vpop.eup %7594  ;;  %v11482_v41 = vmul.f32 %v6134_v19, %v11313_v28  ;;  %v11486_v10 = vsel %vm11460_vm3, %v3403_v52, %v3399_v15  ;;  %v5626_v39 = vmul.f32 %v5498_v46, %v2042_v59  ;;  %7598 = vrcp.f32 %v11475_v43 }
 0x370   : > { %v4984_v17 = vadd.f32 -0.28449672, %v4856_v8  ;;  %v4345_v32 = vmul.f32 1.0614054, %v11486_v10  ;;  %v3407_v61 = vmul.f32 %v7595_v54, %v11449_v48  ;;  %v916_v13 = vadd.f32 %v915_v21, %v8768_v57 }
 0x371   : > { %v5367_v56 = vmul.f32 %v5239_v29, %v11390_v1  ;;  %v3415_v28 = vand.u32 2147483647, %v11449_v48  ;;  %v11495_v42 = vsel %vm1787_vm7, 1.0, %v14002_v6  ;;  %v6510_v47 = vmul.f32 %v6382_v55, %v10950_v60 }
 0x372   : > { %v11498_v59 = vpop.eup %7596  ;;  %v4473_v35 = vadd.f32 -1.4531521, %v4345_v32  ;;  %v3408_v19 = vsub.f32 1.0, %v3407_v61  ;;  %v3417_v52 = vand.u32 2147483648, %v11449_v48  ;;  %v6511_v46 = vmul.f32 %v6383_v2, %v10973_v22 }
 0x373   : > { %vm3412_vm8 = vweird.f32 %v7595_v54  ;;  %v5499_v21 = vsub.f32 0.0, %v11456_v34  ;;  %v6638_v1 = vmul.f32 %v6510_v47, %v707_v37  ;;  %v11504_v0 = vadd.f32 %v1167_v45, %v8182_v50 }
 0x374   : > { %v5112_v31 = vmul.f32 %v4984_v17, %v11433_v58  ;;  %v4601_v60 = vmul.f32 %v4473_v35, %v11486_v10  ;;  %v3409_v4 = vmul.f32 %v7595_v54, %v3408_v19  ;;  %v6639_v29 = vmul.f32 %v6511_v46, %v916_v13  ;;  %v1376_v17 = vpop.f32.mrf.mxu3 }
 0x375   : > { %v7599_v55 = vpop.eup %7598  ;;  %v6007_v8 = vmul.f32 %v11420_v25, %v5367_v56  ;;  %vm3411_vm9 = vweird.f32 %v11449_v48  ;;  %v5824_v22 = vmul.f32 1.442695, %v5626_v39  ;;  %6766 = vst [vmem:[%s8785_s10 + $0x1d0] sm:$0xff] %v6638_v1  ;;  %v11512_v15 = vmul.f32 0.70710677, %v11504_v0 }
 0x376   : > { %v4729_v37 = vadd.f32 1.4214138, %v4601_v60  ;;  %v3410_v2 = vadd.f32 %v7595_v54, %v3409_v4  ;;  %vm3416_vm10 = vcmp.eq.f32.partialorder %v3415_v28, 8.507059e+37  ;;  %v3422_v32 = vmul.f32 %v7599_v55, %v11475_v43  ;;  %6767 = vst [vmem:[%s8785_s10 + $0x1d8] sm:$0xff] %v6639_v29  ;;  %vm3413_vm11 = vmor %vm3411_vm9, %vm3412_vm8  ;;  %v709_v4 = vpop.f32.mrf.mxu0  ;;  %v918_v29 = vpop.f32.mrf.mxu1 }
 0x377   : > { %v3418_v61 = vor.u32 1.1754944e-38, %v3417_v52  ;;  %v3430_v25 = vand.u32 2147483647, %v11475_v43  ;;  %v5627_v48 = vmul.f32 %v5499_v21, %v11456_v34  ;;  %v2044_v39 = vand.u32 2147483647, %v11512_v15  ;;  %v377_v52 = vld [vmem:[%s8042_s9 + $0x1b0] sm:$0xff] }
 0x378   : > { %v5240_v13 = vadd.f32 0.2548296, %v5112_v31  ;;  %v4857_v45 = vmul.f32 %v4729_v37, %v11486_v10  ;;  %v3414_v56 = vsel %vm3413_vm11, %v7595_v54, %v3410_v2  ;;  %v3423_v47 = vsub.f32 1.0, %v3422_v32  ;;  %7176 = vmatmul.msk.f32.gmra.mxu2 %vm409_vm0, %v377_v52  ;;  %7240 = vmatmul.msk.f32.gmra.mxu3 %vm409_vm0, %v377_v52 }
 0x379   : > { %v11521_v28 = vsel %vm3416_vm10, %v3418_v61, %v3414_v56  ;;  %v3432_v35 = vand.u32 2147483648, %v11475_v43  ;;  %v2172_v19 = vmul.f32 0.3275911, %v2044_v39  ;;  %v11525_v46 = vadd.f32 %v1376_v17, %v8184_v51  ;;  %7048 = vmatmul.msk.f32.gmra.mxu0 %vm409_vm0, %v377_v52  ;;  %7112 = vmatmul.msk.f32.gmra.mxu1 %vm409_vm0, %v377_v52 }
 0x37a   : > { %v4985_v1 = vadd.f32 -0.28449672, %v4857_v45  ;;  %v4346_v60 = vmul.f32 1.0614054, %v11521_v28  ;;  %v3424_v34 = vmul.f32 %v7599_v55, %v3423_v47  ;;  %vm3427_vm12 = vweird.f32 %v7599_v55 }
 0x37b   : > { %v6135_v54 = vsub.f32 1.0, %v6007_v8  ;;  %vm3426_vm13 = vweird.f32 %v11475_v43  ;;  %v5826_v21 = vmul.f32 1.442695, %v5627_v48  ;;  %v11532_v31 = vadd.f32 1.0, %v2172_v19 }
 0x37c   : > { %v5368_v37 = vmul.f32 %v5240_v13, %v11433_v58  ;;  %v5113_v2 = vmul.f32 %v4985_v1, %v11486_v10  ;;  %v4474_v32 = vadd.f32 -1.4531521, %v4346_v60  ;;  %v3425_v17 = vadd.f32 %v7599_v55, %v3424_v34  ;;  %vm3428_vm14 = vmor %vm3426_vm13, %vm3427_vm12 }
 0x37d   : > { %v3433_v8 = vor.u32 1.1754944e-38, %v3432_v35  ;;  %7600 = vrcp.f32 %v11532_v31  ;;  %v11541_v43 = vmul.f32 0.70710677, %v11525_v46  ;;  %v6384_v61 = vadd.f32 1.0, %v11266_v18 }
 0x37e   : > { %v4602_v48 = vmul.f32 %v4474_v32, %v11521_v28  ;;  %v3429_v45 = vsel %vm3428_vm14, %v7599_v55, %v3425_v17  ;;  %vm3431_vm15 = vcmp.eq.f32.partialorder %v3430_v25, 8.507059e+37  ;;  %v5500_v56 = vsub.f32 0.0, %v2044_v39  ;;  %v1170_v32 = vpop.f32.mrf.mxu2 }
 0x37f   : > { %v5241_v58 = vadd.f32 0.2548296, %v5113_v2  ;;  %7602 = vpow2.f32 %v5824_v22  ;;  %v11545_v13 = vsel %vm3431_vm15, %v3433_v8, %v3429_v45  ;;  %v710_v47 = vadd.f32 %v709_v4, %v8732_v23 }
 0x380   : > { %v11549_v35 = vmul.f32 %v6135_v54, %v11356_v53  ;;  %v6008_v19 = vmul.f32 %v11465_v30, %v5368_v37  ;;  %v4730_v52 = vadd.f32 1.4214138, %v4602_v48  ;;  %v4347_v1 = vmul.f32 1.0614054, %v11545_v13 }
 0x381   : > { %7604 = vpow2.f32 %v5826_v21  ;;  %v11554_v18 = vmul.f32 0.5, %v11504_v0  ;;  %v2045_v55 = vand.u32 2147483647, %v11541_v43  ;;  %v6512_v22 = vmul.f32 %v6384_v61, %v11047_v27 }
 0x382   : > { %v4858_v25 = vmul.f32 %v4730_v52, %v11521_v28  ;;  %v4475_v60 = vadd.f32 -1.4531521, %v4347_v1  ;;  %v5628_v34 = vmul.f32 %v5500_v56, %v2044_v39  ;;  %v6385_v53 = vadd.f32 1.0, %v11291_v40 }
 0x383   : > { %v7601_v54 = vpop.eup %7600  ;;  %v5369_v30 = vmul.f32 %v5241_v58, %v11486_v10  ;;  %vm1788_vm1 = vcmp.ge.f32.partialorder %v11512_v15, 0.0  ;;  %v2173_v21 = vmul.f32 0.3275911, %v2045_v55  ;;  %v6640_v4 = vmul.f32 %v6512_v22, %v710_v47 }
 0x384   : > { %v6136_v0 = vsub.f32 1.0, %v6008_v19  ;;  %v4986_v37 = vadd.f32 -0.28449672, %v4858_v25  ;;  %v4603_v2 = vmul.f32 %v4475_v60, %v11545_v13  ;;  %v3437_v27 = vmul.f32 %v7601_v54, %v11532_v31 }
 0x385   : > { %v11564_v17 = vpop.eup %7602  ;;  %v3445_v39 = vand.u32 2147483647, %v11532_v31  ;;  %v11567_v8 = vadd.f32 1.0, %v2173_v21  ;;  %6768 = vst [vmem:[%s8785_s10 + $0x1e0] sm:$0xff] %v6640_v4  ;;  %v919_v40 = vadd.f32 %v918_v29, %v8768_v57  ;;  %v6513_v10 = vmul.f32 %v6385_v53, %v11066_v24  ;;  %v1379_v21 = vpop.f32.mrf.mxu3 }
 0x386   : > { %v4731_v61 = vadd.f32 1.4214138, %v4603_v2  ;;  %v3438_v48 = vsub.f32 1.0, %v3437_v27  ;;  %v3447_v45 = vand.u32 2147483648, %v11532_v31  ;;  %v5828_v56 = vmul.f32 1.442695, %v5628_v34 }
 0x387   : > { %v11573_v58 = vpop.eup %7604  ;;  %v6009_v47 = vmul.f32 %v11498_v59, %v5369_v30  ;;  %7606 = vrcp.f32 %v11567_v8  ;;  %v5501_v19 = vsub.f32 0.0, %v2045_v55  ;;  %v1171_v52 = vadd.f32 %v1170_v32, %v8182_v50 }
 0x388   : > { %v5114_v1 = vmul.f32 %v4986_v37, %v11521_v28  ;;  %v4859_v29 = vmul.f32 %v4731_v61, %v11545_v13  ;;  %v3439_v24 = vmul.f32 %v7601_v54, %v3438_v48  ;;  %vm3442_vm2 = vweird.f32 %v7601_v54 }
 0x389   : > { %v11581_v22 = vmul.f32 %v6136_v0, %v11402_v44  ;;  %v11586_v25 = vsel %vm1788_vm1, 1.0, %v14002_v6  ;;  %v11589_v59 = vmul.f32 0.5, %v11525_v46  ;;  %v6641_v60 = vmul.f32 %v6513_v10, %v919_v40 }
 0x38a   : > { %v4987_v34 = vadd.f32 -0.28449672, %v4859_v29  ;;  %v3440_v53 = vadd.f32 %v7601_v54, %v3439_v24  ;;  %vm3441_vm3 = vweird.f32 %v11532_v31  ;;  %v3448_v30 = vor.u32 1.1754944e-38, %v3447_v45 }
 0x38b   : > { %v6137_v4 = vsub.f32 1.0, %v6009_v47  ;;  %vm3443_vm4 = vmor %vm3441_vm3, %vm3442_vm2  ;;  %vm1789_vm5 = vcmp.ge.f32.partialorder %v11541_v43, 0.0  ;;  %v5629_v44 = vmul.f32 %v5501_v19, %v2045_v55  ;;  %6769 = vst [vmem:[%s8785_s10 + $0x1e8] sm:$0xff] %v6641_v60  ;;  %v11594_v0 = vmul.f32 0.70710677, %v1171_v52  ;;  %v712_v19 = vpop.f32.mrf.mxu0 }
 0x38c   : > { %v5242_v15 = vadd.f32 0.2548296, %v5114_v1  ;;  %v3444_v37 = vsel %vm3443_vm4, %v7601_v54, %v3440_v53  ;;  %vm3446_vm6 = vcmp.eq.f32.partialorder %v3445_v39, 8.507059e+37  ;;  %7608 = vpow2.f32 %v5828_v56 }
 0x38d   : > { %v7607_v46 = vpop.eup %7606  ;;  %v5115_v2 = vmul.f32 %v4987_v34, %v11545_v13  ;;  %v11597_v27 = vsel %vm3446_vm6, %v3448_v30, %v3444_v37  ;;  %v11600_v31 = vand.u32 2147483647, %v11594_v0  ;;  %v1380_v32 = vadd.f32 %v1379_v21, %v8184_v51 }
 0x38e   : > { %v4348_v43 = vmul.f32 1.0614054, %v11597_v27  ;;  %v11605_v55 = vsel %vm1789_vm5, 1.0, %v14002_v6  ;;  %v3452_v54 = vmul.f32 %v7607_v46, %v11567_v8  ;;  %v3460_v39 = vand.u32 2147483647, %v11567_v8 }
 0x38f   : > { %v11610_v40 = vmul.f32 %v6137_v4, %v11436_v36  ;;  %v3462_v10 = vand.u32 2147483648, %v11567_v8  ;;  %v5830_v61 = vmul.f32 1.442695, %v5629_v44  ;;  %v2174_v48 = vmul.f32 0.3275911, %v11600_v31  ;;  %v378_v36 = vld [vmem:[%s8042_s9 + $0x1b8] sm:$0xff]  ;;  %v921_v44 = vpop.f32.mrf.mxu1 }
 0x390   : > { %v5370_v45 = vmul.f32 %v5242_v15, %v11521_v28  ;;  %v4476_v56 = vadd.f32 -1.4531521, %v4348_v43  ;;  %v3453_v47 = vsub.f32 1.0, %v3452_v54  ;;  %v6386_v1 = vadd.f32 1.0, %v11345_v63  ;;  %7177 = vmatmul.msk.f32.gmra.mxu2 %vm409_vm0, %v378_v36  ;;  %7241 = vmatmul.msk.f32.gmra.mxu3 %vm409_vm0, %v378_v36 }
 0x391   : > { %v5243_v29 = vadd.f32 0.2548296, %v5115_v2  ;;  %vm3456_vm7 = vweird.f32 %v11567_v8  ;;  %v11617_v24 = vadd.f32 1.0, %v2174_v48  ;;  %v11619_v60 = vmul.f32 0.70710677, %v1380_v32  ;;  %7049 = vmatmul.msk.f32.gmra.mxu0 %vm409_vm0, %v378_v36  ;;  %7113 = vmatmul.msk.f32.gmra.mxu1 %vm409_vm0, %v378_v36 }
 0x392   : > { %v11622_v34 = vpop.eup %7608  ;;  %v4604_v53 = vmul.f32 %v4476_v56, %v11597_v27  ;;  %v3454_v30 = vmul.f32 %v7607_v46, %v3453_v47  ;;  %vm3457_vm8 = vweird.f32 %v7607_v46  ;;  %vm11625_vm9 = vcmp.eq.f32.partialorder %v3460_v39, 8.507059e+37 }
 0x393   : > { %v3463_v63 = vor.u32 1.1754944e-38, %v3462_v10  ;;  %v11631_v21 = vmul.f32 0.5, %v1171_v52  ;;  %7610 = vrcp.f32 %v11617_v24  ;;  %v713_v4 = vadd.f32 %v712_v19, %v8732_v23  ;;  %vm3458_vm10 = vmor %vm3456_vm7, %vm3457_vm8  ;;  %v1382_v19 = vpop.f32.mrf.mxu3 }
 0x394   : > { %v6010_v15 = vmul.f32 %v11564_v17, %v5370_v45  ;;  %v4732_v37 = vadd.f32 1.4214138, %v4604_v53  ;;  %v3455_v2 = vadd.f32 %v7607_v46, %v3454_v30  ;;  %v6514_v43 = vmul.f32 %v6386_v1, %v11155_v49 }
 0x395   : > { %v5371_v54 = vmul.f32 %v5243_v29, %v11545_v13  ;;  %7612 = vpow2.f32 %v5830_v61  ;;  %v2047_v52 = vand.u32 2147483647, %v11619_v60  ;;  %v6387_v39 = vadd.f32 1.0, %v11388_v16 }
 0x396   : > { %v4860_v10 = vmul.f32 %v4732_v37, %v11597_v27  ;;  %v3459_v48 = vsel %vm3458_vm10, %v7607_v46, %v3455_v2  ;;  %vm1790_vm11 = vcmp.ge.f32.partialorder %v11594_v0, 0.0  ;;  %v5502_v17 = vsub.f32 0.0, %v11600_v31  ;;  %v1173_v46 = vpop.f32.mrf.mxu2 }
 0x397   : > { %v11650_v49 = vsel %vm11625_vm9, %v3463_v63, %v3459_v48  ;;  %v11652_v13 = vmul.f32 0.5, %v1380_v32  ;;  %v2175_v8 = vmul.f32 0.3275911, %v2047_v52  ;;  %v922_v61 = vadd.f32 %v921_v44, %v8768_v57 }
 0x398   : > { %v6138_v45 = vsub.f32 1.0, %v6010_v15  ;;  %v4988_v56 = vadd.f32 -0.28449672, %v4860_v10  ;;  %v4349_v16 = vmul.f32 1.0614054, %v11650_v49  ;;  %v6642_v47 = vmul.f32 %v6514_v43, %v713_v4 }
 0x399   : > { %v7611_v0 = vpop.eup %7610  ;;  %v6011_v1 = vmul.f32 %v11573_v58, %v5371_v54  ;;  %v11658_v29 = vsel %vm1790_vm11, 1.0, %v14002_v6  ;;  %v11660_v36 = vadd.f32 1.0, %v2175_v8  ;;  %v6515_v32 = vmul.f32 %v6387_v39, %v11157_v7 }
 0x39a   : > { %v5116_v53 = vmul.f32 %v4988_v56, %v11597_v27  ;;  %v4477_v30 = vadd.f32 -1.4531521, %v4349_v16  ;;  %v3467_v28 = vmul.f32 %v7611_v0, %v11617_v24  ;;  %v5630_v63 = vmul.f32 %v5502_v17, %v11600_v31  ;;  %6770 = vst [vmem:[%s8785_s10 + $0x1f0] sm:$0xff] %v6642_v47 }
 0x39b   : > { %v11667_v4 = vpop.eup %7612  ;;  %v3475_v44 = vand.u32 2147483647, %v11617_v24  ;;  %7614 = vrcp.f32 %v11660_v36  ;;  %v1174_v58 = vadd.f32 %v1173_v46, %v8182_v50  ;;  %v11673_v15 = vadd.f32 %v1382_v19, %v8184_v51 }
 0x39c   : > { %v4605_v7 = vmul.f32 %v4477_v30, %v11650_v49  ;;  %v3468_v37 = vsub.f32 1.0, %v3467_v28  ;;  %v3477_v2 = vand.u32 2147483648, %v11617_v24  ;;  %v5503_v43 = vsub.f32 0.0, %v2047_v52 }
 0x39d   : > { %v11678_v31 = vmul.f32 %v6138_v45, %v11473_v11  ;;  %v6139_v54 = vsub.f32 1.0, %v6011_v1  ;;  %v5244_v39 = vadd.f32 0.2548296, %v5116_v53  ;;  %v6643_v10 = vmul.f32 %v6515_v32, %v922_v61 }
 0x39e   : > { %v4733_v48 = vadd.f32 1.4214138, %v4605_v7  ;;  %v3469_v17 = vmul.f32 %v7611_v0, %v3468_v37  ;;  %vm3472_vm12 = vweird.f32 %v7611_v0  ;;  %v5832_v8 = vmul.f32 1.442695, %v5630_v63  ;;  %v379_v37 = vld [vmem:[%s8042_s9 + $0x1c0] sm:$0xff] }
 0x39f   : > { %vm3471_vm13 = vweird.f32 %v11617_v24  ;;  %vm11681_vm14 = vcmp.eq.f32.partialorder %v3475_v44, 8.507059e+37  ;;  %6771 = vst [vmem:[%s8785_s10 + $0x1f8] sm:$0xff] %v6643_v10  ;;  %v11686_v16 = vmul.f32 0.70710677, %v1174_v58  ;;  %v11689_v47 = vmul.f32 0.70710677, %v11673_v15  ;;  %7178 = vmatmul.msk.f32.gmra.mxu2 %vm409_vm0, %v379_v37  ;;  %7242 = vmatmul.msk.f32.gmra.mxu3 %vm409_vm0, %v379_v37 }
 0x3a0   : > { %v4861_v11 = vmul.f32 %v4733_v48, %v11650_v49  ;;  %v3470_v45 = vadd.f32 %v7611_v0, %v3469_v17  ;;  %v3478_v61 = vor.u32 1.1754944e-38, %v3477_v2  ;;  %v5631_v46 = vmul.f32 %v5503_v43, %v2047_v52  ;;  %vm3473_vm15 = vmor %vm3471_vm13, %vm3472_vm12  ;;  %v715_v48 = vpop.f32.mrf.mxu0  ;;  %v924_v17 = vpop.f32.mrf.mxu1  ;;  %7050 = vmatmul.msk.f32.gmra.mxu0 %vm409_vm0, %v379_v37  ;;  %7114 = vmatmul.msk.f32.gmra.mxu1 %vm409_vm0, %v379_v37 }
 0x3a1   : > { %v7615_v19 = vpop.eup %7614  ;;  %v5372_v1 = vmul.f32 %v5244_v39, %v11597_v27  ;;  %vm1791_vm1 = vcmp.ge.f32.partialorder %v11619_v60, 0.0  ;;  %v11695_v24 = vand.u32 2147483647, %v11686_v16  ;;  %v11698_v32 = vand.u32 2147483647, %v11689_v47 }
 0x3a2   : > { %v11701_v53 = vmul.f32 %v6139_v54, %v11495_v42  ;;  %v3474_v30 = vsel %vm3473_vm15, %v7611_v0, %v3470_v45  ;;  %v3482_v28 = vmul.f32 %v7615_v19, %v11660_v36  ;;  %v3490_v52 = vand.u32 2147483647, %v11660_v36 }
 0x3a3   : > { %v4989_v63 = vadd.f32 -0.28449672, %v4861_v11  ;;  %v11707_v27 = vsel %vm11681_vm14, %v3478_v61, %v3474_v30  ;;  %v3492_v44 = vand.u32 2147483648, %v11660_v36  ;;  %v2176_v7 = vmul.f32 0.3275911, %v11695_v24 }
 0x3a4   : > { %v4350_v2 = vmul.f32 1.0614054, %v11707_v27  ;;  %7616 = vpow2.f32 %v5832_v8  ;;  %v3483_v42 = vsub.f32 1.0, %v3482_v28  ;;  %v5834_v43 = vmul.f32 1.442695, %v5631_v46 }
 0x3a5   : > { %v6012_v0 = vmul.f32 %v11622_v34, %v5372_v1  ;;  %v11719_v54 = vsel %vm1791_vm1, 1.0, %v14002_v6  ;;  %v11721_v39 = vadd.f32 1.0, %v2176_v7  ;;  %v2177_v10 = vmul.f32 0.3275911, %v11698_v32 }
 0x3a6   : > { %v4478_v8 = vadd.f32 -1.4531521, %v4350_v2  ;;  %v3484_v56 = vmul.f32 %v7615_v19, %v3483_v42  ;;  %vm3486_vm2 = vweird.f32 %v11660_v36  ;;  %vm3487_vm3 = vweird.f32 %v7615_v19 }
 0x3a7   : > { %v5117_v34 = vmul.f32 %v4989_v63, %v11650_v49  ;;  %vm11728_vm4 = vcmp.eq.f32.partialorder %v3490_v52, 8.507059e+37  ;;  %v3493_v11 = vor.u32 1.1754944e-38, %v3492_v44  ;;  %7618 = vrcp.f32 %v11721_v39  ;;  %vm3488_vm5 = vmor %vm3486_vm2, %vm3487_vm3 }
 0x3a8   : > { %v4606_v45 = vmul.f32 %v4478_v8, %v11707_v27  ;;  %v3485_v61 = vadd.f32 %v7615_v19, %v3484_v56  ;;  %7620 = vpow2.f32 %v5834_v43  ;;  %v11734_v46 = vmul.f32 0.5, %v1174_v58 }
 0x3a9   : > { %v6140_v1 = vsub.f32 1.0, %v6012_v0  ;;  %v11736_v30 = vadd.f32 1.0, %v2177_v10  ;;  %v716_v36 = vadd.f32 %v715_v48, %v8732_v23  ;;  %v6388_v28 = vadd.f32 1.0, %v11408_v20 }
 0x3aa   : > { %v11740_v52 = vpop.eup %7616  ;;  %v4734_v63 = vadd.f32 1.4214138, %v4606_v45  ;;  %v3489_v44 = vsel %vm3488_vm5, %v7615_v19, %v3485_v61  ;;  %vm1792_vm6 = vcmp.ge.f32.partialorder %v11686_v16, 0.0  ;;  %v5504_v7 = vsub.f32 0.0, %v11695_v24 }
 0x3ab   : > { %v5245_v37 = vadd.f32 0.2548296, %v5117_v34  ;;  %v11746_v58 = vsel %vm11728_vm4, %v3493_v11, %v3489_v44  ;;  %v3505_v2 = vand.u32 2147483647, %v11721_v39  ;;  %7622 = vrcp.f32 %v11736_v30 }
 0x3ac   : > { %v4862_v42 = vmul.f32 %v4734_v63, %v11707_v27  ;;  %v4351_v20 = vmul.f32 1.0614054, %v11746_v58  ;;  %v3507_v43 = vand.u32 2147483648, %v11721_v39  ;;  %v11754_v19 = vmul.f32 0.5, %v11673_v15  ;;  %v1176_v15 = vpop.f32.mrf.mxu2 }
 0x3ad   : > { %v7619_v16 = vpop.eup %7618  ;;  %v11757_v0 = vmul.f32 %v6140_v1, %v11586_v25  ;;  %v11760_v10 = vsel %vm1792_vm6, 1.0, %v14002_v6  ;;  %v5505_v48 = vsub.f32 0.0, %v11698_v32  ;;  %v6516_v8 = vmul.f32 %v6388_v28, %v11230_v62 }
 0x3ae   : > { %v11764_v56 = vpop.eup %7620  ;;  %v4990_v34 = vadd.f32 -0.28449672, %v4862_v42  ;;  %v4479_v60 = vadd.f32 -1.4531521, %v4351_v20  ;;  %v3497_v11 = vmul.f32 %v7619_v16, %v11721_v39  ;;  %vm3501_vm7 = vweird.f32 %v11721_v39 }
 0x3af   : > { %v5373_v25 = vmul.f32 %v5245_v37, %v11650_v49  ;;  %vm11769_vm8 = vcmp.eq.f32.partialorder %v3505_v2, 8.507059e+37  ;;  %v5632_v61 = vmul.f32 %v5504_v7, %v11695_v24  ;;  %v6644_v1 = vmul.f32 %v6516_v8, %v716_v36  ;;  %v1385_v8 = vpop.f32.mrf.mxu3 }
 0x3b0   : > { %v5118_v62 = vmul.f32 %v4990_v34, %v11707_v27  ;;  %v4607_v28 = vmul.f32 %v4479_v60, %v11746_v58  ;;  %v3498_v63 = vsub.f32 1.0, %v3497_v11  ;;  %v3508_v44 = vor.u32 1.1754944e-38, %v3507_v43 }
 0x3b1   : > { %vm1793_vm9 = vcmp.ge.f32.partialorder %v11689_v47, 0.0  ;;  %v7623_v42 = vpop.eup %7622  ;;  %v5633_v20 = vmul.f32 %v5505_v48, %v11698_v32  ;;  %6772 = vst [vmem:[%s8785_s10 + $0x200] sm:$0xff] %v6644_v1  ;;  %v925_v49 = vadd.f32 %v924_v17, %v8768_v57  ;;  %v6389_v37 = vadd.f32 1.0, %v11440_v9 }
 0x3b2   : > { %v11782_v2 = vadd.f32 %v1176_v15, %v8182_v50  ;;  %v4735_v24 = vadd.f32 1.4214138, %v4607_v28  ;;  %v3499_v36 = vmul.f32 %v7619_v16, %v3498_v63  ;;  %vm3502_vm10 = vweird.f32 %v7619_v16 }
 0x3b3   : > { %v3512_v7 = vmul.f32 %v7623_v42, %v11736_v30  ;;  %v6013_v43 = vmul.f32 %v11667_v4, %v5373_v25  ;;  %v5246_v34 = vadd.f32 0.2548296, %v5118_v62  ;;  %v6517_v60 = vmul.f32 %v6389_v37, %v11236_v26  ;;  %vm3503_vm11 = vmor %vm3501_vm7, %vm3502_vm10 }
 0x3b4   : > { %v1666_v32 = vmul.f32 0.70710677, %v11782_v2  ;;  %v4863_v17 = vmul.f32 %v4735_v24, %v11746_v58  ;;  %v3500_v9 = vadd.f32 %v7619_v16, %v3499_v36  ;;  %v3520_v11 = vand.u32 2147483647, %v11736_v30 }
 0x3b5   : > { %v3513_v48 = vsub.f32 1.0, %v3512_v7  ;;  %v3522_v15 = vand.u32 2147483648, %v11736_v30  ;;  %v6645_v1 = vmul.f32 %v6517_v60, %v925_v49  ;;  %v1386_v25 = vadd.f32 %v1385_v8, %v8184_v51  ;;  %v380_v8 = vld [vmem:[%s8042_s9 + $0x1c8] sm:$0xff] }
 0x3b6   : > { %v2050_v4 = vand.u32 2147483647, %v1666_v32  ;;  %v4991_v26 = vadd.f32 -0.28449672, %v4863_v17  ;;  %v3504_v62 = vsel %vm3503_vm11, %v7619_v16, %v3500_v9  ;;  %vm3517_vm12 = vweird.f32 %v7623_v42  ;;  %7179 = vmatmul.msk.f32.gmra.mxu2 %vm409_vm0, %v380_v8  ;;  %7243 = vmatmul.msk.f32.gmra.mxu3 %vm409_vm0, %v380_v8  ;;  %v718_v17 = vpop.f32.mrf.mxu0  ;;  %v927_v9 = vpop.f32.mrf.mxu1 }
 0x3b7   : > { %v3514_v28 = vmul.f32 %v7623_v42, %v3513_v48  ;;  %v5374_v63 = vmul.f32 %v5246_v34, %v11707_v27  ;;  %v11797_v37 = vsel %vm11769_vm8, %v3508_v44, %v3504_v62  ;;  %v5836_v24 = vmul.f32 1.442695, %v5632_v61  ;;  %6773 = vst [vmem:[%s8785_s10 + $0x208] sm:$0xff] %v6645_v1  ;;  %7051 = vmatmul.msk.f32.gmra.mxu0 %vm409_vm0, %v380_v8 }
 0x3b8   : > { %v2178_v39 = vmul.f32 0.3275911, %v2050_v4  ;;  %v6141_v36 = vsub.f32 1.0, %v6013_v43  ;;  %v4352_v49 = vmul.f32 1.0614054, %v11797_v37  ;;  %vm3516_vm13 = vweird.f32 %v11736_v30  ;;  %7115 = vmatmul.msk.f32.gmra.mxu1 %vm409_vm0, %v380_v8 }
 0x3b9   : > { %v3515_v7 = vadd.f32 %v7623_v42, %v3514_v28  ;;  %vm11803_vm14 = vmor %vm3516_vm13, %vm3517_vm12  ;;  %vm11807_vm15 = vcmp.eq.f32.partialorder %v3520_v11, 8.507059e+37  ;;  %v3523_v45 = vor.u32 1.1754944e-38, %v3522_v15  ;;  %v11813_v61 = vmul.f32 0.70710677, %v1386_v25 }
 0x3ba   : > { %v11811_v44 = vadd.f32 1.0, %v2178_v39  ;;  %v5119_v30 = vmul.f32 %v4991_v26, %v11746_v58  ;;  %v4480_v43 = vadd.f32 -1.4531521, %v4352_v49  ;;  %v5838_v60 = vmul.f32 1.442695, %v5633_v20 }
 0x3bb   : > { %v3519_v34 = vsel %vm11803_vm14, %v7623_v42, %v3515_v7  ;;  %v6014_v48 = vmul.f32 %v11740_v52, %v5374_v63  ;;  %v11826_v11 = vsel %vm1793_vm9, 1.0, %v14002_v6  ;;  %v11834_v42 = vmul.f32 %v6141_v36, %v11605_v55 }
 0x3bc   : > { %v11830_v15 = vsel %vm11807_vm15, %v3523_v45, %v3519_v34  ;;  %7624 = vrcp.f32 %v11811_v44  ;;  %v4608_v20 = vmul.f32 %v4480_v43, %v11797_v37  ;;  %vm1794_vm1 = vcmp.ge.f32.partialorder %v1666_v32, 0.0 }
 0x3bd   : > { %7626 = vpow2.f32 %v5836_v24  ;;  %v4353_v1 = vmul.f32 1.0614054, %v11830_v15  ;;  %v5506_v52 = vsub.f32 0.0, %v2050_v4  ;;  %v2051_v47 = vand.u32 2147483647, %v11813_v61 }
 0x3be   : > { %v6390_v26 = vadd.f32 1.0, %v11482_v41  ;;  %v5247_v62 = vadd.f32 0.2548296, %v5119_v30  ;;  %v4736_v28 = vadd.f32 1.4214138, %v4608_v20  ;;  %7628 = vpow2.f32 %v5838_v60 }
 0x3bf   : > { %v4481_v63 = vadd.f32 -1.4531521, %v4353_v1  ;;  %v6142_v39 = vsub.f32 1.0, %v6014_v48  ;;  %v11841_v49 = vmul.f32 0.5, %v11782_v2  ;;  %v2179_v55 = vmul.f32 0.3275911, %v2051_v47 }
 0x3c0   : > { %v719_v36 = vadd.f32 %v718_v17, %v8732_v23  ;;  %v4864_v24 = vmul.f32 %v4736_v28, %v11797_v37  ;;  %v11847_v7 = vsel %vm1794_vm1, 1.0, %v14002_v6  ;;  %v11849_v8 = vmul.f32 0.5, %v1386_v25 }
 0x3c1   : > { %v4609_v32 = vmul.f32 %v4481_v63, %v11830_v15  ;;  %v5634_v16 = vmul.f32 %v5506_v52, %v2050_v4  ;;  %v11851_v27 = vadd.f32 1.0, %v2179_v55  ;;  %v6518_v45 = vmul.f32 %v6390_v26, %v11307_v14  ;;  %v1179_v52 = vpop.f32.mrf.mxu2  ;;  %v930_v55 = vpop.f32.mrf.mxu1 }
 0x3c2   : > { %v7625_v41 = vpop.eup %7624  ;;  %v6391_v2 = vadd.f32 1.0, %v11549_v35  ;;  %v5375_v43 = vmul.f32 %v5247_v62, %v11746_v58  ;;  %v4992_v34 = vadd.f32 -0.28449672, %v4864_v24  ;;  %v11860_v48 = vmul.f32 %v6142_v39, %v11658_v29  ;;  %v1388_v39 = vpop.f32.mrf.mxu3 }
 0x3c3   : > { %v11855_v30 = vpop.eup %7626  ;;  %v4737_v60 = vadd.f32 1.4214138, %v4609_v32  ;;  %v3527_v17 = vmul.f32 %v7625_v41, %v11811_v44  ;;  %v3535_v25 = vand.u32 2147483647, %v11811_v44  ;;  %7630 = vrcp.f32 %v11851_v27 }
 0x3c4   : > { %v928_v4 = vadd.f32 %v927_v9, %v8768_v57  ;;  %v11865_v14 = vpop.eup %7628  ;;  %v5120_v35 = vmul.f32 %v4992_v34, %v11797_v37  ;;  %v5507_v1 = vsub.f32 0.0, %v2051_v47  ;;  %vm3531_vm2 = vweird.f32 %v11811_v44 }
 0x3c5   : > { %v4865_v58 = vmul.f32 %v4737_v60, %v11830_v15  ;;  %v3528_v20 = vsub.f32 1.0, %v3527_v17  ;;  %v3537_v29 = vand.u32 2147483648, %v11811_v44  ;;  %v6646_v26 = vmul.f32 %v6518_v45, %v719_v36 }
 0x3c6   : > { %v6519_v62 = vmul.f32 %v6391_v2, %v11315_v33  ;;  %v6015_v28 = vmul.f32 %v11764_v56, %v5375_v43  ;;  %vm3532_vm3 = vweird.f32 %v7625_v41  ;;  %vm11873_vm4 = vcmp.eq.f32.partialorder %v3535_v25, 8.507059e+37 }
 0x3c7   : > { %v4993_v9 = vadd.f32 -0.28449672, %v4865_v58  ;;  %v3529_v63 = vmul.f32 %v7625_v41, %v3528_v20  ;;  %vm1795_vm5 = vcmp.ge.f32.partialorder %v11813_v61, 0.0  ;;  %6774 = vst [vmem:[%s8785_s10 + $0x210] sm:$0xff] %v6646_v26  ;;  %v1180_v32 = vadd.f32 %v1179_v52, %v8182_v50  ;;  %vm3533_vm6 = vmor %vm3531_vm2, %vm3532_vm3  ;;  %v381_v61 = vld [vmem:[%s8042_s9 + $0x1d0] sm:$0xff] }
 0x3c8   : > { %v6647_v24 = vmul.f32 %v6519_v62, %v928_v4  ;;  %v5248_v36 = vadd.f32 0.2548296, %v5120_v35  ;;  %v5840_v33 = vmul.f32 1.442695, %v5634_v16  ;;  %v5635_v2 = vmul.f32 %v5507_v1, %v2051_v47  ;;  %7180 = vmatmul.msk.f32.gmra.mxu2 %vm409_vm0, %v381_v61  ;;  %7244 = vmatmul.msk.f32.gmra.mxu3 %vm409_vm0, %v381_v61 }
 0x3c9   : > { %v3530_v45 = vadd.f32 %v7625_v41, %v3529_v63  ;;  %v7631_v56 = vpop.eup %7630  ;;  %v5121_v43 = vmul.f32 %v4993_v9, %v11830_v15  ;;  %v3538_v34 = vor.u32 1.1754944e-38, %v3537_v29  ;;  %v1668_v60 = vmul.f32 0.70710677, %v1180_v32  ;;  %7116 = vmatmul.msk.f32.gmra.mxu1 %vm409_vm0, %v381_v61 }
 0x3ca   : > { %6775 = vst [vmem:[%s8785_s10 + $0x218] sm:$0xff] %v6647_v24  ;;  %v1389_v17 = vadd.f32 %v1388_v39, %v8184_v51  ;;  %v6143_v25 = vsub.f32 1.0, %v6015_v28  ;;  %v11888_v35 = vsel %vm1795_vm5, 1.0, %v14002_v6  ;;  %v3542_v47 = vmul.f32 %v7631_v56, %v11851_v27 }
 0x3cb   : > { %v3534_v4 = vsel %vm3533_vm6, %v7625_v41, %v3530_v45  ;;  %v3550_v44 = vand.u32 2147483647, %v11851_v27  ;;  %v3552_v58 = vand.u32 2147483648, %v11851_v27  ;;  %v2052_v20 = vand.u32 2147483647, %v1668_v60 }
 0x3cc   : > { %v11893_v16 = vsel %vm11873_vm4, %v3538_v34, %v3534_v4  ;;  %v5376_v1 = vmul.f32 %v5248_v36, %v11797_v37  ;;  %v3543_v52 = vsub.f32 1.0, %v3542_v47  ;;  %v5842_v29 = vmul.f32 1.442695, %v5635_v2  ;;  %v721_v37 = vpop.f32.mrf.mxu0  ;;  %7052 = vmatmul.msk.f32.gmra.mxu0 %vm409_vm0, %v381_v61 }
 0x3cd   : > { %v4354_v41 = vmul.f32 1.0614054, %v11893_v16  ;;  %v5249_v26 = vadd.f32 0.2548296, %v5121_v43  ;;  %7632 = vpow2.f32 %v5840_v33  ;;  %v2180_v62 = vmul.f32 0.3275911, %v2052_v20 }
 0x3ce   : > { %v1669_v28 = vmul.f32 0.70710677, %v1389_v17  ;;  %v11903_v9 = vmul.f32 %v6143_v25, %v11719_v54  ;;  %v3544_v39 = vmul.f32 %v7631_v56, %v3543_v52  ;;  %vm3547_vm7 = vweird.f32 %v7631_v56 }
 0x3cf   : > { %v4482_v63 = vadd.f32 -1.4531521, %v4354_v41  ;;  %vm3546_vm8 = vweird.f32 %v11851_v27  ;;  %vm11908_vm9 = vcmp.eq.f32.partialorder %v3550_v44, 8.507059e+37  ;;  %v11912_v36 = vadd.f32 1.0, %v2180_v62 }
 0x3d0   : > { %v2053_v45 = vand.u32 2147483647, %v1669_v28  ;;  %v6016_v54 = vmul.f32 %v11855_v30, %v5376_v1  ;;  %v3545_v2 = vadd.f32 %v7631_v56, %v3544_v39  ;;  %7634 = vpow2.f32 %v5842_v29  ;;  %vm3548_vm10 = vmor %vm3546_vm8, %vm3547_vm7 }
 0x3d1   : > { %v4610_v33 = vmul.f32 %v4482_v63, %v11893_v16  ;;  %v5377_v43 = vmul.f32 %v5249_v26, %v11830_v15  ;;  %v3553_v34 = vor.u32 1.1754944e-38, %v3552_v58  ;;  %7636 = vrcp.f32 %v11912_v36 }
 0x3d2   : > { %v6392_v27 = vadd.f32 1.0, %v11581_v22  ;;  %v3549_v4 = vsel %vm3548_vm10, %v7631_v56, %v3545_v2  ;;  %vm1796_vm11 = vcmp.ge.f32.partialorder %v1668_v60, 0.0  ;;  %v722_v47 = vadd.f32 %v721_v37, %v8732_v23  ;;  %v1182_v56 = vpop.f32.mrf.mxu2 }
 0x3d3   : > { %v4738_v25 = vadd.f32 1.4214138, %v4610_v33  ;;  %v11920_v44 = vpop.eup %7632  ;;  %v11924_v30 = vsel %vm11908_vm9, %v3553_v34, %v3549_v4  ;;  %v11926_v1 = vmul.f32 0.5, %v1180_v32  ;;  %v5508_v15 = vsub.f32 0.0, %v2052_v20 }
 0x3d4   : > { %v2181_v41 = vmul.f32 0.3275911, %v2053_v45  ;;  %v6144_v58 = vsub.f32 1.0, %v6016_v54  ;;  %v4355_v22 = vmul.f32 1.0614054, %v11924_v30  ;;  %v11930_v29 = vmul.f32 0.5, %v1389_v17 }
 0x3d5   : > { %v4866_v52 = vmul.f32 %v4738_v25, %v11893_v16  ;;  %v11933_v60 = vmul.f32 %v11865_v14, %v5377_v43  ;;  %v11936_v61 = vsel %vm1796_vm11, 1.0, %v14002_v6  ;;  %v6520_v32 = vmul.f32 %v6392_v27, %v11396_v12 }
 0x3d6   : > { %v11938_v26 = vadd.f32 1.0, %v2181_v41  ;;  %v11941_v62 = vpop.eup %7634  ;;  %v4483_v39 = vadd.f32 -1.4531521, %v4355_v22  ;;  %vm1797_vm12 = vcmp.ge.f32.partialorder %v1669_v28, 0.0  ;;  %v6393_v37 = vadd.f32 1.0, %v11610_v40  ;;  %v1391_v41 = vpop.f32.mrf.mxu3 }
 0x3d7   : > { %v4994_v63 = vadd.f32 -0.28449672, %v4866_v52  ;;  %v7637_v17 = vpop.eup %7636  ;;  %v5636_v24 = vmul.f32 %v5508_v15, %v2052_v20  ;;  %v5509_v14 = vsub.f32 0.0, %v2053_v45  ;;  %v11946_v54 = vadd.f32 %v1182_v56, %v8182_v50 }
 0x3d8   : > { %7638 = vrcp.f32 %v11938_v26  ;;  %v4611_v12 = vmul.f32 %v4483_v39, %v11924_v30  ;;  %v3557_v2 = vmul.f32 %v7637_v17, %v11912_v36  ;;  %v931_v43 = vadd.f32 %v930_v55, %v8768_v57 }
 0x3d9   : > { %v5122_v33 = vmul.f32 %v4994_v63, %v11893_v16  ;;  %v6145_v28 = vsub.f32 1.0, %v11933_v60  ;;  %v3565_v40 = vand.u32 2147483647, %v11912_v36  ;;  %v11955_v20 = vsel %vm1797_vm12, 1.0, %v14002_v6 }
 0x3da   : > { %v6648_v34 = vmul.f32 %v6520_v32, %v722_v47  ;;  %v4739_v25 = vadd.f32 1.4214138, %v4611_v12  ;;  %v3558_v4 = vsub.f32 1.0, %v3557_v2  ;;  %v6521_v15 = vmul.f32 %v6393_v37, %v11404_v5 }
 0x3db   : > { %v5250_v27 = vadd.f32 0.2548296, %v5122_v33  ;;  %v11959_v52 = vmul.f32 %v6144_v58, %v11760_v10  ;;  %v3567_v22 = vand.u32 2147483648, %v11912_v36  ;;  %v5844_v55 = vmul.f32 1.442695, %v5636_v24 }
 0x3dc   : > { %6776 = vst [vmem:[%s8785_s10 + $0x220] sm:$0xff] %v6648_v34  ;;  %v1670_v56 = vmul.f32 0.70710677, %v11946_v54  ;;  %v3559_v60 = vmul.f32 %v7637_v17, %v3558_v4  ;;  %vm3562_vm13 = vweird.f32 %v7637_v17  ;;  %v5637_v63 = vmul.f32 %v5509_v14, %v2053_v45 }
 0x3dd   : > { %v6649_v47 = vmul.f32 %v6521_v15, %v931_v43  ;;  %v4867_v39 = vmul.f32 %v4739_v25, %v11924_v30  ;;  %vm3561_vm14 = vweird.f32 %v11912_v36  ;;  %v1392_v10 = vadd.f32 %v1391_v41, %v8184_v51 }
 0x3de   : > { %v7639_v32 = vpop.eup %7638  ;;  %v2054_v5 = vand.u32 2147483647, %v1670_v56  ;;  %v5378_v58 = vmul.f32 %v5250_v27, %v11893_v16  ;;  %v3560_v37 = vadd.f32 %v7637_v17, %v3559_v60  ;;  %vm3566_vm15 = vcmp.eq.f32.partialorder %v3565_v40, 8.507059e+37  ;;  %vm3563_vm1 = vmor %vm3561_vm14, %vm3562_vm13  ;;  %v382_v27 = vld [vmem:[%s8042_s9 + $0x1d8] sm:$0xff] }
 0x3df   : > { %v3572_v24 = vmul.f32 %v7639_v32, %v11938_v26  ;;  %6777 = vst [vmem:[%s8785_s10 + $0x228] sm:$0xff] %v6649_v47  ;;  %v3568_v33 = vor.u32 1.1754944e-38, %v3567_v22  ;;  %7640 = vpow2.f32 %v5844_v55  ;;  %v3580_v45 = vand.u32 2147483647, %v11938_v26  ;;  %7181 = vmatmul.msk.f32.gmra.mxu2 %vm409_vm0, %v382_v27  ;;  %7245 = vmatmul.msk.f32.gmra.mxu3 %vm409_vm0, %v382_v27  ;;  %v933_v55 = vpop.f32.mrf.mxu1 }
 0x3e0   : > { %v2182_v14 = vmul.f32 0.3275911, %v2054_v5  ;;  %v3564_v12 = vsel %vm3563_vm1, %v7637_v17, %v3560_v37  ;;  %v3582_v36 = vand.u32 2147483648, %v11938_v26  ;;  %v5846_v43 = vmul.f32 1.442695, %v5637_v63  ;;  %7117 = vmatmul.msk.f32.gmra.mxu1 %vm409_vm0, %v382_v27 }
 0x3e1   : > { %v3573_v2 = vsub.f32 1.0, %v3572_v24  ;;  %v4995_v34 = vadd.f32 -0.28449672, %v4867_v39  ;;  %v11972_v25 = vsel %vm3566_vm15, %v3568_v33, %v3564_v12  ;;  %v11976_v40 = vmul.f32 0.70710677, %v1392_v10 }
 0x3e2   : > { %v11974_v16 = vadd.f32 1.0, %v2182_v14  ;;  %v6018_v4 = vmul.f32 %v11920_v44, %v5378_v58  ;;  %v4356_v15 = vmul.f32 1.0614054, %v11972_v25  ;;  %vm3577_vm2 = vweird.f32 %v7639_v32  ;;  %v724_v44 = vpop.f32.mrf.mxu0  ;;  %7053 = vmatmul.msk.f32.gmra.mxu0 %vm409_vm0, %v382_v27 }
 0x3e3   : > { %v3574_v41 = vmul.f32 %v7639_v32, %v3573_v2  ;;  %v11984_v17 = vmul.f32 %v6145_v28, %v11826_v11  ;;  %vm3576_vm3 = vweird.f32 %v11938_v26  ;;  %vm11987_vm4 = vcmp.eq.f32.partialorder %v3580_v45, 8.507059e+37 }
 0x3e4   : > { %7642 = vrcp.f32 %v11974_v16  ;;  %v4484_v60 = vadd.f32 -1.4531521, %v4356_v15  ;;  %vm1798_vm5 = vcmp.ge.f32.partialorder %v1670_v56, 0.0  ;;  %v5510_v47 = vsub.f32 0.0, %v2054_v5  ;;  %vm3578_vm6 = vmor %vm3576_vm3, %vm3577_vm2 }
 0x3e5   : > { %v3575_v63 = vadd.f32 %v7639_v32, %v3574_v41  ;;  %v11994_v11 = vpop.eup %7640  ;;  %v5123_v26 = vmul.f32 %v4995_v34, %v11924_v30  ;;  %v3583_v28 = vor.u32 1.1754944e-38, %v3582_v36  ;;  %7644 = vpow2.f32 %v5846_v43 }
 0x3e6   : > { %v11999_v39 = vand.u32 2147483647, %v11976_v40  ;;  %v6146_v58 = vsub.f32 1.0, %v6018_v4  ;;  %v4612_v37 = vmul.f32 %v4484_v60, %v11972_v25  ;;  %v12003_v33 = vmul.f32 0.5, %v11946_v54 }
 0x3e7   : > { %v3579_v24 = vsel %vm3578_vm6, %v7639_v32, %v3575_v63  ;;  %v12010_v45 = vsel %vm1798_vm5, 1.0, %v14002_v6  ;;  %v12012_v14 = vmul.f32 0.5, %v1392_v10  ;;  %v5638_v43 = vmul.f32 %v5510_v47, %v2054_v5 }
 0x3e8   : > { %v12007_v56 = vsel %vm11987_vm4, %v3583_v28, %v3579_v24  ;;  %v2183_v12 = vmul.f32 0.3275911, %v11999_v39  ;;  %v4740_v2 = vadd.f32 1.4214138, %v4612_v37  ;;  %vm1799_vm7 = vcmp.ge.f32.partialorder %v11976_v40, 0.0 }
 0x3e9   : > { %v4357_v36 = vmul.f32 1.0614054, %v12007_v56  ;;  %v5251_v54 = vadd.f32 0.2548296, %v5123_v26  ;;  %v6394_v27 = vadd.f32 1.0, %v11678_v31  ;;  %v6395_v4 = vadd.f32 1.0, %v11701_v53  ;;  %v1185_v26 = vpop.f32.mrf.mxu2 }
 0x3ea   : > { %v7643_v32 = vpop.eup %7642  ;;  %v12017_v34 = vadd.f32 1.0, %v2183_v12  ;;  %v12022_v15 = vmul.f32 %v6146_v58, %v11847_v7  ;;  %v4868_v10 = vmul.f32 %v4740_v2, %v11972_v25  ;;  %vm3591_vm8 = vweird.f32 %v11974_v16 }
 0x3eb   : > { %v4485_v41 = vadd.f32 -1.4531521, %v4357_v36  ;;  %v3587_v22 = vmul.f32 %v7643_v32, %v11974_v16  ;;  %v12026_v60 = vpop.eup %7644  ;;  %v725_v5 = vadd.f32 %v724_v44, %v8732_v23  ;;  %v934_v31 = vadd.f32 %v933_v55, %v8768_v57 }
 0x3ec   : > { %7646 = vrcp.f32 %v12017_v34  ;;  %v4996_v63 = vadd.f32 -0.28449672, %v4868_v10  ;;  %v3595_v47 = vand.u32 2147483647, %v11974_v16  ;;  %v5379_v28 = vmul.f32 %v5251_v54, %v11924_v30 }
 0x3ed   : > { %v4613_v53 = vmul.f32 %v4485_v41, %v12007_v56  ;;  %v3588_v7 = vsub.f32 1.0, %v3587_v22  ;;  %v3597_v58 = vand.u32 2147483648, %v11974_v16  ;;  %v6522_v37 = vmul.f32 %v6394_v27, %v11444_v3 }
 0x3ee   : > { %v6523_v24 = vmul.f32 %v6395_v4, %v11453_v38  ;;  %v5124_v12 = vmul.f32 %v4996_v63, %v11972_v25  ;;  %vm3592_vm9 = vweird.f32 %v7643_v32  ;;  %v5511_v2 = vsub.f32 0.0, %v11999_v39 }
 0x3ef   : > { %v4741_v44 = vadd.f32 1.4214138, %v4613_v53  ;;  %v3589_v55 = vmul.f32 %v7643_v32, %v3588_v7  ;;  %v6650_v36 = vmul.f32 %v6522_v37, %v725_v5  ;;  %v12041_v41 = vadd.f32 %v1185_v26, %v8182_v50  ;;  %vm3593_vm10 = vmor %vm3591_vm8, %vm3592_vm9  ;;  %v383_v37 = vld [vmem:[%s8042_s9 + $0x1e0] sm:$0xff] }
 0x3f0   : > { %v6651_v10 = vmul.f32 %v6523_v24, %v934_v31  ;;  %v5252_v30 = vadd.f32 0.2548296, %v5124_v12  ;;  %v5848_v27 = vmul.f32 1.442695, %v5638_v43  ;;  %v6019_v4 = vmul.f32 %v11941_v62, %v5379_v28  ;;  %v1394_v62 = vpop.f32.mrf.mxu3  ;;  %7182 = vmatmul.msk.f32.gmra.mxu2 %vm409_vm0, %v383_v37  ;;  %7246 = vmatmul.msk.f32.gmra.mxu3 %vm409_vm0, %v383_v37 }
 0x3f1   : > { %v4869_v54 = vmul.f32 %v4741_v44, %v12007_v56  ;;  %v3590_v3 = vadd.f32 %v7643_v32, %v3589_v55  ;;  %vm3596_vm11 = vcmp.eq.f32.partialorder %v3595_v47, 8.507059e+37  ;;  %v3598_v22 = vor.u32 1.1754944e-38, %v3597_v58  ;;  %6778 = vst [vmem:[%s8785_s10 + $0x230] sm:$0xff] %v6650_v36  ;;  %v727_v36 = vpop.f32.mrf.mxu0  ;;  %7054 = vmatmul.msk.f32.gmra.mxu0 %vm409_vm0, %v383_v37 }
 0x3f2   : > { %v7647_v38 = vpop.eup %7646  ;;  %v1672_v5 = vmul.f32 0.70710677, %v12041_v41  ;;  %v12052_v53 = vsel %vm1799_vm7, 1.0, %v14002_v6  ;;  %6779 = vst [vmem:[%s8785_s10 + $0x238] sm:$0xff] %v6651_v10  ;;  %v5380_v16 = vmul.f32 %v5252_v30, %v11972_v25  ;;  %v5639_v47 = vmul.f32 %v5511_v2, %v11999_v39  ;;  %v936_v10 = vpop.f32.mrf.mxu1  ;;  %7118 = vmatmul.msk.f32.gmra.mxu1 %vm409_vm0, %v383_v37 }
 0x3f3   : > { %v4997_v31 = vadd.f32 -0.28449672, %v4869_v54  ;;  %v3594_v63 = vsel %vm3593_vm10, %v7643_v32, %v3590_v3  ;;  %v3602_v43 = vmul.f32 %v7647_v38, %v12017_v34  ;;  %v3612_v40 = vand.u32 2147483648, %v12017_v34 }
 0x3f4   : > { %v12057_v7 = vsel %vm3596_vm11, %v3598_v22, %v3594_v63  ;;  %v2056_v26 = vand.u32 2147483647, %v1672_v5  ;;  %v6147_v24 = vsub.f32 1.0, %v6019_v4  ;;  %v1395_v44 = vadd.f32 %v1394_v62, %v8184_v51 }
 0x3f5   : > { %v5125_v28 = vmul.f32 %v4997_v31, %v12007_v56  ;;  %v4358_v32 = vmul.f32 1.0614054, %v12057_v7  ;;  %v3603_v58 = vsub.f32 1.0, %v3602_v43  ;;  %v6396_v55 = vadd.f32 1.0, %v11757_v0 }
 0x3f6   : > { %v2184_v12 = vmul.f32 0.3275911, %v2056_v26  ;;  %vm3607_vm12 = vweird.f32 %v7647_v38  ;;  %v3610_v2 = vand.u32 2147483647, %v12017_v34  ;;  %v6020_v30 = vmul.f32 %v11994_v11, %v5380_v16 }
 0x3f7   : > { %v4486_v25 = vadd.f32 -1.4531521, %v4358_v32  ;;  %v3604_v39 = vmul.f32 %v7647_v38, %v3603_v58  ;;  %vm3606_vm13 = vweird.f32 %v12017_v34  ;;  %v5850_v0 = vmul.f32 1.442695, %v5639_v47 }
 0x3f8   : > { %v12073_v54 = vadd.f32 1.0, %v2184_v12  ;;  %v5253_v3 = vadd.f32 0.2548296, %v5125_v28  ;;  %v3613_v31 = vor.u32 1.1754944e-38, %v3612_v40  ;;  %vm3608_vm14 = vmor %vm3606_vm13, %vm3607_vm12  ;;  %v12077_v63 = vmul.f32 0.70710677, %v1395_v44 }
 0x3f9   : > { %v4614_v4 = vmul.f32 %v4486_v25, %v12057_v7  ;;  %v3605_v22 = vadd.f32 %v7647_v38, %v3604_v39  ;;  %v728_v43 = vadd.f32 %v727_v36, %v8732_v23  ;;  %v6524_v62 = vmul.f32 %v6396_v55, %v11554_v18 }
 0x3fa   : > { %7648 = vrcp.f32 %v12073_v54  ;;  %vm3611_vm15 = vcmp.eq.f32.partialorder %v3610_v2, 8.507059e+37  ;;  %v6148_v16 = vsub.f32 1.0, %v6020_v30  ;;  %vm1800_vm1 = vcmp.ge.f32.partialorder %v1672_v5, 0.0 }
 0x3fb   : > { %v4742_v11 = vadd.f32 1.4214138, %v4614_v4  ;;  %7650 = vpow2.f32 %v5848_v27  ;;  %v3609_v34 = vsel %vm3608_vm14, %v7647_v38, %v3605_v22  ;;  %v5512_v28 = vsub.f32 0.0, %v2056_v26 }
 0x3fc   : > { %v12081_v47 = vsel %vm3611_vm15, %v3613_v31, %v3609_v34  ;;  %v12084_v32 = vmul.f32 %v6147_v24, %v11888_v35  ;;  %v5381_v58 = vmul.f32 %v5253_v3, %v12007_v56  ;;  %7652 = vpow2.f32 %v5850_v0  ;;  %v1188_v56 = vpop.f32.mrf.mxu2 }
 0x3fd   : > { %v4870_v40 = vmul.f32 %v4742_v11, %v12057_v7  ;;  %v4359_v37 = vmul.f32 1.0614054, %v12081_v47  ;;  %v12090_v18 = vmul.f32 0.5, %v12041_v41  ;;  %v2057_v27 = vand.u32 2147483647, %v12077_v63 }
 0x3fe   : > { %v6652_v38 = vmul.f32 %v6524_v62, %v728_v43  ;;  %v12094_v55 = vsel %vm1800_vm1, 1.0, %v14002_v6  ;;  %v6397_v35 = vadd.f32 1.0, %v11834_v42  ;;  %v12098_v25 = vmul.f32 %v6148_v16, %v11936_v61 }
 0x3ff   : > { %v4998_v12 = vadd.f32 -0.28449672, %v4870_v40  ;;  %v4487_v5 = vadd.f32 -1.4531521, %v4359_v37  ;;  %v5640_v39 = vmul.f32 %v5512_v28, %v2056_v26  ;;  %v12100_v2 = vmul.f32 0.5, %v1395_v44  ;;  %v1397_v44 = vpop.f32.mrf.mxu3 }
 0x400   : > { %v7649_v24 = vpop.eup %7648  ;;  %v2185_v41 = vmul.f32 0.3275911, %v2057_v27  ;;  %6780 = vst [vmem:[%s8785_s10 + $0x240] sm:$0xff] %v6652_v38  ;;  %v6021_v30 = vmul.f32 %v12026_v60, %v5381_v58  ;;  %v937_v22 = vadd.f32 %v936_v10, %v8768_v57  ;;  %v6525_v61 = vmul.f32 %v6397_v35, %v11589_v59 }
 0x401   : > { %v7651_v36 = vpop.eup %7650  ;;  %v5126_v0 = vmul.f32 %v4998_v12, %v12057_v7  ;;  %v4615_v3 = vmul.f32 %v4487_v5, %v12081_v47  ;;  %v3617_v4 = vmul.f32 %v7649_v24, %v12073_v54  ;;  %v1189_v26 = vadd.f32 %v1188_v56, %v8182_v50 }
 0x402   : > { %v12107_v42 = vadd.f32 1.0, %v2185_v41  ;;  %v3625_v62 = vand.u32 2147483647, %v12073_v54  ;;  %v3627_v60 = vand.u32 2147483648, %v12073_v54  ;;  %v12114_v11 = vpop.eup %7652  ;;  %v5852_v16 = vmul.f32 1.442695, %v5640_v39 }
 0x403   : > { %v4743_v31 = vadd.f32 1.4214138, %v4615_v3  ;;  %v3618_v43 = vsub.f32 1.0, %v3617_v4  ;;  %v5254_v34 = vadd.f32 0.2548296, %v5126_v0  ;;  %v5513_v28 = vsub.f32 0.0, %v2057_v27 }
 0x404   : > { %7654 = vrcp.f32 %v12107_v42  ;;  %vm3622_vm2 = vweird.f32 %v7649_v24  ;;  %v1398_v58 = vadd.f32 %v1397_v44, %v8184_v51  ;;  %v6149_v40 = vsub.f32 1.0, %v6021_v30 }
 0x405   : > { %v4871_v10 = vmul.f32 %v4743_v31, %v12081_v47  ;;  %v3619_v59 = vmul.f32 %v7649_v24, %v3618_v43  ;;  %vm1801_vm3 = vcmp.ge.f32.partialorder %v12077_v63, 0.0  ;;  %v6653_v37 = vmul.f32 %v6525_v61, %v937_v22  ;;  %v384_v61 = vld [vmem:[%s8042_s9 + $0x1e8] sm:$0xff] }
 0x406   : > { %v1674_v38 = vmul.f32 0.70710677, %v1189_v26  ;;  %vm3621_vm4 = vweird.f32 %v12073_v54  ;;  %vm3626_vm5 = vcmp.eq.f32.partialorder %v3625_v62, 8.507059e+37  ;;  %v5382_v35 = vmul.f32 %v5254_v34, %v12057_v7  ;;  %7183 = vmatmul.msk.f32.gmra.mxu2 %vm409_vm0, %v384_v61  ;;  %7247 = vmatmul.msk.f32.gmra.mxu3 %vm409_vm0, %v384_v61  ;;  %v730_v34 = vpop.f32.mrf.mxu0 }
 0x407   : > { %v4999_v12 = vadd.f32 -0.28449672, %v4871_v10  ;;  %v3620_v5 = vadd.f32 %v7649_v24, %v3619_v59  ;;  %vm3623_vm6 = vmor %vm3621_vm4, %vm3622_vm2  ;;  %v3628_v56 = vor.u32 1.1754944e-38, %v3627_v60  ;;  %v5641_v39 = vmul.f32 %v5513_v28, %v2057_v27  ;;  %6781 = vst [vmem:[%s8785_s10 + $0x248] sm:$0xff] %v6653_v37  ;;  %7055 = vmatmul.msk.f32.gmra.mxu0 %vm409_vm0, %v384_v61 }
 0x408   : > { %v2058_v41 = vand.u32 2147483647, %v1674_v38  ;;  %7656 = vpow2.f32 %v5852_v16  ;;  %v12124_v30 = vsel %vm1801_vm3, 1.0, %v14002_v6  ;;  %v12126_v63 = vmul.f32 0.70710677, %v1398_v58  ;;  %v939_v16 = vpop.f32.mrf.mxu1  ;;  %7119 = vmatmul.msk.f32.gmra.mxu1 %vm409_vm0, %v384_v61 }
 0x409   : > { %v3624_v0 = vsel %vm3623_vm6, %v7649_v24, %v3620_v5  ;;  %v12129_v4 = vmul.f32 %v6149_v40, %v11955_v20  ;;  %v3640_v7 = vand.u32 2147483647, %v12107_v42  ;;  %v5127_v27 = vmul.f32 %v4999_v12, %v12081_v47 }
 0x40a   : > { %v7655_v3 = vpop.eup %7654  ;;  %v12131_v54 = vsel %vm3626_vm5, %v3628_v56, %v3624_v0  ;;  %v2186_v22 = vmul.f32 0.3275911, %v2058_v41  ;;  %v12138_v31 = vmul.f32 0.5, %v1189_v26  ;;  %v6022_v20 = vmul.f32 %v7651_v36, %v5382_v35 }
 0x40b   : > { %v4360_v24 = vmul.f32 1.0614054, %v12131_v54  ;;  %v3632_v44 = vmul.f32 %v7655_v3, %v12107_v42  ;;  %v3642_v43 = vand.u32 2147483648, %v12107_v42  ;;  %v5854_v62 = vmul.f32 1.442695, %v5641_v39 }
 0x40c   : > { %v12143_v60 = vadd.f32 1.0, %v2186_v22  ;;  %v12147_v26 = vmul.f32 0.5, %v1398_v58  ;;  %v12150_v59 = vand.u32 2147483647, %v12126_v63  ;;  %vm3636_vm7 = vweird.f32 %v12107_v42 }
 0x40d   : > { %v4488_v28 = vadd.f32 -1.4531521, %v4360_v24  ;;  %v3633_v10 = vsub.f32 1.0, %v3632_v44  ;;  %vm12153_vm8 = vcmp.eq.f32.partialorder %v3640_v7, 8.507059e+37  ;;  %vm1802_vm9 = vcmp.ge.f32.partialorder %v1674_v38, 0.0 }
 0x40e   : > { %7658 = vrcp.f32 %v12143_v60  ;;  %v12158_v40 = vpop.eup %7656  ;;  %v5255_v37 = vadd.f32 0.2548296, %v5127_v27  ;;  %vm3637_vm10 = vweird.f32 %v7655_v3  ;;  %v6150_v58 = vsub.f32 1.0, %v6022_v20 }
 0x40f   : > { %v4616_v12 = vmul.f32 %v4488_v28, %v12131_v54  ;;  %v3634_v5 = vmul.f32 %v7655_v3, %v3633_v10  ;;  %v3643_v35 = vor.u32 1.1754944e-38, %v3642_v43  ;;  %v5514_v56 = vsub.f32 0.0, %v2058_v41  ;;  %vm3638_vm11 = vmor %vm3636_vm7, %vm3637_vm10 }
 0x410   : > { %v2187_v39 = vmul.f32 0.3275911, %v12150_v59  ;;  %7660 = vpow2.f32 %v5854_v62  ;;  %v731_v22 = vadd.f32 %v730_v34, %v8732_v23  ;;  %v12167_v61 = vsel %vm1802_vm9, 1.0, %v14002_v6 }
 0x411   : > { %v4744_v0 = vadd.f32 1.4214138, %v4616_v12  ;;  %v3635_v7 = vadd.f32 %v7655_v3, %v3634_v5  ;;  %vm1803_vm12 = vcmp.ge.f32.partialorder %v12126_v63, 0.0  ;;  %v6398_v24 = vadd.f32 1.0, %v11860_v48 }
 0x412   : > { %v12170_v27 = vadd.f32 1.0, %v2187_v39  ;;  %v5383_v44 = vmul.f32 %v5255_v37, %v12081_v47  ;;  %v6399_v62 = vadd.f32 1.0, %v11903_v9  ;;  %v12177_v42 = vmul.f32 %v6150_v58, %v12010_v45  ;;  %v1191_v37 = vpop.f32.mrf.mxu2 }
 0x413   : > { %v4872_v20 = vmul.f32 %v4744_v0, %v12131_v54  ;;  %v3639_v43 = vsel %vm3638_vm11, %v7655_v3, %v3635_v7  ;;  %v5642_v28 = vmul.f32 %v5514_v56, %v2058_v41  ;;  %v940_v3 = vadd.f32 %v939_v16, %v8768_v57 }
 0x414   : > { %v7659_v34 = vpop.eup %7658  ;;  %v12181_v38 = vsel %vm12153_vm8, %v3643_v35, %v3639_v43  ;;  %7662 = vrcp.f32 %v12170_v27  ;;  %v3655_v9 = vand.u32 2147483647, %v12143_v60  ;;  %v3657_v45 = vand.u32 2147483648, %v12143_v60 }
 0x415   : > { %v5000_v10 = vadd.f32 -0.28449672, %v4872_v20  ;;  %v4361_v48 = vmul.f32 1.0614054, %v12181_v38  ;;  %v3647_v47 = vmul.f32 %v7659_v34, %v12143_v60  ;;  %v12192_v36 = vsel %vm1803_vm12, 1.0, %v14002_v6 }
 0x416   : > { %v6526_v41 = vmul.f32 %v6398_v24, %v11631_v21  ;;  %v12195_v12 = vpop.eup %7660  ;;  %v12198_v5 = vmul.f32 %v12114_v11, %v5383_v44  ;;  %v6527_v35 = vmul.f32 %v6399_v62, %v11652_v13  ;;  %v5515_v39 = vsub.f32 0.0, %v12150_v59 }
 0x417   : > { %v4489_v58 = vadd.f32 -1.4531521, %v4361_v48  ;;  %v3648_v16 = vsub.f32 1.0, %v3647_v47  ;;  %v5128_v56 = vmul.f32 %v5000_v10, %v12131_v54  ;;  %v12204_v63 = vadd.f32 %v1191_v37, %v8182_v50  ;;  %v1400_v48 = vpop.f32.mrf.mxu3 }
 0x418   : > { %v6654_v0 = vmul.f32 %v6526_v41, %v731_v22  ;;  %vm3652_vm13 = vweird.f32 %v7659_v34  ;;  %v6655_v11 = vmul.f32 %v6527_v35, %v940_v3  ;;  %vm3651_vm14 = vweird.f32 %v12143_v60 }
 0x419   : > { %v4617_v21 = vmul.f32 %v4489_v58, %v12181_v38  ;;  %v3649_v7 = vmul.f32 %v7659_v34, %v3648_v16  ;;  %vm12208_vm15 = vcmp.eq.f32.partialorder %v3655_v9, 8.507059e+37  ;;  %v5856_v13 = vmul.f32 1.442695, %v5642_v28  ;;  %vm3653_vm1 = vmor %vm3651_vm14, %vm3652_vm13 }
 0x41a   : > { %v7663_v24 = vpop.eup %7662  ;;  %6782 = vst [vmem:[%s8785_s10 + $0x250] sm:$0xff] %v6654_v0  ;;  %v12214_v22 = vmul.f32 0.70710677, %v12204_v63  ;;  %v3658_v62 = vor.u32 1.1754944e-38, %v3657_v45  ;;  %v6151_v47 = vsub.f32 1.0, %v12198_v5  ;;  %v5643_v3 = vmul.f32 %v5515_v39, %v12150_v59 }
 0x41b   : > { %v4745_v20 = vadd.f32 1.4214138, %v4617_v21  ;;  %v3650_v43 = vadd.f32 %v7659_v34, %v3649_v7  ;;  %v3662_v10 = vmul.f32 %v7663_v24, %v12170_v27  ;;  %6783 = vst [vmem:[%s8785_s10 + $0x258] sm:$0xff] %v6655_v11  ;;  %v5256_v60 = vadd.f32 0.2548296, %v5128_v56  ;;  %v385_v56 = vld [vmem:[%s8042_s9 + $0x1f0] sm:$0xff]  ;;  %v733_v7 = vpop.f32.mrf.mxu0  ;;  %v942_v11 = vpop.f32.mrf.mxu1 }
 0x41c   : > { %v2060_v28 = vand.u32 2147483647, %v12214_v22  ;;  %v3670_v45 = vand.u32 2147483647, %v12170_v27  ;;  %v3672_v16 = vand.u32 2147483648, %v12170_v27  ;;  %v1401_v35 = vadd.f32 %v1400_v48, %v8184_v51  ;;  %7184 = vmatmul.msk.f32.gmra.mxu2 %vm409_vm0, %v385_v56  ;;  %7248 = vmatmul.msk.f32.gmra.mxu3 %vm409_vm0, %v385_v56 }
 0x41d   : > { %v4873_v37 = vmul.f32 %v4745_v20, %v12181_v38  ;;  %v3654_v9 = vsel %vm3653_vm1, %v7659_v34, %v3650_v43  ;;  %v3663_v41 = vsub.f32 1.0, %v3662_v10  ;;  %vm3667_vm2 = vweird.f32 %v7663_v24  ;;  %7056 = vmatmul.msk.f32.gmra.mxu0 %vm409_vm0, %v385_v56  ;;  %7120 = vmatmul.msk.f32.gmra.mxu1 %vm409_vm0, %v385_v56 }
 0x41e   : > { %v12226_v58 = vsel %vm12208_vm15, %v3658_v62, %v3654_v9  ;;  %v2188_v5 = vmul.f32 0.3275911, %v2060_v28  ;;  %v5384_v34 = vmul.f32 %v5256_v60, %v12131_v54  ;;  %7664 = vpow2.f32 %v5856_v13 }
 0x41f   : > { %v5001_v0 = vadd.f32 -0.28449672, %v4873_v37  ;;  %v4362_v59 = vmul.f32 1.0614054, %v12226_v58  ;;  %v3664_v39 = vmul.f32 %v7663_v24, %v3663_v41  ;;  %vm3666_vm3 = vweird.f32 %v12170_v27 }
 0x420   : > { %v12236_v21 = vadd.f32 1.0, %v2188_v5  ;;  %v5858_v62 = vmul.f32 1.442695, %v5643_v3  ;;  %vm3668_vm4 = vmor %vm3666_vm3, %vm3667_vm2  ;;  %v3673_v10 = vor.u32 1.1754944e-38, %v3672_v16  ;;  %v12243_v54 = vmul.f32 0.70710677, %v1401_v35 }
 0x421   : > { %v5129_v44 = vmul.f32 %v5001_v0, %v12181_v38  ;;  %v4490_v20 = vadd.f32 -1.4531521, %v4362_v59  ;;  %v3665_v43 = vadd.f32 %v7663_v24, %v3664_v39  ;;  %v6400_v27 = vadd.f32 1.0, %v11959_v52 }
 0x422   : > { %7666 = vrcp.f32 %v12236_v21  ;;  %vm3671_vm5 = vcmp.eq.f32.partialorder %v3670_v45, 8.507059e+37  ;;  %v12248_v37 = vmul.f32 %v6151_v47, %v12052_v53  ;;  %v6024_v9 = vmul.f32 %v12158_v40, %v5384_v34 }
 0x423   : > { %v5257_v13 = vadd.f32 0.2548296, %v5129_v44  ;;  %v4618_v48 = vmul.f32 %v4490_v20, %v12226_v58  ;;  %v3669_v60 = vsel %vm3668_vm4, %v7663_v24, %v3665_v43  ;;  %v734_v41 = vadd.f32 %v733_v7, %v8732_v23 }
 0x424   : > { %v12251_v3 = vsel %vm3671_vm5, %v3673_v10, %v3669_v60  ;;  %7668 = vpow2.f32 %v5858_v62  ;;  %v5516_v56 = vsub.f32 0.0, %v2060_v28  ;;  %v12255_v52 = vpop.eup %7664  ;;  %v12258_v0 = vmul.f32 0.5, %v12204_v63  ;;  %v1194_v10 = vpop.f32.mrf.mxu2 }
 0x425   : > { %v4746_v16 = vadd.f32 1.4214138, %v4618_v48  ;;  %v4363_v5 = vmul.f32 1.0614054, %v12251_v3  ;;  %vm1804_vm6 = vcmp.ge.f32.partialorder %v12214_v22, 0.0  ;;  %v6528_v40 = vmul.f32 %v6400_v27, %v11734_v46 }
 0x426   : > { %v2061_v53 = vand.u32 2147483647, %v12243_v54  ;;  %v5385_v24 = vmul.f32 %v5257_v13, %v12181_v38  ;;  %v6401_v59 = vadd.f32 1.0, %v11984_v17  ;;  %v6152_v34 = vsub.f32 1.0, %v6024_v9 }
 0x427   : > { %v4874_v47 = vmul.f32 %v4746_v16, %v12226_v58  ;;  %v4491_v45 = vadd.f32 -1.4531521, %v4363_v5  ;;  %v12266_v7 = vmul.f32 0.5, %v1401_v35  ;;  %v6656_v44 = vmul.f32 %v6528_v40, %v734_v41 }
 0x428   : > { %v7667_v39 = vpop.eup %7666  ;;  %v2189_v63 = vmul.f32 0.3275911, %v2061_v53  ;;  %v5644_v46 = vmul.f32 %v5516_v56, %v2060_v28  ;;  %v3685_v38 = vand.u32 2147483647, %v12236_v21  ;;  %v943_v17 = vadd.f32 %v942_v11, %v8768_v57 }
 0x429   : > { %v5002_v20 = vadd.f32 -0.28449672, %v4874_v47  ;;  %v4619_v43 = vmul.f32 %v4491_v45, %v12251_v3  ;;  %v3677_v62 = vmul.f32 %v7667_v39, %v12236_v21  ;;  %6784 = vst [vmem:[%s8785_s10 + $0x260] sm:$0xff] %v6656_v44  ;;  %v6529_v13 = vmul.f32 %v6401_v59, %v11754_v19 }
 0x42a   : > { %v12271_v27 = vadd.f32 1.0, %v2189_v63  ;;  %v12276_v35 = vpop.eup %7668  ;;  %v6025_v48 = vmul.f32 %v12195_v12, %v5385_v24  ;;  %v3687_v41 = vand.u32 2147483648, %v12236_v21  ;;  %v5517_v16 = vsub.f32 0.0, %v2061_v53  ;;  %v1403_v63 = vpop.f32.mrf.mxu3 }
 0x42b   : > { %v4747_v60 = vadd.f32 1.4214138, %v4619_v43  ;;  %v3678_v9 = vsub.f32 1.0, %v3677_v62  ;;  %v5130_v28 = vmul.f32 %v5002_v20, %v12226_v58  ;;  %v12283_v5 = vadd.f32 %v1194_v10, %v8182_v50 }
 0x42c   : > { %7670 = vrcp.f32 %v12271_v27  ;;  %vm3682_vm7 = vweird.f32 %v7667_v39  ;;  %v5860_v19 = vmul.f32 1.442695, %v5644_v46  ;;  %v12287_v12 = vmul.f32 %v6152_v34, %v12094_v55 }
 0x42d   : > { %v4875_v11 = vmul.f32 %v4747_v60, %v12251_v3  ;;  %v3679_v56 = vmul.f32 %v7667_v39, %v3678_v9  ;;  %v12292_v40 = vsel %vm1804_vm6, 1.0, %v14002_v6  ;;  %vm3681_vm8 = vweird.f32 %v12236_v21 }
 0x42e   : > { %v6657_v24 = vmul.f32 %v6529_v13, %v943_v17  ;;  %v3688_v59 = vor.u32 1.1754944e-38, %v3687_v41  ;;  %vm1805_vm9 = vcmp.ge.f32.partialorder %v12243_v54, 0.0  ;;  %v6153_v44 = vsub.f32 1.0, %v6025_v48  ;;  %vm3683_vm10 = vmor %vm3681_vm8, %vm3682_vm7 }
 0x42f   : > { %v5003_v47 = vadd.f32 -0.28449672, %v4875_v11  ;;  %v3680_v45 = vadd.f32 %v7667_v39, %v3679_v56  ;;  %v5258_v20 = vadd.f32 0.2548296, %v5130_v28  ;;  %v5645_v43 = vmul.f32 %v5517_v16, %v2061_v53  ;;  %v736_v56 = vpop.f32.mrf.mxu0 }
 0x430   : > { %6785 = vst [vmem:[%s8785_s10 + $0x268] sm:$0xff] %v6657_v24  ;;  %v12298_v55 = vmul.f32 0.70710677, %v12283_v5  ;;  %vm3686_vm11 = vcmp.eq.f32.partialorder %v3685_v38, 8.507059e+37  ;;  %7672 = vpow2.f32 %v5860_v19  ;;  %v3700_v46 = vand.u32 2147483647, %v12271_v27 }
 0x431   : > { %v5131_v22 = vmul.f32 %v5003_v47, %v12251_v3  ;;  %v3684_v34 = vsel %vm3683_vm10, %v7667_v39, %v3680_v45  ;;  %v1404_v17 = vadd.f32 %v1403_v63, %v8184_v51  ;;  %v12310_v13 = vsel %vm1805_vm9, 1.0, %v14002_v6  ;;  %v386_v47 = vld [vmem:[%s8042_s9 + $0x1f8] sm:$0xff]  ;;  %s7257_s9 = sshll.u32 %s7898_s21, 10  ;;  %s6852_s21 = sshll.u32 %s8785_s10, 4  ;;  %s6853_s21 = int_to_ptr.vmem [resolvable:$true] %s6852_s21 }
 0x432   : > { %v7671_v21 = vpop.eup %7670  ;;  %v12301_v62 = vsel %vm3686_vm11, %v3688_v59, %v3684_v34  ;;  %v2062_v10 = vand.u32 2147483647, %v12298_v55  ;;  %v3702_v38 = vand.u32 2147483648, %v12271_v27  ;;  %v12315_v48 = vmul.f32 %v6153_v44, %v12124_v30  ;;  %7185 = vmatmul.msk.f32.gmra.mxu2 %vm409_vm0, %v386_v47  ;;  %7249 = vmatmul.msk.f32.gmra.mxu3 %vm409_vm0, %v386_v47  ;;  %s6851_s15 = scalar_lea.hbm %s13989_s5, %s7257_s9 }
 0x433   : > { %v4364_v53 = vmul.f32 1.0614054, %v12301_v62  ;;  %v3692_v39 = vmul.f32 %v7671_v21, %v12271_v27  ;;  %v5386_v60 = vmul.f32 %v5258_v20, %v12226_v58  ;;  %v5862_v9 = vmul.f32 1.442695, %v5645_v43  ;;  %v945_v43 = vpop.f32.mrf.mxu1  ;;  %7057 = vmatmul.msk.f32.gmra.mxu0 %vm409_vm0, %v386_v47  ;;  %7121 = vmatmul.msk.f32.gmra.mxu1 %vm409_vm0, %v386_v47  ;;  %s6854_s14 = sshll.u32 %s6851_s15, 4  ;;  %s6855_s14 = int_to_ptr.hbm [resolvable:$true] %s6854_s14 }
 0x434   : > { %v2190_v41 = vmul.f32 0.3275911, %v2062_v10  ;;  %v5259_v28 = vadd.f32 0.2548296, %v5131_v22  ;;  %v6402_v54 = vadd.f32 1.0, %v12022_v15  ;;  %vm3696_vm12 = vweird.f32 %v12271_v27  ;;  %s7842_s17 = sshra.s32 %s6855_s14, 4  ;;  %s7843_s17 = int_to_ptr.hbm [resolvable:$true] %s7842_s17 }
 0x435   : > { %v4492_v16 = vadd.f32 -1.4531521, %v4364_v53  ;;  %v3693_v11 = vsub.f32 1.0, %v3692_v39  ;;  %vm12320_vm13 = vcmp.eq.f32.partialorder %v3700_v46, 8.507059e+37  ;;  %v12326_v30 = vmul.f32 0.70710677, %v1404_v17  ;;  %p7849_p1 = scmp.lt.s32.totalorder %s7843_s17, %s13989_s5 }
 0x436   : > { %v12324_v24 = vadd.f32 1.0, %v2190_v41  ;;  %v12329_v58 = vpop.eup %7672  ;;  %vm3697_vm14 = vweird.f32 %v7671_v21  ;;  %v3703_v63 = vor.u32 1.1754944e-38, %v3702_v38  ;;  %v6026_v15 = vmul.f32 %v12255_v52, %v5386_v60  ;;  %s7844_s24 = scalar_lea.hbm %s7843_s17, 1024 }
 0x437   : > { %v4620_v45 = vmul.f32 %v4492_v16, %v12301_v62  ;;  %v3694_v59 = vmul.f32 %v7671_v21, %v3693_v11  ;;  %v5518_v44 = vsub.f32 0.0, %v2062_v10  ;;  %v737_v20 = vadd.f32 %v736_v56, %v8732_v23  ;;  %vm3698_vm15 = vmor %vm3696_vm12, %vm3697_vm14  ;;  %v1406_v56 = vpop.f32.mrf.mxu3  ;;  %p7845_p12 = scmp.ne.s32.totalorder %s7843_s17, %s7844_s24  ;;  %p7850_p2 = scmp.lt.s32.totalorder %s7848_s29, %s7844_s24 }
 0x438   : > { %7674 = vrcp.f32 %v12324_v24  ;;  %v5387_v22 = vmul.f32 %v5259_v28, %v12251_v3  ;;  %v6530_v53 = vmul.f32 %v6402_v54, %v11841_v49  ;;  %v12345_v52 = vmul.f32 0.5, %v12283_v5 }
 0x439   : > { %v4748_v34 = vadd.f32 1.4214138, %v4620_v45  ;;  %v3695_v46 = vadd.f32 %v7671_v21, %v3694_v59  ;;  %7676 = vpow2.f32 %v5862_v9  ;;  %v2063_v39 = vand.u32 2147483647, %v12326_v30  ;;  %p7846_p13 = pnand %p7845_p12, %p7981_p4  ;;  %p7851_p3 = por %p7850_p2, %p7849_p1 }
 0x43a   : > { %v6403_v38 = vadd.f32 1.0, %v12084_v32  ;;  %vm1806_vm0 = vcmp.ge.f32.partialorder %v12298_v55, 0.0  ;;  %v946_v3 = vadd.f32 %v945_v43, %v8768_v57  ;;  %v6154_v49 = vsub.f32 1.0, %v6026_v15 }
 0x43b   : > { %v4876_v60 = vmul.f32 %v4748_v34, %v12301_v62  ;;  %v3699_v41 = vsel %vm3698_vm15, %v7671_v21, %v3695_v46  ;;  %v12356_v9 = vmul.f32 0.5, %v1404_v17  ;;  %v2191_v5 = vmul.f32 0.3275911, %v2063_v39  ;;  %v1197_v21 = vpop.f32.mrf.mxu2  ;;  %p7847_p0 = pneg %p7846_p13 }
 0x43c   : > { %v12354_v27 = vsel %vm12320_vm13, %v3703_v63, %v3699_v41  ;;  %v6027_v28 = vmul.f32 %v12276_v35, %v5387_v22  ;;  %v5646_v16 = vmul.f32 %v5518_v44, %v2062_v10  ;;  %v6658_v11 = vmul.f32 %v6530_v53, %v737_v20 }
 0x43d   : > { %v4365_v32 = vmul.f32 1.0614054, %v12354_v27  ;;  %v5004_v47 = vadd.f32 -0.28449672, %v4876_v60  ;;  %v3715_v45 = vand.u32 2147483647, %v12324_v24  ;;  %v6531_v19 = vmul.f32 %v6403_v38, %v11849_v8  ;;  %p7852_p5 = pnand %p7851_p3, %p7847_p0 }
 0x43e   : > { %v7675_v54 = vpop.eup %7674  ;;  %v12361_v59 = vadd.f32 1.0, %v2191_v5  ;;  %v12367_v63 = vsel %vm1806_vm0, 1.0, %v14002_v6  ;;  %v5519_v10 = vsub.f32 0.0, %v2063_v39  ;;  %6786 = vst [vmem:[%s8785_s10 + $0x270] sm:$0xff] %v6658_v11  ;;  %v3717_v44 = vand.u32 2147483648, %v12324_v24 }
 0x43f   : > { %v4493_v17 = vadd.f32 -1.4531521, %v4365_v32  ;;  %v3707_v35 = vmul.f32 %v7675_v54, %v12324_v24  ;;  %v12371_v15 = vpop.eup %7676  ;;  %v1198_v20 = vadd.f32 %v1197_v21, %v8182_v50  ;;  %v12377_v8 = vadd.f32 %v1406_v56, %v8184_v51 }
 0x440   : > { %7678 = vrcp.f32 %v12361_v59  ;;  %v12380_v55 = vmul.f32 %v6154_v49, %v12167_v61  ;;  %v6155_v43 = vsub.f32 1.0, %v6027_v28  ;;  %v5132_v46 = vmul.f32 %v5004_v47, %v12301_v62 }
 0x441   : > { %v4621_v22 = vmul.f32 %v4493_v17, %v12354_v27  ;;  %v3708_v34 = vsub.f32 1.0, %v3707_v35  ;;  %vm12384_vm1 = vcmp.eq.f32.partialorder %v3715_v45, 8.507059e+37  ;;  %v5864_v38 = vmul.f32 1.442695, %v5646_v16 }
 0x442   : > { %v6659_v60 = vmul.f32 %v6531_v19, %v946_v3  ;;  %vm3712_vm2 = vweird.f32 %v7675_v54  ;;  %v5647_v32 = vmul.f32 %v5519_v10, %v2063_v39  ;;  %vm3711_vm3 = vweird.f32 %v12324_v24 }
 0x443   : > { %v4749_v41 = vadd.f32 1.4214138, %v4621_v22  ;;  %v3709_v5 = vmul.f32 %v7675_v54, %v3708_v34  ;;  %v3718_v61 = vor.u32 1.1754944e-38, %v3717_v44  ;;  %v12390_v49 = vmul.f32 0.70710677, %v1198_v20  ;;  %vm3713_vm5 = vmor %vm3711_vm3, %vm3712_vm2 }
 0x444   : > { %6787 = vst [vmem:[%s8785_s10 + $0x278] sm:$0xff] %v6659_v60  ;;  %v12393_v28 = vmul.f32 0.70710677, %v12377_v8  ;;  %v12396_v11 = vmul.f32 %v6155_v43, %v12192_v36  ;;  %vm1807_vm4 = vcmp.ge.f32.partialorder %v12326_v30, 0.0  ;;  %v5260_v56 = vadd.f32 0.2548296, %v5132_v46  ;;  %v739_v60 = vpop.f32.mrf.mxu0 }
 0x445   : > { %v4877_v21 = vmul.f32 %v4749_v41, %v12354_v27  ;;  %v3710_v16 = vadd.f32 %v7675_v54, %v3709_v5  ;;  %7680 = vpow2.f32 %v5864_v38  ;;  %v2064_v24 = vand.u32 2147483647, %v12390_v49 }
 0x446   : > { %v7679_v3 = vpop.eup %7678  ;;  %v2065_v39 = vand.u32 2147483647, %v12393_v28  ;;  %v5866_v17 = vmul.f32 1.442695, %v5647_v32  ;;  %v3730_v35 = vand.u32 2147483647, %v12361_v59  ;;  %v5388_v46 = vmul.f32 %v5260_v56, %v12301_v62 }
 0x447   : > { %v5005_v47 = vadd.f32 -0.28449672, %v4877_v21  ;;  %v3714_v45 = vsel %vm3713_vm5, %v7675_v54, %v3710_v16  ;;  %v3722_v19 = vmul.f32 %v7679_v3, %v12361_v59  ;;  %v3732_v10 = vand.u32 2147483648, %v12361_v59 }
 0x448   : > { %v12405_v36 = vsel %vm12384_vm1, %v3718_v61, %v3714_v45  ;;  %v2192_v44 = vmul.f32 0.3275911, %v2064_v24  ;;  %v12414_v54 = vsel %vm1807_vm4, 1.0, %v14002_v6  ;;  %vm3726_vm6 = vweird.f32 %v12361_v59 }
 0x449   : > { %v5133_v43 = vmul.f32 %v5005_v47, %v12354_v27  ;;  %v4366_v22 = vmul.f32 1.0614054, %v12405_v36  ;;  %v3723_v34 = vsub.f32 1.0, %v3722_v19  ;;  %v2193_v38 = vmul.f32 0.3275911, %v2065_v39 }
 0x44a   : > { %v12418_v53 = vadd.f32 1.0, %v2192_v44  ;;  %vm3727_vm7 = vweird.f32 %v7679_v3  ;;  %7682 = vpow2.f32 %v5866_v17  ;;  %vm12422_vm8 = vcmp.eq.f32.partialorder %v3730_v35, 8.507059e+37 }
 0x44b   : > { %v4494_v41 = vadd.f32 -1.4531521, %v4366_v22  ;;  %v3724_v5 = vmul.f32 %v7679_v3, %v3723_v34  ;;  %v12420_v32 = vpop.eup %7680  ;;  %v3733_v30 = vor.u32 1.1754944e-38, %v3732_v10  ;;  %v12426_v21 = vmul.f32 0.5, %v1198_v20  ;;  %vm3728_vm9 = vmor %vm3726_vm6, %vm3727_vm7 }
 0x44c   : > { %7684 = vrcp.f32 %v12418_v53  ;;  %v5261_v62 = vadd.f32 0.2548296, %v5133_v43  ;;  %v740_v47 = vadd.f32 %v739_v60, %v8732_v23  ;;  %v12432_v45 = vmul.f32 %v12329_v58, %v5388_v46 }
 0x44d   : > { %v4622_v16 = vmul.f32 %v4494_v41, %v12405_v36  ;;  %v3725_v56 = vadd.f32 %v7679_v3, %v3724_v5  ;;  %vm1808_vm10 = vcmp.ge.f32.partialorder %v12390_v49, 0.0  ;;  %v12437_v19 = vadd.f32 1.0, %v2193_v38 }
 0x44e   : > { %v6404_v20 = vadd.f32 1.0, %v12098_v25  ;;  %v5520_v10 = vsub.f32 0.0, %v2064_v24  ;;  %v5521_v44 = vsub.f32 0.0, %v2065_v39  ;;  %v3745_v58 = vand.u32 2147483647, %v12418_v53 }
 0x44f   : > { %v4750_v17 = vadd.f32 1.4214138, %v4622_v16  ;;  %v3729_v35 = vsel %vm3728_vm9, %v7679_v3, %v3725_v56  ;;  %v3747_v22 = vand.u32 2147483648, %v12418_v53  ;;  %7686 = vrcp.f32 %v12437_v19  ;;  %v1200_v16 = vpop.f32.mrf.mxu2 }
 0x450   : > { %v12442_v43 = vsel %vm12422_vm8, %v3733_v30, %v3729_v35  ;;  %v12447_v59 = vpop.eup %7682  ;;  %v5389_v34 = vmul.f32 %v5261_v62, %v12354_v27  ;;  %v12453_v46 = vmul.f32 0.5, %v12377_v8  ;;  %v12459_v41 = vsel %vm1808_vm10, 1.0, %v14002_v6  ;;  %v948_v8 = vpop.f32.mrf.mxu1 }
 0x451   : > { %v4878_v25 = vmul.f32 %v4750_v17, %v12405_v36  ;;  %v4367_v3 = vmul.f32 1.0614054, %v12442_v43  ;;  %vm3741_vm11 = vweird.f32 %v12418_v53  ;;  %v6532_v5 = vmul.f32 %v6404_v20, %v11926_v1 }
 0x452   : > { %14061 = vst [vmem:[#allocation6_spill] sm:$0xff] %v12453_v46  ;;  %v7685_v38 = vpop.eup %7684  ;;  %v5648_v62 = vmul.f32 %v5520_v10, %v2064_v24  ;;  %vm12464_vm12 = vcmp.eq.f32.partialorder %v3745_v58, 8.507059e+37  ;;  %v3748_v17 = vor.u32 1.1754944e-38, %v3747_v22  ;;  %v5649_v49 = vmul.f32 %v5521_v44, %v2065_v39  ;;  %v1409_v22 = vpop.f32.mrf.mxu3 }
 0x453   : > { %v5006_v27 = vadd.f32 -0.28449672, %v4878_v25  ;;  %v4495_v61 = vadd.f32 -1.4531521, %v4367_v3  ;;  %v3737_v30 = vmul.f32 %v7685_v38, %v12418_v53  ;;  %v6660_v35 = vmul.f32 %v6532_v5, %v740_v47 }
 0x454   : > { %v6029_v60 = vmul.f32 %v12371_v15, %v5389_v34  ;;  %vm1809_vm13 = vcmp.ge.f32.partialorder %v12393_v28, 0.0  ;;  %vm3742_vm14 = vweird.f32 %v7685_v38  ;;  %v949_v24 = vadd.f32 %v948_v8, %v8768_v57 }
 0x455   : > { %v5134_v46 = vmul.f32 %v5006_v27, %v12405_v36  ;;  %v4623_v1 = vmul.f32 %v4495_v61, %v12442_v43  ;;  %v3738_v20 = vsub.f32 1.0, %v3737_v30  ;;  %v7687_v25 = vpop.eup %7686  ;;  %6788 = vst [vmem:[%s8785_s10 + $0x280] sm:$0xff] %v6660_v35  ;;  %v6405_v10 = vadd.f32 1.0, %v12129_v4  ;;  %vm3743_vm15 = vmor %vm3741_vm11, %vm3742_vm14 }
 0x456   : > { %v1201_v58 = vadd.f32 %v1200_v16, %v8182_v50  ;;  %v3752_v15 = vmul.f32 %v7687_v25, %v12437_v19  ;;  %v5868_v34 = vmul.f32 1.442695, %v5648_v62  ;;  %v3760_v3 = vand.u32 2147483647, %v12437_v19 }
 0x457   : > { %v5262_v39 = vadd.f32 0.2548296, %v5134_v46  ;;  %v4751_v47 = vadd.f32 1.4214138, %v4623_v1  ;;  %v3739_v44 = vmul.f32 %v7685_v38, %v3738_v20  ;;  %v6533_v5 = vmul.f32 %v6405_v10, %v11930_v29 }
 0x458   : > { %v1682_v27 = vmul.f32 0.70710677, %v1201_v58  ;;  %v3753_v8 = vsub.f32 1.0, %v3752_v15  ;;  %v3762_v4 = vand.u32 2147483648, %v12437_v19  ;;  %vm3757_vm0 = vweird.f32 %v7687_v25 }
 0x459   : > { %v4879_v61 = vmul.f32 %v4751_v47, %v12442_v43  ;;  %v3740_v30 = vadd.f32 %v7685_v38, %v3739_v44  ;;  %v6661_v46 = vmul.f32 %v6533_v5, %v949_v24  ;;  %v1410_v62 = vadd.f32 %v1409_v22, %v8184_v51 }
 0x45a   : > { %v2066_v16 = vand.u32 2147483647, %v1682_v27  ;;  %v5390_v35 = vmul.f32 %v5262_v39, %v12405_v36  ;;  %v3754_v20 = vmul.f32 %v7687_v25, %v3753_v8  ;;  %v6157_v10 = vsub.f32 1.0, %v6029_v60 }
 0x45b   : > { %v5007_v29 = vadd.f32 -0.28449672, %v4879_v61  ;;  %v3744_v1 = vsel %vm3743_vm15, %v7685_v38, %v3740_v30  ;;  %vm3756_vm1 = vweird.f32 %v12437_v19  ;;  %6789 = vst [vmem:[%s8785_s10 + $0x288] sm:$0xff] %v6661_v46  ;;  %7688 = vpow2.f32 %v5868_v34 }
 0x45c   : > { %v12488_v47 = vsel %vm12464_vm12, %v3748_v17, %v3744_v1  ;;  %v2194_v53 = vmul.f32 0.3275911, %v2066_v16  ;;  %v3755_v15 = vadd.f32 %v7687_v25, %v3754_v20  ;;  %vm3758_vm2 = vmor %vm3756_vm1, %vm3757_vm0  ;;  %vm3761_vm3 = vcmp.eq.f32.partialorder %v3760_v3, 8.507059e+37 }
 0x45d   : > { %v5135_v44 = vmul.f32 %v5007_v29, %v12442_v43  ;;  %v4368_v24 = vmul.f32 1.0614054, %v12488_v47  ;;  %v3763_v36 = vor.u32 1.1754944e-38, %v3762_v4  ;;  %v12497_v60 = vmul.f32 0.70710677, %v1410_v62 }
 0x45e   : > { %v12495_v38 = vadd.f32 1.0, %v2194_v53  ;;  %v6030_v56 = vmul.f32 %v12420_v32, %v5390_v35  ;;  %v3759_v19 = vsel %vm3758_vm2, %v7687_v25, %v3755_v15  ;;  %v5870_v39 = vmul.f32 1.442695, %v5649_v49 }
 0x45f   : > { %v4496_v17 = vadd.f32 -1.4531521, %v4368_v24  ;;  %v14064_v22 = vsub.f32 1.0, %v12432_v45  ;;  %v12508_v34 = vsel %vm1809_vm13, 1.0, %v14002_v6  ;;  %v12510_v3 = vsel %vm3761_vm3, %v3763_v36, %v3759_v19  ;;  %v742_v45 = vpop.f32.mrf.mxu0  ;;  %v951_v24 = vpop.f32.mrf.mxu1 }
 0x460   : > { %7690 = vrcp.f32 %v12495_v38  ;;  %v12514_v61 = vmul.f32 %v6157_v10, %v12310_v13  ;;  %v5263_v32 = vadd.f32 0.2548296, %v5135_v44  ;;  %v4369_v25 = vmul.f32 1.0614054, %v12510_v3 }
 0x461   : > { %v12503_v5 = vmul.f32 %v14064_v22, %v12292_v40  ;;  %v4624_v49 = vmul.f32 %v4496_v17, %v12488_v47  ;;  %vm1810_vm4 = vcmp.ge.f32.partialorder %v1682_v27, 0.0  ;;  %v5522_v40 = vsub.f32 0.0, %v2066_v16  ;;  %v12522_v8 = vpop.eup %7688 }
 0x462   : > { %v12519_v30 = vand.u32 2147483647, %v12497_v60  ;;  %v6406_v28 = vadd.f32 1.0, %v12177_v42  ;;  %v6158_v4 = vsub.f32 1.0, %v6030_v56  ;;  %v4497_v35 = vadd.f32 -1.4531521, %v4369_v25  ;;  %v1203_v25 = vpop.f32.mrf.mxu2 }
 0x463   : > { %v4752_v46 = vadd.f32 1.4214138, %v4624_v49  ;;  %7692 = vpow2.f32 %v5870_v39  ;;  %v12524_v13 = vmul.f32 0.5, %v1201_v58  ;;  %v12526_v29 = vmul.f32 0.5, %v1410_v62 }
 0x464   : > { %v2195_v1 = vmul.f32 0.3275911, %v12519_v30  ;;  %v743_v20 = vadd.f32 %v742_v45, %v8732_v23  ;;  %v5391_v10 = vmul.f32 %v5263_v32, %v12442_v43  ;;  %v4625_v42 = vmul.f32 %v4497_v35, %v12510_v3 }
 0x465   : > { %v4880_v53 = vmul.f32 %v4752_v46, %v12488_v47  ;;  %v12535_v44 = vsel %vm1810_vm4, 1.0, %v14002_v6  ;;  %v5650_v58 = vmul.f32 %v5522_v40, %v2066_v16  ;;  %v6534_v62 = vmul.f32 %v6406_v28, %v12003_v33 }
 0x466   : > { %v7691_v15 = vpop.eup %7690  ;;  %v12537_v36 = vadd.f32 1.0, %v2195_v1  ;;  %v6407_v56 = vadd.f32 1.0, %v12248_v37  ;;  %v12542_v17 = vmul.f32 %v6158_v4, %v12367_v63  ;;  %v4753_v19 = vadd.f32 1.4214138, %v4625_v42 }
 0x467   : > { %v5008_v43 = vadd.f32 -0.28449672, %v4880_v53  ;;  %v3767_v39 = vmul.f32 %v7691_v15, %v12495_v38  ;;  %v3775_v27 = vand.u32 2147483647, %v12495_v38  ;;  %v3777_v22 = vand.u32 2147483648, %v12495_v38  ;;  %v1412_v53 = vpop.f32.mrf.mxu3 }
 0x468   : > { %7694 = vrcp.f32 %v12537_v36  ;;  %v952_v16 = vadd.f32 %v951_v24, %v8768_v57  ;;  %v6031_v33 = vmul.f32 %v12447_v59, %v5391_v10  ;;  %v4881_v63 = vmul.f32 %v4753_v19, %v12510_v3 }
 0x469   : > { %v12549_v32 = vpop.eup %7692  ;;  %v5136_v37 = vmul.f32 %v5008_v43, %v12488_v47  ;;  %v3768_v49 = vsub.f32 1.0, %v3767_v39  ;;  %v5872_v45 = vmul.f32 1.442695, %v5650_v58  ;;  %v5523_v40 = vsub.f32 0.0, %v12519_v30 }
 0x46a   : > { %v6662_v28 = vmul.f32 %v6534_v62, %v743_v20  ;;  %v6535_v4 = vmul.f32 %v6407_v56, %v12012_v14  ;;  %v5009_v35 = vadd.f32 -0.28449672, %v4881_v63  ;;  %vm3772_vm5 = vweird.f32 %v7691_v15 }
 0x46b   : > { %v5264_v46 = vadd.f32 0.2548296, %v5136_v37  ;;  %v3769_v1 = vmul.f32 %v7691_v15, %v3768_v49  ;;  %vm3771_vm6 = vweird.f32 %v12495_v38  ;;  %vm12557_vm7 = vcmp.eq.f32.partialorder %v3775_v27, 8.507059e+37 }
 0x46c   : > { %6790 = vst [vmem:[%s8785_s10 + $0x290] sm:$0xff] %v6662_v28  ;;  %v6663_v10 = vmul.f32 %v6535_v4, %v952_v16  ;;  %v1204_v42 = vadd.f32 %v1203_v25, %v8182_v50  ;;  %v6159_v24 = vsub.f32 1.0, %v6031_v33  ;;  %v3778_v58 = vor.u32 1.1754944e-38, %v3777_v22  ;;  %vm3773_vm9 = vmor %vm3771_vm6, %vm3772_vm5 }
 0x46d   : > { %v3770_v20 = vadd.f32 %v7691_v15, %v3769_v1  ;;  %vm1811_vm8 = vcmp.ge.f32.partialorder %v12497_v60, 0.0  ;;  %v5392_v62 = vmul.f32 %v5264_v46, %v12488_v47  ;;  %v5137_v56 = vmul.f32 %v5009_v35, %v12510_v3  ;;  %v745_v1 = vpop.f32.mrf.mxu0 }
 0x46e   : > { %v7695_v14 = vpop.eup %7694  ;;  %6791 = vst [vmem:[%s8785_s10 + $0x298] sm:$0xff] %v6663_v10  ;;  %v1684_v38 = vmul.f32 0.70710677, %v1204_v42  ;;  %v1413_v43 = vadd.f32 %v1412_v53, %v8184_v51  ;;  %7696 = vpow2.f32 %v5872_v45  ;;  %v5651_v27 = vmul.f32 %v5523_v40, %v12519_v30 }
 0x46f   : > { %v3774_v19 = vsel %vm3773_vm9, %v7691_v15, %v3770_v20  ;;  %v3782_v39 = vmul.f32 %v7695_v14, %v12537_v36  ;;  %v12575_v60 = vsel %vm1811_vm8, 1.0, %v14002_v6  ;;  %v3790_v47 = vand.u32 2147483647, %v12537_v36 }
 0x470   : > { %v12572_v22 = vsel %vm12557_vm7, %v3778_v58, %v3774_v19  ;;  %v2068_v16 = vand.u32 2147483647, %v1684_v38  ;;  %v12579_v33 = vmul.f32 %v6159_v24, %v12414_v54  ;;  %v3792_v63 = vand.u32 2147483648, %v12537_v36 }
 0x471   : > { %v4370_v15 = vmul.f32 1.0614054, %v12572_v22  ;;  %v3783_v37 = vsub.f32 1.0, %v3782_v39  ;;  %v6032_v30 = vmul.f32 %v12522_v8, %v5392_v62  ;;  %v5265_v49 = vadd.f32 0.2548296, %v5137_v56 }
 0x472   : > { %v2196_v25 = vmul.f32 0.3275911, %v2068_v16  ;;  %v1685_v45 = vmul.f32 0.70710677, %v1413_v43  ;;  %vm3787_vm10 = vweird.f32 %v7695_v14  ;;  %v5874_v4 = vmul.f32 1.442695, %v5651_v27 }
 0x473   : > { %v4498_v40 = vadd.f32 -1.4531521, %v4370_v15  ;;  %v3784_v28 = vmul.f32 %v7695_v14, %v3783_v37  ;;  %vm3786_vm11 = vweird.f32 %v12537_v36  ;;  %vm12585_vm12 = vcmp.eq.f32.partialorder %v3790_v47, 8.507059e+37 }
 0x474   : > { %v12589_v54 = vadd.f32 1.0, %v2196_v25  ;;  %v2069_v35 = vand.u32 2147483647, %v1685_v45  ;;  %v12591_v53 = vpop.eup %7696  ;;  %v3793_v10 = vor.u32 1.1754944e-38, %v3792_v63  ;;  %v6408_v24 = vadd.f32 1.0, %v12287_v12  ;;  %vm3788_vm13 = vmor %vm3786_vm11, %vm3787_vm10 }
 0x475   : > { %v4626_v8 = vmul.f32 %v4498_v40, %v12572_v22  ;;  %v3785_v59 = vadd.f32 %v7695_v14, %v3784_v28  ;;  %v6160_v20 = vsub.f32 1.0, %v6032_v30  ;;  %v5393_v58 = vmul.f32 %v5265_v49, %v12510_v3  ;;  %v954_v49 = vpop.f32.mrf.mxu1 }
 0x476   : > { %vm1812_vm14 = vcmp.ge.f32.partialorder %v1684_v38, 0.0  ;;  %7698 = vrcp.f32 %v12589_v54  ;;  %v746_v56 = vadd.f32 %v745_v1, %v8732_v23  ;;  %v12602_v39 = vmul.f32 0.5, %v1204_v42 }
 0x477   : > { %v4754_v36 = vadd.f32 1.4214138, %v4626_v8  ;;  %v3789_v62 = vsel %vm3788_vm13, %v7695_v14, %v3785_v59  ;;  %7700 = vpow2.f32 %v5874_v4  ;;  %v5524_v27 = vsub.f32 0.0, %v2068_v16  ;;  %v1206_v14 = vpop.f32.mrf.mxu2 }
 0x478   : > { %v12600_v19 = vsel %vm12585_vm12, %v3793_v10, %v3789_v62  ;;  %v2197_v12 = vmul.f32 0.3275911, %v2069_v35  ;;  %v12607_v38 = vsel %vm1812_vm14, 1.0, %v14002_v6  ;;  %v12609_v15 = vmul.f32 0.5, %v1413_v43  ;;  %v1415_v62 = vpop.f32.mrf.mxu3 }
 0x479   : > { %v4882_v47 = vmul.f32 %v4754_v36, %v12572_v22  ;;  %v4371_v3 = vmul.f32 1.0614054, %v12600_v19  ;;  %v12612_v37 = vmul.f32 %v6160_v20, %v12459_v41  ;;  %v6033_v63 = vmul.f32 %v12549_v32, %v5393_v58 }
 0x47a   : > { %v12615_v30 = vadd.f32 1.0, %v2197_v12  ;;  %v6536_v42 = vmul.f32 %v6408_v24, %v12090_v18  ;;  %vm1813_vm15 = vcmp.ge.f32.partialorder %v1685_v45, 0.0  ;;  %v6409_v28 = vadd.f32 1.0, %v12315_v48 }
 0x47b   : > { %v5010_v25 = vadd.f32 -0.28449672, %v4882_v47  ;;  %v4499_v40 = vadd.f32 -1.4531521, %v4371_v3  ;;  %v5652_v46 = vmul.f32 %v5524_v27, %v2068_v16  ;;  %v5525_v43 = vsub.f32 0.0, %v2069_v35 }
 0x47c   : > { %v7699_v4 = vpop.eup %7698  ;;  %7702 = vrcp.f32 %v12615_v30  ;;  %v12621_v41 = vadd.f32 %v1206_v14, %v8182_v50  ;;  %v955_v45 = vadd.f32 %v954_v49, %v8768_v57  ;;  %v6161_v48 = vsub.f32 1.0, %v6033_v63 }
 0x47d   : > { %v12623_v1 = vpop.eup %7700  ;;  %v5138_v32 = vmul.f32 %v5010_v25, %v12572_v22  ;;  %v4627_v18 = vmul.f32 %v4499_v40, %v12600_v19  ;;  %v3797_v8 = vmul.f32 %v7699_v4, %v12589_v54  ;;  %v3805_v16 = vand.u32 2147483647, %v12589_v54 }
 0x47e   : > { %v12631_v59 = vsel %vm1813_vm15, 1.0, %v14002_v6  ;;  %v6664_v10 = vmul.f32 %v6536_v42, %v746_v56  ;;  %v6537_v36 = vmul.f32 %v6409_v28, %v12100_v2  ;;  %vm3801_vm0 = vweird.f32 %v12589_v54 }
 0x47f   : > { %v5266_v24 = vadd.f32 0.2548296, %v5138_v32  ;;  %v4755_v20 = vadd.f32 1.4214138, %v4627_v18  ;;  %v3798_v58 = vsub.f32 1.0, %v3797_v8  ;;  %v3807_v27 = vand.u32 2147483648, %v12589_v54 }
 0x480   : > { %v5653_v12 = vmul.f32 %v5525_v43, %v2069_v35  ;;  %6792 = vst [vmem:[%s8785_s10 + $0x2a0] sm:$0xff] %v6664_v10  ;;  %v1686_v47 = vmul.f32 0.70710677, %v12621_v41  ;;  %vm3802_vm1 = vweird.f32 %v7699_v4  ;;  %v6665_v56 = vmul.f32 %v6537_v36, %v955_v45 }
 0x481   : > { %v5394_v3 = vmul.f32 %v5266_v24, %v12572_v22  ;;  %v3799_v14 = vmul.f32 %v7699_v4, %v3798_v58  ;;  %v12640_v42 = vmul.f32 %v6161_v48, %v12508_v34  ;;  %v4883_v2 = vmul.f32 %v4755_v20, %v12600_v19  ;;  %vm3803_vm3 = vmor %vm3801_vm0, %vm3802_vm1 }
 0x482   : > { %v7703_v63 = vpop.eup %7702  ;;  %v2070_v49 = vand.u32 2147483647, %v1686_v47  ;;  %v1416_v25 = vadd.f32 %v1415_v62, %v8184_v51  ;;  %vm3806_vm2 = vcmp.eq.f32.partialorder %v3805_v16, 8.507059e+37  ;;  %v5876_v35 = vmul.f32 1.442695, %v5652_v46  ;;  %6793 = vst [vmem:[%s8785_s10 + $0x2a8] sm:$0xff] %v6665_v56 }
 0x483   : > { %v3800_v40 = vadd.f32 %v7699_v4, %v3799_v14  ;;  %v3812_v28 = vmul.f32 %v7703_v63, %v12615_v30  ;;  %v3808_v22 = vor.u32 1.1754944e-38, %v3807_v27  ;;  %v3820_v43 = vand.u32 2147483647, %v12615_v30 }
 0x484   : > { %v3822_v34 = vand.u32 2147483648, %v12615_v30  ;;  %v2198_v32 = vmul.f32 0.3275911, %v2070_v49  ;;  %v6034_v18 = vmul.f32 %v12591_v53, %v5394_v3  ;;  %v5878_v48 = vmul.f32 1.442695, %v5653_v12 }
 0x485   : > { %v3804_v8 = vsel %vm3803_vm3, %v7699_v4, %v3800_v40  ;;  %v3813_v45 = vsub.f32 1.0, %v3812_v28  ;;  %v5011_v10 = vadd.f32 -0.28449672, %v4883_v2  ;;  %v12655_v24 = vmul.f32 0.70710677, %v1416_v25 }
 0x486   : > { %v12651_v16 = vsel %vm3806_vm2, %v3808_v22, %v3804_v8  ;;  %v12653_v46 = vadd.f32 1.0, %v2198_v32  ;;  %7704 = vpow2.f32 %v5876_v35  ;;  %vm3817_vm4 = vweird.f32 %v7703_v63 }
 0x487   : > { %v4372_v54 = vmul.f32 1.0614054, %v12651_v16  ;;  %v3814_v20 = vmul.f32 %v7703_v63, %v3813_v45  ;;  %vm3816_vm5 = vweird.f32 %v12615_v30  ;;  %vm12659_vm6 = vcmp.eq.f32.partialorder %v3820_v43, 8.507059e+37 }
 0x488   : > { %7706 = vrcp.f32 %v12653_v46  ;;  %v5526_v53 = vsub.f32 0.0, %v2070_v49  ;;  %v6162_v4 = vsub.f32 1.0, %v6034_v18  ;;  %vm1814_vm7 = vcmp.ge.f32.partialorder %v1686_v47, 0.0  ;;  %vm3818_vm8 = vmor %vm3816_vm5, %vm3817_vm4 }
 0x489   : > { %v4500_v36 = vadd.f32 -1.4531521, %v4372_v54  ;;  %v3815_v62 = vadd.f32 %v7703_v63, %v3814_v20  ;;  %v5139_v27 = vmul.f32 %v5011_v10, %v12600_v19  ;;  %v3823_v12 = vor.u32 1.1754944e-38, %v3822_v34  ;;  %v957_v34 = vpop.f32.mrf.mxu1 }
 0x48a   : > { %7708 = vpow2.f32 %v5878_v48  ;;  %v2071_v3 = vand.u32 2147483647, %v12655_v24  ;;  %v12668_v56 = vmul.f32 0.5, %v12621_v41  ;;  %v12670_v2 = vmul.f32 0.5, %v1416_v25  ;;  %v748_v25 = vpop.f32.mrf.mxu0 }
 0x48b   : > { %v4628_v30 = vmul.f32 %v4500_v36, %v12651_v16  ;;  %v3819_v14 = vsel %vm3818_vm8, %v7703_v63, %v3815_v62  ;;  %v12677_v47 = vsel %vm1814_vm7, 1.0, %v14002_v6  ;;  %v5654_v35 = vmul.f32 %v5526_v53, %v2070_v49  ;;  %v1209_v62 = vpop.f32.mrf.mxu2 }
 0x48c   : > { %v12674_v40 = vsel %vm12659_vm6, %v3823_v12, %v3819_v14  ;;  %v2199_v28 = vmul.f32 0.3275911, %v2071_v3  ;;  %v12679_v22 = vpop.eup %7704  ;;  %v12682_v43 = vmul.f32 %v6162_v4, %v12535_v44  ;;  %vm1815_vm9 = vcmp.ge.f32.partialorder %v12655_v24, 0.0 }
 0x48d   : > { %v4756_v63 = vadd.f32 1.4214138, %v4628_v30  ;;  %v4373_v41 = vmul.f32 1.0614054, %v12674_v40  ;;  %v5267_v18 = vadd.f32 0.2548296, %v5139_v27  ;;  %vm3831_vm10 = vweird.f32 %v12653_v46 }
 0x48e   : > { %v7707_v32 = vpop.eup %7706  ;;  %v12686_v8 = vadd.f32 1.0, %v2199_v28  ;;  %v6410_v45 = vadd.f32 1.0, %v12380_v55  ;;  %v6411_v49 = vadd.f32 1.0, %v12396_v11  ;;  %v3835_v20 = vand.u32 2147483647, %v12653_v46 }
 0x48f   : > { %v4884_v48 = vmul.f32 %v4756_v63, %v12651_v16  ;;  %v4501_v10 = vadd.f32 -1.4531521, %v4373_v41  ;;  %v3827_v44 = vmul.f32 %v7707_v32, %v12653_v46  ;;  %v749_v58 = vadd.f32 %v748_v25, %v8732_v23 }
 0x490   : > { %v12693_v54 = vpop.eup %7708  ;;  %7710 = vrcp.f32 %v12686_v8  ;;  %v958_v53 = vadd.f32 %v957_v34, %v8768_v57  ;;  %v3837_v36 = vand.u32 2147483648, %v12653_v46  ;;  %v5395_v27 = vmul.f32 %v5267_v18, %v12600_v19 }
 0x491   : > { %v5012_v55 = vadd.f32 -0.28449672, %v4884_v48  ;;  %v4629_v11 = vmul.f32 %v4501_v10, %v12674_v40  ;;  %v3828_v4 = vsub.f32 1.0, %v3827_v44  ;;  %v5527_v12 = vsub.f32 0.0, %v2071_v3 }
 0x492   : > { %v6538_v30 = vmul.f32 %v6410_v45, %v12138_v31  ;;  %v6539_v14 = vmul.f32 %v6411_v49, %v12147_v26  ;;  %vm3832_vm11 = vweird.f32 %v7707_v32  ;;  %v5880_v25 = vmul.f32 1.442695, %v5654_v35 }
 0x493   : > { %v5140_v28 = vmul.f32 %v5012_v55, %v12651_v16  ;;  %v4757_v63 = vadd.f32 1.4214138, %v4629_v11  ;;  %v3829_v41 = vmul.f32 %v7707_v32, %v3828_v4  ;;  %v1210_v10 = vadd.f32 %v1209_v62, %v8182_v50  ;;  %vm3833_vm13 = vmor %vm3831_vm10, %vm3832_vm11 }
 0x494   : > { %v6666_v34 = vmul.f32 %v6538_v30, %v749_v58  ;;  %v6667_v48 = vmul.f32 %v6539_v14, %v958_v53  ;;  %vm3836_vm12 = vcmp.eq.f32.partialorder %v3835_v20, 8.507059e+37  ;;  %v6035_v26 = vmul.f32 %v12623_v1, %v5395_v27  ;;  %v1418_v20 = vpop.f32.mrf.mxu3 }
 0x495   : > { %v5268_v44 = vadd.f32 0.2548296, %v5140_v28  ;;  %v4885_v19 = vmul.f32 %v4757_v63, %v12674_v40  ;;  %v3830_v18 = vadd.f32 %v7707_v32, %v3829_v41  ;;  %v3838_v45 = vor.u32 1.1754944e-38, %v3837_v36  ;;  %v751_v63 = vpop.f32.mrf.mxu0 }
 0x496   : > { %v7711_v31 = vpop.eup %7710  ;;  %v12713_v35 = vsel %vm1815_vm9, 1.0, %v14002_v6  ;;  %6794 = vst [vmem:[%s8785_s10 + $0x2b0] sm:$0xff] %v6666_v34  ;;  %v1688_v49 = vmul.f32 0.70710677, %v1210_v10  ;;  %v5655_v11 = vmul.f32 %v5527_v12, %v2071_v3  ;;  %v3850_v46 = vand.u32 2147483647, %v12686_v8 }
 0x497   : > { %v5013_v58 = vadd.f32 -0.28449672, %v4885_v19  ;;  %v3834_v53 = vsel %vm3833_vm13, %v7707_v32, %v3830_v18  ;;  %v3842_v55 = vmul.f32 %v7711_v31, %v12686_v8  ;;  %6795 = vst [vmem:[%s8785_s10 + $0x2b8] sm:$0xff] %v6667_v48  ;;  %v5396_v1 = vmul.f32 %v5268_v44, %v12651_v16 }
 0x498   : > { %v12719_v4 = vsel %vm3836_vm12, %v3838_v45, %v3834_v53  ;;  %v2072_v36 = vand.u32 2147483647, %v1688_v49  ;;  %v3852_v30 = vand.u32 2147483648, %v12686_v8  ;;  %v6163_v32 = vsub.f32 1.0, %v6035_v26 }
 0x499   : > { %v5141_v24 = vmul.f32 %v5013_v58, %v12674_v40  ;;  %v4374_v62 = vmul.f32 1.0614054, %v12719_v4  ;;  %v3843_v27 = vsub.f32 1.0, %v3842_v55  ;;  %v1419_v3 = vadd.f32 %v1418_v20, %v8184_v51 }
 0x49a   : > { %v2200_v14 = vmul.f32 0.3275911, %v2072_v36  ;;  %v6412_v12 = vadd.f32 1.0, %v12503_v5  ;;  %vm3846_vm14 = vweird.f32 %v12686_v8  ;;  %vm3847_vm15 = vweird.f32 %v7711_v31 }
 0x49b   : > { %v4502_v28 = vadd.f32 -1.4531521, %v4374_v62  ;;  %v3844_v16 = vmul.f32 %v7711_v31, %v3843_v27  ;;  %v6036_v41 = vmul.f32 %v12679_v22, %v5396_v1  ;;  %v5269_v34 = vadd.f32 0.2548296, %v5141_v24  ;;  %vm3848_vm1 = vmor %vm3846_vm14, %vm3847_vm15 }
 0x49c   : > { %vm12729_vm0 = vcmp.eq.f32.partialorder %v3850_v46, 8.507059e+37  ;;  %v12733_v44 = vadd.f32 1.0, %v2200_v14  ;;  %v3853_v26 = vor.u32 1.1754944e-38, %v3852_v30  ;;  %v5882_v5 = vmul.f32 1.442695, %v5655_v11  ;;  %v960_v14 = vpop.f32.mrf.mxu1 }
 0x49d   : > { %v4630_v19 = vmul.f32 %v4502_v28, %v12719_v4  ;;  %v3845_v18 = vadd.f32 %v7711_v31, %v3844_v16  ;;  %v12737_v8 = vmul.f32 0.70710677, %v1419_v3  ;;  %v752_v45 = vadd.f32 %v751_v63, %v8732_v23 }
 0x49e   : > { %7712 = vrcp.f32 %v12733_v44  ;;  %v6540_v22 = vmul.f32 %v6412_v12, %v12258_v0  ;;  %vm1816_vm2 = vcmp.ge.f32.partialorder %v1688_v49, 0.0  ;;  %v5528_v55 = vsub.f32 0.0, %v2072_v36 }
 0x49f   : > { %v4758_v58 = vadd.f32 1.4214138, %v4630_v19  ;;  %v3849_v53 = vsel %vm3848_vm1, %v7711_v31, %v3845_v18  ;;  %v6164_v20 = vsub.f32 1.0, %v6036_v41  ;;  %v5397_v1 = vmul.f32 %v5269_v34, %v12674_v40 }
 0x4a0   : > { %7714 = vpow2.f32 %v5880_v25  ;;  %v12744_v11 = vsel %vm12729_vm0, %v3853_v26, %v3849_v53  ;;  %v12747_v46 = vmul.f32 %v6163_v32, %v12575_v60  ;;  %v12751_v0 = vmul.f32 0.5, %v1210_v10  ;;  %v1212_v32 = vpop.f32.mrf.mxu2 }
 0x4a1   : > { %v4886_v24 = vmul.f32 %v4758_v58, %v12719_v4  ;;  %v4375_v62 = vmul.f32 1.0614054, %v12744_v11  ;;  %7716 = vpow2.f32 %v5882_v5  ;;  %v12754_v31 = vsel %vm1816_vm2, 1.0, %v14002_v6 }
 0x4a2   : > { %v2073_v40 = vand.u32 2147483647, %v12737_v8  ;;  %v6668_v25 = vmul.f32 %v6540_v22, %v752_v45  ;;  %v5656_v30 = vmul.f32 %v5528_v55, %v2072_v36  ;;  %v6413_v60 = vadd.f32 1.0, %v12514_v61 }
 0x4a3   : > { %v5014_v49 = vadd.f32 -0.28449672, %v4886_v24  ;;  %v4503_v27 = vadd.f32 -1.4531521, %v4375_v62  ;;  %v12759_v28 = vmul.f32 %v6164_v20, %v12607_v38  ;;  %v6037_v10 = vmul.f32 %v12693_v54, %v5397_v1 }
 0x4a4   : > { %v7713_v12 = vpop.eup %7712  ;;  %v12762_v16 = vmul.f32 0.5, %v1419_v3  ;;  %v2201_v63 = vmul.f32 0.3275911, %v2073_v40  ;;  %6796 = vst [vmem:[%s8785_s10 + $0x2c0] sm:$0xff] %v6668_v25  ;;  %v3865_v48 = vand.u32 2147483647, %v12733_v44  ;;  %v961_v38 = vadd.f32 %v960_v14, %v8768_v57  ;;  %v1421_v3 = vpop.f32.mrf.mxu3 }
 0x4a5   : > { %v5142_v41 = vmul.f32 %v5014_v49, %v12719_v4  ;;  %v4631_v34 = vmul.f32 %v4503_v27, %v12744_v11  ;;  %v3857_v36 = vmul.f32 %v7713_v12, %v12733_v44  ;;  %v6541_v18 = vmul.f32 %v6413_v60, %v12266_v7 }
 0x4a6   : > { %v7715_v61 = vpop.eup %7714  ;;  %v12769_v19 = vadd.f32 1.0, %v2201_v63  ;;  %v1213_v54 = vadd.f32 %v1212_v32, %v8182_v50  ;;  %v3867_v22 = vand.u32 2147483648, %v12733_v44  ;;  %v5884_v58 = vmul.f32 1.442695, %v5656_v30 }
 0x4a7   : > { %v12774_v26 = vpop.eup %7716  ;;  %v4759_v5 = vadd.f32 1.4214138, %v4631_v34  ;;  %v3858_v45 = vsub.f32 1.0, %v3857_v36  ;;  %v6165_v53 = vsub.f32 1.0, %v6037_v10  ;;  %v5270_v55 = vadd.f32 0.2548296, %v5142_v41 }
 0x4a8   : > { %7718 = vrcp.f32 %v12769_v19  ;;  %v5529_v20 = vsub.f32 0.0, %v2073_v40  ;;  %vm3862_vm3 = vweird.f32 %v7713_v12  ;;  %v1422_v7 = vadd.f32 %v1421_v3, %v8184_v51 }
 0x4a9   : > { %v4887_v1 = vmul.f32 %v4759_v5, %v12744_v11  ;;  %v3859_v24 = vmul.f32 %v7713_v12, %v3858_v45  ;;  %vm3861_vm4 = vweird.f32 %v12733_v44  ;;  %vm1817_vm5 = vcmp.ge.f32.partialorder %v12737_v8, 0.0 }
 0x4aa   : > { %v6669_v62 = vmul.f32 %v6541_v18, %v961_v38  ;;  %v1690_v25 = vmul.f32 0.70710677, %v1213_v54  ;;  %vm3866_vm6 = vcmp.eq.f32.partialorder %v3865_v48, 8.507059e+37  ;;  %v3868_v30 = vor.u32 1.1754944e-38, %v3867_v22  ;;  %vm3863_vm7 = vmor %vm3861_vm4, %vm3862_vm3 }
 0x4ab   : > { %v5015_v49 = vadd.f32 -0.28449672, %v4887_v1  ;;  %v3860_v27 = vadd.f32 %v7713_v12, %v3859_v24  ;;  %v5398_v14 = vmul.f32 %v5270_v55, %v12719_v4  ;;  %7720 = vpow2.f32 %v5884_v58 }
 0x4ac   : > { %v5657_v60 = vmul.f32 %v5529_v20, %v2073_v40  ;;  %6797 = vst [vmem:[%s8785_s10 + $0x2c8] sm:$0xff] %v6669_v62  ;;  %v2074_v32 = vand.u32 2147483647, %v1690_v25  ;;  %v12785_v10 = vmul.f32 %v6165_v53, %v12631_v59  ;;  %v12788_v44 = vsel %vm1817_vm5, 1.0, %v14002_v6 }
 0x4ad   : > { %v3864_v63 = vsel %vm3863_vm7, %v7713_v12, %v3860_v27  ;;  %v1691_v8 = vmul.f32 0.70710677, %v1422_v7  ;;  %v5143_v34 = vmul.f32 %v5015_v49, %v12744_v11  ;;  %v3880_v4 = vand.u32 2147483647, %v12769_v19 }
 0x4ae   : > { %v7719_v41 = vpop.eup %7718  ;;  %v12791_v36 = vsel %vm3866_vm6, %v3868_v30, %v3864_v63  ;;  %v2202_v48 = vmul.f32 0.3275911, %v2074_v32  ;;  %v12796_v18 = vmul.f32 0.5, %v1213_v54  ;;  %v12798_v59 = vmul.f32 0.5, %v1422_v7 }
 0x4af   : > { %v4376_v40 = vmul.f32 1.0614054, %v12791_v36  ;;  %v3872_v38 = vmul.f32 %v7719_v41, %v12769_v19  ;;  %v6038_v12 = vmul.f32 %v7715_v61, %v5398_v14  ;;  %v3882_v3 = vand.u32 2147483648, %v12769_v19  ;;  %v754_v61 = vpop.f32.mrf.mxu0 }
 0x4b0   : > { %v5886_v5 = vmul.f32 1.442695, %v5657_v60  ;;  %v12801_v45 = vadd.f32 1.0, %v2202_v48  ;;  %vm3876_vm8 = vweird.f32 %v12769_v19  ;;  %v12804_v53 = vand.u32 2147483647, %v1691_v8 }
 0x4b1   : > { %v4504_v22 = vadd.f32 -1.4531521, %v4376_v40  ;;  %v3873_v58 = vsub.f32 1.0, %v3872_v38  ;;  %v12806_v55 = vpop.eup %7720  ;;  %v5271_v20 = vadd.f32 0.2548296, %v5143_v34  ;;  %vm12808_vm9 = vcmp.eq.f32.partialorder %v3880_v4, 8.507059e+37  ;;  %v963_v40 = vpop.f32.mrf.mxu1 }
 0x4b2   : > { %vm1818_vm10 = vcmp.ge.f32.partialorder %v1690_v25, 0.0  ;;  %7722 = vrcp.f32 %v12801_v45  ;;  %vm3877_vm11 = vweird.f32 %v7719_v41  ;;  %v5530_v7 = vsub.f32 0.0, %v2074_v32 }
 0x4b3   : > { %v4632_v1 = vmul.f32 %v4504_v22, %v12791_v36  ;;  %v3874_v24 = vmul.f32 %v7719_v41, %v3873_v58  ;;  %v6166_v62 = vsub.f32 1.0, %v6038_v12  ;;  %v3883_v49 = vor.u32 1.1754944e-38, %v3882_v3  ;;  %vm3878_vm13 = vmor %vm3876_vm8, %vm3877_vm11 }
 0x4b4   : > { %7724 = vpow2.f32 %v5886_v5  ;;  %v2203_v27 = vmul.f32 0.3275911, %v12804_v53  ;;  %vm1819_vm12 = vcmp.ge.f32.partialorder %v1691_v8, 0.0  ;;  %v755_v60 = vadd.f32 %v754_v61, %v8732_v23 }
 0x4b5   : > { %v4760_v30 = vadd.f32 1.4214138, %v4632_v1  ;;  %v3875_v14 = vadd.f32 %v7719_v41, %v3874_v24  ;;  %v5399_v63 = vmul.f32 %v5271_v20, %v12744_v11  ;;  %v12821_v34 = vsel %vm1818_vm10, 1.0, %v14002_v6 }
 0x4b6   : > { %v12823_v4 = vadd.f32 1.0, %v2203_v27  ;;  %v6414_v48 = vadd.f32 1.0, %v12542_v17  ;;  %v5658_v8 = vmul.f32 %v5530_v7, %v2074_v32  ;;  %v6415_v3 = vadd.f32 1.0, %v12579_v33 }
 0x4b7   : > { %v4888_v38 = vmul.f32 %v4760_v30, %v12791_v36  ;;  %v3879_v12 = vsel %vm3878_vm13, %v7719_v41, %v3875_v14  ;;  %v12829_v11 = vmul.f32 %v6166_v62, %v12677_v47  ;;  %v12836_v25 = vsel %vm1819_vm12, 1.0, %v14002_v6  ;;  %v1215_v41 = vpop.f32.mrf.mxu2 }
 0x4b8   : > { %v7723_v5 = vpop.eup %7722  ;;  %v12833_v19 = vsel %vm12808_vm9, %v3883_v49, %v3879_v12  ;;  %7726 = vrcp.f32 %v12823_v4  ;;  %v964_v33 = vadd.f32 %v963_v40, %v8768_v57  ;;  %v6039_v47 = vmul.f32 %v12774_v26, %v5399_v63 }
 0x4b9   : > { %v5016_v17 = vadd.f32 -0.28449672, %v4888_v38  ;;  %v4377_v22 = vmul.f32 1.0614054, %v12833_v19  ;;  %v3887_v32 = vmul.f32 %v7723_v5, %v12801_v45  ;;  %v3895_v20 = vand.u32 2147483647, %v12801_v45 }
 0x4ba   : > { %v12842_v58 = vpop.eup %7724  ;;  %v3897_v54 = vand.u32 2147483648, %v12801_v45  ;;  %v6542_v61 = vmul.f32 %v6414_v48, %v12345_v52  ;;  %v5888_v7 = vmul.f32 1.442695, %v5658_v8  ;;  %v6543_v62 = vmul.f32 %v6415_v3, %v12356_v9  ;;  %v757_v48 = vpop.f32.mrf.mxu0 }
 0x4bb   : > { %v4505_v1 = vadd.f32 -1.4531521, %v4377_v22  ;;  %v3888_v24 = vsub.f32 1.0, %v3887_v32  ;;  %v5144_v49 = vmul.f32 %v5016_v17, %v12791_v36  ;;  %v5531_v27 = vsub.f32 0.0, %v12804_v53  ;;  %v1424_v17 = vpop.f32.mrf.mxu3 }
 0x4bc   : > { %v6670_v30 = vmul.f32 %v6542_v61, %v755_v60  ;;  %v1216_v26 = vadd.f32 %v1215_v41, %v8182_v50  ;;  %vm3892_vm14 = vweird.f32 %v7723_v5  ;;  %v6671_v40 = vmul.f32 %v6543_v62, %v964_v33 }
 0x4bd   : > { %v4633_v14 = vmul.f32 %v4505_v1, %v12833_v19  ;;  %v3889_v63 = vmul.f32 %v7723_v5, %v3888_v24  ;;  %vm3891_vm15 = vweird.f32 %v12801_v45  ;;  %vm12854_vm0 = vcmp.eq.f32.partialorder %v3895_v20, 8.507059e+37 }
 0x4be   : > { %v7727_v52 = vpop.eup %7726  ;;  %v3898_v9 = vor.u32 1.1754944e-38, %v3897_v54  ;;  %6798 = vst [vmem:[%s8785_s10 + $0x2d0] sm:$0xff] %v6670_v30  ;;  %v12859_v38 = vmul.f32 0.70710677, %v1216_v26  ;;  %v6167_v60 = vsub.f32 1.0, %v6039_v47  ;;  %vm3893_vm1 = vmor %vm3891_vm15, %vm3892_vm14  ;;  %7728 = vpow2.f32 %v5888_v7 }
 0x4bf   : > { %v4761_v12 = vadd.f32 1.4214138, %v4633_v14  ;;  %v3890_v8 = vadd.f32 %v7723_v5, %v3889_v63  ;;  %v3902_v3 = vmul.f32 %v7727_v52, %v12823_v4  ;;  %6799 = vst [vmem:[%s8785_s10 + $0x2d8] sm:$0xff] %v6671_v40  ;;  %v5272_v22 = vadd.f32 0.2548296, %v5144_v49 }
 0x4c0   : > { %v5659_v45 = vmul.f32 %v5531_v27, %v12804_v53  ;;  %v2076_v32 = vand.u32 2147483647, %v12859_v38  ;;  %v3910_v47 = vand.u32 2147483647, %v12823_v4  ;;  %v3912_v61 = vand.u32 2147483648, %v12823_v4 }
 0x4c1   : > { %v4889_v33 = vmul.f32 %v4761_v12, %v12833_v19  ;;  %v3894_v41 = vsel %vm3893_vm1, %v7723_v5, %v3890_v8  ;;  %v3903_v20 = vsub.f32 1.0, %v3902_v3  ;;  %v1425_v24 = vadd.f32 %v1424_v17, %v8184_v51 }
 0x4c2   : > { %v12870_v54 = vsel %vm12854_vm0, %v3898_v9, %v3894_v41  ;;  %v2204_v1 = vmul.f32 0.3275911, %v2076_v32  ;;  %vm3907_vm2 = vweird.f32 %v7727_v52  ;;  %v12876_v49 = vmul.f32 %v6167_v60, %v12713_v35 }
 0x4c3   : > { %v5017_v7 = vadd.f32 -0.28449672, %v4889_v33  ;;  %v4378_v53 = vmul.f32 1.0614054, %v12870_v54  ;;  %v3904_v62 = vmul.f32 %v7727_v52, %v3903_v20  ;;  %v5400_v5 = vmul.f32 %v5272_v22, %v12791_v36 }
 0x4c4   : > { %v5890_v27 = vmul.f32 1.442695, %v5659_v45  ;;  %v12879_v30 = vadd.f32 1.0, %v2204_v1  ;;  %vm3906_vm3 = vweird.f32 %v12823_v4  ;;  %v12883_v9 = vpop.eup %7728  ;;  %v3913_v12 = vor.u32 1.1754944e-38, %v3912_v61 }
 0x4c5   : > { %v5145_v14 = vmul.f32 %v5017_v7, %v12833_v19  ;;  %v4506_v63 = vadd.f32 -1.4531521, %v4378_v53  ;;  %v3905_v40 = vadd.f32 %v7727_v52, %v3904_v62  ;;  %vm3908_vm4 = vmor %vm3906_vm3, %vm3907_vm2  ;;  %v12886_v35 = vmul.f32 0.70710677, %v1425_v24  ;;  %v966_v7 = vpop.f32.mrf.mxu1 }
 0x4c6   : > { %7730 = vrcp.f32 %v12879_v30  ;;  %v6416_v36 = vadd.f32 1.0, %v12612_v37  ;;  %vm3911_vm5 = vcmp.eq.f32.partialorder %v3910_v47, 8.507059e+37  ;;  %v6040_v17 = vmul.f32 %v12806_v55, %v5400_v5 }
 0x4c7   : > { %v5273_v60 = vadd.f32 0.2548296, %v5145_v14  ;;  %v4634_v8 = vmul.f32 %v4506_v63, %v12870_v54  ;;  %v3909_v3 = vsel %vm3908_vm4, %v7727_v52, %v3905_v40  ;;  %7732 = vpow2.f32 %v5890_v27  ;;  %v1218_v63 = vpop.f32.mrf.mxu2 }
 0x4c8   : > { %v12891_v22 = vsel %vm3911_vm5, %v3913_v12, %v3909_v3  ;;  %v758_v4 = vadd.f32 %v757_v48, %v8732_v23  ;;  %vm1820_vm6 = vcmp.ge.f32.partialorder %v12859_v38, 0.0  ;;  %v5532_v41 = vsub.f32 0.0, %v2076_v32 }
 0x4c9   : > { %v4762_v45 = vadd.f32 1.4214138, %v4634_v8  ;;  %v4379_v33 = vmul.f32 1.0614054, %v12891_v22  ;;  %v12896_v20 = vmul.f32 0.5, %v1216_v26  ;;  %v12898_v37 = vmul.f32 0.5, %v1425_v24 }
 0x4ca   : > { %v2077_v52 = vand.u32 2147483647, %v12886_v35  ;;  %v6544_v47 = vmul.f32 %v6416_v36, %v12426_v21  ;;  %v5401_v55 = vmul.f32 %v5273_v60, %v12833_v19  ;;  %v6417_v53 = vadd.f32 1.0, %v12640_v42  ;;  %v14077_v36 = vld [vmem:[#allocation6_spill] sm:$0xff] }
 0x4cb   : > { %v4890_v61 = vmul.f32 %v4762_v45, %v12870_v54  ;;  %v4507_v1 = vadd.f32 -1.4531521, %v4379_v33  ;;  %v6168_v38 = vsub.f32 1.0, %v6040_v17  ;;  %v12906_v26 = vsel %vm1820_vm6, 1.0, %v14002_v6 }
 0x4cc   : > { %v7731_v62 = vpop.eup %7730  ;;  %v2205_v24 = vmul.f32 0.3275911, %v2077_v52  ;;  %v6672_v5 = vmul.f32 %v6544_v47, %v758_v4  ;;  %v5660_v19 = vmul.f32 %v5532_v41, %v2076_v32  ;;  %v3925_v48 = vand.u32 2147483647, %v12879_v30 }
 0x4cd   : > { %v5018_v27 = vadd.f32 -0.28449672, %v4890_v61  ;;  %v4635_v14 = vmul.f32 %v4507_v1, %v12891_v22  ;;  %v3917_v21 = vmul.f32 %v7731_v62, %v12879_v30  ;;  %v12910_v40 = vpop.eup %7732  ;;  %v967_v42 = vadd.f32 %v966_v7, %v8768_v57 }
 0x4ce   : > { %v12913_v12 = vadd.f32 1.0, %v2205_v24  ;;  %6800 = vst [vmem:[%s8785_s10 + $0x2e0] sm:$0xff] %v6672_v5  ;;  %v6545_v60 = vmul.f32 %v6417_v53, %v14077_v36  ;;  %v6041_v8 = vmul.f32 %v12842_v58, %v5401_v55  ;;  %v3927_v4 = vand.u32 2147483648, %v12879_v30 }
 0x4cf   : > { %v4763_v3 = vadd.f32 1.4214138, %v4635_v14  ;;  %v3918_v17 = vsub.f32 1.0, %v3917_v21  ;;  %v5146_v32 = vmul.f32 %v5018_v27, %v12870_v54  ;;  %v5533_v45 = vsub.f32 0.0, %v2077_v52  ;;  %v1427_v27 = vpop.f32.mrf.mxu3 }
 0x4d0   : > { %7734 = vrcp.f32 %v12913_v12  ;;  %v1219_v33 = vadd.f32 %v1218_v63, %v8182_v50  ;;  %vm3922_vm7 = vweird.f32 %v7731_v62  ;;  %v5892_v61 = vmul.f32 1.442695, %v5660_v19 }
 0x4d1   : > { %v4891_v41 = vmul.f32 %v4763_v3, %v12891_v22  ;;  %v3919_v47 = vmul.f32 %v7731_v62, %v3918_v17  ;;  %v12925_v1 = vmul.f32 %v6168_v38, %v12754_v31  ;;  %vm3921_vm8 = vweird.f32 %v12879_v30 }
 0x4d2   : > { %vm12928_vm9 = vcmp.eq.f32.partialorder %v3925_v48, 8.507059e+37  ;;  %v6673_v55 = vmul.f32 %v6545_v60, %v967_v42  ;;  %v6169_v7 = vsub.f32 1.0, %v6041_v8  ;;  %v3928_v5 = vor.u32 1.1754944e-38, %v3927_v4  ;;  %vm3923_vm10 = vmor %vm3921_vm8, %vm3922_vm7 }
 0x4d3   : > { %v5019_v53 = vadd.f32 -0.28449672, %v4891_v41  ;;  %v3920_v24 = vadd.f32 %v7731_v62, %v3919_v47  ;;  %v5274_v14 = vadd.f32 0.2548296, %v5146_v32  ;;  %vm1821_vm11 = vcmp.ge.f32.partialorder %v12886_v35, 0.0  ;;  %v760_v47 = vpop.f32.mrf.mxu0 }
 0x4d4   : > { %v5661_v21 = vmul.f32 %v5533_v45, %v2077_v52  ;;  %6801 = vst [vmem:[%s8785_s10 + $0x2e8] sm:$0xff] %v6673_v55  ;;  %v1694_v31 = vmul.f32 0.70710677, %v1219_v33  ;;  %7736 = vpow2.f32 %v5892_v61  ;;  %v3940_v19 = vand.u32 2147483647, %v12913_v12 }
 0x4d5   : > { %v5147_v38 = vmul.f32 %v5019_v53, %v12891_v22  ;;  %v3924_v30 = vsel %vm3923_vm10, %v7731_v62, %v3920_v24  ;;  %v3942_v42 = vand.u32 2147483648, %v12913_v12  ;;  %v1428_v60 = vadd.f32 %v1427_v27, %v8184_v51 }
 0x4d6   : > { %v7735_v63 = vpop.eup %7734  ;;  %v12938_v48 = vsel %vm12928_vm9, %v3928_v5, %v3924_v30  ;;  %v2078_v36 = vand.u32 2147483647, %v1694_v31  ;;  %v12943_v35 = vmul.f32 %v6169_v7, %v12788_v44  ;;  %v12947_v62 = vsel %vm1821_vm11, 1.0, %v14002_v6 }
 0x4d7   : > { %v4380_v52 = vmul.f32 1.0614054, %v12938_v48  ;;  %v3932_v8 = vmul.f32 %v7735_v63, %v12913_v12  ;;  %v5402_v3 = vmul.f32 %v5274_v14, %v12870_v54  ;;  %vm3936_vm12 = vweird.f32 %v12913_v12  ;;  %v969_v14 = vpop.f32.mrf.mxu1 }
 0x4d8   : > { %v5894_v17 = vmul.f32 1.442695, %v5661_v21  ;;  %v2206_v4 = vmul.f32 0.3275911, %v2078_v36  ;;  %v5275_v32 = vadd.f32 0.2548296, %v5147_v38  ;;  %vm3937_vm14 = vweird.f32 %v7735_v63 }
 0x4d9   : > { %v4508_v45 = vadd.f32 -1.4531521, %v4380_v52  ;;  %v3933_v41 = vsub.f32 1.0, %v3932_v8  ;;  %v6418_v44 = vadd.f32 1.0, %v12682_v43  ;;  %vm12953_vm13 = vcmp.eq.f32.partialorder %v3940_v19, 8.507059e+37  ;;  %vm3938_vm0 = vmor %vm3936_vm12, %vm3937_vm14 }
 0x4da   : > { %v3943_v58 = vor.u32 1.1754944e-38, %v3942_v42  ;;  %v12957_v55 = vadd.f32 1.0, %v2206_v4  ;;  %v12959_v7 = vmul.f32 0.70710677, %v1428_v60  ;;  %v12961_v54 = vpop.eup %7736  ;;  %v12964_v5 = vmul.f32 0.5, %v1219_v33 }
 0x4db   : > { %v4636_v53 = vmul.f32 %v4508_v45, %v12938_v48  ;;  %v3934_v24 = vmul.f32 %v7735_v63, %v3933_v41  ;;  %v6042_v27 = vmul.f32 %v12883_v9, %v5402_v3  ;;  %vm1822_vm15 = vcmp.ge.f32.partialorder %v1694_v31, 0.0  ;;  %v1221_v45 = vpop.f32.mrf.mxu2  ;;  %v1430_v41 = vpop.f32.mrf.mxu3 }
 0x4dc   : > { %7738 = vrcp.f32 %v12957_v55  ;;  %v761_v43 = vadd.f32 %v760_v47, %v8732_v23  ;;  %v5403_v21 = vmul.f32 %v5275_v32, %v12891_v22  ;;  %v6546_v19 = vmul.f32 %v6418_v44, %v12524_v13 }
 0x4dd   : > { %v4764_v38 = vadd.f32 1.4214138, %v4636_v53  ;;  %v3935_v30 = vadd.f32 %v7735_v63, %v3934_v24  ;;  %7740 = vpow2.f32 %v5894_v17  ;;  %v5534_v33 = vsub.f32 0.0, %v2078_v36 }
 0x4de   : > { %v2079_v42 = vand.u32 2147483647, %v12959_v7  ;;  %v6419_v9 = vadd.f32 1.0, %v12747_v46  ;;  %v12976_v3 = vmul.f32 0.5, %v1428_v60  ;;  %v970_v22 = vadd.f32 %v969_v14, %v8768_v57 }
 0x4df   : > { %v4892_v52 = vmul.f32 %v4764_v38, %v12938_v48  ;;  %v3939_v8 = vsel %vm3938_vm0, %v7735_v63, %v3935_v30  ;;  %v6170_v4 = vsub.f32 1.0, %v6042_v27  ;;  %v12985_v12 = vsel %vm1822_vm15, 1.0, %v14002_v6 }
 0x4e0   : > { %v12981_v13 = vsel %vm12953_vm13, %v3943_v58, %v3939_v8  ;;  %v2207_v17 = vmul.f32 0.3275911, %v2079_v42  ;;  %v6043_v46 = vmul.f32 %v12910_v40, %v5403_v21  ;;  %v6674_v60 = vmul.f32 %v6546_v19, %v761_v43 }
 0x4e1   : > { %v5020_v32 = vadd.f32 -0.28449672, %v4892_v52  ;;  %v4381_v63 = vmul.f32 1.0614054, %v12981_v13  ;;  %v3955_v44 = vand.u32 2147483647, %v12957_v55  ;;  %v5662_v61 = vmul.f32 %v5534_v33, %v2078_v36 }
 0x4e2   : > { %v7739_v47 = vpop.eup %7738  ;;  %v12990_v58 = vadd.f32 1.0, %v2207_v17  ;;  %v6547_v31 = vmul.f32 %v6419_v9, %v12526_v29  ;;  %v5535_v40 = vsub.f32 0.0, %v2079_v42  ;;  %6802 = vst [vmem:[%s8785_s10 + $0x2f0] sm:$0xff] %v6674_v60  ;;  %v3957_v43 = vand.u32 2147483648, %v12957_v55 }
 0x4e3   : > { %v5148_v53 = vmul.f32 %v5020_v32, %v12938_v48  ;;  %v4509_v24 = vadd.f32 -1.4531521, %v4381_v63  ;;  %v3947_v27 = vmul.f32 %v7739_v47, %v12957_v55  ;;  %v12996_v14 = vpop.eup %7740  ;;  %v1222_v21 = vadd.f32 %v1221_v45, %v8182_v50 }
 0x4e4   : > { %7742 = vrcp.f32 %v12990_v58  ;;  %v13002_v36 = vadd.f32 %v1430_v41, %v8184_v51  ;;  %v13005_v29 = vmul.f32 %v6170_v4, %v12821_v34  ;;  %v6171_v38 = vsub.f32 1.0, %v6043_v46 }
 0x4e5   : > { %v4637_v30 = vmul.f32 %v4509_v24, %v12981_v13  ;;  %v3948_v19 = vsub.f32 1.0, %v3947_v27  ;;  %v5276_v33 = vadd.f32 0.2548296, %v5148_v53  ;;  %vm13008_vm1 = vcmp.eq.f32.partialorder %v3955_v44, 8.507059e+37 }
 0x4e6   : > { %v5896_v52 = vmul.f32 1.442695, %v5662_v61  ;;  %v6675_v8 = vmul.f32 %v6547_v31, %v970_v22  ;;  %vm3952_vm2 = vweird.f32 %v7739_v47  ;;  %v5663_v63 = vmul.f32 %v5535_v40, %v2079_v42 }
 0x4e7   : > { %v4765_v17 = vadd.f32 1.4214138, %v4637_v30  ;;  %v3949_v32 = vmul.f32 %v7739_v47, %v3948_v19  ;;  %vm3951_vm3 = vweird.f32 %v12957_v55  ;;  %v3958_v60 = vor.u32 1.1754944e-38, %v3957_v43 }
 0x4e8   : > { %6803 = vst [vmem:[%s8785_s10 + $0x2f8] sm:$0xff] %v6675_v8  ;;  %v13014_v34 = vmul.f32 0.70710677, %v1222_v21  ;;  %v13017_v4 = vmul.f32 0.70710677, %v13002_v36  ;;  %v13020_v46 = vmul.f32 %v6171_v38, %v12836_v25  ;;  %vm1823_vm4 = vcmp.ge.f32.partialorder %v12959_v7, 0.0  ;;  %vm3953_vm5 = vmor %vm3951_vm3, %vm3952_vm2 }
 0x4e9   : > { %v4893_v45 = vmul.f32 %v4765_v17, %v12981_v13  ;;  %v3950_v41 = vadd.f32 %v7739_v47, %v3949_v32  ;;  %v5404_v42 = vmul.f32 %v5276_v33, %v12938_v48  ;;  %7744 = vpow2.f32 %v5896_v52  ;;  %v763_v52 = vpop.f32.mrf.mxu0 }
 0x4ea   : > { %v7743_v22 = vpop.eup %7742  ;;  %v2080_v55 = vand.u32 2147483647, %v13014_v34  ;;  %v2081_v44 = vand.u32 2147483647, %v13017_v4  ;;  %v5898_v25 = vmul.f32 1.442695, %v5663_v63  ;;  %vm3966_vm6 = vweird.f32 %v12990_v58 }
 0x4eb   : > { %v5021_v61 = vadd.f32 -0.28449672, %v4893_v45  ;;  %v3954_v31 = vsel %vm3953_vm5, %v7739_v47, %v3950_v41  ;;  %v3962_v53 = vmul.f32 %v7743_v22, %v12990_v58  ;;  %v3970_v27 = vand.u32 2147483647, %v12990_v58 }
 0x4ec   : > { %v13030_v24 = vsel %vm13008_vm1, %v3958_v60, %v3954_v31  ;;  %v3972_v40 = vand.u32 2147483648, %v12990_v58  ;;  %v2208_v48 = vmul.f32 0.3275911, %v2080_v55  ;;  %v13039_v47 = vsel %vm1823_vm4, 1.0, %v14002_v6 }
 0x4ed   : > { %v5149_v43 = vmul.f32 %v5021_v61, %v12981_v13  ;;  %v4382_v38 = vmul.f32 1.0614054, %v13030_v24  ;;  %v3963_v30 = vsub.f32 1.0, %v3962_v53  ;;  %v6044_v19 = vmul.f32 %v12961_v54, %v5404_v42 }
 0x4ee   : > { %v13043_v33 = vadd.f32 1.0, %v2208_v48  ;;  %v2209_v9 = vmul.f32 0.3275911, %v2081_v44  ;;  %vm3967_vm7 = vweird.f32 %v7743_v22  ;;  %7746 = vpow2.f32 %v5898_v25 }
 0x4ef   : > { %v4510_v8 = vadd.f32 -1.4531521, %v4382_v38  ;;  %v3964_v17 = vmul.f32 %v7743_v22, %v3963_v30  ;;  %v13045_v32 = vpop.eup %7744  ;;  %vm13047_vm8 = vcmp.eq.f32.partialorder %v3970_v27, 8.507059e+37  ;;  %v3973_v7 = vor.u32 1.1754944e-38, %v3972_v40  ;;  %vm3968_vm9 = vmor %vm3966_vm6, %vm3967_vm7 }
 0x4f0   : > { %v13051_v60 = vmul.f32 0.5, %v1222_v21  ;;  %7748 = vrcp.f32 %v13043_v33  ;;  %v5277_v54 = vadd.f32 0.2548296, %v5149_v43  ;;  %v764_v42 = vadd.f32 %v763_v52, %v8732_v23 }
 0x4f1   : > { %v4638_v45 = vmul.f32 %v4510_v8, %v13030_v24  ;;  %v3965_v41 = vadd.f32 %v7743_v22, %v3964_v17  ;;  %v6172_v61 = vsub.f32 1.0, %v6044_v19  ;;  %vm1824_vm10 = vcmp.ge.f32.partialorder %v13014_v34, 0.0 }
 0x4f2   : > { %v13059_v31 = vadd.f32 1.0, %v2209_v9  ;;  %v6420_v53 = vadd.f32 1.0, %v12759_v28  ;;  %v5536_v27 = vsub.f32 0.0, %v2080_v55  ;;  %v5537_v40 = vsub.f32 0.0, %v2081_v44 }
 0x4f3   : > { %v4766_v21 = vadd.f32 1.4214138, %v4638_v45  ;;  %v3969_v25 = vsel %vm3968_vm9, %v7743_v22, %v3965_v41  ;;  %v3985_v43 = vand.u32 2147483647, %v13043_v33  ;;  %v3987_v38 = vand.u32 2147483648, %v13043_v33  ;;  %v1224_v45 = vpop.f32.mrf.mxu2 }
 0x4f4   : > { %v13064_v48 = vsel %vm13047_vm8, %v3973_v7, %v3969_v25  ;;  %7750 = vrcp.f32 %v13059_v31  ;;  %v13069_v58 = vpop.eup %7746  ;;  %v5405_v30 = vmul.f32 %v5277_v54, %v12981_v13  ;;  %v13075_v19 = vmul.f32 0.5, %v13002_v36  ;;  %v972_v54 = vpop.f32.mrf.mxu1 }
 0x4f5   : > { %v4894_v28 = vmul.f32 %v4766_v21, %v13030_v24  ;;  %v4383_v22 = vmul.f32 1.0614054, %v13064_v48  ;;  %v13078_v52 = vmul.f32 %v6172_v61, %v12906_v26  ;;  %v13083_v8 = vsel %vm1824_vm10, 1.0, %v14002_v6 }
 0x4f6   : > { %v7749_v9 = vpop.eup %7748  ;;  %vm3981_vm11 = vweird.f32 %v13043_v33  ;;  %v6548_v13 = vmul.f32 %v6420_v53, %v12602_v39  ;;  %v5664_v36 = vmul.f32 %v5536_v27, %v2080_v55  ;;  %vm13088_vm12 = vcmp.eq.f32.partialorder %v3985_v43, 8.507059e+37 }
 0x4f7   : > { %v5022_v17 = vadd.f32 -0.28449672, %v4894_v28  ;;  %v4511_v63 = vadd.f32 -1.4531521, %v4383_v22  ;;  %v3977_v7 = vmul.f32 %v7749_v9, %v13043_v33  ;;  %v3988_v41 = vor.u32 1.1754944e-38, %v3987_v38  ;;  %v1433_v38 = vpop.f32.mrf.mxu3 }
 0x4f8   : > { %v5665_v34 = vmul.f32 %v5537_v40, %v2081_v44  ;;  %v6676_v61 = vmul.f32 %v6548_v13, %v764_v42  ;;  %v6045_v21 = vmul.f32 %v12996_v14, %v5405_v30  ;;  %vm1825_vm13 = vcmp.ge.f32.partialorder %v13017_v4, 0.0 }
 0x4f9   : > { %v5150_v25 = vmul.f32 %v5022_v17, %v13030_v24  ;;  %v4639_v39 = vmul.f32 %v4511_v63, %v13064_v48  ;;  %v3978_v53 = vsub.f32 1.0, %v3977_v7  ;;  %vm3982_vm14 = vweird.f32 %v7749_v9 }
 0x4fa   : > { %v7751_v28 = vpop.eup %7750  ;;  %6804 = vst [vmem:[%s8785_s10 + $0x300] sm:$0xff] %v6676_v61  ;;  %v973_v55 = vadd.f32 %v972_v54, %v8768_v57  ;;  %v6421_v27 = vadd.f32 1.0, %v12785_v10  ;;  %v1225_v43 = vadd.f32 %v1224_v45, %v8182_v50  ;;  %v5900_v30 = vmul.f32 1.442695, %v5664_v36  ;;  %vm3983_vm15 = vmor %vm3981_vm11, %vm3982_vm14 }
 0x4fb   : > { %v5278_v44 = vadd.f32 0.2548296, %v5150_v25  ;;  %v4767_v42 = vadd.f32 1.4214138, %v4639_v39  ;;  %v3979_v40 = vmul.f32 %v7749_v9, %v3978_v53  ;;  %v3992_v14 = vmul.f32 %v7751_v28, %v13059_v31 }
 0x4fc   : > { %v4000_v22 = vand.u32 2147483647, %v13059_v31  ;;  %v6549_v13 = vmul.f32 %v6421_v27, %v12609_v15  ;;  %v1698_v17 = vmul.f32 0.70710677, %v1225_v43  ;;  %v4002_v10 = vand.u32 2147483648, %v13059_v31 }
 0x4fd   : > { %v4895_v63 = vmul.f32 %v4767_v42, %v13064_v48  ;;  %v3980_v7 = vadd.f32 %v7749_v9, %v3979_v40  ;;  %v3993_v54 = vsub.f32 1.0, %v3992_v14  ;;  %v5406_v45 = vmul.f32 %v5278_v44, %v13030_v24 }
 0x4fe   : > { %v6677_v61 = vmul.f32 %v6549_v13, %v973_v55  ;;  %v2082_v36 = vand.u32 2147483647, %v1698_v17  ;;  %v1434_v25 = vadd.f32 %v1433_v38, %v8184_v51  ;;  %vm3997_vm0 = vweird.f32 %v7751_v28 }
 0x4ff   : > { %v5023_v39 = vadd.f32 -0.28449672, %v4895_v63  ;;  %v3984_v15 = vsel %vm3983_vm15, %v7749_v9, %v3980_v7  ;;  %v3994_v53 = vmul.f32 %v7751_v28, %v3993_v54  ;;  %v6173_v27 = vsub.f32 1.0, %v6045_v21 }
 0x500   : > { %v13112_v42 = vsel %vm13088_vm12, %v3988_v41, %v3984_v15  ;;  %vm3996_vm1 = vweird.f32 %v13059_v31  ;;  %6805 = vst [vmem:[%s8785_s10 + $0x308] sm:$0xff] %v6677_v61  ;;  %v2210_v24 = vmul.f32 0.3275911, %v2082_v36  ;;  %7752 = vpow2.f32 %v5900_v30 }
 0x501   : > { %v5151_v33 = vmul.f32 %v5023_v39, %v13064_v48  ;;  %v4384_v55 = vmul.f32 1.0614054, %v13112_v42  ;;  %v3995_v44 = vadd.f32 %v7751_v28, %v3994_v53  ;;  %v6046_v40 = vmul.f32 %v13045_v32, %v5406_v45  ;;  %vm3998_vm2 = vmor %vm3996_vm1, %vm3997_vm0  ;;  %v766_v32 = vpop.f32.mrf.mxu0 }
 0x502   : > { %v4003_v9 = vor.u32 1.1754944e-38, %v4002_v10  ;;  %v13119_v14 = vadd.f32 1.0, %v2210_v24  ;;  %v13121_v21 = vmul.f32 0.70710677, %v1434_v25  ;;  %vm4001_vm3 = vcmp.eq.f32.partialorder %v4000_v22, 8.507059e+37 }
 0x503   : > { %v4512_v26 = vadd.f32 -1.4531521, %v4384_v55  ;;  %v3999_v41 = vsel %vm3998_vm2, %v7751_v28, %v3995_v44  ;;  %v5902_v31 = vmul.f32 1.442695, %v5665_v34  ;;  %v13126_v38 = vsel %vm1825_vm13, 1.0, %v14002_v6  ;;  %v975_v44 = vpop.f32.mrf.mxu1 }
 0x504   : > { %v13128_v13 = vsel %vm4001_vm3, %v4003_v9, %v3999_v41  ;;  %vm1826_vm4 = vcmp.ge.f32.partialorder %v1698_v17, 0.0  ;;  %7754 = vrcp.f32 %v13119_v14  ;;  %v5279_v30 = vadd.f32 0.2548296, %v5151_v33 }
 0x505   : > { %v4640_v63 = vmul.f32 %v4512_v26, %v13112_v42  ;;  %v4385_v7 = vmul.f32 1.0614054, %v13128_v13  ;;  %v5538_v54 = vsub.f32 0.0, %v2082_v36  ;;  %v13134_v28 = vmul.f32 %v6173_v27, %v12947_v62 }
 0x506   : > { %v6174_v34 = vsub.f32 1.0, %v6046_v40  ;;  %v13137_v4 = vand.u32 2147483647, %v13121_v21  ;;  %v6422_v22 = vadd.f32 1.0, %v12829_v11  ;;  %v13140_v10 = vpop.eup %7752  ;;  %7756 = vpow2.f32 %v5902_v31 }
 0x507   : > { %v4768_v45 = vadd.f32 1.4214138, %v4640_v63  ;;  %v4513_v61 = vadd.f32 -1.4531521, %v4385_v7  ;;  %v767_v39 = vadd.f32 %v766_v32, %v8732_v23  ;;  %v13143_v15 = vmul.f32 0.5, %v1225_v43  ;;  %v1227_v7 = vpop.f32.mrf.mxu2 }
 0x508   : > { %v13147_v53 = vsel %vm1826_vm4, 1.0, %v14002_v6  ;;  %v13149_v62 = vmul.f32 0.5, %v1434_v25  ;;  %v2211_v27 = vmul.f32 0.3275911, %v13137_v4  ;;  %v5407_v24 = vmul.f32 %v5279_v30, %v13064_v48 }
 0x509   : > { %v4896_v11 = vmul.f32 %v4768_v45, %v13112_v42  ;;  %v4641_v33 = vmul.f32 %v4513_v61, %v13128_v13  ;;  %v5666_v55 = vmul.f32 %v5538_v54, %v2082_v36  ;;  %v13156_v43 = vmul.f32 %v6174_v34, %v12985_v12 }
 0x50a   : > { %v7755_v40 = vpop.eup %7754  ;;  %v13158_v9 = vadd.f32 1.0, %v2211_v27  ;;  %v6550_v17 = vmul.f32 %v6422_v22, %v12668_v56  ;;  %v6423_v25 = vadd.f32 1.0, %v12876_v49  ;;  %vm4011_vm5 = vweird.f32 %v13119_v14 }
 0x50b   : > { %v5024_v26 = vadd.f32 -0.28449672, %v4896_v11  ;;  %v4769_v41 = vadd.f32 1.4214138, %v4641_v33  ;;  %v4007_v48 = vmul.f32 %v7755_v40, %v13119_v14  ;;  %v4015_v31 = vand.u32 2147483647, %v13119_v14  ;;  %v1436_v33 = vpop.f32.mrf.mxu3 }
 0x50c   : > { %v4017_v36 = vand.u32 2147483648, %v13119_v14  ;;  %7758 = vrcp.f32 %v13158_v9  ;;  %v976_v12 = vadd.f32 %v975_v44, %v8768_v57  ;;  %v13168_v32 = vpop.eup %7756  ;;  %v6047_v56 = vmul.f32 %v13069_v58, %v5407_v24 }
 0x50d   : > { %v5152_v49 = vmul.f32 %v5024_v26, %v13112_v42  ;;  %v4897_v30 = vmul.f32 %v4769_v41, %v13128_v13  ;;  %v4008_v63 = vsub.f32 1.0, %v4007_v48  ;;  %v5904_v54 = vmul.f32 1.442695, %v5666_v55 }
 0x50e   : > { %v5539_v34 = vsub.f32 0.0, %v13137_v4  ;;  %v6678_v22 = vmul.f32 %v6550_v17, %v767_v39  ;;  %v6551_v45 = vmul.f32 %v6423_v25, %v12670_v2  ;;  %vm4012_vm6 = vweird.f32 %v7755_v40 }
 0x50f   : > { %v5280_v61 = vadd.f32 0.2548296, %v5152_v49  ;;  %v5025_v27 = vadd.f32 -0.28449672, %v4897_v30  ;;  %v4009_v11 = vmul.f32 %v7755_v40, %v4008_v63  ;;  %vm13175_vm7 = vcmp.eq.f32.partialorder %v4015_v31, 8.507059e+37  ;;  %vm4013_vm9 = vmor %vm4011_vm5, %vm4012_vm6 }
 0x510   : > { %vm1827_vm8 = vcmp.ge.f32.partialorder %v13121_v21, 0.0  ;;  %6806 = vst [vmem:[%s8785_s10 + $0x310] sm:$0xff] %v6678_v22  ;;  %v6679_v24 = vmul.f32 %v6551_v45, %v976_v12  ;;  %v1228_v55 = vadd.f32 %v1227_v7, %v8182_v50  ;;  %v6175_v44 = vsub.f32 1.0, %v6047_v56 }
 0x511   : > { %v5153_v39 = vmul.f32 %v5025_v27, %v13128_v13  ;;  %v4010_v2 = vadd.f32 %v7755_v40, %v4009_v11  ;;  %v4018_v17 = vor.u32 1.1754944e-38, %v4017_v36  ;;  %v5408_v26 = vmul.f32 %v5280_v61, %v13112_v42 }
 0x512   : > { %v7759_v25 = vpop.eup %7758  ;;  %7760 = vpow2.f32 %v5904_v54  ;;  %6807 = vst [vmem:[%s8785_s10 + $0x318] sm:$0xff] %v6679_v24  ;;  %v1700_v41 = vmul.f32 0.70710677, %v1228_v55  ;;  %v1437_v48 = vadd.f32 %v1436_v33, %v8184_v51  ;;  %v13191_v12 = vsel %vm1827_vm8, 1.0, %v14002_v6 }
 0x513   : > { %v4014_v31 = vsel %vm4013_vm9, %v7755_v40, %v4010_v2  ;;  %v4022_v56 = vmul.f32 %v7759_v25, %v13158_v9  ;;  %v5667_v36 = vmul.f32 %v5539_v34, %v13137_v4  ;;  %v5281_v49 = vadd.f32 0.2548296, %v5153_v39 }
 0x514   : > { %v13197_v42 = vsel %vm13175_vm7, %v4018_v17, %v4014_v31  ;;  %v4030_v14 = vand.u32 2147483647, %v13158_v9  ;;  %v2084_v30 = vand.u32 2147483647, %v1700_v41  ;;  %v13201_v63 = vmul.f32 %v6175_v44, %v13039_v47 }
 0x515   : > { %v4386_v40 = vmul.f32 1.0614054, %v13197_v42  ;;  %v4023_v21 = vsub.f32 1.0, %v4022_v56  ;;  %v4032_v7 = vand.u32 2147483648, %v13158_v9  ;;  %v6048_v54 = vmul.f32 %v13140_v10, %v5408_v26  ;;  %v769_v10 = vpop.f32.mrf.mxu0 }
 0x516   : > { %vm4026_vm10 = vweird.f32 %v13158_v9  ;;  %v2212_v4 = vmul.f32 0.3275911, %v2084_v30  ;;  %v1701_v34 = vmul.f32 0.70710677, %v1437_v48  ;;  %vm4027_vm11 = vweird.f32 %v7759_v25 }
 0x517   : > { %v4514_v22 = vadd.f32 -1.4531521, %v4386_v40  ;;  %v4024_v45 = vmul.f32 %v7759_v25, %v4023_v21  ;;  %v5906_v61 = vmul.f32 1.442695, %v5667_v36  ;;  %v5409_v47 = vmul.f32 %v5281_v49, %v13128_v13  ;;  %vm4028_vm13 = vmor %vm4026_vm10, %vm4027_vm11  ;;  %v1230_v21 = vpop.f32.mrf.mxu2 }
 0x518   : > { %v13207_v27 = vpop.eup %7760  ;;  %vm13210_vm12 = vcmp.eq.f32.partialorder %v4030_v14, 8.507059e+37  ;;  %v13214_v33 = vadd.f32 1.0, %v2212_v4  ;;  %v2085_v58 = vand.u32 2147483647, %v1701_v34  ;;  %v4033_v39 = vor.u32 1.1754944e-38, %v4032_v7  ;;  %v978_v4 = vpop.f32.mrf.mxu1 }
 0x519   : > { %v4642_v24 = vmul.f32 %v4514_v22, %v13197_v42  ;;  %v4025_v44 = vadd.f32 %v7759_v25, %v4024_v45  ;;  %v6424_v2 = vadd.f32 1.0, %v12925_v1  ;;  %v6176_v17 = vsub.f32 1.0, %v6048_v54 }
 0x51a   : > { %vm1828_vm14 = vcmp.ge.f32.partialorder %v1700_v41, 0.0  ;;  %7762 = vrcp.f32 %v13214_v33  ;;  %v5540_v13 = vsub.f32 0.0, %v2084_v30  ;;  %v770_v56 = vadd.f32 %v769_v10, %v8732_v23 }
 0x51b   : > { %v4770_v26 = vadd.f32 1.4214138, %v4642_v24  ;;  %v4029_v31 = vsel %vm4028_vm13, %v7759_v25, %v4025_v44  ;;  %7764 = vpow2.f32 %v5906_v61  ;;  %v6049_v36 = vmul.f32 %v13168_v32, %v5409_v47 }
 0x51c   : > { %v13225_v49 = vsel %vm13210_vm12, %v4033_v39, %v4029_v31  ;;  %v13227_v1 = vmul.f32 0.5, %v1228_v55  ;;  %v2213_v14 = vmul.f32 0.3275911, %v2085_v58  ;;  %v13232_v40 = vsel %vm1828_vm14, 1.0, %v14002_v6  ;;  %v1439_v31 = vpop.f32.mrf.mxu3 }
 0x51d   : > { %v4898_v9 = vmul.f32 %v4770_v26, %v13197_v42  ;;  %v4387_v41 = vmul.f32 1.0614054, %v13225_v49  ;;  %v13234_v25 = vmul.f32 0.5, %v1437_v48  ;;  %v13237_v7 = vmul.f32 %v6176_v17, %v13083_v8 }
 0x51e   : > { %v5668_v32 = vmul.f32 %v5540_v13, %v2084_v30  ;;  %v13239_v54 = vadd.f32 1.0, %v2213_v14  ;;  %v6552_v55 = vmul.f32 %v6424_v2, %v12751_v0  ;;  %vm1829_vm15 = vcmp.ge.f32.partialorder %v1701_v34, 0.0 }
 0x51f   : > { %v5026_v22 = vadd.f32 -0.28449672, %v4898_v9  ;;  %v4515_v45 = vadd.f32 -1.4531521, %v4387_v41  ;;  %v6425_v61 = vadd.f32 1.0, %v12943_v35  ;;  %v6177_v11 = vsub.f32 1.0, %v6049_v36 }
 0x520   : > { %v7763_v47 = vpop.eup %7762  ;;  %7766 = vrcp.f32 %v13239_v54  ;;  %v5541_v48 = vsub.f32 0.0, %v2085_v58  ;;  %v13245_v10 = vadd.f32 %v1230_v21, %v8182_v50  ;;  %v979_v34 = vadd.f32 %v978_v4, %v8768_v57 }
 0x521   : > { %v13247_v8 = vpop.eup %7764  ;;  %v5154_v30 = vmul.f32 %v5026_v22, %v13197_v42  ;;  %v4643_v0 = vmul.f32 %v4515_v45, %v13225_v49  ;;  %v4037_v24 = vmul.f32 %v7763_v47, %v13214_v33  ;;  %vm4041_vm0 = vweird.f32 %v13214_v33 }
 0x522   : > { %v4045_v35 = vand.u32 2147483647, %v13214_v33  ;;  %v13256_v44 = vsel %vm1829_vm15, 1.0, %v14002_v6  ;;  %v6680_v39 = vmul.f32 %v6552_v55, %v770_v56  ;;  %v6553_v26 = vmul.f32 %v6425_v61, %v12762_v16 }
 0x523   : > { %v5282_v2 = vadd.f32 0.2548296, %v5154_v30  ;;  %v4771_v17 = vadd.f32 1.4214138, %v4643_v0  ;;  %v4038_v13 = vsub.f32 1.0, %v4037_v24  ;;  %vm4042_vm1 = vweird.f32 %v7763_v47 }
 0x524   : > { %v4047_v36 = vand.u32 2147483648, %v13214_v33  ;;  %v5669_v14 = vmul.f32 %v5541_v48, %v2085_v58  ;;  %6808 = vst [vmem:[%s8785_s10 + $0x320] sm:$0xff] %v6680_v39  ;;  %v1702_v9 = vmul.f32 0.70710677, %v13245_v10  ;;  %v6681_v56 = vmul.f32 %v6553_v26, %v979_v34  ;;  %vm4043_vm3 = vmor %vm4041_vm0, %vm4042_vm1 }
 0x525   : > { %v5410_v41 = vmul.f32 %v5282_v2, %v13197_v42  ;;  %v4899_v21 = vmul.f32 %v4771_v17, %v13225_v49  ;;  %v4039_v4 = vmul.f32 %v7763_v47, %v4038_v13  ;;  %v13265_v22 = vmul.f32 %v6177_v11, %v13126_v38 }
 0x526   : > { %v7767_v55 = vpop.eup %7766  ;;  %v5908_v16 = vmul.f32 1.442695, %v5668_v32  ;;  %v2086_v45 = vand.u32 2147483647, %v1702_v9  ;;  %v1440_v61 = vadd.f32 %v1439_v31, %v8184_v51  ;;  %vm4046_vm2 = vcmp.eq.f32.partialorder %v4045_v35, 8.507059e+37  ;;  %6809 = vst [vmem:[%s8785_s10 + $0x328] sm:$0xff] %v6681_v56 }
 0x527   : > { %v5027_v30 = vadd.f32 -0.28449672, %v4899_v21  ;;  %v4040_v58 = vadd.f32 %v7763_v47, %v4039_v4  ;;  %v4052_v48 = vmul.f32 %v7767_v55, %v13239_v54  ;;  %v4048_v42 = vor.u32 1.1754944e-38, %v4047_v36 }
 0x528   : > { %v4060_v0 = vand.u32 2147483647, %v13239_v54  ;;  %v4062_v38 = vand.u32 2147483648, %v13239_v54  ;;  %v2214_v11 = vmul.f32 0.3275911, %v2086_v45  ;;  %v6050_v32 = vmul.f32 %v13207_v27, %v5410_v41 }
 0x529   : > { %v4044_v24 = vsel %vm4043_vm3, %v7763_v47, %v4040_v58  ;;  %v4053_v34 = vsub.f32 1.0, %v4052_v48  ;;  %v5910_v39 = vmul.f32 1.442695, %v5669_v14  ;;  %v5155_v35 = vmul.f32 %v5027_v30, %v13225_v49 }
 0x52a   : > { %v13277_v2 = vsel %vm4046_vm2, %v4048_v42, %v4044_v24  ;;  %v13279_v17 = vadd.f32 1.0, %v2214_v11  ;;  %v13281_v13 = vmul.f32 0.70710677, %v1440_v61  ;;  %7768 = vpow2.f32 %v5908_v16  ;;  %v981_v11 = vpop.f32.mrf.mxu1 }
 0x52b   : > { %v4388_v33 = vmul.f32 1.0614054, %v13277_v2  ;;  %v4054_v26 = vmul.f32 %v7767_v55, %v4053_v34  ;;  %vm4057_vm4 = vweird.f32 %v7767_v55  ;;  %vm4056_vm5 = vweird.f32 %v13239_v54 }
 0x52c   : > { %vm13285_vm6 = vcmp.eq.f32.partialorder %v4060_v0, 8.507059e+37  ;;  %7770 = vrcp.f32 %v13279_v17  ;;  %v5542_v47 = vsub.f32 0.0, %v2086_v45  ;;  %v6178_v31 = vsub.f32 1.0, %v6050_v32  ;;  %vm4058_vm8 = vmor %vm4056_vm5, %vm4057_vm4 }
 0x52d   : > { %v4516_v36 = vadd.f32 -1.4531521, %v4388_v33  ;;  %v4055_v14 = vadd.f32 %v7767_v55, %v4054_v26  ;;  %vm1830_vm7 = vcmp.ge.f32.partialorder %v1702_v9, 0.0  ;;  %v5283_v41 = vadd.f32 0.2548296, %v5155_v35 }
 0x52e   : > { %v4063_v21 = vor.u32 1.1754944e-38, %v4062_v38  ;;  %7772 = vpow2.f32 %v5910_v39  ;;  %v13291_v4 = vand.u32 2147483647, %v13281_v13  ;;  %v13295_v16 = vmul.f32 0.5, %v13245_v10 }
 0x52f   : > { %v4644_v54 = vmul.f32 %v4516_v36, %v13277_v2  ;;  %v4059_v56 = vsel %vm4058_vm8, %v7767_v55, %v4055_v14  ;;  %v13297_v30 = vmul.f32 0.5, %v1440_v61  ;;  %v13304_v9 = vsel %vm1830_vm7, 1.0, %v14002_v6  ;;  %v772_v61 = vpop.f32.mrf.mxu0  ;;  %v1233_v14 = vpop.f32.mrf.mxu2 }
 0x530   : > { %v13301_v58 = vsel %vm13285_vm6, %v4063_v21, %v4059_v56  ;;  %v5670_v48 = vmul.f32 %v5542_v47, %v2086_v45  ;;  %v2215_v42 = vmul.f32 0.3275911, %v13291_v4  ;;  %v13307_v0 = vpop.eup %7768  ;;  %v13310_v38 = vmul.f32 %v6178_v31, %v13147_v53 }
 0x531   : > { %v4772_v55 = vadd.f32 1.4214138, %v4644_v54  ;;  %v4389_v10 = vmul.f32 1.0614054, %v13301_v58  ;;  %vm1831_vm9 = vcmp.ge.f32.partialorder %v13281_v13, 0.0  ;;  %v5411_v24 = vmul.f32 %v5283_v41, %v13225_v49 }
 0x532   : > { %v7771_v32 = vpop.eup %7770  ;;  %v13315_v34 = vadd.f32 1.0, %v2215_v42  ;;  %v6426_v45 = vadd.f32 1.0, %v13005_v29  ;;  %v6427_v39 = vadd.f32 1.0, %v13020_v46  ;;  %vm4071_vm10 = vweird.f32 %v13279_v17 }
 0x533   : > { %v4900_v35 = vmul.f32 %v4772_v55, %v13277_v2  ;;  %v4517_v53 = vadd.f32 -1.4531521, %v4389_v10  ;;  %v4067_v33 = vmul.f32 %v7771_v32, %v13279_v17  ;;  %v4075_v27 = vand.u32 2147483647, %v13279_v17 }
 0x534   : > { %v13322_v26 = vpop.eup %7772  ;;  %7774 = vrcp.f32 %v13315_v34  ;;  %v773_v49 = vadd.f32 %v772_v61, %v8732_v23  ;;  %v982_v47 = vadd.f32 %v981_v11, %v8768_v57  ;;  %v4077_v36 = vand.u32 2147483648, %v13279_v17 }
 0x535   : > { %v5028_v29 = vadd.f32 -0.28449672, %v4900_v35  ;;  %v4645_v46 = vmul.f32 %v4517_v53, %v13301_v58  ;;  %v4068_v31 = vsub.f32 1.0, %v4067_v33  ;;  %v13331_v41 = vmul.f32 %v13247_v8, %v5411_v24 }
 0x536   : > { %v5912_v21 = vmul.f32 1.442695, %v5670_v48  ;;  %v6554_v54 = vmul.f32 %v6426_v45, %v12796_v18  ;;  %v6555_v56 = vmul.f32 %v6427_v39, %v12798_v59  ;;  %vm4072_vm11 = vweird.f32 %v7771_v32 }
 0x537   : > { %v5156_v42 = vmul.f32 %v5028_v29, %v13277_v2  ;;  %v4773_v55 = vadd.f32 1.4214138, %v4645_v46  ;;  %v4069_v10 = vmul.f32 %v7771_v32, %v4068_v31  ;;  %v5543_v61 = vsub.f32 0.0, %v13291_v4  ;;  %vm4073_vm13 = vmor %vm4071_vm10, %vm4072_vm11 }
 0x538   : > { %v6682_v11 = vmul.f32 %v6554_v54, %v773_v49  ;;  %v6683_v35 = vmul.f32 %v6555_v56, %v982_v47  ;;  %v1234_v53 = vadd.f32 %v1233_v14, %v8182_v50  ;;  %vm4076_vm12 = vcmp.eq.f32.partialorder %v4075_v27, 8.507059e+37  ;;  %v1442_v27 = vpop.f32.mrf.mxu3 }
 0x539   : > { %v5284_v8 = vadd.f32 0.2548296, %v5156_v42  ;;  %v4901_v48 = vmul.f32 %v4773_v55, %v13301_v58  ;;  %v4070_v24 = vadd.f32 %v7771_v32, %v4069_v10  ;;  %v4078_v59 = vor.u32 1.1754944e-38, %v4077_v36  ;;  %v775_v55 = vpop.f32.mrf.mxu0 }
 0x53a   : > { %v7775_v18 = vpop.eup %7774  ;;  %7776 = vpow2.f32 %v5912_v21  ;;  %v13344_v45 = vsel %vm1831_vm9, 1.0, %v14002_v6  ;;  %6810 = vst [vmem:[%s8785_s10 + $0x330] sm:$0xff] %v6682_v11  ;;  %v1704_v39 = vmul.f32 0.70710677, %v1234_v53  ;;  %v6179_v33 = vsub.f32 1.0, %v13331_v41 }
 0x53b   : > { %v5029_v49 = vadd.f32 -0.28449672, %v4901_v48  ;;  %v4074_v47 = vsel %vm4073_vm13, %v7771_v32, %v4070_v24  ;;  %v4082_v29 = vmul.f32 %v7775_v18, %v13315_v34  ;;  %6811 = vst [vmem:[%s8785_s10 + $0x338] sm:$0xff] %v6683_v35  ;;  %v5412_v17 = vmul.f32 %v5284_v8, %v13277_v2 }
 0x53c   : > { %v13351_v46 = vsel %vm4076_vm12, %v4078_v59, %v4074_v47  ;;  %v5671_v31 = vmul.f32 %v5543_v61, %v13291_v4  ;;  %v2088_v36 = vand.u32 2147483647, %v1704_v39  ;;  %v4092_v41 = vand.u32 2147483648, %v13315_v34 }
 0x53d   : > { %v5157_v13 = vmul.f32 %v5029_v49, %v13301_v58  ;;  %v4390_v14 = vmul.f32 1.0614054, %v13351_v46  ;;  %v4083_v21 = vsub.f32 1.0, %v4082_v29  ;;  %vm4086_vm14 = vweird.f32 %v13315_v34 }
 0x53e   : > { %v2216_v32 = vmul.f32 0.3275911, %v2088_v36  ;;  %v1443_v54 = vadd.f32 %v1442_v27, %v8184_v51  ;;  %v6428_v56 = vadd.f32 1.0, %v13078_v52  ;;  %vm4087_vm15 = vweird.f32 %v7775_v18 }
 0x53f   : > { %v4518_v2 = vadd.f32 -1.4531521, %v4390_v14  ;;  %v4084_v42 = vmul.f32 %v7775_v18, %v4083_v21  ;;  %v4090_v4 = vand.u32 2147483647, %v13315_v34  ;;  %v6052_v61 = vmul.f32 %v13307_v0, %v5412_v17  ;;  %vm4088_vm0 = vmor %vm4086_vm14, %vm4087_vm15 }
 0x540   : > { %v13361_v10 = vpop.eup %7776  ;;  %v5285_v11 = vadd.f32 0.2548296, %v5157_v13  ;;  %v5914_v35 = vmul.f32 1.442695, %v5671_v31  ;;  %v13364_v8 = vadd.f32 1.0, %v2216_v32  ;;  %v4093_v59 = vor.u32 1.1754944e-38, %v4092_v41 }
 0x541   : > { %v4646_v48 = vmul.f32 %v4518_v2, %v13351_v46  ;;  %v4085_v24 = vadd.f32 %v7775_v18, %v4084_v42  ;;  %v5544_v49 = vsub.f32 0.0, %v2088_v36  ;;  %v13370_v52 = vmul.f32 0.70710677, %v1443_v54  ;;  %v1236_v42 = vpop.f32.mrf.mxu2 }
 0x542   : > { %7778 = vrcp.f32 %v13364_v8  ;;  %v776_v47 = vadd.f32 %v775_v55, %v8732_v23  ;;  %v6556_v0 = vmul.f32 %v6428_v56, %v12896_v20  ;;  %vm4091_vm1 = vcmp.eq.f32.partialorder %v4090_v4, 8.507059e+37  ;;  %v984_v56 = vpop.f32.mrf.mxu1 }
 0x543   : > { %v4774_v29 = vadd.f32 1.4214138, %v4646_v48  ;;  %v4089_v27 = vsel %vm4088_vm0, %v7775_v18, %v4085_v24  ;;  %vm1832_vm2 = vcmp.ge.f32.partialorder %v1704_v39, 0.0  ;;  %v13375_v17 = vmul.f32 %v6179_v33, %v13191_v12 }
 0x544   : > { %v6180_v31 = vsub.f32 1.0, %v6052_v61  ;;  %v5413_v13 = vmul.f32 %v5285_v11, %v13301_v58  ;;  %v13378_v34 = vsel %vm4091_vm1, %v4093_v59, %v4089_v27  ;;  %7780 = vpow2.f32 %v5914_v35 }
 0x545   : > { %v4902_v14 = vmul.f32 %v4774_v29, %v13351_v46  ;;  %v4391_v21 = vmul.f32 1.0614054, %v13378_v34  ;;  %v5672_v41 = vmul.f32 %v5544_v49, %v2088_v36  ;;  %v13382_v20 = vmul.f32 0.5, %v1234_v53 }
 0x546   : > { %v13385_v18 = vsel %vm1832_vm2, 1.0, %v14002_v6  ;;  %v2089_v12 = vand.u32 2147483647, %v13370_v52  ;;  %v6684_v39 = vmul.f32 %v6556_v0, %v776_v47  ;;  %v13388_v58 = vmul.f32 0.5, %v1443_v54 }
 0x547   : > { %v5030_v33 = vadd.f32 -0.28449672, %v4902_v14  ;;  %v4519_v32 = vadd.f32 -1.4531521, %v4391_v21  ;;  %v6429_v2 = vadd.f32 1.0, %v13134_v28  ;;  %v13392_v36 = vmul.f32 %v6180_v31, %v13232_v40 }
 0x548   : > { %v7779_v4 = vpop.eup %7778  ;;  %v6053_v53 = vmul.f32 %v13322_v26, %v5413_v13  ;;  %v4105_v55 = vand.u32 2147483647, %v13364_v8  ;;  %v2217_v61 = vmul.f32 0.3275911, %v2089_v12  ;;  %6812 = vst [vmem:[%s8785_s10 + $0x340] sm:$0xff] %v6684_v39  ;;  %v985_v28 = vadd.f32 %v984_v56, %v8768_v57  ;;  %v1445_v26 = vpop.f32.mrf.mxu3 }
 0x549   : > { %v5158_v11 = vmul.f32 %v5030_v33, %v13351_v46  ;;  %v4647_v35 = vmul.f32 %v4519_v32, %v13378_v34  ;;  %v4097_v54 = vmul.f32 %v7779_v4, %v13364_v8  ;;  %v5916_v48 = vmul.f32 1.442695, %v5672_v41 }
 0x54a   : > { %v13400_v24 = vadd.f32 1.0, %v2217_v61  ;;  %v6557_v40 = vmul.f32 %v6429_v2, %v12898_v37  ;;  %v1237_v59 = vadd.f32 %v1236_v42, %v8182_v50  ;;  %v13405_v49 = vpop.eup %7780  ;;  %v4107_v27 = vand.u32 2147483648, %v13364_v8 }
 0x54b   : > { %v5286_v47 = vadd.f32 0.2548296, %v5158_v11  ;;  %v4775_v0 = vadd.f32 1.4214138, %v4647_v35  ;;  %v4098_v29 = vsub.f32 1.0, %v4097_v54  ;;  %v6181_v31 = vsub.f32 1.0, %v6053_v53 }
 0x54c   : > { %vm1833_vm3 = vcmp.ge.f32.partialorder %v13370_v52, 0.0  ;;  %7782 = vrcp.f32 %v13400_v24  ;;  %v5545_v13 = vsub.f32 0.0, %v2089_v12  ;;  %vm4102_vm4 = vweird.f32 %v7779_v4 }
 0x54d   : > { %v4903_v14 = vmul.f32 %v4775_v0, %v13378_v34  ;;  %v4099_v37 = vmul.f32 %v7779_v4, %v4098_v29  ;;  %v1446_v21 = vadd.f32 %v1445_v26, %v8184_v51  ;;  %vm4101_vm5 = vweird.f32 %v13364_v8 }
 0x54e   : > { %vm13413_vm6 = vcmp.eq.f32.partialorder %v4105_v55, 8.507059e+37  ;;  %v6685_v39 = vmul.f32 %v6557_v40, %v985_v28  ;;  %v1706_v33 = vmul.f32 0.70710677, %v1237_v59  ;;  %v5414_v32 = vmul.f32 %v5286_v47, %v13351_v46  ;;  %vm4103_vm7 = vmor %vm4101_vm5, %vm4102_vm4 }
 0x54f   : > { %v5031_v56 = vadd.f32 -0.28449672, %v4903_v14  ;;  %v4100_v2 = vadd.f32 %v7779_v4, %v4099_v37  ;;  %v4108_v42 = vor.u32 1.1754944e-38, %v4107_v27  ;;  %7784 = vpow2.f32 %v5916_v48 }
 0x550   : > { %v13421_v53 = vsel %vm1833_vm3, 1.0, %v14002_v6  ;;  %v5673_v61 = vmul.f32 %v5545_v13, %v2089_v12  ;;  %6813 = vst [vmem:[%s8785_s10 + $0x348] sm:$0xff] %v6685_v39  ;;  %v2090_v8 = vand.u32 2147483647, %v1706_v33  ;;  %v13425_v55 = vmul.f32 %v6181_v31, %v13256_v44  ;;  %v778_v13 = vpop.f32.mrf.mxu0 }
 0x551   : > { %v4104_v11 = vsel %vm4103_vm7, %v7779_v4, %v4100_v2  ;;  %v4120_v35 = vand.u32 2147483647, %v13400_v24  ;;  %v1707_v46 = vmul.f32 0.70710677, %v1446_v21  ;;  %v5159_v28 = vmul.f32 %v5031_v56, %v13378_v34 }
 0x552   : > { %v7783_v54 = vpop.eup %7782  ;;  %v13431_v48 = vsel %vm13413_vm6, %v4108_v42, %v4104_v11  ;;  %v13433_v52 = vmul.f32 0.5, %v1237_v59  ;;  %v2218_v40 = vmul.f32 0.3275911, %v2090_v8  ;;  %v6054_v12 = vmul.f32 %v13361_v10, %v5414_v32 }
 0x553   : > { %v4392_v26 = vmul.f32 1.0614054, %v13431_v48  ;;  %v4112_v44 = vmul.f32 %v7783_v54, %v13400_v24  ;;  %v13438_v4 = vmul.f32 0.5, %v1446_v21  ;;  %vm4116_vm8 = vweird.f32 %v13400_v24 }
 0x554   : > { %v4122_v47 = vand.u32 2147483648, %v13400_v24  ;;  %v5918_v0 = vmul.f32 1.442695, %v5673_v61  ;;  %v13442_v29 = vadd.f32 1.0, %v2218_v40  ;;  %vm13444_vm9 = vcmp.eq.f32.partialorder %v4120_v35, 8.507059e+37 }
 0x555   : > { %v4520_v27 = vadd.f32 -1.4531521, %v4392_v26  ;;  %v4113_v31 = vsub.f32 1.0, %v4112_v44  ;;  %v13448_v10 = vand.u32 2147483647, %v1707_v46  ;;  %v13450_v14 = vpop.eup %7784  ;;  %vm1834_vm10 = vcmp.ge.f32.partialorder %v1706_v33, 0.0  ;;  %v987_v26 = vpop.f32.mrf.mxu1 }
 0x556   : > { %v5287_v37 = vadd.f32 0.2548296, %v5159_v28  ;;  %7786 = vrcp.f32 %v13442_v29  ;;  %v5546_v21 = vsub.f32 0.0, %v2090_v8  ;;  %v6182_v41 = vsub.f32 1.0, %v6054_v12 }
 0x557   : > { %v4648_v39 = vmul.f32 %v4520_v27, %v13431_v48  ;;  %v4114_v32 = vmul.f32 %v7783_v54, %v4113_v31  ;;  %vm4117_vm11 = vweird.f32 %v7783_v54  ;;  %v4123_v56 = vor.u32 1.1754944e-38, %v4122_v47 }
 0x558   : > { %7788 = vpow2.f32 %v5918_v0  ;;  %v2219_v2 = vmul.f32 0.3275911, %v13448_v10  ;;  %v779_v42 = vadd.f32 %v778_v13, %v8732_v23  ;;  %v13457_v35 = vsel %vm1834_vm10, 1.0, %v14002_v6  ;;  %vm4118_vm13 = vmor %vm4116_vm8, %vm4117_vm11 }
 0x559   : > { %v4776_v61 = vadd.f32 1.4214138, %v4648_v39  ;;  %v4115_v11 = vadd.f32 %v7783_v54, %v4114_v32  ;;  %vm1835_vm12 = vcmp.ge.f32.partialorder %v1707_v46, 0.0  ;;  %v5415_v33 = vmul.f32 %v5287_v37, %v13378_v34 }
 0x55a   : > { %v5674_v28 = vmul.f32 %v5546_v21, %v2090_v8  ;;  %v13462_v40 = vadd.f32 1.0, %v2219_v2  ;;  %v6430_v12 = vadd.f32 1.0, %v13156_v43  ;;  %v13466_v44 = vmul.f32 %v6182_v41, %v13304_v9 }
 0x55b   : > { %v4904_v47 = vmul.f32 %v4776_v61, %v13431_v48  ;;  %v4119_v0 = vsel %vm4118_vm13, %v7783_v54, %v4115_v11  ;;  %v6431_v27 = vadd.f32 1.0, %v13201_v63  ;;  %v4135_v24 = vand.u32 2147483647, %v13442_v29  ;;  %v1239_v63 = vpop.f32.mrf.mxu2 }
 0x55c   : > { %v7787_v46 = vpop.eup %7786  ;;  %v13472_v34 = vsel %vm13444_vm9, %v4123_v56, %v4119_v0  ;;  %v13476_v8 = vsel %vm1835_vm12, 1.0, %v14002_v6  ;;  %7790 = vrcp.f32 %v13462_v40  ;;  %v988_v54 = vadd.f32 %v987_v26, %v8768_v57 }
 0x55d   : > { %v5032_v43 = vadd.f32 -0.28449672, %v4904_v47  ;;  %v4393_v9 = vmul.f32 1.0614054, %v13472_v34  ;;  %v4127_v31 = vmul.f32 %v7787_v46, %v13442_v29  ;;  %v6055_v59 = vmul.f32 %v13405_v49, %v5415_v33 }
 0x55e   : > { %v13482_v13 = vpop.eup %7788  ;;  %v4137_v37 = vand.u32 2147483648, %v13442_v29  ;;  %v5920_v21 = vmul.f32 1.442695, %v5674_v28  ;;  %v6558_v41 = vmul.f32 %v6430_v12, %v12964_v5  ;;  %v6559_v2 = vmul.f32 %v6431_v27, %v12976_v3  ;;  %v781_v12 = vpop.f32.mrf.mxu0 }
 0x55f   : > { %v5160_v39 = vmul.f32 %v5032_v43, %v13431_v48  ;;  %v4521_v32 = vadd.f32 -1.4531521, %v4393_v9  ;;  %v4128_v56 = vsub.f32 1.0, %v4127_v31  ;;  %vm4132_vm14 = vweird.f32 %v7787_v46  ;;  %v1448_v31 = vpop.f32.mrf.mxu3 }
 0x560   : > { %v5547_v61 = vsub.f32 0.0, %v13448_v10  ;;  %v6686_v11 = vmul.f32 %v6558_v41, %v779_v42  ;;  %v1240_v26 = vadd.f32 %v1239_v63, %v8182_v50  ;;  %v6687_v47 = vmul.f32 %v6559_v2, %v988_v54 }
 0x561   : > { %v5288_v49 = vadd.f32 0.2548296, %v5160_v39  ;;  %v4649_v33 = vmul.f32 %v4521_v32, %v13472_v34  ;;  %v4129_v28 = vmul.f32 %v7787_v46, %v4128_v56  ;;  %vm4131_vm15 = vweird.f32 %v13442_v29 }
 0x562   : > { %v7791_v5 = vpop.eup %7790  ;;  %vm13493_vm0 = vcmp.eq.f32.partialorder %v4135_v24, 8.507059e+37  ;;  %v4138_v3 = vor.u32 1.1754944e-38, %v4137_v37  ;;  %6814 = vst [vmem:[%s8785_s10 + $0x350] sm:$0xff] %v6686_v11  ;;  %v1708_v0 = vmul.f32 0.70710677, %v1240_v26  ;;  %v6183_v27 = vsub.f32 1.0, %v6055_v59  ;;  %vm4133_vm1 = vmor %vm4131_vm15, %vm4132_vm14 }
 0x563   : > { %v4777_v42 = vadd.f32 1.4214138, %v4649_v33  ;;  %v4130_v43 = vadd.f32 %v7787_v46, %v4129_v28  ;;  %v4142_v9 = vmul.f32 %v7791_v5, %v13462_v40  ;;  %6815 = vst [vmem:[%s8785_s10 + $0x358] sm:$0xff] %v6687_v47  ;;  %7792 = vpow2.f32 %v5920_v21 }
 0x564   : > { %v4150_v54 = vand.u32 2147483647, %v13462_v40  ;;  %v5675_v29 = vmul.f32 %v5547_v61, %v13448_v10  ;;  %v2092_v24 = vand.u32 2147483647, %v1708_v0  ;;  %v5416_v63 = vmul.f32 %v5288_v49, %v13431_v48 }
 0x565   : > { %v4905_v37 = vmul.f32 %v4777_v42, %v13472_v34  ;;  %v4134_v41 = vsel %vm4133_vm1, %v7787_v46, %v4130_v43  ;;  %v4143_v59 = vsub.f32 1.0, %v4142_v9  ;;  %v4152_v32 = vand.u32 2147483648, %v13462_v40 }
 0x566   : > { %v13507_v39 = vsel %vm13493_vm0, %v4138_v3, %v4134_v41  ;;  %v2220_v56 = vmul.f32 0.3275911, %v2092_v24  ;;  %v1449_v21 = vadd.f32 %v1448_v31, %v8184_v51  ;;  %vm4147_vm2 = vweird.f32 %v7791_v5 }
 0x567   : > { %v5033_v2 = vadd.f32 -0.28449672, %v4905_v37  ;;  %v4394_v11 = vmul.f32 1.0614054, %v13507_v39  ;;  %v4144_v10 = vmul.f32 %v7791_v5, %v4143_v59  ;;  %v13513_v48 = vmul.f32 %v6183_v27, %v13344_v45 }
 0x568   : > { %vm4146_vm3 = vweird.f32 %v13462_v40  ;;  %v5922_v46 = vmul.f32 1.442695, %v5675_v29  ;;  %v13516_v61 = vadd.f32 1.0, %v2220_v56  ;;  %v6056_v49 = vmul.f32 %v13450_v14, %v5416_v63 }
 0x569   : > { %v5161_v33 = vmul.f32 %v5033_v2, %v13472_v34  ;;  %v4522_v28 = vadd.f32 -1.4531521, %v4394_v11  ;;  %v4145_v47 = vadd.f32 %v7791_v5, %v4144_v10  ;;  %v13520_v3 = vpop.eup %7792  ;;  %vm4148_vm4 = vmor %vm4146_vm3, %vm4147_vm2  ;;  %v4153_v42 = vor.u32 1.1754944e-38, %v4152_v32  ;;  %v990_v11 = vpop.f32.mrf.mxu1 }
 0x56a   : > { %7794 = vrcp.f32 %v13516_v61  ;;  %v13523_v45 = vmul.f32 0.70710677, %v1449_v21  ;;  %v6432_v40 = vadd.f32 1.0, %v13237_v7  ;;  %vm4151_vm5 = vcmp.eq.f32.partialorder %v4150_v54, 8.507059e+37 }
 0x56b   : > { %v5289_v27 = vadd.f32 0.2548296, %v5161_v33  ;;  %v4650_v43 = vmul.f32 %v4522_v28, %v13507_v39  ;;  %v4149_v9 = vsel %vm4148_vm4, %v7791_v5, %v4145_v47  ;;  %7796 = vpow2.f32 %v5922_v46  ;;  %v1242_v47 = vpop.f32.mrf.mxu2 }
 0x56c   : > { %v13527_v14 = vsel %vm4151_vm5, %v4153_v42, %v4149_v9  ;;  %v5548_v31 = vsub.f32 0.0, %v2092_v24  ;;  %v782_v29 = vadd.f32 %v781_v12, %v8732_v23  ;;  %v6184_v63 = vsub.f32 1.0, %v6056_v49 }
 0x56d   : > { %v4778_v37 = vadd.f32 1.4214138, %v4650_v43  ;;  %v4395_v41 = vmul.f32 1.0614054, %v13527_v14  ;;  %vm1836_vm6 = vcmp.ge.f32.partialorder %v1708_v0, 0.0  ;;  %v13531_v59 = vmul.f32 0.5, %v1240_v26 }
 0x56e   : > { %v13533_v32 = vmul.f32 0.5, %v1449_v21  ;;  %v2093_v7 = vand.u32 2147483647, %v13523_v45  ;;  %v6560_v5 = vmul.f32 %v6432_v40, %v13051_v60  ;;  %v5417_v54 = vmul.f32 %v5289_v27, %v13472_v34 }
 0x56f   : > { %v4906_v56 = vmul.f32 %v4778_v37, %v13507_v39  ;;  %v4523_v2 = vadd.f32 -1.4531521, %v4395_v41  ;;  %v6433_v10 = vadd.f32 1.0, %v13265_v22  ;;  %v13541_v0 = vsel %vm1836_vm6, 1.0, %v14002_v6 }
 0x570   : > { %v7795_v46 = vpop.eup %7794  ;;  %v5676_v26 = vmul.f32 %v5548_v31, %v2092_v24  ;;  %v2221_v21 = vmul.f32 0.3275911, %v2093_v7  ;;  %v6688_v49 = vmul.f32 %v6560_v5, %v782_v29  ;;  %v13544_v33 = vmul.f32 %v6184_v63, %v13385_v18 }
 0x571   : > { %v5034_v60 = vadd.f32 -0.28449672, %v4906_v56  ;;  %v4651_v34 = vmul.f32 %v4523_v2, %v13527_v14  ;;  %v4157_v28 = vmul.f32 %v7795_v46, %v13516_v61  ;;  %v13548_v12 = vpop.eup %7796  ;;  %v4165_v22 = vand.u32 2147483647, %v13516_v61 }
 0x572   : > { %v13551_v42 = vadd.f32 1.0, %v2221_v21  ;;  %6816 = vst [vmem:[%s8785_s10 + $0x360] sm:$0xff] %v6688_v49  ;;  %v991_v24 = vadd.f32 %v990_v11, %v8768_v57  ;;  %v6561_v40 = vmul.f32 %v6433_v10, %v13075_v19  ;;  %v6057_v18 = vmul.f32 %v13482_v13, %v5417_v54  ;;  %v1451_v10 = vpop.f32.mrf.mxu3 }
 0x573   : > { %v5162_v27 = vmul.f32 %v5034_v60, %v13507_v39  ;;  %v4779_v43 = vadd.f32 1.4214138, %v4651_v34  ;;  %v4158_v9 = vsub.f32 1.0, %v4157_v28  ;;  %v4167_v31 = vand.u32 2147483648, %v13516_v61 }
 0x574   : > { %7798 = vrcp.f32 %v13551_v42  ;;  %v5549_v29 = vsub.f32 0.0, %v2093_v7  ;;  %v1243_v63 = vadd.f32 %v1242_v47, %v8182_v50  ;;  %vm4162_vm7 = vweird.f32 %v7795_v46 }
 0x575   : > { %v4907_v37 = vmul.f32 %v4779_v43, %v13527_v14  ;;  %v4159_v41 = vmul.f32 %v7795_v46, %v4158_v9  ;;  %v5924_v5 = vmul.f32 1.442695, %v5676_v26  ;;  %vm4161_vm8 = vweird.f32 %v13516_v61  ;;  %v784_v43 = vpop.f32.mrf.mxu0  ;;  %v993_v9 = vpop.f32.mrf.mxu1 }
 0x576   : > { %vm13563_vm9 = vcmp.eq.f32.partialorder %v4165_v22, 8.507059e+37  ;;  %vm1837_vm10 = vcmp.ge.f32.partialorder %v13523_v45, 0.0  ;;  %v6689_v13 = vmul.f32 %v6561_v40, %v991_v24  ;;  %v6185_v54 = vsub.f32 1.0, %v6057_v18  ;;  %vm4163_vm11 = vmor %vm4161_vm8, %vm4162_vm7 }
 0x577   : > { %v5290_v56 = vadd.f32 0.2548296, %v5162_v27  ;;  %v5035_v2 = vadd.f32 -0.28449672, %v4907_v37  ;;  %v4160_v11 = vadd.f32 %v7795_v46, %v4159_v41  ;;  %v4168_v21 = vor.u32 1.1754944e-38, %v4167_v31 }
 0x578   : > { %v4180_v49 = vand.u32 2147483647, %v13551_v42  ;;  %v5677_v60 = vmul.f32 %v5549_v29, %v2093_v7  ;;  %6817 = vst [vmem:[%s8785_s10 + $0x368] sm:$0xff] %v6689_v13  ;;  %v1710_v26 = vmul.f32 0.70710677, %v1243_v63  ;;  %7800 = vpow2.f32 %v5924_v5 }
 0x579   : > { %v5163_v61 = vmul.f32 %v5035_v2, %v13527_v14  ;;  %v4164_v34 = vsel %vm4163_vm11, %v7795_v46, %v4160_v11  ;;  %v13574_v28 = vsel %vm1837_vm10, 1.0, %v14002_v6  ;;  %v4182_v24 = vand.u32 2147483648, %v13551_v42 }
 0x57a   : > { %v7799_v47 = vpop.eup %7798  ;;  %v13578_v22 = vsel %vm13563_vm9, %v4168_v21, %v4164_v34  ;;  %v2094_v40 = vand.u32 2147483647, %v1710_v26  ;;  %v1452_v7 = vadd.f32 %v1451_v10, %v8184_v51  ;;  %v13583_v18 = vmul.f32 %v6185_v54, %v13421_v53 }
 0x57b   : > { %v5418_v46 = vmul.f32 %v5290_v56, %v13507_v39  ;;  %v4396_v27 = vmul.f32 1.0614054, %v13578_v22  ;;  %v4172_v45 = vmul.f32 %v7799_v47, %v13551_v42  ;;  %vm4176_vm12 = vweird.f32 %v13551_v42 }
 0x57c   : > { %vm13589_vm13 = vcmp.eq.f32.partialorder %v4180_v49, 8.507059e+37  ;;  %v5926_v29 = vmul.f32 1.442695, %v5677_v60  ;;  %v2222_v37 = vmul.f32 0.3275911, %v2094_v40  ;;  %v6434_v19 = vadd.f32 1.0, %v13310_v38 }
 0x57d   : > { %v5291_v41 = vadd.f32 0.2548296, %v5163_v61  ;;  %v4524_v5 = vadd.f32 -1.4531521, %v4396_v27  ;;  %v4173_v53 = vsub.f32 1.0, %v4172_v45  ;;  %v4183_v39 = vor.u32 1.1754944e-38, %v4182_v24  ;;  %v13628_v31 = vpop.f32.mrf.mxu1 }
 0x57e   : > { %v13594_v13 = vmul.f32 0.5, %v1243_v63  ;;  %v13596_v54 = vadd.f32 1.0, %v2222_v37  ;;  %v13598_v56 = vmul.f32 0.70710677, %v1452_v7  ;;  %v13600_v2 = vpop.eup %7800  ;;  %v6058_v11 = vmul.f32 %v13520_v3, %v5418_v46 }
 0x57f   : > { %v4652_v10 = vmul.f32 %v4524_v5, %v13578_v22  ;;  %v4174_v21 = vmul.f32 %v7799_v47, %v4173_v53  ;;  %vm4177_vm14 = vweird.f32 %v7799_v47  ;;  %vm1838_vm15 = vcmp.ge.f32.partialorder %v1710_v26, 0.0  ;;  %v13626_v53 = vpop.f32.mrf.mxu0 }
 0x580   : > { %7802 = vrcp.f32 %v13596_v54  ;;  %v5550_v49 = vsub.f32 0.0, %v2094_v40  ;;  %v785_v38 = vadd.f32 %v784_v43, %v8732_v23  ;;  %v5419_v63 = vmul.f32 %v5291_v41, %v13527_v14  ;;  %vm4178_vm0 = vmor %vm4176_vm12, %vm4177_vm14  ;;  %v1245_v41 = vpop.f32.mrf.mxu2 }
 0x581   : > { %v4780_v60 = vadd.f32 1.4214138, %v4652_v10  ;;  %v4175_v61 = vadd.f32 %v7799_v47, %v4174_v21  ;;  %v6562_v34 = vmul.f32 %v6434_v19, %v13143_v15  ;;  %7804 = vpow2.f32 %v5926_v29 }
 0x582   : > { %v2095_v3 = vand.u32 2147483647, %v13598_v56  ;;  %v994_v24 = vadd.f32 %v993_v9, %v8768_v57  ;;  %v6435_v46 = vadd.f32 1.0, %v13375_v17  ;;  %v6186_v27 = vsub.f32 1.0, %v6058_v11  ;;  %v1454_v9 = vpop.f32.mrf.mxu3 }
 0x583   : > { %v4908_v45 = vmul.f32 %v4780_v60, %v13578_v22  ;;  %v4179_v43 = vsel %vm4178_vm0, %v7799_v47, %v4175_v61  ;;  %v13614_v37 = vmul.f32 0.5, %v1452_v7  ;;  %v13622_v15 = vsel %vm1838_vm15, 1.0, %v14002_v6 }
 0x584   : > { %v13618_v14 = vsel %vm13589_vm13, %v4183_v39, %v4179_v43  ;;  %v5678_v42 = vmul.f32 %v5550_v49, %v2094_v40  ;;  %v2223_v29 = vmul.f32 0.3275911, %v2095_v3  ;;  %v6059_v17 = vmul.f32 %v13548_v12, %v5419_v63 }
 0x585   : > { %v5036_v5 = vadd.f32 -0.28449672, %v4908_v45  ;;  %v4397_v47 = vmul.f32 1.0614054, %v13618_v14  ;;  %v6690_v7 = vmul.f32 %v6562_v34, %v785_v38  ;;  %v4195_v26 = vand.u32 2147483647, %v13596_v54 }
 0x586   : > { %v7803_v19 = vpop.eup %7802  ;;  %v4197_v39 = vand.u32 2147483648, %v13596_v54  ;;  %v13632_v40 = vadd.f32 1.0, %v2223_v29  ;;  %v6563_v11 = vmul.f32 %v6435_v46, %v13149_v62  ;;  %v5551_v49 = vsub.f32 0.0, %v2095_v3 }
 0x587   : > { %v5164_v10 = vmul.f32 %v5036_v5, %v13578_v22  ;;  %v4525_v12 = vadd.f32 -1.4531521, %v4397_v47  ;;  %v4187_v21 = vmul.f32 %v7803_v19, %v13596_v54  ;;  %6818 = vst [vmem:[%s8785_s10 + $0x370] sm:$0xff] %v6690_v7  ;;  %v13638_v38 = vpop.eup %7804  ;;  %v13641_v63 = vmul.f32 %v6186_v27, %v13457_v35 }
 0x588   : > { %7806 = vrcp.f32 %v13632_v40  ;;  %v1246_v60 = vadd.f32 %v1245_v41, %v8182_v50  ;;  %v13646_v61 = vadd.f32 %v1454_v9, %v8184_v51  ;;  %v6187_v62 = vsub.f32 1.0, %v6059_v17 }
 0x589   : > { %v4653_v34 = vmul.f32 %v4525_v12, %v13618_v14  ;;  %v4188_v46 = vsub.f32 1.0, %v4187_v21  ;;  %v5928_v45 = vmul.f32 1.442695, %v5678_v42  ;;  %v5292_v43 = vadd.f32 0.2548296, %v5164_v10 }
 0x58a   : > { %vm13649_vm1 = vcmp.eq.f32.partialorder %v4195_v26, 8.507059e+37  ;;  %v4198_v35 = vor.u32 1.1754944e-38, %v4197_v39  ;;  %v6691_v27 = vmul.f32 %v6563_v11, %v994_v24  ;;  %vm4192_vm2 = vweird.f32 %v7803_v19 }
 0x58b   : > { %v4781_v5 = vadd.f32 1.4214138, %v4653_v34  ;;  %v4189_v47 = vmul.f32 %v7803_v19, %v4188_v46  ;;  %v5679_v41 = vmul.f32 %v5551_v49, %v2095_v3  ;;  %vm4191_vm3 = vweird.f32 %v13596_v54  ;;  %v13672_v49 = vpop.f32.mrf.mxu0 }
 0x58c   : > { %vm1839_vm4 = vcmp.ge.f32.partialorder %v13598_v56, 0.0  ;;  %6819 = vst [vmem:[%s8785_s10 + $0x378] sm:$0xff] %v6691_v27  ;;  %v13656_v9 = vmul.f32 0.70710677, %v1246_v60  ;;  %v13659_v42 = vmul.f32 0.70710677, %v13646_v61  ;;  %v13662_v17 = vmul.f32 %v6187_v62, %v13476_v8  ;;  %vm4193_vm5 = vmor %vm4191_vm3, %vm4192_vm2  ;;  %v13674_v62 = vpop.f32.mrf.mxu1 }
 0x58d   : > { %v4909_v7 = vmul.f32 %v4781_v5, %v13618_v14  ;;  %v4190_v24 = vadd.f32 %v7803_v19, %v4189_v47  ;;  %7808 = vpow2.f32 %v5928_v45  ;;  %v5420_v3 = vmul.f32 %v5292_v43, %v13578_v22 }
 0x58e   : > { %v7807_v26 = vpop.eup %7806  ;;  %v4210_v54 = vand.u32 2147483647, %v13632_v40  ;;  %v2096_v39 = vand.u32 2147483647, %v13656_v9  ;;  %v13669_v11 = vand.u32 2147483647, %v13659_v42  ;;  %vm4206_vm6 = vweird.f32 %v13632_v40 }
 0x58f   : > { %v5037_v10 = vadd.f32 -0.28449672, %v4909_v7  ;;  %v4194_v12 = vsel %vm4193_vm5, %v7803_v19, %v4190_v24  ;;  %v4202_v8 = vmul.f32 %v7807_v26, %v13632_v40  ;;  %v5930_v21 = vmul.f32 1.442695, %v5679_v41 }
 0x590   : > { %v13678_v22 = vsel %vm13649_vm1, %v4198_v35, %v4194_v12  ;;  %v13683_v34 = vsel %vm1839_vm4, 1.0, %v14002_v6  ;;  %v4212_v46 = vand.u32 2147483648, %v13632_v40  ;;  %v2224_v45 = vmul.f32 0.3275911, %v2096_v39 }
 0x591   : > { %v5165_v19 = vmul.f32 %v5037_v10, %v13618_v14  ;;  %v4398_v43 = vmul.f32 1.0614054, %v13678_v22  ;;  %v4203_v27 = vsub.f32 1.0, %v4202_v8  ;;  %v6060_v5 = vmul.f32 %v13600_v2, %v5420_v3 }
 0x592   : > { %vm13690_vm7 = vcmp.eq.f32.partialorder %v4210_v54, 8.507059e+37  ;;  %v13694_v35 = vadd.f32 1.0, %v2224_v45  ;;  %v2225_v56 = vmul.f32 0.3275911, %v13669_v11  ;;  %vm4207_vm8 = vweird.f32 %v7807_v26 }
 0x593   : > { %v13697_v47 = vpop.eup %7808  ;;  %v4526_v41 = vadd.f32 -1.4531521, %v4398_v43  ;;  %v4204_v7 = vmul.f32 %v7807_v26, %v4203_v27  ;;  %7810 = vpow2.f32 %v5930_v21  ;;  %v5293_v24 = vadd.f32 0.2548296, %v5165_v19  ;;  %vm4208_vm9 = vmor %vm4206_vm6, %vm4207_vm8 }
 0x594   : > { %v4213_v10 = vor.u32 1.1754944e-38, %v4212_v46  ;;  %v13699_v12 = vmul.f32 0.5, %v1246_v60  ;;  %7812 = vrcp.f32 %v13694_v35  ;;  %v5552_v54 = vsub.f32 0.0, %v2096_v39 }
 0x595   : > { %v4654_v2 = vmul.f32 %v4526_v41, %v13678_v22  ;;  %v4205_v3 = vadd.f32 %v7807_v26, %v4204_v7  ;;  %v788_v8 = vadd.f32 %v13626_v53, %v8732_v23  ;;  %v6188_v45 = vsub.f32 1.0, %v6060_v5 }
 0x596   : > { %14108 = vst [vmem:[#allocation5_spill] sm:$0xff] %v13699_v12  ;;  %vm1840_vm10 = vcmp.ge.f32.partialorder %v13656_v9, 0.0  ;;  %v13708_v21 = vadd.f32 1.0, %v2225_v56  ;;  %v6436_v60 = vadd.f32 1.0, %v13392_v36  ;;  %v4225_v43 = vand.u32 2147483647, %v13694_v35 }
 0x597   : > { %v4782_v46 = vadd.f32 1.4214138, %v4654_v2  ;;  %v4209_v19 = vsel %vm4208_vm9, %v7807_v26, %v4205_v3  ;;  %v5553_v27 = vsub.f32 0.0, %v13669_v11  ;;  %v5421_v41 = vmul.f32 %v5293_v24, %v13618_v14  ;;  %v13727_v2 = vpop.f32.mrf.mxu0  ;;  %v13729_v14 = vpop.f32.mrf.mxu1 }
 0x598   : > { %v13716_v53 = vsel %vm13690_vm7, %v4213_v10, %v4209_v19  ;;  %v4227_v40 = vand.u32 2147483648, %v13694_v35  ;;  %7814 = vrcp.f32 %v13708_v21  ;;  %v5680_v56 = vmul.f32 %v5552_v54, %v2096_v39 }
 0x599   : > { %v13720_v5 = vpop.eup %7810  ;;  %v4910_v36 = vmul.f32 %v4782_v46, %v13678_v22  ;;  %v4399_v26 = vmul.f32 1.0614054, %v13716_v53  ;;  %v13725_v7 = vmul.f32 0.5, %v13646_v61  ;;  %v13732_v24 = vmul.f32 %v6188_v45, %v13541_v0  ;;  %v1248_v0 = vpop.f32.mrf.mxu2 }
 0x59a   : > { %v7813_v29 = vpop.eup %7812  ;;  %v13737_v10 = vsel %vm1840_vm10, 1.0, %v14002_v6  ;;  %vm4221_vm11 = vweird.f32 %v13694_v35  ;;  %v6564_v39 = vmul.f32 %v6436_v60, %v13227_v1  ;;  %vm13742_vm12 = vcmp.eq.f32.partialorder %v4225_v43, 8.507059e+37 }
 0x59b   : > { %14109 = vst [vmem:[#allocation6_spill] sm:$0xff] %v13725_v7  ;;  %v5038_v3 = vadd.f32 -0.28449672, %v4910_v36  ;;  %v4527_v61 = vadd.f32 -1.4531521, %v4399_v26  ;;  %v4217_v54 = vmul.f32 %v7813_v29, %v13694_v35  ;;  %v13747_v45 = vmul.f32 %v13638_v38, %v5421_v41 }
 0x59c   : > { %v4228_v9 = vor.u32 1.1754944e-38, %v4227_v40  ;;  %v5681_v19 = vmul.f32 %v5553_v27, %v13669_v11  ;;  %v6692_v7 = vmul.f32 %v6564_v39, %v788_v8  ;;  %v5932_v36 = vmul.f32 1.442695, %v5680_v56  ;;  %v1457_v39 = vpop.f32.mrf.mxu3 }
 0x59d   : > { %v5166_v12 = vmul.f32 %v5038_v3, %v13678_v22  ;;  %v4655_v1 = vmul.f32 %v4527_v61, %v13716_v53  ;;  %v4218_v60 = vsub.f32 1.0, %v4217_v54  ;;  %vm1841_vm13 = vcmp.ge.f32.partialorder %v13659_v42, 0.0 }
 0x59e   : > { %v7815_v43 = vpop.eup %7814  ;;  %vm4222_vm14 = vweird.f32 %v7813_v29  ;;  %6820 = vst [vmem:[%s8785_s10 + $0x380] sm:$0xff] %v6692_v7  ;;  %v997_v26 = vadd.f32 %v13628_v31, %v8768_v57  ;;  %v6437_v38 = vadd.f32 1.0, %v13425_v55  ;;  %v13758_v41 = vadd.f32 %v1248_v0, %v8182_v50 }
 0x59f   : > { %v5294_v11 = vadd.f32 0.2548296, %v5166_v12  ;;  %v4783_v8 = vadd.f32 1.4214138, %v4655_v1  ;;  %v4219_v27 = vmul.f32 %v7813_v29, %v4218_v60  ;;  %v4232_v40 = vmul.f32 %v7815_v43, %v13708_v21  ;;  %v13769_v61 = vpop.f32.mrf.mxu0  ;;  %vm4223_vm0 = vmor %vm4221_vm11, %vm4222_vm14 }
 0x5a0   : > { %vm4236_vm15 = vweird.f32 %v13708_v21  ;;  %v4240_v56 = vand.u32 2147483647, %v13708_v21  ;;  %v6565_v7 = vmul.f32 %v6437_v38, %v13234_v25  ;;  %v13765_v3 = vmul.f32 0.70710677, %v13758_v41 }
 0x5a1   : > { %v5422_v55 = vmul.f32 %v5294_v11, %v13678_v22  ;;  %v4911_v50 = vmul.f32 %v4783_v8, %v13716_v53  ;;  %v4220_v31 = vadd.f32 %v7813_v29, %v4219_v27  ;;  %v4233_v12 = vsub.f32 1.0, %v4232_v40  ;;  %v13779_v11 = vpop.f32.mrf.mxu1 }
 0x5a2   : > { %v4242_v54 = vand.u32 2147483648, %v13708_v21  ;;  %v6693_v0 = vmul.f32 %v6565_v7, %v997_v26  ;;  %v2098_v25 = vand.u32 2147483647, %v13765_v3  ;;  %v13777_v1 = vadd.f32 %v1457_v39, %v8184_v51 }
 0x5a3   : > { %v5039_v22 = vadd.f32 -0.28449672, %v4911_v50  ;;  %v4224_v60 = vsel %vm4223_vm0, %v7813_v29, %v4220_v31  ;;  %v4234_v38 = vmul.f32 %v7815_v43, %v4233_v12  ;;  %vm4237_vm1 = vweird.f32 %v7815_v43 }
 0x5a4   : > { %v6189_v8 = vsub.f32 1.0, %v13747_v45  ;;  %v13784_v35 = vsel %vm13742_vm12, %v4228_v9, %v4224_v60  ;;  %7816 = vpow2.f32 %v5932_v36  ;;  %6821 = vst [vmem:[%s8785_s10 + $0x388] sm:$0xff] %v6693_v0  ;;  %v2226_v26 = vmul.f32 0.3275911, %v2098_v25  ;;  %vm4238_vm2 = vmor %vm4236_vm15, %vm4237_vm1 }
 0x5a5   : > { %v6062_v27 = vmul.f32 %v13697_v47, %v5422_v55  ;;  %v5167_v51 = vmul.f32 %v5039_v22, %v13716_v53  ;;  %v4400_v40 = vmul.f32 1.0614054, %v13784_v35  ;;  %v4235_v29 = vadd.f32 %v7815_v43, %v4234_v38 }
 0x5a6   : > { %v4243_v39 = vor.u32 1.1754944e-38, %v4242_v54  ;;  %v13792_v7 = vadd.f32 1.0, %v2226_v26  ;;  %v5554_v45 = vsub.f32 0.0, %v2098_v25  ;;  %v13795_v46 = vmul.f32 0.70710677, %v13777_v1 }
 0x5a7   : > { %v5295_v9 = vadd.f32 0.2548296, %v5167_v51  ;;  %v4528_v36 = vadd.f32 -1.4531521, %v4400_v40  ;;  %v4239_v50 = vsel %vm4238_vm2, %v7815_v43, %v4235_v29  ;;  %vm4241_vm3 = vcmp.eq.f32.partialorder %v4240_v56, 8.507059e+37 }
 0x5a8   : > { %v13800_v47 = vsel %vm1841_vm13, 1.0, %v14002_v6  ;;  %v13802_v55 = vsel %vm4241_vm3, %v4243_v39, %v4239_v50  ;;  %v5934_v21 = vmul.f32 1.442695, %v5681_v19  ;;  %7818 = vrcp.f32 %v13792_v7 }
 0x5a9   : > { %v6190_v31 = vsub.f32 1.0, %v6062_v27  ;;  %v5423_v12 = vmul.f32 %v5295_v9, %v13716_v53  ;;  %v4656_v54 = vmul.f32 %v4528_v36, %v13784_v35  ;;  %v4401_v0 = vmul.f32 1.0614054, %v13802_v55  ;;  %v13819_v27 = vpop.f32.mrf.mxu0  ;;  %v13831_v40 = vpop.f32.mrf.mxu1 }
 0x5aa   : > { %v13808_v22 = vpop.eup %7816  ;;  %v13811_v43 = vmul.f32 %v6189_v8, %v13574_v28  ;;  %v5682_v42 = vmul.f32 %v5554_v45, %v2098_v25  ;;  %v13814_v56 = vand.u32 2147483647, %v13795_v46  ;;  %v6438_v19 = vadd.f32 1.0, %v13466_v44 }
 0x5ab   : > { %v6063_v60 = vmul.f32 %v13720_v5, %v5423_v12  ;;  %v4784_v38 = vadd.f32 1.4214138, %v4656_v54  ;;  %v4529_v26 = vadd.f32 -1.4531521, %v4401_v0  ;;  %v4255_v53 = vand.u32 2147483647, %v13792_v7 }
 0x5ac   : > { %7820 = vpow2.f32 %v5934_v21  ;;  %v4257_v51 = vand.u32 2147483648, %v13792_v7  ;;  %v2227_v28 = vmul.f32 0.3275911, %v13814_v56  ;;  %v791_v25 = vadd.f32 %v13672_v49, %v8732_v23 }
 0x5ad   : > { %v13826_v8 = vmul.f32 %v6190_v31, %v13622_v15  ;;  %v4912_v44 = vmul.f32 %v4784_v38, %v13784_v35  ;;  %v4657_v5 = vmul.f32 %v4529_v26, %v13802_v55  ;;  %vm4251_vm4 = vweird.f32 %v13792_v7 }
 0x5ae   : > { %v7819_v29 = vpop.eup %7818  ;;  %v6191_v39 = vsub.f32 1.0, %v6063_v60  ;;  %v13833_v45 = vadd.f32 1.0, %v2227_v28  ;;  %v6566_v9 = vmul.f32 %v6438_v19, %v13295_v16  ;;  %v6439_v36 = vadd.f32 1.0, %v13513_v48 }
 0x5af   : > { %v5040_v49 = vadd.f32 -0.28449672, %v4912_v44  ;;  %v4785_v50 = vadd.f32 1.4214138, %v4657_v5  ;;  %v4247_v15 = vmul.f32 %v7819_v29, %v13792_v7  ;;  %vm13838_vm5 = vcmp.eq.f32.partialorder %v4255_v53, 8.507059e+37 }
 0x5b0   : > { %v13842_v31 = vmul.f32 1.442695, %v5682_v42  ;;  %v4258_v12 = vor.u32 1.1754944e-38, %v4257_v51  ;;  %7822 = vrcp.f32 %v13833_v45  ;;  %v5555_v54 = vsub.f32 0.0, %v13814_v56 }
 0x5b1   : > { %v1000_v16 = vadd.f32 %v13674_v62, %v8768_v57  ;;  %v5168_v48 = vmul.f32 %v5040_v49, %v13784_v35  ;;  %v4913_v0 = vmul.f32 %v4785_v50, %v13802_v55  ;;  %v4248_v19 = vsub.f32 1.0, %v4247_v15 }
 0x5b2   : > { %v4272_v60 = vand.u32 2147483648, %v13833_v45  ;;  %v7821_v38 = vpop.eup %7820  ;;  %v13852_v42 = vmul.f32 %v6191_v39, %v13683_v34  ;;  %vm4252_vm6 = vweird.f32 %v7819_v29  ;;  %v6694_v26 = vmul.f32 %v6566_v9, %v791_v25  ;;  %v802_v9 = vpop.f32.mrf.mxu0 }
 0x5b3   : > { %v6567_v53 = vmul.f32 %v6439_v36, %v13297_v30  ;;  %v5296_v51 = vadd.f32 0.2548296, %v5168_v48  ;;  %v5041_v28 = vadd.f32 -0.28449672, %v4913_v0  ;;  %v4249_v44 = vmul.f32 %v7819_v29, %v4248_v19  ;;  %vm4253_vm8 = vmor %vm4251_vm4, %vm4252_vm6 }
 0x5b4   : > { %v4270_v62 = vand.u32 2147483647, %v13833_v45  ;;  %v4273_v5 = vor.u32 1.1754944e-38, %v4272_v60  ;;  %6822 = vst [vmem:[%s8785_s10 + $0x390] sm:$0xff] %v6694_v26  ;;  %v794_v50 = vadd.f32 %v13727_v2, %v8732_v23  ;;  %v6440_v15 = vadd.f32 1.0, %v13544_v33  ;;  %v1011_v60 = vpop.f32.mrf.mxu1 }
 0x5b5   : > { %v6695_v49 = vmul.f32 %v6567_v53, %v1000_v16  ;;  %v5424_v34 = vmul.f32 %v5296_v51, %v13784_v35  ;;  %v5169_v25 = vmul.f32 %v5041_v28, %v13802_v55  ;;  %v4250_v39 = vadd.f32 %v7819_v29, %v4249_v44 }
 0x5b6   : > { %vm4266_vm7 = vweird.f32 %v13833_v45  ;;  %v1003_v30 = vadd.f32 %v13729_v14, %v8768_v57  ;;  %v7823_v36 = vpop.eup %7822  ;;  %v6568_v2 = vmul.f32 %v6440_v15, %v13382_v20  ;;  %v6441_v33 = vadd.f32 1.0, %v13583_v18 }
 0x5b7   : > { %6823 = vst [vmem:[%s8785_s10 + $0x398] sm:$0xff] %v6695_v49  ;;  %v797_v35 = vadd.f32 %v13769_v61, %v8732_v23  ;;  %v6442_v16 = vadd.f32 1.0, %v13641_v63  ;;  %v6064_v48 = vmul.f32 %v13808_v22, %v5424_v34  ;;  %v5297_v14 = vadd.f32 0.2548296, %v5169_v25 }
 0x5b8   : > { %v4254_v0 = vsel %vm4253_vm8, %v7819_v29, %v4250_v39  ;;  %v4262_v19 = vmul.f32 %v7823_v36, %v13833_v45  ;;  %vm13876_vm9 = vcmp.eq.f32.partialorder %v4270_v62, 8.507059e+37  ;;  %vm4267_vm10 = vweird.f32 %v7823_v36 }
 0x5b9   : > { %v13882_v20 = vsel %vm13838_vm5, %v4258_v12, %v4254_v0  ;;  %v6696_v18 = vmul.f32 %v6568_v2, %v794_v50  ;;  %v6569_v63 = vmul.f32 %v6441_v33, %v13388_v58  ;;  %v6192_v61 = vsub.f32 1.0, %v6064_v48  ;;  %vm4268_vm11 = vmor %vm4266_vm7, %vm4267_vm10 }
 0x5ba   : > { %v5425_v22 = vmul.f32 %v5297_v14, %v13802_v55  ;;  %v4402_v29 = vmul.f32 1.0614054, %v13882_v20  ;;  %v4263_v26 = vsub.f32 1.0, %v4262_v19  ;;  %v6570_v51 = vmul.f32 %v6442_v16, %v13433_v52 }
 0x5bb   : > { %6824 = vst [vmem:[%s8785_s10 + $0x3a0] sm:$0xff] %v6696_v18  ;;  %v6697_v53 = vmul.f32 %v6569_v63, %v1003_v30  ;;  %v1006_v21 = vadd.f32 %v13779_v11, %v8768_v57  ;;  %v6443_v12 = vadd.f32 1.0, %v13662_v17  ;;  %v6320_v28 = vmul.f32 %v6192_v61, %v13737_v10 }
 0x5bc   : > { %v6065_v44 = vmul.f32 %v7821_v38, %v5425_v22  ;;  %v4530_v58 = vadd.f32 -1.4531521, %v4402_v29  ;;  %v4264_v62 = vmul.f32 %v7823_v36, %v4263_v26  ;;  %v6698_v55 = vmul.f32 %v6570_v51, %v797_v35  ;;  %v1014_v35 = vpop.f32.mrf.mxu1  ;;  %v14117_v22 = vld [vmem:[#allocation6_spill] sm:$0xff] }
 0x5bd   : > { %6825 = vst [vmem:[%s8785_s10 + $0x3a8] sm:$0xff] %v6697_v53  ;;  %v6571_v49 = vmul.f32 %v6443_v12, %v13438_v4  ;;  %v800_v50 = vadd.f32 %v13819_v27, %v8732_v23  ;;  %v6444_v52 = vadd.f32 1.0, %v13732_v24  ;;  %v1009_v17 = vadd.f32 %v13831_v40, %v8768_v57  ;;  %v805_v40 = vpop.f32.mrf.mxu0 }
 0x5be   : > { %v6193_v15 = vsub.f32 1.0, %v6065_v44  ;;  %v4658_v11 = vmul.f32 %v4530_v58, %v13882_v20  ;;  %v4265_v34 = vadd.f32 %v7823_v36, %v4264_v62  ;;  %6826 = vst [vmem:[%s8785_s10 + $0x3b0] sm:$0xff] %v6698_v55  ;;  %v6445_v27 = vadd.f32 1.0, %v13811_v43 }
 0x5bf   : > { %v6699_v10 = vmul.f32 %v6571_v49, %v1006_v21  ;;  %v6572_v4 = vmul.f32 %v6444_v52, %v13531_v59  ;;  %v803_v24 = vadd.f32 %v802_v9, %v8732_v23  ;;  %v6446_v30 = vadd.f32 1.0, %v13826_v8 }
 0x5c0   : > { %v6321_v38 = vmul.f32 %v6193_v15, %v13800_v47  ;;  %v4786_v25 = vadd.f32 1.4214138, %v4658_v11  ;;  %v4269_v39 = vsel %vm4268_vm11, %v7823_v36, %v4265_v34  ;;  %v6573_v33 = vmul.f32 %v6445_v27, %v13533_v32 }
 0x5c1   : > { %v4274_v45 = vsel %vm13876_vm9, %v4273_v5, %v4269_v39  ;;  %6827 = vst [vmem:[%s8785_s10 + $0x3b8] sm:$0xff] %v6699_v10  ;;  %v6700_v2 = vmul.f32 %v6572_v4, %v800_v50  ;;  %v1012_v59 = vadd.f32 %v1011_v60, %v8768_v57  ;;  %v6574_v47 = vmul.f32 %v6446_v30, %v13594_v13 }
 0x5c2   : > { %v4914_v43 = vmul.f32 %v4786_v25, %v13882_v20  ;;  %v4403_v9 = vmul.f32 1.0614054, %v4274_v45  ;;  %v6447_v36 = vadd.f32 1.0, %v13852_v42  ;;  %7824 = vpow2.f32 %v13842_v31  ;;  %v14116_v42 = vld [vmem:[#allocation5_spill] sm:$0xff] }
 0x5c3   : > { %6828 = vst [vmem:[%s8785_s10 + $0x3c0] sm:$0xff] %v6700_v2  ;;  %v6701_v8 = vmul.f32 %v6573_v33, %v1009_v17  ;;  %v806_v5 = vadd.f32 %v805_v40, %v8732_v23  ;;  %v6448_v16 = vadd.f32 1.0, %v6320_v28  ;;  %v6702_v14 = vmul.f32 %v6574_v47, %v803_v24 }
 0x5c4   : > { %v5042_v32 = vadd.f32 -0.28449672, %v4914_v43  ;;  %v4531_v48 = vadd.f32 -1.4531521, %v4403_v9  ;;  %v6575_v0 = vmul.f32 %v6447_v36, %v13614_v37  ;;  %v5683_v13 = vmul.f32 %v5555_v54, %v13814_v56  ;;  %v1017_v24 = vpop.f32.mrf.mxu1 }
 0x5c5   : > { %6829 = vst [vmem:[%s8785_s10 + $0x3c8] sm:$0xff] %v6701_v8  ;;  %v6576_v31 = vmul.f32 %v6448_v16, %v14116_v42  ;;  %v1015_v19 = vadd.f32 %v1014_v35, %v8768_v57  ;;  %v6449_v7 = vadd.f32 1.0, %v6321_v38  ;;  %vm1842_vm12 = vcmp.ge.f32.partialorder %v13765_v3, 0.0  ;;  %v808_v55 = vpop.f32.mrf.mxu0 }
 0x5c6   : > { %v5170_v60 = vmul.f32 %v5042_v32, %v13882_v20  ;;  %v4659_v18 = vmul.f32 %v4531_v48, %v4274_v45  ;;  %6830 = vst [vmem:[%s8785_s10 + $0x3d0] sm:$0xff] %v6702_v14  ;;  %v6703_v63 = vmul.f32 %v6575_v0, %v1012_v59  ;;  %v5938_v54 = vmul.f32 1.442695, %v5683_v13 }
 0x5c7   : > { %v6704_v61 = vmul.f32 %v6576_v31, %v806_v5  ;;  %v6577_v37 = vmul.f32 %v6449_v7, %v14117_v22  ;;  %v1970_v62 = vsel %vm1842_vm12, 1.0, %v14002_v6  ;;  %v1586_v52 = vmul.f32 0.5, %v13758_v41 }
 0x5c8   : > { %v5298_v29 = vadd.f32 0.2548296, %v5170_v60  ;;  %v4787_v26 = vadd.f32 1.4214138, %v4659_v18  ;;  %6831 = vst [vmem:[%s8785_s10 + $0x3d8] sm:$0xff] %v6703_v63  ;;  %v7825_v56 = vpop.eup %7824  ;;  %7826 = vpow2.f32 %v5938_v54  ;;  %vm1843_vm13 = vcmp.ge.f32.partialorder %v13795_v46, 0.0 }
 0x5c9   : > { %6832 = vst [vmem:[%s8785_s10 + $0x3e0] sm:$0xff] %v6704_v61  ;;  %v6705_v53 = vmul.f32 %v6577_v37, %v1015_v19  ;;  %v1971_v27 = vsel %vm1843_vm13, 1.0, %v14002_v6  ;;  %v1587_v41 = vmul.f32 0.5, %v13777_v1  ;;  %v1018_v46 = vadd.f32 %v1017_v24, %v8768_v57 }
 0x5ca   : > { %v5426_v51 = vmul.f32 %v5298_v29, %v13882_v20  ;;  %v4915_v21 = vmul.f32 %v4787_v26, %v4274_v45  ;;  %v809_v20 = vadd.f32 %v808_v55, %v8732_v23 }
 0x5cb   : > { %6833 = vst [vmem:[%s8785_s10 + $0x3e8] sm:$0xff] %v6705_v53 }
 0x5cc   : > { %v6066_v12 = vmul.f32 %v7825_v56, %v5426_v51  ;;  %v5043_v28 = vadd.f32 -0.28449672, %v4915_v21 }
 0x5ce   : > { %v6194_v44 = vsub.f32 1.0, %v6066_v12  ;;  %v5171_v58 = vmul.f32 %v5043_v28, %v4274_v45  ;;  %v7827_v3 = vpop.eup %7826 }
 0x5d0   : > { %v6322_v49 = vmul.f32 %v6194_v44, %v1970_v62  ;;  %v5299_v50 = vadd.f32 0.2548296, %v5171_v58 }
 0x5d2   : > { %v5427_v15 = vmul.f32 %v5299_v50, %v4274_v45  ;;  %v6450_v11 = vadd.f32 1.0, %v6322_v49 }
 0x5d4   : > { %v6067_v34 = vmul.f32 %v7827_v3, %v5427_v15  ;;  %v6578_v17 = vmul.f32 %v6450_v11, %v1586_v52 }
 0x5d6   : > { %v6195_v10 = vsub.f32 1.0, %v6067_v34  ;;  %v6706_v4 = vmul.f32 %v6578_v17, %v809_v20 }
 0x5d8   : > { %v6323_v23 = vmul.f32 %v6195_v10, %v1971_v27  ;;  %6834 = vst [vmem:[%s8785_s10 + $0x3f0] sm:$0xff] %v6706_v4 }
 0x5da   : > { %v6451_v38 = vadd.f32 1.0, %v6323_v23 }
 0x5dc   : > { %v6579_v25 = vmul.f32 %v6451_v38, %v1587_v41 }
 0x5de   : > { %v6707_v39 = vmul.f32 %v6579_v25, %v1018_v46 }
 0x5e0   : > { %6835 = vst [vmem:[%s8785_s10 + $0x3f8] sm:$0xff] %v6707_v39 }
 0x5e1   : > { %7855 = shalt.err (!%p7852_p5)
}
 0x5e2   : > { %s7909_s8 = smov 256   ;;  %s7910_s10 = smov 16  }
 0x5e3   : > { %7258 = dma.vmem_to_hbm [thread:$0]  (%p7981_p4), %s6853_s21, 16384, %s6855_s14, %s6837_s16, %s7909_s8, %s7909_s8, %s7910_s10  }
 0x5e4 PF: > { %p7264_p6 = scmp.ge.s32.totalorder %s7906_s23, 2  ;;  %s6869_s9 = sand.u32 1, %s7886_s18  }
 0x5e5   : > { %s6870_s11 = scalar_lea.sflag [#allocation3], %s6869_s9 }
 0x5e6   : > { %p7261_p7 = pnand %p7264_p6, %p7988_p8 }
 0x5e8   : > { %p7262_p9 = pneg %p7261_p7 }
 0x5ea   : > { %7881 = dma.done.wait (%p7262_p9), %s6870_s11, 16384  }
 0x5eb   : > { %7883 = vsyncadd (%p7262_p9), %s6870_s11, 4294950912  ;;  %s18_s23 = sadd.s32 1, %s7906_s23   ;;  %s14118_s18 = smov %s7890_s19 }
 0x5ec   : > { %p15_p10 = scmp.ge.s32.totalorder %s18_s23, 4   ;;  %s14119_s19 = smov %s7894_s20 }
 0x5ed   : > { %s14120_s20 = smov %s7994_s6  ;;  %s14121_s21 = smov %s7902_s22 }
 0x5ee   : > { %s14122_s22 = smov %s14124_s26  ;;  %17 = sbr.rel (!%p15_p10) target bundleno = 4 (0x4), region = 87 }
 0x5f3   :  { %6876 = vsyncpa [#allocation3], 1 }
 0x5f4   :  { %6878 = vsyncpa [#allocation3 + $0x1], 1 }

</bundles_post_ra>
